<compile_context>
chip_gen: v5e
topology: v5e:2x2
jax: 0.10.0
libtpu: 0.0.40
codegen_flags: <defaults>
</compile_context>

<pallas_src>
import functools

import jax
import jax.numpy as jnp
from jax import lax
from jax.experimental import pallas as pl
from jax.experimental.pallas import tpu as pltpu  # noqa: F401  (TPU backend assumed)

_EPS = 1e-5  # torch BatchNorm2d default


# --------------------------- fused Pallas kernel bodies ---------------------------
def _mm_bn_relu_kernel(a_ref, w_ref, g_ref, b_ref, o_ref):
    """out = relu(batchnorm(A @ W)); batch statistics computed in-kernel (train mode)."""
    y = jnp.dot(a_ref[...], w_ref[...], preferred_element_type=jnp.float32)
    mu = jnp.mean(y, axis=0, keepdims=True)
    var = jnp.mean((y - mu) ** 2, axis=0, keepdims=True)
    s = g_ref[...] * lax.rsqrt(var + _EPS)
    o_ref[...] = jnp.maximum(y * s + (b_ref[...] - mu * s), 0.0).astype(o_ref.dtype)


def _bn_relu_mm_kernel(x_ref, g_ref, b_ref, w_ref, o_ref):
    """out = relu(batchnorm(X)) @ W   (transition: BN + ReLU + 1x1 conv, fused)."""
    xf = x_ref[...].astype(jnp.float32)
    mu = jnp.mean(xf, axis=0, keepdims=True)
    var = jnp.mean((xf - mu) ** 2, axis=0, keepdims=True)
    s = g_ref[...] * lax.rsqrt(var + _EPS)
    a = jnp.maximum(xf * s + (b_ref[...] - mu * s), 0.0).astype(jnp.bfloat16)
    y = jnp.dot(a, w_ref[...], preferred_element_type=jnp.float32)
    o_ref[...] = y.astype(o_ref.dtype)


def _dense_stage1_kernel(x_ref, g1_ref, b1_ref, w1_ref, g2_ref, b2_ref, z_ref):
    """z = relu(bn2(relu(bn1(X)) @ W1))  -- BN1 + ReLU + 1x1 conv + BN2 + ReLU fused."""
    xf = x_ref[...].astype(jnp.float32)
    mu1 = jnp.mean(xf, axis=0, keepdims=True)
    var1 = jnp.mean((xf - mu1) ** 2, axis=0, keepdims=True)
    s1 = g1_ref[...] * lax.rsqrt(var1 + _EPS)
    a = jnp.maximum(xf * s1 + (b1_ref[...] - mu1 * s1), 0.0).astype(jnp.bfloat16)
    y = jnp.dot(a, w1_ref[...], preferred_element_type=jnp.float32)
    mu2 = jnp.mean(y, axis=0, keepdims=True)
    var2 = jnp.mean((y - mu2) ** 2, axis=0, keepdims=True)
    s2 = g2_ref[...] * lax.rsqrt(var2 + _EPS)
    z_ref[...] = jnp.maximum(y * s2 + (b2_ref[...] - mu2 * s2), 0.0)


def _conv3x3_taps_kernel(zp_ref, w_ref, o_ref, *, w_sp):
    """3x3 conv (stride 1, pad 1) as 9 constant-row-shift matmuls on a per-sample
    zero-padded, row-flattened activation -- no im2col materialization.

    zp_ref rows: [P zero rows | flat(N, H+2, W+2, Cb) | P zero rows], P = w_sp + 3.
    Output rows cover the padded (H+2, W+2) grid; the caller slices away the ring.
    """
    m_out, _ = o_ref.shape
    p = w_sp + 3
    acc = jnp.zeros(o_ref.shape, jnp.float32)
    for di in range(3):
        for dj in range(3):
            start = p + (di - 1) * (w_sp + 2) + (dj - 1)      # static Python int
            a = zp_ref[start:start + m_out, :].astype(jnp.bfloat16)
            acc = acc + jnp.dot(a, w_ref[di * 3 + dj],
                                preferred_element_type=jnp.float32)
    o_ref[...] = acc.astype(o_ref.dtype)


def _head_kernel(x_ref, g_ref, b_ref, avg_ref, fw_ref, fb_ref, o_ref):
    """Classifier: norm5 + relu + AdaptiveAvgPool2d(1) + Linear, fused (tiny shapes)."""
    xf = x_ref[...].astype(jnp.float32)
    mu = jnp.mean(xf, axis=0, keepdims=True)
    var = jnp.mean((xf - mu) ** 2, axis=0, keepdims=True)
    s = g_ref[...] * lax.rsqrt(var + _EPS)
    y = jnp.maximum(xf * s + (b_ref[...] - mu * s), 0.0)          # (M, C)
    pooled = jnp.dot(avg_ref[...], y, preferred_element_type=jnp.float32)   # (N, C)
    o_ref[...] = jnp.dot(pooled, fw_ref[...],
                         preferred_element_type=jnp.float32) + fb_ref[...]


# --------------------------------- wrapper pieces ---------------------------------
def _im2col(x, k, stride, pad):
    """Plain-JAX im2col; used ONLY for the single strided stem conv (tiny input)."""
    n, h, w, c = x.shape
    xp = jnp.pad(x, ((0, 0), (pad, pad), (pad, pad), (0, 0)))
    ho = (h + 2 * pad - k) // stride + 1
    wo = (w + 2 * pad - k) // stride + 1
    cols = []
    for i in range(k):
        for j in range(k):
            cols.append(xp[:, i:i + stride * (ho - 1) + 1:stride,
                              j:j + stride * (wo - 1) + 1:stride, :])
    cols = jnp.concatenate(cols, axis=-1)                  # column order = (ki, kj, Cin)
    return cols.reshape(n * ho * wo, k * k * c), (n, ho, wo)


def _stem(x_nhwc, params):
    # TODO(synk): single small im2col for the strided stem conv only; repeated dense-block
    # 3x3 convs use the shift-matmul kernel instead (no im2col).
    cols, (n, ho, wo) = _im2col(x_nhwc, 3, 2, 1)
    num_init = params['stem_w'].shape[1]
    y = pl.pallas_call(
        _mm_bn_relu_kernel,
        out_shape=jax.ShapeDtypeStruct((n * ho * wo, num_init), jnp.bfloat16),
    )(cols.astype(jnp.bfloat16), params['stem_w'], params['stem_g'], params['stem_b'])
    y = y.reshape(n, ho, wo, num_init)

    # TODO(synk): MaxPool2d(3,2,1) stays in plain JAX glue; hot path is in Pallas.
    yp = jnp.pad(y, ((0, 0), (1, 1), (1, 1), (0, 0)), constant_values=-jnp.inf)
    hp = (ho + 2 - 3) // 2 + 1
    wp = (wo + 2 - 3) // 2 + 1
    out = None
    for i in range(3):
        for j in range(3):
            s = yp[:, i:i + 2 * (hp - 1) + 1:2, j:j + 2 * (wp - 1) + 1:2, :]
            out = s if out is None else jnp.maximum(out, s)
    return out, hp, wp


def _dense_layer(x, layer, n, h, w):
    cin = x.shape[-1]
    m = n * h * w
    cb = layer['w1'].shape[1]
    g = layer['w2'].shape[-1]

    # Kernel 1: BN1 + ReLU + 1x1 conv + BN2 + ReLU, one pallas_call.
    z = pl.pallas_call(
        _dense_stage1_kernel,
        out_shape=jax.ShapeDtypeStruct((m, cb), jnp.float32),
    )(x.reshape(m, cin), layer['g1'], layer['b1'], layer['w1'],
      layer['g2'], layer['b2'])

    # Kernel 2: 3x3 conv via 9 shifted matmuls (per-sample zero pad, row-flattened).
    zp4 = jnp.pad(z.reshape(n, h, w, cb), ((0, 0), (1, 1), (1, 1), (0, 0)))
    m2 = n * (h + 2) * (w + 2)
    p = w + 3
    zp2 = jnp.pad(zp4.reshape(m2, cb), ((p, p), (0, 0)))
    y_full = pl.pallas_call(
        functools.partial(_conv3x3_taps_kernel, w_sp=w),
        out_shape=jax.ShapeDtypeStruct((m2, g), jnp.bfloat16),
    )(zp2, layer['w2'])
    y = y_full.reshape(n, h + 2, w + 2, g)[:, 1:h + 1, 1:w + 1, :]

    # TODO(synk): dense connectivity kept as a wrapper concat (O(L^2) copies); a
    # preallocated feature buffer + input_output_aliases would remove them at scale.
    return jnp.concatenate([x, y], axis=-1)


def _transition(x, t, n, h, w):
    c = x.shape[-1]
    m = n * h * w
    cout = t['w'].shape[1]
    y = pl.pallas_call(
        _bn_relu_mm_kernel,
        out_shape=jax.ShapeDtypeStruct((m, cout), jnp.bfloat16),
    )(x.reshape(m, c), t['g'], t['b'], t['w'])
    y = y.reshape(n, h, w, cout)
    # TODO(synk): AvgPool2d(2,2) stays in plain JAX glue.
    y = y.astype(jnp.float32).reshape(n, h // 2, 2, w // 2, 2, cout).mean(axis=(2, 4))
    return y.astype(jnp.bfloat16), h // 2, w // 2


def _head(x, params, n, h, w):
    c = x.shape[-1]
    m = n * h * w
    ncls = params['fc_w'].shape[1]
    # per-sample spatial averaging expressed as a tiny (N, N*H*W) matmul inside the kernel
    avg = jnp.kron(jnp.eye(n, dtype=jnp.float32),
                   jnp.full((1, h * w), 1.0 / (h * w), jnp.float32))
    return pl.pallas_call(
        _head_kernel,
        out_shape=jax.ShapeDtypeStruct((n, ncls), jnp.float32),
    )(x.reshape(m, c), params['norm5_g'], params['norm5_b'], avg,
      params['fc_w'], params['fc_b'])


# ----------------------------- parameter construction -----------------------------
def init_params(key, in_ch, num_init, growth, block_config, bn_size, n_classes):
    keys = iter(jax.random.split(key, 1024))

    def conv_w(cin, cout, k):                      # kaiming_normal (fan_in, relu)
        fan_in = cin * k * k
        std = (2.0 / fan_in) ** 0.5
        return jax.random.normal(next(keys), (k, k, cin, cout), jnp.float32) * std

    def bn_p(c):                                   # weight=1, bias=0
        return jnp.ones((1, c), jnp.float32), jnp.zeros((1, c), jnp.float32)

    # Weights are pre-reshaped to matmul layout and pre-cast to bf16 once, here.
    stem_w = conv_w(in_ch, num_init, 3).reshape(9 * in_ch, num_init).astype(jnp.bfloat16)
    sg, sb = bn_p(num_init)
    params = {'stem_w': stem_w, 'stem_g': sg, 'stem_b': sb,
              'blocks': [], 'transitions': []}
    nf = num_init
    cb = bn_size * growth
    for i, nl in enumerate(block_config):
        layers = []
        for l in range(nl):
            cin = nf + l * growth
            g1, b1 = bn_p(cin)
            g2, b2 = bn_p(cb)
            layers.append({
                'g1': g1, 'b1': b1,
                'w1': conv_w(cin, cb, 1).reshape(cin, cb).astype(jnp.bfloat16),
                'g2': g2, 'b2': b2,
                'w2': conv_w(cb, growth, 3).reshape(9, cb, growth).astype(jnp.bfloat16),
            })
        params['blocks'].append(layers)
        nf = nf + nl * growth
        if i != len(block_config) - 1:
            tg, tb = bn_p(nf)
            params['transitions'].append({
                'g': tg, 'b': tb,
                'w': conv_w(nf, nf // 2, 1).reshape(nf, nf // 2).astype(jnp.bfloat16)})
            nf = nf // 2
    ng, nb = bn_p(nf)
    params['norm5_g'], params['norm5_b'] = ng, nb
    std = (2.0 / (nf + n_classes)) ** 0.5          # xavier_normal
    params['fc_w'] = jax.random.normal(next(keys), (nf, n_classes), jnp.float32) * std
    params['fc_b'] = jnp.zeros((1, n_classes), jnp.float32)
    return params


# ----------------------------------- forward -----------------------------------
def densenet_forward(params, x_nchw, a):
    del a                                          # unused by the reference forward
    x = jnp.transpose(x_nchw, (0, 2, 3, 1))        # NCHW -> NHWC, exactly once
    x, h, w = _stem(x, params)                     # conv0 + norm0 + relu0 + pool0
    n = x.shape[0]
    for i, layers in enumerate(params['blocks']):
        for layer in layers:
            x = _dense_layer(x, layer, n, h, w)
        if i < len(params['transitions']):
            x, h, w = _transition(x, params['transitions'][i], n, h, w)
    return _head(x, params, n, h, w)               # norm5 + relu + avgpool + linear


if __name__ == "__main__":
    key = jax.random.PRNGKey(0)
    kx, ka, kp = jax.random.split(key, 3)

    # Small instantiation of the same architecture. Spatial 32 is the minimum that
    # survives the stem stride-2, pool stride-2 and three AvgPool2d(2,2) transitions.
    batch, in_ch, spatial = 2, 4, 32
    num_init, growth, block_config, bn_size, n_classes = 32, 16, (2, 2, 2, 2), 4, 2

    x = jax.random.normal(kx, (batch, in_ch, spatial, spatial), jnp.float32)  # NCHW
    a = jax.random.normal(ka, (batch, 1), jnp.float32)                        # unused arg
    params = init_params(kp, in_ch, num_init, growth, block_config, bn_size, n_classes)

    fwd = jax.jit(densenet_forward)
    y = jax.block_until_ready(fwd(params, x, a))
    assert y.shape == (batch, n_classes) and y.dtype == jnp.float32
    print("KERNEL_OK")
</pallas_src>

<mosaic_0001>
module attributes {stable_mosaic.version = 11 : i64} {
  func.func @_mm_bn_relu_kernel(%arg0: memref<512x36xbf16, #tpu.memory_space<vmem>>, %arg1: memref<36x32xbf16, #tpu.memory_space<vmem>>, %arg2: memref<1x32xf32, #tpu.memory_space<vmem>>, %arg3: memref<1x32xf32, #tpu.memory_space<vmem>>, %arg4: memref<512x32xbf16, #tpu.memory_space<vmem>>) attributes {dimension_semantics = [], scalar_prefetch = 0 : i64, scratch_operands = 0 : i64, tpu.core_type = #tpu.core_type<tc>} {
    %c0 = arith.constant 0 : index
    %c0_0 = arith.constant 0 : index
    %0 = vector.load %arg0[%c0, %c0_0] : memref<512x36xbf16, #tpu.memory_space<vmem>>, vector<512x36xbf16>
    %c0_1 = arith.constant 0 : index
    %c0_2 = arith.constant 0 : index
    %1 = vector.load %arg1[%c0_1, %c0_2] : memref<36x32xbf16, #tpu.memory_space<vmem>>, vector<36x32xbf16>
    %cst = arith.constant dense<0.000000e+00> : vector<512x32xf32>
    %2 = tpu.matmul %0, %1, %cst {dimension_numbers = #tpu.dot_dimension_numbers<[1], [0], [0], [1], [0, 0, 1, 1], [], []>} : vector<512x36xbf16>, vector<36x32xbf16>, vector<512x32xf32> -> vector<512x32xf32>
    %cst_3 = arith.constant dense<0.000000e+00> : vector<32xf32>
    %3 = vector.multi_reduction <add>, %2, %cst_3 [0] : vector<512x32xf32> to vector<32xf32>
    %4 = vector.shape_cast %3 : vector<32xf32> to vector<1x32xf32>
    %cst_4 = arith.constant 5.120000e+02 : f32
    %5 = vector.broadcast %cst_4 : f32 to vector<1x32xf32>
    %6 = arith.divf %4, %5 : vector<1x32xf32>
    %7 = vector.broadcast %6 : vector<1x32xf32> to vector<512x32xf32>
    %8 = arith.subf %2, %7 : vector<512x32xf32>
    %9 = arith.mulf %8, %8 : vector<512x32xf32>
    %cst_5 = arith.constant dense<0.000000e+00> : vector<32xf32>
    %10 = vector.multi_reduction <add>, %9, %cst_5 [0] : vector<512x32xf32> to vector<32xf32>
    %11 = vector.shape_cast %10 : vector<32xf32> to vector<1x32xf32>
    %cst_6 = arith.constant 5.120000e+02 : f32
    %12 = vector.broadcast %cst_6 : f32 to vector<1x32xf32>
    %13 = arith.divf %11, %12 : vector<1x32xf32>
    %c0_7 = arith.constant 0 : index
    %c0_8 = arith.constant 0 : index
    %14 = vector.load %arg2[%c0_7, %c0_8] : memref<1x32xf32, #tpu.memory_space<vmem>>, vector<1x32xf32>
    %cst_9 = arith.constant 9.99999974E-6 : f32
    %15 = vector.broadcast %cst_9 : f32 to vector<1x32xf32>
    %16 = arith.addf %13, %15 : vector<1x32xf32>
    %17 = math.rsqrt %16 : vector<1x32xf32>
    %18 = arith.mulf %14, %17 : vector<1x32xf32>
    %19 = vector.broadcast %18 : vector<1x32xf32> to vector<512x32xf32>
    %20 = arith.mulf %2, %19 : vector<512x32xf32>
    %c0_10 = arith.constant 0 : index
    %c0_11 = arith.constant 0 : index
    %21 = vector.load %arg3[%c0_10, %c0_11] : memref<1x32xf32, #tpu.memory_space<vmem>>, vector<1x32xf32>
    %22 = arith.mulf %6, %18 : vector<1x32xf32>
    %23 = arith.subf %21, %22 : vector<1x32xf32>
    %24 = vector.broadcast %23 : vector<1x32xf32> to vector<512x32xf32>
    %25 = arith.addf %20, %24 : vector<512x32xf32>
    %cst_12 = arith.constant 0.000000e+00 : f32
    %26 = vector.broadcast %cst_12 : f32 to vector<512x32xf32>
    %27 = arith.maximumf %25, %26 : vector<512x32xf32>
    %28 = arith.truncf %27 : vector<512x32xf32> to vector<512x32xbf16>
    %c0_13 = arith.constant 0 : index
    %c0_14 = arith.constant 0 : index
    %29 = vector.load %arg4[%c0_13, %c0_14] : memref<512x32xbf16, #tpu.memory_space<vmem>>, vector<512x32xbf16>
    tpu.vector_store %arg4[%c0_13, %c0_14], %28 {strides = array<i32>} : memref<512x32xbf16, #tpu.memory_space<vmem>>, vector<512x32xbf16>,
    return
  }
}

module attributes {stable_mosaic.version = 11 : i64} {
  func.func @_dense_stage1_kernel(%arg0: memref<128x32xbf16, #tpu.memory_space<vmem>>, %arg1: memref<1x32xf32, #tpu.memory_space<vmem>>, %arg2: memref<1x32xf32, #tpu.memory_space<vmem>>, %arg3: memref<32x64xbf16, #tpu.memory_space<vmem>>, %arg4: memref<1x64xf32, #tpu.memory_space<vmem>>, %arg5: memref<1x64xf32, #tpu.memory_space<vmem>>, %arg6: memref<128x64xf32, #tpu.memory_space<vmem>>) attributes {dimension_semantics = [], scalar_prefetch = 0 : i64, scratch_operands = 0 : i64, tpu.core_type = #tpu.core_type<tc>} {
    %c0 = arith.constant 0 : index
    %c0_0 = arith.constant 0 : index
    %0 = vector.load %arg0[%c0, %c0_0] : memref<128x32xbf16, #tpu.memory_space<vmem>>, vector<128x32xbf16>
    %1 = arith.extf %0 : vector<128x32xbf16> to vector<128x32xf32>
    %cst = arith.constant dense<0.000000e+00> : vector<32xf32>
    %2 = vector.multi_reduction <add>, %1, %cst [0] : vector<128x32xf32> to vector<32xf32>
    %3 = vector.shape_cast %2 : vector<32xf32> to vector<1x32xf32>
    %cst_1 = arith.constant 1.280000e+02 : f32
    %4 = vector.broadcast %cst_1 : f32 to vector<1x32xf32>
    %5 = arith.divf %3, %4 : vector<1x32xf32>
    %6 = vector.broadcast %5 : vector<1x32xf32> to vector<128x32xf32>
    %7 = arith.subf %1, %6 : vector<128x32xf32>
    %8 = arith.mulf %7, %7 : vector<128x32xf32>
    %cst_2 = arith.constant dense<0.000000e+00> : vector<32xf32>
    %9 = vector.multi_reduction <add>, %8, %cst_2 [0] : vector<128x32xf32> to vector<32xf32>
    %10 = vector.shape_cast %9 : vector<32xf32> to vector<1x32xf32>
    %cst_3 = arith.constant 1.280000e+02 : f32
    %11 = vector.broadcast %cst_3 : f32 to vector<1x32xf32>
    %12 = arith.divf %10, %11 : vector<1x32xf32>
    %c0_4 = arith.constant 0 : index
    %c0_5 = arith.constant 0 : index
    %13 = vector.load %arg1[%c0_4, %c0_5] : memref<1x32xf32, #tpu.memory_space<vmem>>, vector<1x32xf32>
    %cst_6 = arith.constant 9.99999974E-6 : f32
    %14 = vector.broadcast %cst_6 : f32 to vector<1x32xf32>
    %15 = arith.addf %12, %14 : vector<1x32xf32>
    %16 = math.rsqrt %15 : vector<1x32xf32>
    %17 = arith.mulf %13, %16 : vector<1x32xf32>
    %18 = vector.broadcast %17 : vector<1x32xf32> to vector<128x32xf32>
    %19 = arith.mulf %1, %18 : vector<128x32xf32>
    %c0_7 = arith.constant 0 : index
    %c0_8 = arith.constant 0 : index
    %20 = vector.load %arg2[%c0_7, %c0_8] : memref<1x32xf32, #tpu.memory_space<vmem>>, vector<1x32xf32>
    %21 = arith.mulf %5, %17 : vector<1x32xf32>
    %22 = arith.subf %20, %21 : vector<1x32xf32>
    %23 = vector.broadcast %22 : vector<1x32xf32> to vector<128x32xf32>
    %24 = arith.addf %19, %23 : vector<128x32xf32>
    %cst_9 = arith.constant 0.000000e+00 : f32
    %25 = vector.broadcast %cst_9 : f32 to vector<128x32xf32>
    %26 = arith.maximumf %24, %25 : vector<128x32xf32>
    %27 = arith.truncf %26 : vector<128x32xf32> to vector<128x32xbf16>
    %c0_10 = arith.constant 0 : index
    %c0_11 = arith.constant 0 : index
    %28 = vector.load %arg3[%c0_10, %c0_11] : memref<32x64xbf16, #tpu.memory_space<vmem>>, vector<32x64xbf16>
    %cst_12 = arith.constant dense<0.000000e+00> : vector<128x64xf32>
    %29 = tpu.matmul %27, %28, %cst_12 {dimension_numbers = #tpu.dot_dimension_numbers<[1], [0], [0], [1], [0, 0, 1, 1], [], []>} : vector<128x32xbf16>, vector<32x64xbf16>, vector<128x64xf32> -> vector<128x64xf32>
    %cst_13 = arith.constant dense<0.000000e+00> : vector<64xf32>
    %30 = vector.multi_reduction <add>, %29, %cst_13 [0] : vector<128x64xf32> to vector<64xf32>
    %31 = vector.shape_cast %30 : vector<64xf32> to vector<1x64xf32>
    %cst_14 = arith.constant 1.280000e+02 : f32
    %32 = vector.broadcast %cst_14 : f32 to vector<1x64xf32>
    %33 = arith.divf %31, %32 : vector<1x64xf32>
    %34 = vector.broadcast %33 : vector<1x64xf32> to vector<128x64xf32>
    %35 = arith.subf %29, %34 : vector<128x64xf32>
    %36 = arith.mulf %35, %35 : vector<128x64xf32>
    %cst_15 = arith.constant dense<0.000000e+00> : vector<64xf32>
    %37 = vector.multi_reduction <add>, %36, %cst_15 [0] : vector<128x64xf32> to vector<64xf32>
    %38 = vector.shape_cast %37 : vector<64xf32> to vector<1x64xf32>
    %cst_16 = arith.constant 1.280000e+02 : f32
    %39 = vector.broadcast %cst_16 : f32 to vector<1x64xf32>
    %40 = arith.divf %38, %39 : vector<1x64xf32>
    %c0_17 = arith.constant 0 : index
    %c0_18 = arith.constant 0 : index
    %41 = vector.load %arg4[%c0_17, %c0_18] : memref<1x64xf32, #tpu.memory_space<vmem>>, vector<1x64xf32>
    %cst_19 = arith.constant 9.99999974E-6 : f32
    %42 = vector.broadcast %cst_19 : f32 to vector<1x64xf32>
    %43 = arith.addf %40, %42 : vector<1x64xf32>
    %44 = math.rsqrt %43 : vector<1x64xf32>
    %45 = arith.mulf %41, %44 : vector<1x64xf32>
    %46 = vector.broadcast %45 : vector<1x64xf32> to vector<128x64xf32>
    %47 = arith.mulf %29, %46 : vector<128x64xf32>
    %c0_20 = arith.constant 0 : index
    %c0_21 = arith.constant 0 : index
    %48 = vector.load %arg5[%c0_20, %c0_21] : memref<1x64xf32, #tpu.memory_space<vmem>>, vector<1x64xf32>
    %49 = arith.mulf %33, %45 : vector<1x64xf32>
    %50 = arith.subf %48, %49 : vector<1x64xf32>
    %51 = vector.broadcast %50 : vector<1x64xf32> to vector<128x64xf32>
    %52 = arith.addf %47, %51 : vector<128x64xf32>
    %cst_22 = arith.constant 0.000000e+00 : f32
    %53 = vector.broadcast %cst_22 : f32 to vector<128x64xf32>
    %54 = arith.maximumf %52, %53 : vector<128x64xf32>
    %c0_23 = arith.constant 0 : index
    %c0_24 = arith.constant 0 : index
    %55 = vector.load %arg6[%c0_23, %c0_24] : memref<128x64xf32, #tpu.memory_space<vmem>>, vector<128x64xf32>
    tpu.vector_store %arg6[%c0_23, %c0_24], %54 {strides = array<i32>} : memref<128x64xf32, #tpu.memory_space<vmem>>, vector<128x64xf32>,
    return
  }
}

module attributes {stable_mosaic.version = 11 : i64} {
  func.func @_conv3x3_taps_kernel(%arg0: memref<222x64xf32, #tpu.memory_space<vmem>>, %arg1: memref<9x64x16xbf16, #tpu.memory_space<vmem>>, %arg2: memref<200x16xbf16, #tpu.memory_space<vmem>>) attributes {dimension_semantics = [], scalar_prefetch = 0 : i64, scratch_operands = 0 : i64, tpu.core_type = #tpu.core_type<tc>} {
    %cst = arith.constant 0.000000e+00 : f32
    %0 = vector.broadcast %cst : f32 to vector<200x16xf32>
    %c0 = arith.constant 0 : index
    %c0_0 = arith.constant 0 : index
    %1 = vector.load %arg0[%c0, %c0_0] : memref<222x64xf32, #tpu.memory_space<vmem>>, vector<200x64xf32>
    %2 = arith.truncf %1 : vector<200x64xf32> to vector<200x64xbf16>
    %c0_1 = arith.constant 0 : index
    %c0_2 = arith.constant 0 : index
    %c0_3 = arith.constant 0 : index
    %3 = vector.load %arg1[%c0_1, %c0_2, %c0_3] : memref<9x64x16xbf16, #tpu.memory_space<vmem>>, vector<1x64x16xbf16>
    %4 = vector.shape_cast %3 : vector<1x64x16xbf16> to vector<64x16xbf16>
    %cst_4 = arith.constant dense<0.000000e+00> : vector<200x16xf32>
    %5 = tpu.matmul %2, %4, %cst_4 {dimension_numbers = #tpu.dot_dimension_numbers<[1], [0], [0], [1], [0, 0, 1, 1], [], []>} : vector<200x64xbf16>, vector<64x16xbf16>, vector<200x16xf32> -> vector<200x16xf32>
    %6 = arith.addf %0, %5 : vector<200x16xf32>
    %c1 = arith.constant 1 : index
    %c0_5 = arith.constant 0 : index
    %7 = vector.load %arg0[%c1, %c0_5] : memref<222x64xf32, #tpu.memory_space<vmem>>, vector<200x64xf32>
    %8 = arith.truncf %7 : vector<200x64xf32> to vector<200x64xbf16>
    %c1_6 = arith.constant 1 : index
    %c0_7 = arith.constant 0 : index
    %c0_8 = arith.constant 0 : index
    %9 = vector.load %arg1[%c1_6, %c0_7, %c0_8] : memref<9x64x16xbf16, #tpu.memory_space<vmem>>, vector<1x64x16xbf16>
    %10 = vector.shape_cast %9 : vector<1x64x16xbf16> to vector<64x16xbf16>
    %cst_9 = arith.constant dense<0.000000e+00> : vector<200x16xf32>
    %11 = tpu.matmul %8, %10, %cst_9 {dimension_numbers = #tpu.dot_dimension_numbers<[1], [0], [0], [1], [0, 0, 1, 1], [], []>} : vector<200x64xbf16>, vector<64x16xbf16>, vector<200x16xf32> -> vector<200x16xf32>
    %12 = arith.addf %6, %11 : vector<200x16xf32>
    %c2 = arith.constant 2 : index
    %c0_10 = arith.constant 0 : index
    %13 = vector.load %arg0[%c2, %c0_10] : memref<222x64xf32, #tpu.memory_space<vmem>>, vector<200x64xf32>
    %14 = arith.truncf %13 : vector<200x64xf32> to vector<200x64xbf16>
    %c2_11 = arith.constant 2 : index
    %c0_12 = arith.constant 0 : index
    %c0_13 = arith.constant 0 : index
    %15 = vector.load %arg1[%c2_11, %c0_12, %c0_13] : memref<9x64x16xbf16, #tpu.memory_space<vmem>>, vector<1x64x16xbf16>
    %16 = vector.shape_cast %15 : vector<1x64x16xbf16> to vector<64x16xbf16>
    %cst_14 = arith.constant dense<0.000000e+00> : vector<200x16xf32>
    %17 = tpu.matmul %14, %16, %cst_14 {dimension_numbers = #tpu.dot_dimension_numbers<[1], [0], [0], [1], [0, 0, 1, 1], [], []>} : vector<200x64xbf16>, vector<64x16xbf16>, vector<200x16xf32> -> vector<200x16xf32>
    %18 = arith.addf %12, %17 : vector<200x16xf32>
    %c10 = arith.constant 10 : index
    %c0_15 = arith.constant 0 : index
    %19 = vector.load %arg0[%c10, %c0_15] : memref<222x64xf32, #tpu.memory_space<vmem>>, vector<200x64xf32>
    %20 = arith.truncf %19 : vector<200x64xf32> to vector<200x64xbf16>
    %c3 = arith.constant 3 : index
    %c0_16 = arith.constant 0 : index
    %c0_17 = arith.constant 0 : index
    %21 = vector.load %arg1[%c3, %c0_16, %c0_17] : memref<9x64x16xbf16, #tpu.memory_space<vmem>>, vector<1x64x16xbf16>
    %22 = vector.shape_cast %21 : vector<1x64x16xbf16> to vector<64x16xbf16>
    %cst_18 = arith.constant dense<0.000000e+00> : vector<200x16xf32>
    %23 = tpu.matmul %20, %22, %cst_18 {dimension_numbers = #tpu.dot_dimension_numbers<[1], [0], [0], [1], [0, 0, 1, 1], [], []>} : vector<200x64xbf16>, vector<64x16xbf16>, vector<200x16xf32> -> vector<200x16xf32>
    %24 = arith.addf %18, %23 : vector<200x16xf32>
    %c11 = arith.constant 11 : index
    %c0_19 = arith.constant 0 : index
    %25 = vector.load %arg0[%c11, %c0_19] : memref<222x64xf32, #tpu.memory_space<vmem>>, vector<200x64xf32>
    %26 = arith.truncf %25 : vector<200x64xf32> to vector<200x64xbf16>
    %c4 = arith.constant 4 : index
    %c0_20 = arith.constant 0 : index
    %c0_21 = arith.constant 0 : index
    %27 = vector.load %arg1[%c4, %c0_20, %c0_21] : memref<9x64x16xbf16, #tpu.memory_space<vmem>>, vector<1x64x16xbf16>
    %28 = vector.shape_cast %27 : vector<1x64x16xbf16> to vector<64x16xbf16>
    %cst_22 = arith.constant dense<0.000000e+00> : vector<200x16xf32>
    %29 = tpu.matmul %26, %28, %cst_22 {dimension_numbers = #tpu.dot_dimension_numbers<[1], [0], [0], [1], [0, 0, 1, 1], [], []>} : vector<200x64xbf16>, vector<64x16xbf16>, vector<200x16xf32> -> vector<200x16xf32>
    %30 = arith.addf %24, %29 : vector<200x16xf32>
    %c12 = arith.constant 12 : index
    %c0_23 = arith.constant 0 : index
    %31 = vector.load %arg0[%c12, %c0_23] : memref<222x64xf32, #tpu.memory_space<vmem>>, vector<200x64xf32>
    %32 = arith.truncf %31 : vector<200x64xf32> to vector<200x64xbf16>
    %c5 = arith.constant 5 : index
    %c0_24 = arith.constant 0 : index
    %c0_25 = arith.constant 0 : index
    %33 = vector.load %arg1[%c5, %c0_24, %c0_25] : memref<9x64x16xbf16, #tpu.memory_space<vmem>>, vector<1x64x16xbf16>
    %34 = vector.shape_cast %33 : vector<1x64x16xbf16> to vector<64x16xbf16>
    %cst_26 = arith.constant dense<0.000000e+00> : vector<200x16xf32>
    %35 = tpu.matmul %32, %34, %cst_26 {dimension_numbers = #tpu.dot_dimension_numbers<[1], [0], [0], [1], [0, 0, 1, 1], [], []>} : vector<200x64xbf16>, vector<64x16xbf16>, vector<200x16xf32> -> vector<200x16xf32>
    %36 = arith.addf %30, %35 : vector<200x16xf32>
    %c20 = arith.constant 20 : index
    %c0_27 = arith.constant 0 : index
    %37 = vector.load %arg0[%c20, %c0_27] : memref<222x64xf32, #tpu.memory_space<vmem>>, vector<200x64xf32>
    %38 = arith.truncf %37 : vector<200x64xf32> to vector<200x64xbf16>
    %c6 = arith.constant 6 : index
    %c0_28 = arith.constant 0 : index
    %c0_29 = arith.constant 0 : index
    %39 = vector.load %arg1[%c6, %c0_28, %c0_29] : memref<9x64x16xbf16, #tpu.memory_space<vmem>>, vector<1x64x16xbf16>
    %40 = vector.shape_cast %39 : vector<1x64x16xbf16> to vector<64x16xbf16>
    %cst_30 = arith.constant dense<0.000000e+00> : vector<200x16xf32>
    %41 = tpu.matmul %38, %40, %cst_30 {dimension_numbers = #tpu.dot_dimension_numbers<[1], [0], [0], [1], [0, 0, 1, 1], [], []>} : vector<200x64xbf16>, vector<64x16xbf16>, vector<200x16xf32> -> vector<200x16xf32>
    %42 = arith.addf %36, %41 : vector<200x16xf32>
    %c21 = arith.constant 21 : index
    %c0_31 = arith.constant 0 : index
    %43 = vector.load %arg0[%c21, %c0_31] : memref<222x64xf32, #tpu.memory_space<vmem>>, vector<200x64xf32>
    %44 = arith.truncf %43 : vector<200x64xf32> to vector<200x64xbf16>
    %c7 = arith.constant 7 : index
    %c0_32 = arith.constant 0 : index
    %c0_33 = arith.constant 0 : index
    %45 = vector.load %arg1[%c7, %c0_32, %c0_33] : memref<9x64x16xbf16, #tpu.memory_space<vmem>>, vector<1x64x16xbf16>
    %46 = vector.shape_cast %45 : vector<1x64x16xbf16> to vector<64x16xbf16>
    %cst_34 = arith.constant dense<0.000000e+00> : vector<200x16xf32>
    %47 = tpu.matmul %44, %46, %cst_34 {dimension_numbers = #tpu.dot_dimension_numbers<[1], [0], [0], [1], [0, 0, 1, 1], [], []>} : vector<200x64xbf16>, vector<64x16xbf16>, vector<200x16xf32> -> vector<200x16xf32>
    %48 = arith.addf %42, %47 : vector<200x16xf32>
    %c22 = arith.constant 22 : index
    %c0_35 = arith.constant 0 : index
    %49 = vector.load %arg0[%c22, %c0_35] : memref<222x64xf32, #tpu.memory_space<vmem>>, vector<200x64xf32>
    %50 = arith.truncf %49 : vector<200x64xf32> to vector<200x64xbf16>
    %c8 = arith.constant 8 : index
    %c0_36 = arith.constant 0 : index
    %c0_37 = arith.constant 0 : index
    %51 = vector.load %arg1[%c8, %c0_36, %c0_37] : memref<9x64x16xbf16, #tpu.memory_space<vmem>>, vector<1x64x16xbf16>
    %52 = vector.shape_cast %51 : vector<1x64x16xbf16> to vector<64x16xbf16>
    %cst_38 = arith.constant dense<0.000000e+00> : vector<200x16xf32>
    %53 = tpu.matmul %50, %52, %cst_38 {dimension_numbers = #tpu.dot_dimension_numbers<[1], [0], [0], [1], [0, 0, 1, 1], [], []>} : vector<200x64xbf16>, vector<64x16xbf16>, vector<200x16xf32> -> vector<200x16xf32>
    %54 = arith.addf %48, %53 : vector<200x16xf32>
    %55 = arith.truncf %54 : vector<200x16xf32> to vector<200x16xbf16>
    %c0_39 = arith.constant 0 : index
    %c0_40 = arith.constant 0 : index
    %56 = vector.load %arg2[%c0_39, %c0_40] : memref<200x16xbf16, #tpu.memory_space<vmem>>, vector<200x16xbf16>
    tpu.vector_store %arg2[%c0_39, %c0_40], %55 {strides = array<i32>} : memref<200x16xbf16, #tpu.memory_space<vmem>>, vector<200x16xbf16>,
    return
  }
}

module attributes {stable_mosaic.version = 11 : i64} {
  func.func @_dense_stage1_kernel(%arg0: memref<128x48xbf16, #tpu.memory_space<vmem>>, %arg1: memref<1x48xf32, #tpu.memory_space<vmem>>, %arg2: memref<1x48xf32, #tpu.memory_space<vmem>>, %arg3: memref<48x64xbf16, #tpu.memory_space<vmem>>, %arg4: memref<1x64xf32, #tpu.memory_space<vmem>>, %arg5: memref<1x64xf32, #tpu.memory_space<vmem>>, %arg6: memref<128x64xf32, #tpu.memory_space<vmem>>) attributes {dimension_semantics = [], scalar_prefetch = 0 : i64, scratch_operands = 0 : i64, tpu.core_type = #tpu.core_type<tc>} {
    %c0 = arith.constant 0 : index
    %c0_0 = arith.constant 0 : index
    %0 = vector.load %arg0[%c0, %c0_0] : memref<128x48xbf16, #tpu.memory_space<vmem>>, vector<128x48xbf16>
    %1 = arith.extf %0 : vector<128x48xbf16> to vector<128x48xf32>
    %cst = arith.constant dense<0.000000e+00> : vector<48xf32>
    %2 = vector.multi_reduction <add>, %1, %cst [0] : vector<128x48xf32> to vector<48xf32>
    %3 = vector.shape_cast %2 : vector<48xf32> to vector<1x48xf32>
    %cst_1 = arith.constant 1.280000e+02 : f32
    %4 = vector.broadcast %cst_1 : f32 to vector<1x48xf32>
    %5 = arith.divf %3, %4 : vector<1x48xf32>
    %6 = vector.broadcast %5 : vector<1x48xf32> to vector<128x48xf32>
    %7 = arith.subf %1, %6 : vector<128x48xf32>
    %8 = arith.mulf %7, %7 : vector<128x48xf32>
    %cst_2 = arith.constant dense<0.000000e+00> : vector<48xf32>
    %9 = vector.multi_reduction <add>, %8, %cst_2 [0] : vector<128x48xf32> to vector<48xf32>
    %10 = vector.shape_cast %9 : vector<48xf32> to vector<1x48xf32>
    %cst_3 = arith.constant 1.280000e+02 : f32
    %11 = vector.broadcast %cst_3 : f32 to vector<1x48xf32>
    %12 = arith.divf %10, %11 : vector<1x48xf32>
    %c0_4 = arith.constant 0 : index
    %c0_5 = arith.constant 0 : index
    %13 = vector.load %arg1[%c0_4, %c0_5] : memref<1x48xf32, #tpu.memory_space<vmem>>, vector<1x48xf32>
    %cst_6 = arith.constant 9.99999974E-6 : f32
    %14 = vector.broadcast %cst_6 : f32 to vector<1x48xf32>
    %15 = arith.addf %12, %14 : vector<1x48xf32>
    %16 = math.rsqrt %15 : vector<1x48xf32>
    %17 = arith.mulf %13, %16 : vector<1x48xf32>
    %18 = vector.broadcast %17 : vector<1x48xf32> to vector<128x48xf32>
    %19 = arith.mulf %1, %18 : vector<128x48xf32>
    %c0_7 = arith.constant 0 : index
    %c0_8 = arith.constant 0 : index
    %20 = vector.load %arg2[%c0_7, %c0_8] : memref<1x48xf32, #tpu.memory_space<vmem>>, vector<1x48xf32>
    %21 = arith.mulf %5, %17 : vector<1x48xf32>
    %22 = arith.subf %20, %21 : vector<1x48xf32>
    %23 = vector.broadcast %22 : vector<1x48xf32> to vector<128x48xf32>
    %24 = arith.addf %19, %23 : vector<128x48xf32>
    %cst_9 = arith.constant 0.000000e+00 : f32
    %25 = vector.broadcast %cst_9 : f32 to vector<128x48xf32>
    %26 = arith.maximumf %24, %25 : vector<128x48xf32>
    %27 = arith.truncf %26 : vector<128x48xf32> to vector<128x48xbf16>
    %c0_10 = arith.constant 0 : index
    %c0_11 = arith.constant 0 : index
    %28 = vector.load %arg3[%c0_10, %c0_11] : memref<48x64xbf16, #tpu.memory_space<vmem>>, vector<48x64xbf16>
    %cst_12 = arith.constant dense<0.000000e+00> : vector<128x64xf32>
    %29 = tpu.matmul %27, %28, %cst_12 {dimension_numbers = #tpu.dot_dimension_numbers<[1], [0], [0], [1], [0, 0, 1, 1], [], []>} : vector<128x48xbf16>, vector<48x64xbf16>, vector<128x64xf32> -> vector<128x64xf32>
    %cst_13 = arith.constant dense<0.000000e+00> : vector<64xf32>
    %30 = vector.multi_reduction <add>, %29, %cst_13 [0] : vector<128x64xf32> to vector<64xf32>
    %31 = vector.shape_cast %30 : vector<64xf32> to vector<1x64xf32>
    %cst_14 = arith.constant 1.280000e+02 : f32
    %32 = vector.broadcast %cst_14 : f32 to vector<1x64xf32>
    %33 = arith.divf %31, %32 : vector<1x64xf32>
    %34 = vector.broadcast %33 : vector<1x64xf32> to vector<128x64xf32>
    %35 = arith.subf %29, %34 : vector<128x64xf32>
    %36 = arith.mulf %35, %35 : vector<128x64xf32>
    %cst_15 = arith.constant dense<0.000000e+00> : vector<64xf32>
    %37 = vector.multi_reduction <add>, %36, %cst_15 [0] : vector<128x64xf32> to vector<64xf32>
    %38 = vector.shape_cast %37 : vector<64xf32> to vector<1x64xf32>
    %cst_16 = arith.constant 1.280000e+02 : f32
    %39 = vector.broadcast %cst_16 : f32 to vector<1x64xf32>
    %40 = arith.divf %38, %39 : vector<1x64xf32>
    %c0_17 = arith.constant 0 : index
    %c0_18 = arith.constant 0 : index
    %41 = vector.load %arg4[%c0_17, %c0_18] : memref<1x64xf32, #tpu.memory_space<vmem>>, vector<1x64xf32>
    %cst_19 = arith.constant 9.99999974E-6 : f32
    %42 = vector.broadcast %cst_19 : f32 to vector<1x64xf32>
    %43 = arith.addf %40, %42 : vector<1x64xf32>
    %44 = math.rsqrt %43 : vector<1x64xf32>
    %45 = arith.mulf %41, %44 : vector<1x64xf32>
    %46 = vector.broadcast %45 : vector<1x64xf32> to vector<128x64xf32>
    %47 = arith.mulf %29, %46 : vector<128x64xf32>
    %c0_20 = arith.constant 0 : index
    %c0_21 = arith.constant 0 : index
    %48 = vector.load %arg5[%c0_20, %c0_21] : memref<1x64xf32, #tpu.memory_space<vmem>>, vector<1x64xf32>
    %49 = arith.mulf %33, %45 : vector<1x64xf32>
    %50 = arith.subf %48, %49 : vector<1x64xf32>
    %51 = vector.broadcast %50 : vector<1x64xf32> to vector<128x64xf32>
    %52 = arith.addf %47, %51 : vector<128x64xf32>
    %cst_22 = arith.constant 0.000000e+00 : f32
    %53 = vector.broadcast %cst_22 : f32 to vector<128x64xf32>
    %54 = arith.maximumf %52, %53 : vector<128x64xf32>
    %c0_23 = arith.constant 0 : index
    %c0_24 = arith.constant 0 : index
    %55 = vector.load %arg6[%c0_23, %c0_24] : memref<128x64xf32, #tpu.memory_space<vmem>>, vector<128x64xf32>
    tpu.vector_store %arg6[%c0_23, %c0_24], %54 {strides = array<i32>} : memref<128x64xf32, #tpu.memory_space<vmem>>, vector<128x64xf32>,
    return
  }
}

module attributes {stable_mosaic.version = 11 : i64} {
  func.func @_bn_relu_mm_kernel(%arg0: memref<128x64xbf16, #tpu.memory_space<vmem>>, %arg1: memref<1x64xf32, #tpu.memory_space<vmem>>, %arg2: memref<1x64xf32, #tpu.memory_space<vmem>>, %arg3: memref<64x32xbf16, #tpu.memory_space<vmem>>, %arg4: memref<128x32xbf16, #tpu.memory_space<vmem>>) attributes {dimension_semantics = [], scalar_prefetch = 0 : i64, scratch_operands = 0 : i64, tpu.core_type = #tpu.core_type<tc>} {
    %c0 = arith.constant 0 : index
    %c0_0 = arith.constant 0 : index
    %0 = vector.load %arg0[%c0, %c0_0] : memref<128x64xbf16, #tpu.memory_space<vmem>>, vector<128x64xbf16>
    %1 = arith.extf %0 : vector<128x64xbf16> to vector<128x64xf32>
    %cst = arith.constant dense<0.000000e+00> : vector<64xf32>
    %2 = vector.multi_reduction <add>, %1, %cst [0] : vector<128x64xf32> to vector<64xf32>
    %3 = vector.shape_cast %2 : vector<64xf32> to vector<1x64xf32>
    %cst_1 = arith.constant 1.280000e+02 : f32
    %4 = vector.broadcast %cst_1 : f32 to vector<1x64xf32>
    %5 = arith.divf %3, %4 : vector<1x64xf32>
    %6 = vector.broadcast %5 : vector<1x64xf32> to vector<128x64xf32>
    %7 = arith.subf %1, %6 : vector<128x64xf32>
    %8 = arith.mulf %7, %7 : vector<128x64xf32>
    %cst_2 = arith.constant dense<0.000000e+00> : vector<64xf32>
    %9 = vector.multi_reduction <add>, %8, %cst_2 [0] : vector<128x64xf32> to vector<64xf32>
    %10 = vector.shape_cast %9 : vector<64xf32> to vector<1x64xf32>
    %cst_3 = arith.constant 1.280000e+02 : f32
    %11 = vector.broadcast %cst_3 : f32 to vector<1x64xf32>
    %12 = arith.divf %10, %11 : vector<1x64xf32>
    %c0_4 = arith.constant 0 : index
    %c0_5 = arith.constant 0 : index
    %13 = vector.load %arg1[%c0_4, %c0_5] : memref<1x64xf32, #tpu.memory_space<vmem>>, vector<1x64xf32>
    %cst_6 = arith.constant 9.99999974E-6 : f32
    %14 = vector.broadcast %cst_6 : f32 to vector<1x64xf32>
    %15 = arith.addf %12, %14 : vector<1x64xf32>
    %16 = math.rsqrt %15 : vector<1x64xf32>
    %17 = arith.mulf %13, %16 : vector<1x64xf32>
    %18 = vector.broadcast %17 : vector<1x64xf32> to vector<128x64xf32>
    %19 = arith.mulf %1, %18 : vector<128x64xf32>
    %c0_7 = arith.constant 0 : index
    %c0_8 = arith.constant 0 : index
    %20 = vector.load %arg2[%c0_7, %c0_8] : memref<1x64xf32, #tpu.memory_space<vmem>>, vector<1x64xf32>
    %21 = arith.mulf %5, %17 : vector<1x64xf32>
    %22 = arith.subf %20, %21 : vector<1x64xf32>
    %23 = vector.broadcast %22 : vector<1x64xf32> to vector<128x64xf32>
    %24 = arith.addf %19, %23 : vector<128x64xf32>
    %cst_9 = arith.constant 0.000000e+00 : f32
    %25 = vector.broadcast %cst_9 : f32 to vector<128x64xf32>
    %26 = arith.maximumf %24, %25 : vector<128x64xf32>
    %27 = arith.truncf %26 : vector<128x64xf32> to vector<128x64xbf16>
    %c0_10 = arith.constant 0 : index
    %c0_11 = arith.constant 0 : index
    %28 = vector.load %arg3[%c0_10, %c0_11] : memref<64x32xbf16, #tpu.memory_space<vmem>>, vector<64x32xbf16>
    %cst_12 = arith.constant dense<0.000000e+00> : vector<128x32xf32>
    %29 = tpu.matmul %27, %28, %cst_12 {dimension_numbers = #tpu.dot_dimension_numbers<[1], [0], [0], [1], [0, 0, 1, 1], [], []>} : vector<128x64xbf16>, vector<64x32xbf16>, vector<128x32xf32> -> vector<128x32xf32>
    %30 = arith.truncf %29 : vector<128x32xf32> to vector<128x32xbf16>
    %c0_13 = arith.constant 0 : index
    %c0_14 = arith.constant 0 : index
    %31 = vector.load %arg4[%c0_13, %c0_14] : memref<128x32xbf16, #tpu.memory_space<vmem>>, vector<128x32xbf16>
    tpu.vector_store %arg4[%c0_13, %c0_14], %30 {strides = array<i32>} : memref<128x32xbf16, #tpu.memory_space<vmem>>, vector<128x32xbf16>,
    return
  }
}

module attributes {stable_mosaic.version = 11 : i64} {
  func.func @_dense_stage1_kernel(%arg0: memref<32x32xbf16, #tpu.memory_space<vmem>>, %arg1: memref<1x32xf32, #tpu.memory_space<vmem>>, %arg2: memref<1x32xf32, #tpu.memory_space<vmem>>, %arg3: memref<32x64xbf16, #tpu.memory_space<vmem>>, %arg4: memref<1x64xf32, #tpu.memory_space<vmem>>, %arg5: memref<1x64xf32, #tpu.memory_space<vmem>>, %arg6: memref<32x64xf32, #tpu.memory_space<vmem>>) attributes {dimension_semantics = [], scalar_prefetch = 0 : i64, scratch_operands = 0 : i64, tpu.core_type = #tpu.core_type<tc>} {
    %c0 = arith.constant 0 : index
    %c0_0 = arith.constant 0 : index
    %0 = vector.load %arg0[%c0, %c0_0] : memref<32x32xbf16, #tpu.memory_space<vmem>>, vector<32x32xbf16>
    %1 = arith.extf %0 : vector<32x32xbf16> to vector<32x32xf32>
    %cst = arith.constant dense<0.000000e+00> : vector<32xf32>
    %2 = vector.multi_reduction <add>, %1, %cst [0] : vector<32x32xf32> to vector<32xf32>
    %3 = vector.shape_cast %2 : vector<32xf32> to vector<1x32xf32>
    %cst_1 = arith.constant 3.200000e+01 : f32
    %4 = vector.broadcast %cst_1 : f32 to vector<1x32xf32>
    %5 = arith.divf %3, %4 : vector<1x32xf32>
    %6 = vector.broadcast %5 : vector<1x32xf32> to vector<32x32xf32>
    %7 = arith.subf %1, %6 : vector<32x32xf32>
    %8 = arith.mulf %7, %7 : vector<32x32xf32>
    %cst_2 = arith.constant dense<0.000000e+00> : vector<32xf32>
    %9 = vector.multi_reduction <add>, %8, %cst_2 [0] : vector<32x32xf32> to vector<32xf32>
    %10 = vector.shape_cast %9 : vector<32xf32> to vector<1x32xf32>
    %cst_3 = arith.constant 3.200000e+01 : f32
    %11 = vector.broadcast %cst_3 : f32 to vector<1x32xf32>
    %12 = arith.divf %10, %11 : vector<1x32xf32>
    %c0_4 = arith.constant 0 : index
    %c0_5 = arith.constant 0 : index
    %13 = vector.load %arg1[%c0_4, %c0_5] : memref<1x32xf32, #tpu.memory_space<vmem>>, vector<1x32xf32>
    %cst_6 = arith.constant 9.99999974E-6 : f32
    %14 = vector.broadcast %cst_6 : f32 to vector<1x32xf32>
    %15 = arith.addf %12, %14 : vector<1x32xf32>
    %16 = math.rsqrt %15 : vector<1x32xf32>
    %17 = arith.mulf %13, %16 : vector<1x32xf32>
    %18 = vector.broadcast %17 : vector<1x32xf32> to vector<32x32xf32>
    %19 = arith.mulf %1, %18 : vector<32x32xf32>
    %c0_7 = arith.constant 0 : index
    %c0_8 = arith.constant 0 : index
    %20 = vector.load %arg2[%c0_7, %c0_8] : memref<1x32xf32, #tpu.memory_space<vmem>>, vector<1x32xf32>
    %21 = arith.mulf %5, %17 : vector<1x32xf32>
    %22 = arith.subf %20, %21 : vector<1x32xf32>
    %23 = vector.broadcast %22 : vector<1x32xf32> to vector<32x32xf32>
    %24 = arith.addf %19, %23 : vector<32x32xf32>
    %cst_9 = arith.constant 0.000000e+00 : f32
    %25 = vector.broadcast %cst_9 : f32 to vector<32x32xf32>
    %26 = arith.maximumf %24, %25 : vector<32x32xf32>
    %27 = arith.truncf %26 : vector<32x32xf32> to vector<32x32xbf16>
    %c0_10 = arith.constant 0 : index
    %c0_11 = arith.constant 0 : index
    %28 = vector.load %arg3[%c0_10, %c0_11] : memref<32x64xbf16, #tpu.memory_space<vmem>>, vector<32x64xbf16>
    %cst_12 = arith.constant dense<0.000000e+00> : vector<32x64xf32>
    %29 = tpu.matmul %27, %28, %cst_12 {dimension_numbers = #tpu.dot_dimension_numbers<[1], [0], [0], [1], [0, 0, 1, 1], [], []>} : vector<32x32xbf16>, vector<32x64xbf16>, vector<32x64xf32> -> vector<32x64xf32>
    %cst_13 = arith.constant dense<0.000000e+00> : vector<64xf32>
    %30 = vector.multi_reduction <add>, %29, %cst_13 [0] : vector<32x64xf32> to vector<64xf32>
    %31 = vector.shape_cast %30 : vector<64xf32> to vector<1x64xf32>
    %cst_14 = arith.constant 3.200000e+01 : f32
    %32 = vector.broadcast %cst_14 : f32 to vector<1x64xf32>
    %33 = arith.divf %31, %32 : vector<1x64xf32>
    %34 = vector.broadcast %33 : vector<1x64xf32> to vector<32x64xf32>
    %35 = arith.subf %29, %34 : vector<32x64xf32>
    %36 = arith.mulf %35, %35 : vector<32x64xf32>
    %cst_15 = arith.constant dense<0.000000e+00> : vector<64xf32>
    %37 = vector.multi_reduction <add>, %36, %cst_15 [0] : vector<32x64xf32> to vector<64xf32>
    %38 = vector.shape_cast %37 : vector<64xf32> to vector<1x64xf32>
    %cst_16 = arith.constant 3.200000e+01 : f32
    %39 = vector.broadcast %cst_16 : f32 to vector<1x64xf32>
    %40 = arith.divf %38, %39 : vector<1x64xf32>
    %c0_17 = arith.constant 0 : index
    %c0_18 = arith.constant 0 : index
    %41 = vector.load %arg4[%c0_17, %c0_18] : memref<1x64xf32, #tpu.memory_space<vmem>>, vector<1x64xf32>
    %cst_19 = arith.constant 9.99999974E-6 : f32
    %42 = vector.broadcast %cst_19 : f32 to vector<1x64xf32>
    %43 = arith.addf %40, %42 : vector<1x64xf32>
    %44 = math.rsqrt %43 : vector<1x64xf32>
    %45 = arith.mulf %41, %44 : vector<1x64xf32>
    %46 = vector.broadcast %45 : vector<1x64xf32> to vector<32x64xf32>
    %47 = arith.mulf %29, %46 : vector<32x64xf32>
    %c0_20 = arith.constant 0 : index
    %c0_21 = arith.constant 0 : index
    %48 = vector.load %arg5[%c0_20, %c0_21] : memref<1x64xf32, #tpu.memory_space<vmem>>, vector<1x64xf32>
    %49 = arith.mulf %33, %45 : vector<1x64xf32>
    %50 = arith.subf %48, %49 : vector<1x64xf32>
    %51 = vector.broadcast %50 : vector<1x64xf32> to vector<32x64xf32>
    %52 = arith.addf %47, %51 : vector<32x64xf32>
    %cst_22 = arith.constant 0.000000e+00 : f32
    %53 = vector.broadcast %cst_22 : f32 to vector<32x64xf32>
    %54 = arith.maximumf %52, %53 : vector<32x64xf32>
    %c0_23 = arith.constant 0 : index
    %c0_24 = arith.constant 0 : index
    %55 = vector.load %arg6[%c0_23, %c0_24] : memref<32x64xf32, #tpu.memory_space<vmem>>, vector<32x64xf32>
    tpu.vector_store %arg6[%c0_23, %c0_24], %54 {strides = array<i32>} : memref<32x64xf32, #tpu.memory_space<vmem>>, vector<32x64xf32>,
    return
  }
}

module attributes {stable_mosaic.version = 11 : i64} {
  func.func @_conv3x3_taps_kernel(%arg0: memref<86x64xf32, #tpu.memory_space<vmem>>, %arg1: memref<9x64x16xbf16, #tpu.memory_space<vmem>>, %arg2: memref<72x16xbf16, #tpu.memory_space<vmem>>) attributes {dimension_semantics = [], scalar_prefetch = 0 : i64, scratch_operands = 0 : i64, tpu.core_type = #tpu.core_type<tc>} {
    %cst = arith.constant 0.000000e+00 : f32
    %0 = vector.broadcast %cst : f32 to vector<72x16xf32>
    %c0 = arith.constant 0 : index
    %c0_0 = arith.constant 0 : index
    %1 = vector.load %arg0[%c0, %c0_0] : memref<86x64xf32, #tpu.memory_space<vmem>>, vector<72x64xf32>
    %2 = arith.truncf %1 : vector<72x64xf32> to vector<72x64xbf16>
    %c0_1 = arith.constant 0 : index
    %c0_2 = arith.constant 0 : index
    %c0_3 = arith.constant 0 : index
    %3 = vector.load %arg1[%c0_1, %c0_2, %c0_3] : memref<9x64x16xbf16, #tpu.memory_space<vmem>>, vector<1x64x16xbf16>
    %4 = vector.shape_cast %3 : vector<1x64x16xbf16> to vector<64x16xbf16>
    %cst_4 = arith.constant dense<0.000000e+00> : vector<72x16xf32>
    %5 = tpu.matmul %2, %4, %cst_4 {dimension_numbers = #tpu.dot_dimension_numbers<[1], [0], [0], [1], [0, 0, 1, 1], [], []>} : vector<72x64xbf16>, vector<64x16xbf16>, vector<72x16xf32> -> vector<72x16xf32>
    %6 = arith.addf %0, %5 : vector<72x16xf32>
    %c1 = arith.constant 1 : index
    %c0_5 = arith.constant 0 : index
    %7 = vector.load %arg0[%c1, %c0_5] : memref<86x64xf32, #tpu.memory_space<vmem>>, vector<72x64xf32>
    %8 = arith.truncf %7 : vector<72x64xf32> to vector<72x64xbf16>
    %c1_6 = arith.constant 1 : index
    %c0_7 = arith.constant 0 : index
    %c0_8 = arith.constant 0 : index
    %9 = vector.load %arg1[%c1_6, %c0_7, %c0_8] : memref<9x64x16xbf16, #tpu.memory_space<vmem>>, vector<1x64x16xbf16>
    %10 = vector.shape_cast %9 : vector<1x64x16xbf16> to vector<64x16xbf16>
    %cst_9 = arith.constant dense<0.000000e+00> : vector<72x16xf32>
    %11 = tpu.matmul %8, %10, %cst_9 {dimension_numbers = #tpu.dot_dimension_numbers<[1], [0], [0], [1], [0, 0, 1, 1], [], []>} : vector<72x64xbf16>, vector<64x16xbf16>, vector<72x16xf32> -> vector<72x16xf32>
    %12 = arith.addf %6, %11 : vector<72x16xf32>
    %c2 = arith.constant 2 : index
    %c0_10 = arith.constant 0 : index
    %13 = vector.load %arg0[%c2, %c0_10] : memref<86x64xf32, #tpu.memory_space<vmem>>, vector<72x64xf32>
    %14 = arith.truncf %13 : vector<72x64xf32> to vector<72x64xbf16>
    %c2_11 = arith.constant 2 : index
    %c0_12 = arith.constant 0 : index
    %c0_13 = arith.constant 0 : index
    %15 = vector.load %arg1[%c2_11, %c0_12, %c0_13] : memref<9x64x16xbf16, #tpu.memory_space<vmem>>, vector<1x64x16xbf16>
    %16 = vector.shape_cast %15 : vector<1x64x16xbf16> to vector<64x16xbf16>
    %cst_14 = arith.constant dense<0.000000e+00> : vector<72x16xf32>
    %17 = tpu.matmul %14, %16, %cst_14 {dimension_numbers = #tpu.dot_dimension_numbers<[1], [0], [0], [1], [0, 0, 1, 1], [], []>} : vector<72x64xbf16>, vector<64x16xbf16>, vector<72x16xf32> -> vector<72x16xf32>
    %18 = arith.addf %12, %17 : vector<72x16xf32>
    %c6 = arith.constant 6 : index
    %c0_15 = arith.constant 0 : index
    %19 = vector.load %arg0[%c6, %c0_15] : memref<86x64xf32, #tpu.memory_space<vmem>>, vector<72x64xf32>
    %20 = arith.truncf %19 : vector<72x64xf32> to vector<72x64xbf16>
    %c3 = arith.constant 3 : index
    %c0_16 = arith.constant 0 : index
    %c0_17 = arith.constant 0 : index
    %21 = vector.load %arg1[%c3, %c0_16, %c0_17] : memref<9x64x16xbf16, #tpu.memory_space<vmem>>, vector<1x64x16xbf16>
    %22 = vector.shape_cast %21 : vector<1x64x16xbf16> to vector<64x16xbf16>
    %cst_18 = arith.constant dense<0.000000e+00> : vector<72x16xf32>
    %23 = tpu.matmul %20, %22, %cst_18 {dimension_numbers = #tpu.dot_dimension_numbers<[1], [0], [0], [1], [0, 0, 1, 1], [], []>} : vector<72x64xbf16>, vector<64x16xbf16>, vector<72x16xf32> -> vector<72x16xf32>
    %24 = arith.addf %18, %23 : vector<72x16xf32>
    %c7 = arith.constant 7 : index
    %c0_19 = arith.constant 0 : index
    %25 = vector.load %arg0[%c7, %c0_19] : memref<86x64xf32, #tpu.memory_space<vmem>>, vector<72x64xf32>
    %26 = arith.truncf %25 : vector<72x64xf32> to vector<72x64xbf16>
    %c4 = arith.constant 4 : index
    %c0_20 = arith.constant 0 : index
    %c0_21 = arith.constant 0 : index
    %27 = vector.load %arg1[%c4, %c0_20, %c0_21] : memref<9x64x16xbf16, #tpu.memory_space<vmem>>, vector<1x64x16xbf16>
    %28 = vector.shape_cast %27 : vector<1x64x16xbf16> to vector<64x16xbf16>
    %cst_22 = arith.constant dense<0.000000e+00> : vector<72x16xf32>
    %29 = tpu.matmul %26, %28, %cst_22 {dimension_numbers = #tpu.dot_dimension_numbers<[1], [0], [0], [1], [0, 0, 1, 1], [], []>} : vector<72x64xbf16>, vector<64x16xbf16>, vector<72x16xf32> -> vector<72x16xf32>
    %30 = arith.addf %24, %29 : vector<72x16xf32>
    %c8 = arith.constant 8 : index
    %c0_23 = arith.constant 0 : index
    %31 = vector.load %arg0[%c8, %c0_23] : memref<86x64xf32, #tpu.memory_space<vmem>>, vector<72x64xf32>
    %32 = arith.truncf %31 : vector<72x64xf32> to vector<72x64xbf16>
    %c5 = arith.constant 5 : index
    %c0_24 = arith.constant 0 : index
    %c0_25 = arith.constant 0 : index
    %33 = vector.load %arg1[%c5, %c0_24, %c0_25] : memref<9x64x16xbf16, #tpu.memory_space<vmem>>, vector<1x64x16xbf16>
    %34 = vector.shape_cast %33 : vector<1x64x16xbf16> to vector<64x16xbf16>
    %cst_26 = arith.constant dense<0.000000e+00> : vector<72x16xf32>
    %35 = tpu.matmul %32, %34, %cst_26 {dimension_numbers = #tpu.dot_dimension_numbers<[1], [0], [0], [1], [0, 0, 1, 1], [], []>} : vector<72x64xbf16>, vector<64x16xbf16>, vector<72x16xf32> -> vector<72x16xf32>
    %36 = arith.addf %30, %35 : vector<72x16xf32>
    %c12 = arith.constant 12 : index
    %c0_27 = arith.constant 0 : index
    %37 = vector.load %arg0[%c12, %c0_27] : memref<86x64xf32, #tpu.memory_space<vmem>>, vector<72x64xf32>
    %38 = arith.truncf %37 : vector<72x64xf32> to vector<72x64xbf16>
    %c6_28 = arith.constant 6 : index
    %c0_29 = arith.constant 0 : index
    %c0_30 = arith.constant 0 : index
    %39 = vector.load %arg1[%c6_28, %c0_29, %c0_30] : memref<9x64x16xbf16, #tpu.memory_space<vmem>>, vector<1x64x16xbf16>
    %40 = vector.shape_cast %39 : vector<1x64x16xbf16> to vector<64x16xbf16>
    %cst_31 = arith.constant dense<0.000000e+00> : vector<72x16xf32>
    %41 = tpu.matmul %38, %40, %cst_31 {dimension_numbers = #tpu.dot_dimension_numbers<[1], [0], [0], [1], [0, 0, 1, 1], [], []>} : vector<72x64xbf16>, vector<64x16xbf16>, vector<72x16xf32> -> vector<72x16xf32>
    %42 = arith.addf %36, %41 : vector<72x16xf32>
    %c13 = arith.constant 13 : index
    %c0_32 = arith.constant 0 : index
    %43 = vector.load %arg0[%c13, %c0_32] : memref<86x64xf32, #tpu.memory_space<vmem>>, vector<72x64xf32>
    %44 = arith.truncf %43 : vector<72x64xf32> to vector<72x64xbf16>
    %c7_33 = arith.constant 7 : index
    %c0_34 = arith.constant 0 : index
    %c0_35 = arith.constant 0 : index
    %45 = vector.load %arg1[%c7_33, %c0_34, %c0_35] : memref<9x64x16xbf16, #tpu.memory_space<vmem>>, vector<1x64x16xbf16>
    %46 = vector.shape_cast %45 : vector<1x64x16xbf16> to vector<64x16xbf16>
    %cst_36 = arith.constant dense<0.000000e+00> : vector<72x16xf32>
    %47 = tpu.matmul %44, %46, %cst_36 {dimension_numbers = #tpu.dot_dimension_numbers<[1], [0], [0], [1], [0, 0, 1, 1], [], []>} : vector<72x64xbf16>, vector<64x16xbf16>, vector<72x16xf32> -> vector<72x16xf32>
    %48 = arith.addf %42, %47 : vector<72x16xf32>
    %c14 = arith.constant 14 : index
    %c0_37 = arith.constant 0 : index
    %49 = vector.load %arg0[%c14, %c0_37] : memref<86x64xf32, #tpu.memory_space<vmem>>, vector<72x64xf32>
    %50 = arith.truncf %49 : vector<72x64xf32> to vector<72x64xbf16>
    %c8_38 = arith.constant 8 : index
    %c0_39 = arith.constant 0 : index
    %c0_40 = arith.constant 0 : index
    %51 = vector.load %arg1[%c8_38, %c0_39, %c0_40] : memref<9x64x16xbf16, #tpu.memory_space<vmem>>, vector<1x64x16xbf16>
    %52 = vector.shape_cast %51 : vector<1x64x16xbf16> to vector<64x16xbf16>
    %cst_41 = arith.constant dense<0.000000e+00> : vector<72x16xf32>
    %53 = tpu.matmul %50, %52, %cst_41 {dimension_numbers = #tpu.dot_dimension_numbers<[1], [0], [0], [1], [0, 0, 1, 1], [], []>} : vector<72x64xbf16>, vector<64x16xbf16>, vector<72x16xf32> -> vector<72x16xf32>
    %54 = arith.addf %48, %53 : vector<72x16xf32>
    %55 = arith.truncf %54 : vector<72x16xf32> to vector<72x16xbf16>
    %c0_42 = arith.constant 0 : index
    %c0_43 = arith.constant 0 : index
    %56 = vector.load %arg2[%c0_42, %c0_43] : memref<72x16xbf16, #tpu.memory_space<vmem>>, vector<72x16xbf16>
    tpu.vector_store %arg2[%c0_42, %c0_43], %55 {strides = array<i32>} : memref<72x16xbf16, #tpu.memory_space<vmem>>, vector<72x16xbf16>,
    return
  }
}

module attributes {stable_mosaic.version = 11 : i64} {
  func.func @_dense_stage1_kernel(%arg0: memref<32x48xbf16, #tpu.memory_space<vmem>>, %arg1: memref<1x48xf32, #tpu.memory_space<vmem>>, %arg2: memref<1x48xf32, #tpu.memory_space<vmem>>, %arg3: memref<48x64xbf16, #tpu.memory_space<vmem>>, %arg4: memref<1x64xf32, #tpu.memory_space<vmem>>, %arg5: memref<1x64xf32, #tpu.memory_space<vmem>>, %arg6: memref<32x64xf32, #tpu.memory_space<vmem>>) attributes {dimension_semantics = [], scalar_prefetch = 0 : i64, scratch_operands = 0 : i64, tpu.core_type = #tpu.core_type<tc>} {
    %c0 = arith.constant 0 : index
    %c0_0 = arith.constant 0 : index
    %0 = vector.load %arg0[%c0, %c0_0] : memref<32x48xbf16, #tpu.memory_space<vmem>>, vector<32x48xbf16>
    %1 = arith.extf %0 : vector<32x48xbf16> to vector<32x48xf32>
    %cst = arith.constant dense<0.000000e+00> : vector<48xf32>
    %2 = vector.multi_reduction <add>, %1, %cst [0] : vector<32x48xf32> to vector<48xf32>
    %3 = vector.shape_cast %2 : vector<48xf32> to vector<1x48xf32>
    %cst_1 = arith.constant 3.200000e+01 : f32
    %4 = vector.broadcast %cst_1 : f32 to vector<1x48xf32>
    %5 = arith.divf %3, %4 : vector<1x48xf32>
    %6 = vector.broadcast %5 : vector<1x48xf32> to vector<32x48xf32>
    %7 = arith.subf %1, %6 : vector<32x48xf32>
    %8 = arith.mulf %7, %7 : vector<32x48xf32>
    %cst_2 = arith.constant dense<0.000000e+00> : vector<48xf32>
    %9 = vector.multi_reduction <add>, %8, %cst_2 [0] : vector<32x48xf32> to vector<48xf32>
    %10 = vector.shape_cast %9 : vector<48xf32> to vector<1x48xf32>
    %cst_3 = arith.constant 3.200000e+01 : f32
    %11 = vector.broadcast %cst_3 : f32 to vector<1x48xf32>
    %12 = arith.divf %10, %11 : vector<1x48xf32>
    %c0_4 = arith.constant 0 : index
    %c0_5 = arith.constant 0 : index
    %13 = vector.load %arg1[%c0_4, %c0_5] : memref<1x48xf32, #tpu.memory_space<vmem>>, vector<1x48xf32>
    %cst_6 = arith.constant 9.99999974E-6 : f32
    %14 = vector.broadcast %cst_6 : f32 to vector<1x48xf32>
    %15 = arith.addf %12, %14 : vector<1x48xf32>
    %16 = math.rsqrt %15 : vector<1x48xf32>
    %17 = arith.mulf %13, %16 : vector<1x48xf32>
    %18 = vector.broadcast %17 : vector<1x48xf32> to vector<32x48xf32>
    %19 = arith.mulf %1, %18 : vector<32x48xf32>
    %c0_7 = arith.constant 0 : index
    %c0_8 = arith.constant 0 : index
    %20 = vector.load %arg2[%c0_7, %c0_8] : memref<1x48xf32, #tpu.memory_space<vmem>>, vector<1x48xf32>
    %21 = arith.mulf %5, %17 : vector<1x48xf32>
    %22 = arith.subf %20, %21 : vector<1x48xf32>
    %23 = vector.broadcast %22 : vector<1x48xf32> to vector<32x48xf32>
    %24 = arith.addf %19, %23 : vector<32x48xf32>
    %cst_9 = arith.constant 0.000000e+00 : f32
    %25 = vector.broadcast %cst_9 : f32 to vector<32x48xf32>
    %26 = arith.maximumf %24, %25 : vector<32x48xf32>
    %27 = arith.truncf %26 : vector<32x48xf32> to vector<32x48xbf16>
    %c0_10 = arith.constant 0 : index
    %c0_11 = arith.constant 0 : index
    %28 = vector.load %arg3[%c0_10, %c0_11] : memref<48x64xbf16, #tpu.memory_space<vmem>>, vector<48x64xbf16>
    %cst_12 = arith.constant dense<0.000000e+00> : vector<32x64xf32>
    %29 = tpu.matmul %27, %28, %cst_12 {dimension_numbers = #tpu.dot_dimension_numbers<[1], [0], [0], [1], [0, 0, 1, 1], [], []>} : vector<32x48xbf16>, vector<48x64xbf16>, vector<32x64xf32> -> vector<32x64xf32>
    %cst_13 = arith.constant dense<0.000000e+00> : vector<64xf32>
    %30 = vector.multi_reduction <add>, %29, %cst_13 [0] : vector<32x64xf32> to vector<64xf32>
    %31 = vector.shape_cast %30 : vector<64xf32> to vector<1x64xf32>
    %cst_14 = arith.constant 3.200000e+01 : f32
    %32 = vector.broadcast %cst_14 : f32 to vector<1x64xf32>
    %33 = arith.divf %31, %32 : vector<1x64xf32>
    %34 = vector.broadcast %33 : vector<1x64xf32> to vector<32x64xf32>
    %35 = arith.subf %29, %34 : vector<32x64xf32>
    %36 = arith.mulf %35, %35 : vector<32x64xf32>
    %cst_15 = arith.constant dense<0.000000e+00> : vector<64xf32>
    %37 = vector.multi_reduction <add>, %36, %cst_15 [0] : vector<32x64xf32> to vector<64xf32>
    %38 = vector.shape_cast %37 : vector<64xf32> to vector<1x64xf32>
    %cst_16 = arith.constant 3.200000e+01 : f32
    %39 = vector.broadcast %cst_16 : f32 to vector<1x64xf32>
    %40 = arith.divf %38, %39 : vector<1x64xf32>
    %c0_17 = arith.constant 0 : index
    %c0_18 = arith.constant 0 : index
    %41 = vector.load %arg4[%c0_17, %c0_18] : memref<1x64xf32, #tpu.memory_space<vmem>>, vector<1x64xf32>
    %cst_19 = arith.constant 9.99999974E-6 : f32
    %42 = vector.broadcast %cst_19 : f32 to vector<1x64xf32>
    %43 = arith.addf %40, %42 : vector<1x64xf32>
    %44 = math.rsqrt %43 : vector<1x64xf32>
    %45 = arith.mulf %41, %44 : vector<1x64xf32>
    %46 = vector.broadcast %45 : vector<1x64xf32> to vector<32x64xf32>
    %47 = arith.mulf %29, %46 : vector<32x64xf32>
    %c0_20 = arith.constant 0 : index
    %c0_21 = arith.constant 0 : index
    %48 = vector.load %arg5[%c0_20, %c0_21] : memref<1x64xf32, #tpu.memory_space<vmem>>, vector<1x64xf32>
    %49 = arith.mulf %33, %45 : vector<1x64xf32>
    %50 = arith.subf %48, %49 : vector<1x64xf32>
    %51 = vector.broadcast %50 : vector<1x64xf32> to vector<32x64xf32>
    %52 = arith.addf %47, %51 : vector<32x64xf32>
    %cst_22 = arith.constant 0.000000e+00 : f32
    %53 = vector.broadcast %cst_22 : f32 to vector<32x64xf32>
    %54 = arith.maximumf %52, %53 : vector<32x64xf32>
    %c0_23 = arith.constant 0 : index
    %c0_24 = arith.constant 0 : index
    %55 = vector.load %arg6[%c0_23, %c0_24] : memref<32x64xf32, #tpu.memory_space<vmem>>, vector<32x64xf32>
    tpu.vector_store %arg6[%c0_23, %c0_24], %54 {strides = array<i32>} : memref<32x64xf32, #tpu.memory_space<vmem>>, vector<32x64xf32>,
    return
  }
}

module attributes {stable_mosaic.version = 11 : i64} {
  func.func @_bn_relu_mm_kernel(%arg0: memref<32x64xbf16, #tpu.memory_space<vmem>>, %arg1: memref<1x64xf32, #tpu.memory_space<vmem>>, %arg2: memref<1x64xf32, #tpu.memory_space<vmem>>, %arg3: memref<64x32xbf16, #tpu.memory_space<vmem>>, %arg4: memref<32x32xbf16, #tpu.memory_space<vmem>>) attributes {dimension_semantics = [], scalar_prefetch = 0 : i64, scratch_operands = 0 : i64, tpu.core_type = #tpu.core_type<tc>} {
    %c0 = arith.constant 0 : index
    %c0_0 = arith.constant 0 : index
    %0 = vector.load %arg0[%c0, %c0_0] : memref<32x64xbf16, #tpu.memory_space<vmem>>, vector<32x64xbf16>
    %1 = arith.extf %0 : vector<32x64xbf16> to vector<32x64xf32>
    %cst = arith.constant dense<0.000000e+00> : vector<64xf32>
    %2 = vector.multi_reduction <add>, %1, %cst [0] : vector<32x64xf32> to vector<64xf32>
    %3 = vector.shape_cast %2 : vector<64xf32> to vector<1x64xf32>
    %cst_1 = arith.constant 3.200000e+01 : f32
    %4 = vector.broadcast %cst_1 : f32 to vector<1x64xf32>
    %5 = arith.divf %3, %4 : vector<1x64xf32>
    %6 = vector.broadcast %5 : vector<1x64xf32> to vector<32x64xf32>
    %7 = arith.subf %1, %6 : vector<32x64xf32>
    %8 = arith.mulf %7, %7 : vector<32x64xf32>
    %cst_2 = arith.constant dense<0.000000e+00> : vector<64xf32>
    %9 = vector.multi_reduction <add>, %8, %cst_2 [0] : vector<32x64xf32> to vector<64xf32>
    %10 = vector.shape_cast %9 : vector<64xf32> to vector<1x64xf32>
    %cst_3 = arith.constant 3.200000e+01 : f32
    %11 = vector.broadcast %cst_3 : f32 to vector<1x64xf32>
    %12 = arith.divf %10, %11 : vector<1x64xf32>
    %c0_4 = arith.constant 0 : index
    %c0_5 = arith.constant 0 : index
    %13 = vector.load %arg1[%c0_4, %c0_5] : memref<1x64xf32, #tpu.memory_space<vmem>>, vector<1x64xf32>
    %cst_6 = arith.constant 9.99999974E-6 : f32
    %14 = vector.broadcast %cst_6 : f32 to vector<1x64xf32>
    %15 = arith.addf %12, %14 : vector<1x64xf32>
    %16 = math.rsqrt %15 : vector<1x64xf32>
    %17 = arith.mulf %13, %16 : vector<1x64xf32>
    %18 = vector.broadcast %17 : vector<1x64xf32> to vector<32x64xf32>
    %19 = arith.mulf %1, %18 : vector<32x64xf32>
    %c0_7 = arith.constant 0 : index
    %c0_8 = arith.constant 0 : index
    %20 = vector.load %arg2[%c0_7, %c0_8] : memref<1x64xf32, #tpu.memory_space<vmem>>, vector<1x64xf32>
    %21 = arith.mulf %5, %17 : vector<1x64xf32>
    %22 = arith.subf %20, %21 : vector<1x64xf32>
    %23 = vector.broadcast %22 : vector<1x64xf32> to vector<32x64xf32>
    %24 = arith.addf %19, %23 : vector<32x64xf32>
    %cst_9 = arith.constant 0.000000e+00 : f32
    %25 = vector.broadcast %cst_9 : f32 to vector<32x64xf32>
    %26 = arith.maximumf %24, %25 : vector<32x64xf32>
    %27 = arith.truncf %26 : vector<32x64xf32> to vector<32x64xbf16>
    %c0_10 = arith.constant 0 : index
    %c0_11 = arith.constant 0 : index
    %28 = vector.load %arg3[%c0_10, %c0_11] : memref<64x32xbf16, #tpu.memory_space<vmem>>, vector<64x32xbf16>
    %cst_12 = arith.constant dense<0.000000e+00> : vector<32x32xf32>
    %29 = tpu.matmul %27, %28, %cst_12 {dimension_numbers = #tpu.dot_dimension_numbers<[1], [0], [0], [1], [0, 0, 1, 1], [], []>} : vector<32x64xbf16>, vector<64x32xbf16>, vector<32x32xf32> -> vector<32x32xf32>
    %30 = arith.truncf %29 : vector<32x32xf32> to vector<32x32xbf16>
    %c0_13 = arith.constant 0 : index
    %c0_14 = arith.constant 0 : index
    %31 = vector.load %arg4[%c0_13, %c0_14] : memref<32x32xbf16, #tpu.memory_space<vmem>>, vector<32x32xbf16>
    tpu.vector_store %arg4[%c0_13, %c0_14], %30 {strides = array<i32>} : memref<32x32xbf16, #tpu.memory_space<vmem>>, vector<32x32xbf16>,
    return
  }
}

module attributes {stable_mosaic.version = 11 : i64} {
  func.func @_dense_stage1_kernel(%arg0: memref<8x32xbf16, #tpu.memory_space<vmem>>, %arg1: memref<1x32xf32, #tpu.memory_space<vmem>>, %arg2: memref<1x32xf32, #tpu.memory_space<vmem>>, %arg3: memref<32x64xbf16, #tpu.memory_space<vmem>>, %arg4: memref<1x64xf32, #tpu.memory_space<vmem>>, %arg5: memref<1x64xf32, #tpu.memory_space<vmem>>, %arg6: memref<8x64xf32, #tpu.memory_space<vmem>>) attributes {dimension_semantics = [], scalar_prefetch = 0 : i64, scratch_operands = 0 : i64, tpu.core_type = #tpu.core_type<tc>} {
    %c0 = arith.constant 0 : index
    %c0_0 = arith.constant 0 : index
    %0 = vector.load %arg0[%c0, %c0_0] : memref<8x32xbf16, #tpu.memory_space<vmem>>, vector<8x32xbf16>
    %1 = arith.extf %0 : vector<8x32xbf16> to vector<8x32xf32>
    %cst = arith.constant dense<0.000000e+00> : vector<32xf32>
    %2 = vector.multi_reduction <add>, %1, %cst [0] : vector<8x32xf32> to vector<32xf32>
    %3 = vector.shape_cast %2 : vector<32xf32> to vector<1x32xf32>
    %cst_1 = arith.constant 8.000000e+00 : f32
    %4 = vector.broadcast %cst_1 : f32 to vector<1x32xf32>
    %5 = arith.divf %3, %4 : vector<1x32xf32>
    %6 = vector.broadcast %5 : vector<1x32xf32> to vector<8x32xf32>
    %7 = arith.subf %1, %6 : vector<8x32xf32>
    %8 = arith.mulf %7, %7 : vector<8x32xf32>
    %cst_2 = arith.constant dense<0.000000e+00> : vector<32xf32>
    %9 = vector.multi_reduction <add>, %8, %cst_2 [0] : vector<8x32xf32> to vector<32xf32>
    %10 = vector.shape_cast %9 : vector<32xf32> to vector<1x32xf32>
    %cst_3 = arith.constant 8.000000e+00 : f32
    %11 = vector.broadcast %cst_3 : f32 to vector<1x32xf32>
    %12 = arith.divf %10, %11 : vector<1x32xf32>
    %c0_4 = arith.constant 0 : index
    %c0_5 = arith.constant 0 : index
    %13 = vector.load %arg1[%c0_4, %c0_5] : memref<1x32xf32, #tpu.memory_space<vmem>>, vector<1x32xf32>
    %cst_6 = arith.constant 9.99999974E-6 : f32
    %14 = vector.broadcast %cst_6 : f32 to vector<1x32xf32>
    %15 = arith.addf %12, %14 : vector<1x32xf32>
    %16 = math.rsqrt %15 : vector<1x32xf32>
    %17 = arith.mulf %13, %16 : vector<1x32xf32>
    %18 = vector.broadcast %17 : vector<1x32xf32> to vector<8x32xf32>
    %19 = arith.mulf %1, %18 : vector<8x32xf32>
    %c0_7 = arith.constant 0 : index
    %c0_8 = arith.constant 0 : index
    %20 = vector.load %arg2[%c0_7, %c0_8] : memref<1x32xf32, #tpu.memory_space<vmem>>, vector<1x32xf32>
    %21 = arith.mulf %5, %17 : vector<1x32xf32>
    %22 = arith.subf %20, %21 : vector<1x32xf32>
    %23 = vector.broadcast %22 : vector<1x32xf32> to vector<8x32xf32>
    %24 = arith.addf %19, %23 : vector<8x32xf32>
    %cst_9 = arith.constant 0.000000e+00 : f32
    %25 = vector.broadcast %cst_9 : f32 to vector<8x32xf32>
    %26 = arith.maximumf %24, %25 : vector<8x32xf32>
    %27 = arith.truncf %26 : vector<8x32xf32> to vector<8x32xbf16>
    %c0_10 = arith.constant 0 : index
    %c0_11 = arith.constant 0 : index
    %28 = vector.load %arg3[%c0_10, %c0_11] : memref<32x64xbf16, #tpu.memory_space<vmem>>, vector<32x64xbf16>
    %cst_12 = arith.constant dense<0.000000e+00> : vector<8x64xf32>
    %29 = tpu.matmul %27, %28, %cst_12 {dimension_numbers = #tpu.dot_dimension_numbers<[1], [0], [0], [1], [0, 0, 1, 1], [], []>} : vector<8x32xbf16>, vector<32x64xbf16>, vector<8x64xf32> -> vector<8x64xf32>
    %cst_13 = arith.constant dense<0.000000e+00> : vector<64xf32>
    %30 = vector.multi_reduction <add>, %29, %cst_13 [0] : vector<8x64xf32> to vector<64xf32>
    %31 = vector.shape_cast %30 : vector<64xf32> to vector<1x64xf32>
    %cst_14 = arith.constant 8.000000e+00 : f32
    %32 = vector.broadcast %cst_14 : f32 to vector<1x64xf32>
    %33 = arith.divf %31, %32 : vector<1x64xf32>
    %34 = vector.broadcast %33 : vector<1x64xf32> to vector<8x64xf32>
    %35 = arith.subf %29, %34 : vector<8x64xf32>
    %36 = arith.mulf %35, %35 : vector<8x64xf32>
    %cst_15 = arith.constant dense<0.000000e+00> : vector<64xf32>
    %37 = vector.multi_reduction <add>, %36, %cst_15 [0] : vector<8x64xf32> to vector<64xf32>
    %38 = vector.shape_cast %37 : vector<64xf32> to vector<1x64xf32>
    %cst_16 = arith.constant 8.000000e+00 : f32
    %39 = vector.broadcast %cst_16 : f32 to vector<1x64xf32>
    %40 = arith.divf %38, %39 : vector<1x64xf32>
    %c0_17 = arith.constant 0 : index
    %c0_18 = arith.constant 0 : index
    %41 = vector.load %arg4[%c0_17, %c0_18] : memref<1x64xf32, #tpu.memory_space<vmem>>, vector<1x64xf32>
    %cst_19 = arith.constant 9.99999974E-6 : f32
    %42 = vector.broadcast %cst_19 : f32 to vector<1x64xf32>
    %43 = arith.addf %40, %42 : vector<1x64xf32>
    %44 = math.rsqrt %43 : vector<1x64xf32>
    %45 = arith.mulf %41, %44 : vector<1x64xf32>
    %46 = vector.broadcast %45 : vector<1x64xf32> to vector<8x64xf32>
    %47 = arith.mulf %29, %46 : vector<8x64xf32>
    %c0_20 = arith.constant 0 : index
    %c0_21 = arith.constant 0 : index
    %48 = vector.load %arg5[%c0_20, %c0_21] : memref<1x64xf32, #tpu.memory_space<vmem>>, vector<1x64xf32>
    %49 = arith.mulf %33, %45 : vector<1x64xf32>
    %50 = arith.subf %48, %49 : vector<1x64xf32>
    %51 = vector.broadcast %50 : vector<1x64xf32> to vector<8x64xf32>
    %52 = arith.addf %47, %51 : vector<8x64xf32>
    %cst_22 = arith.constant 0.000000e+00 : f32
    %53 = vector.broadcast %cst_22 : f32 to vector<8x64xf32>
    %54 = arith.maximumf %52, %53 : vector<8x64xf32>
    %c0_23 = arith.constant 0 : index
    %c0_24 = arith.constant 0 : index
    %55 = vector.load %arg6[%c0_23, %c0_24] : memref<8x64xf32, #tpu.memory_space<vmem>>, vector<8x64xf32>
    tpu.vector_store %arg6[%c0_23, %c0_24], %54 {strides = array<i32>} : memref<8x64xf32, #tpu.memory_space<vmem>>, vector<8x64xf32>,
    return
  }
}

module attributes {stable_mosaic.version = 11 : i64} {
  func.func @_conv3x3_taps_kernel(%arg0: memref<42x64xf32, #tpu.memory_space<vmem>>, %arg1: memref<9x64x16xbf16, #tpu.memory_space<vmem>>, %arg2: memref<32x16xbf16, #tpu.memory_space<vmem>>) attributes {dimension_semantics = [], scalar_prefetch = 0 : i64, scratch_operands = 0 : i64, tpu.core_type = #tpu.core_type<tc>} {
    %cst = arith.constant 0.000000e+00 : f32
    %0 = vector.broadcast %cst : f32 to vector<32x16xf32>
    %c0 = arith.constant 0 : index
    %c0_0 = arith.constant 0 : index
    %1 = vector.load %arg0[%c0, %c0_0] : memref<42x64xf32, #tpu.memory_space<vmem>>, vector<32x64xf32>
    %2 = arith.truncf %1 : vector<32x64xf32> to vector<32x64xbf16>
    %c0_1 = arith.constant 0 : index
    %c0_2 = arith.constant 0 : index
    %c0_3 = arith.constant 0 : index
    %3 = vector.load %arg1[%c0_1, %c0_2, %c0_3] : memref<9x64x16xbf16, #tpu.memory_space<vmem>>, vector<1x64x16xbf16>
    %4 = vector.shape_cast %3 : vector<1x64x16xbf16> to vector<64x16xbf16>
    %cst_4 = arith.constant dense<0.000000e+00> : vector<32x16xf32>
    %5 = tpu.matmul %2, %4, %cst_4 {dimension_numbers = #tpu.dot_dimension_numbers<[1], [0], [0], [1], [0, 0, 1, 1], [], []>} : vector<32x64xbf16>, vector<64x16xbf16>, vector<32x16xf32> -> vector<32x16xf32>
    %6 = arith.addf %0, %5 : vector<32x16xf32>
    %c1 = arith.constant 1 : index
    %c0_5 = arith.constant 0 : index
    %7 = vector.load %arg0[%c1, %c0_5] : memref<42x64xf32, #tpu.memory_space<vmem>>, vector<32x64xf32>
    %8 = arith.truncf %7 : vector<32x64xf32> to vector<32x64xbf16>
    %c1_6 = arith.constant 1 : index
    %c0_7 = arith.constant 0 : index
    %c0_8 = arith.constant 0 : index
    %9 = vector.load %arg1[%c1_6, %c0_7, %c0_8] : memref<9x64x16xbf16, #tpu.memory_space<vmem>>, vector<1x64x16xbf16>
    %10 = vector.shape_cast %9 : vector<1x64x16xbf16> to vector<64x16xbf16>
    %cst_9 = arith.constant dense<0.000000e+00> : vector<32x16xf32>
    %11 = tpu.matmul %8, %10, %cst_9 {dimension_numbers = #tpu.dot_dimension_numbers<[1], [0], [0], [1], [0, 0, 1, 1], [], []>} : vector<32x64xbf16>, vector<64x16xbf16>, vector<32x16xf32> -> vector<32x16xf32>
    %12 = arith.addf %6, %11 : vector<32x16xf32>
    %c2 = arith.constant 2 : index
    %c0_10 = arith.constant 0 : index
    %13 = vector.load %arg0[%c2, %c0_10] : memref<42x64xf32, #tpu.memory_space<vmem>>, vector<32x64xf32>
    %14 = arith.truncf %13 : vector<32x64xf32> to vector<32x64xbf16>
    %c2_11 = arith.constant 2 : index
    %c0_12 = arith.constant 0 : index
    %c0_13 = arith.constant 0 : index
    %15 = vector.load %arg1[%c2_11, %c0_12, %c0_13] : memref<9x64x16xbf16, #tpu.memory_space<vmem>>, vector<1x64x16xbf16>
    %16 = vector.shape_cast %15 : vector<1x64x16xbf16> to vector<64x16xbf16>
    %cst_14 = arith.constant dense<0.000000e+00> : vector<32x16xf32>
    %17 = tpu.matmul %14, %16, %cst_14 {dimension_numbers = #tpu.dot_dimension_numbers<[1], [0], [0], [1], [0, 0, 1, 1], [], []>} : vector<32x64xbf16>, vector<64x16xbf16>, vector<32x16xf32> -> vector<32x16xf32>
    %18 = arith.addf %12, %17 : vector<32x16xf32>
    %c4 = arith.constant 4 : index
    %c0_15 = arith.constant 0 : index
    %19 = vector.load %arg0[%c4, %c0_15] : memref<42x64xf32, #tpu.memory_space<vmem>>, vector<32x64xf32>
    %20 = arith.truncf %19 : vector<32x64xf32> to vector<32x64xbf16>
    %c3 = arith.constant 3 : index
    %c0_16 = arith.constant 0 : index
    %c0_17 = arith.constant 0 : index
    %21 = vector.load %arg1[%c3, %c0_16, %c0_17] : memref<9x64x16xbf16, #tpu.memory_space<vmem>>, vector<1x64x16xbf16>
    %22 = vector.shape_cast %21 : vector<1x64x16xbf16> to vector<64x16xbf16>
    %cst_18 = arith.constant dense<0.000000e+00> : vector<32x16xf32>
    %23 = tpu.matmul %20, %22, %cst_18 {dimension_numbers = #tpu.dot_dimension_numbers<[1], [0], [0], [1], [0, 0, 1, 1], [], []>} : vector<32x64xbf16>, vector<64x16xbf16>, vector<32x16xf32> -> vector<32x16xf32>
    %24 = arith.addf %18, %23 : vector<32x16xf32>
    %c5 = arith.constant 5 : index
    %c0_19 = arith.constant 0 : index
    %25 = vector.load %arg0[%c5, %c0_19] : memref<42x64xf32, #tpu.memory_space<vmem>>, vector<32x64xf32>
    %26 = arith.truncf %25 : vector<32x64xf32> to vector<32x64xbf16>
    %c4_20 = arith.constant 4 : index
    %c0_21 = arith.constant 0 : index
    %c0_22 = arith.constant 0 : index
    %27 = vector.load %arg1[%c4_20, %c0_21, %c0_22] : memref<9x64x16xbf16, #tpu.memory_space<vmem>>, vector<1x64x16xbf16>
    %28 = vector.shape_cast %27 : vector<1x64x16xbf16> to vector<64x16xbf16>
    %cst_23 = arith.constant dense<0.000000e+00> : vector<32x16xf32>
    %29 = tpu.matmul %26, %28, %cst_23 {dimension_numbers = #tpu.dot_dimension_numbers<[1], [0], [0], [1], [0, 0, 1, 1], [], []>} : vector<32x64xbf16>, vector<64x16xbf16>, vector<32x16xf32> -> vector<32x16xf32>
    %30 = arith.addf %24, %29 : vector<32x16xf32>
    %c6 = arith.constant 6 : index
    %c0_24 = arith.constant 0 : index
    %31 = vector.load %arg0[%c6, %c0_24] : memref<42x64xf32, #tpu.memory_space<vmem>>, vector<32x64xf32>
    %32 = arith.truncf %31 : vector<32x64xf32> to vector<32x64xbf16>
    %c5_25 = arith.constant 5 : index
    %c0_26 = arith.constant 0 : index
    %c0_27 = arith.constant 0 : index
    %33 = vector.load %arg1[%c5_25, %c0_26, %c0_27] : memref<9x64x16xbf16, #tpu.memory_space<vmem>>, vector<1x64x16xbf16>
    %34 = vector.shape_cast %33 : vector<1x64x16xbf16> to vector<64x16xbf16>
    %cst_28 = arith.constant dense<0.000000e+00> : vector<32x16xf32>
    %35 = tpu.matmul %32, %34, %cst_28 {dimension_numbers = #tpu.dot_dimension_numbers<[1], [0], [0], [1], [0, 0, 1, 1], [], []>} : vector<32x64xbf16>, vector<64x16xbf16>, vector<32x16xf32> -> vector<32x16xf32>
    %36 = arith.addf %30, %35 : vector<32x16xf32>
    %c8 = arith.constant 8 : index
    %c0_29 = arith.constant 0 : index
    %37 = vector.load %arg0[%c8, %c0_29] : memref<42x64xf32, #tpu.memory_space<vmem>>, vector<32x64xf32>
    %38 = arith.truncf %37 : vector<32x64xf32> to vector<32x64xbf16>
    %c6_30 = arith.constant 6 : index
    %c0_31 = arith.constant 0 : index
    %c0_32 = arith.constant 0 : index
    %39 = vector.load %arg1[%c6_30, %c0_31, %c0_32] : memref<9x64x16xbf16, #tpu.memory_space<vmem>>, vector<1x64x16xbf16>
    %40 = vector.shape_cast %39 : vector<1x64x16xbf16> to vector<64x16xbf16>
    %cst_33 = arith.constant dense<0.000000e+00> : vector<32x16xf32>
    %41 = tpu.matmul %38, %40, %cst_33 {dimension_numbers = #tpu.dot_dimension_numbers<[1], [0], [0], [1], [0, 0, 1, 1], [], []>} : vector<32x64xbf16>, vector<64x16xbf16>, vector<32x16xf32> -> vector<32x16xf32>
    %42 = arith.addf %36, %41 : vector<32x16xf32>
    %c9 = arith.constant 9 : index
    %c0_34 = arith.constant 0 : index
    %43 = vector.load %arg0[%c9, %c0_34] : memref<42x64xf32, #tpu.memory_space<vmem>>, vector<32x64xf32>
    %44 = arith.truncf %43 : vector<32x64xf32> to vector<32x64xbf16>
    %c7 = arith.constant 7 : index
    %c0_35 = arith.constant 0 : index
    %c0_36 = arith.constant 0 : index
    %45 = vector.load %arg1[%c7, %c0_35, %c0_36] : memref<9x64x16xbf16, #tpu.memory_space<vmem>>, vector<1x64x16xbf16>
    %46 = vector.shape_cast %45 : vector<1x64x16xbf16> to vector<64x16xbf16>
    %cst_37 = arith.constant dense<0.000000e+00> : vector<32x16xf32>
    %47 = tpu.matmul %44, %46, %cst_37 {dimension_numbers = #tpu.dot_dimension_numbers<[1], [0], [0], [1], [0, 0, 1, 1], [], []>} : vector<32x64xbf16>, vector<64x16xbf16>, vector<32x16xf32> -> vector<32x16xf32>
    %48 = arith.addf %42, %47 : vector<32x16xf32>
    %c10 = arith.constant 10 : index
    %c0_38 = arith.constant 0 : index
    %49 = vector.load %arg0[%c10, %c0_38] : memref<42x64xf32, #tpu.memory_space<vmem>>, vector<32x64xf32>
    %50 = arith.truncf %49 : vector<32x64xf32> to vector<32x64xbf16>
    %c8_39 = arith.constant 8 : index
    %c0_40 = arith.constant 0 : index
    %c0_41 = arith.constant 0 : index
    %51 = vector.load %arg1[%c8_39, %c0_40, %c0_41] : memref<9x64x16xbf16, #tpu.memory_space<vmem>>, vector<1x64x16xbf16>
    %52 = vector.shape_cast %51 : vector<1x64x16xbf16> to vector<64x16xbf16>
    %cst_42 = arith.constant dense<0.000000e+00> : vector<32x16xf32>
    %53 = tpu.matmul %50, %52, %cst_42 {dimension_numbers = #tpu.dot_dimension_numbers<[1], [0], [0], [1], [0, 0, 1, 1], [], []>} : vector<32x64xbf16>, vector<64x16xbf16>, vector<32x16xf32> -> vector<32x16xf32>
    %54 = arith.addf %48, %53 : vector<32x16xf32>
    %55 = arith.truncf %54 : vector<32x16xf32> to vector<32x16xbf16>
    %c0_43 = arith.constant 0 : index
    %c0_44 = arith.constant 0 : index
    %56 = vector.load %arg2[%c0_43, %c0_44] : memref<32x16xbf16, #tpu.memory_space<vmem>>, vector<32x16xbf16>
    tpu.vector_store %arg2[%c0_43, %c0_44], %55 {strides = array<i32>} : memref<32x16xbf16, #tpu.memory_space<vmem>>, vector<32x16xbf16>,
    return
  }
}

module attributes {stable_mosaic.version = 11 : i64} {
  func.func @_dense_stage1_kernel(%arg0: memref<8x48xbf16, #tpu.memory_space<vmem>>, %arg1: memref<1x48xf32, #tpu.memory_space<vmem>>, %arg2: memref<1x48xf32, #tpu.memory_space<vmem>>, %arg3: memref<48x64xbf16, #tpu.memory_space<vmem>>, %arg4: memref<1x64xf32, #tpu.memory_space<vmem>>, %arg5: memref<1x64xf32, #tpu.memory_space<vmem>>, %arg6: memref<8x64xf32, #tpu.memory_space<vmem>>) attributes {dimension_semantics = [], scalar_prefetch = 0 : i64, scratch_operands = 0 : i64, tpu.core_type = #tpu.core_type<tc>} {
    %c0 = arith.constant 0 : index
    %c0_0 = arith.constant 0 : index
    %0 = vector.load %arg0[%c0, %c0_0] : memref<8x48xbf16, #tpu.memory_space<vmem>>, vector<8x48xbf16>
    %1 = arith.extf %0 : vector<8x48xbf16> to vector<8x48xf32>
    %cst = arith.constant dense<0.000000e+00> : vector<48xf32>
    %2 = vector.multi_reduction <add>, %1, %cst [0] : vector<8x48xf32> to vector<48xf32>
    %3 = vector.shape_cast %2 : vector<48xf32> to vector<1x48xf32>
    %cst_1 = arith.constant 8.000000e+00 : f32
    %4 = vector.broadcast %cst_1 : f32 to vector<1x48xf32>
    %5 = arith.divf %3, %4 : vector<1x48xf32>
    %6 = vector.broadcast %5 : vector<1x48xf32> to vector<8x48xf32>
    %7 = arith.subf %1, %6 : vector<8x48xf32>
    %8 = arith.mulf %7, %7 : vector<8x48xf32>
    %cst_2 = arith.constant dense<0.000000e+00> : vector<48xf32>
    %9 = vector.multi_reduction <add>, %8, %cst_2 [0] : vector<8x48xf32> to vector<48xf32>
    %10 = vector.shape_cast %9 : vector<48xf32> to vector<1x48xf32>
    %cst_3 = arith.constant 8.000000e+00 : f32
    %11 = vector.broadcast %cst_3 : f32 to vector<1x48xf32>
    %12 = arith.divf %10, %11 : vector<1x48xf32>
    %c0_4 = arith.constant 0 : index
    %c0_5 = arith.constant 0 : index
    %13 = vector.load %arg1[%c0_4, %c0_5] : memref<1x48xf32, #tpu.memory_space<vmem>>, vector<1x48xf32>
    %cst_6 = arith.constant 9.99999974E-6 : f32
    %14 = vector.broadcast %cst_6 : f32 to vector<1x48xf32>
    %15 = arith.addf %12, %14 : vector<1x48xf32>
    %16 = math.rsqrt %15 : vector<1x48xf32>
    %17 = arith.mulf %13, %16 : vector<1x48xf32>
    %18 = vector.broadcast %17 : vector<1x48xf32> to vector<8x48xf32>
    %19 = arith.mulf %1, %18 : vector<8x48xf32>
    %c0_7 = arith.constant 0 : index
    %c0_8 = arith.constant 0 : index
    %20 = vector.load %arg2[%c0_7, %c0_8] : memref<1x48xf32, #tpu.memory_space<vmem>>, vector<1x48xf32>
    %21 = arith.mulf %5, %17 : vector<1x48xf32>
    %22 = arith.subf %20, %21 : vector<1x48xf32>
    %23 = vector.broadcast %22 : vector<1x48xf32> to vector<8x48xf32>
    %24 = arith.addf %19, %23 : vector<8x48xf32>
    %cst_9 = arith.constant 0.000000e+00 : f32
    %25 = vector.broadcast %cst_9 : f32 to vector<8x48xf32>
    %26 = arith.maximumf %24, %25 : vector<8x48xf32>
    %27 = arith.truncf %26 : vector<8x48xf32> to vector<8x48xbf16>
    %c0_10 = arith.constant 0 : index
    %c0_11 = arith.constant 0 : index
    %28 = vector.load %arg3[%c0_10, %c0_11] : memref<48x64xbf16, #tpu.memory_space<vmem>>, vector<48x64xbf16>
    %cst_12 = arith.constant dense<0.000000e+00> : vector<8x64xf32>
    %29 = tpu.matmul %27, %28, %cst_12 {dimension_numbers = #tpu.dot_dimension_numbers<[1], [0], [0], [1], [0, 0, 1, 1], [], []>} : vector<8x48xbf16>, vector<48x64xbf16>, vector<8x64xf32> -> vector<8x64xf32>
    %cst_13 = arith.constant dense<0.000000e+00> : vector<64xf32>
    %30 = vector.multi_reduction <add>, %29, %cst_13 [0] : vector<8x64xf32> to vector<64xf32>
    %31 = vector.shape_cast %30 : vector<64xf32> to vector<1x64xf32>
    %cst_14 = arith.constant 8.000000e+00 : f32
    %32 = vector.broadcast %cst_14 : f32 to vector<1x64xf32>
    %33 = arith.divf %31, %32 : vector<1x64xf32>
    %34 = vector.broadcast %33 : vector<1x64xf32> to vector<8x64xf32>
    %35 = arith.subf %29, %34 : vector<8x64xf32>
    %36 = arith.mulf %35, %35 : vector<8x64xf32>
    %cst_15 = arith.constant dense<0.000000e+00> : vector<64xf32>
    %37 = vector.multi_reduction <add>, %36, %cst_15 [0] : vector<8x64xf32> to vector<64xf32>
    %38 = vector.shape_cast %37 : vector<64xf32> to vector<1x64xf32>
    %cst_16 = arith.constant 8.000000e+00 : f32
    %39 = vector.broadcast %cst_16 : f32 to vector<1x64xf32>
    %40 = arith.divf %38, %39 : vector<1x64xf32>
    %c0_17 = arith.constant 0 : index
    %c0_18 = arith.constant 0 : index
    %41 = vector.load %arg4[%c0_17, %c0_18] : memref<1x64xf32, #tpu.memory_space<vmem>>, vector<1x64xf32>
    %cst_19 = arith.constant 9.99999974E-6 : f32
    %42 = vector.broadcast %cst_19 : f32 to vector<1x64xf32>
    %43 = arith.addf %40, %42 : vector<1x64xf32>
    %44 = math.rsqrt %43 : vector<1x64xf32>
    %45 = arith.mulf %41, %44 : vector<1x64xf32>
    %46 = vector.broadcast %45 : vector<1x64xf32> to vector<8x64xf32>
    %47 = arith.mulf %29, %46 : vector<8x64xf32>
    %c0_20 = arith.constant 0 : index
    %c0_21 = arith.constant 0 : index
    %48 = vector.load %arg5[%c0_20, %c0_21] : memref<1x64xf32, #tpu.memory_space<vmem>>, vector<1x64xf32>
    %49 = arith.mulf %33, %45 : vector<1x64xf32>
    %50 = arith.subf %48, %49 : vector<1x64xf32>
    %51 = vector.broadcast %50 : vector<1x64xf32> to vector<8x64xf32>
    %52 = arith.addf %47, %51 : vector<8x64xf32>
    %cst_22 = arith.constant 0.000000e+00 : f32
    %53 = vector.broadcast %cst_22 : f32 to vector<8x64xf32>
    %54 = arith.maximumf %52, %53 : vector<8x64xf32>
    %c0_23 = arith.constant 0 : index
    %c0_24 = arith.constant 0 : index
    %55 = vector.load %arg6[%c0_23, %c0_24] : memref<8x64xf32, #tpu.memory_space<vmem>>, vector<8x64xf32>
    tpu.vector_store %arg6[%c0_23, %c0_24], %54 {strides = array<i32>} : memref<8x64xf32, #tpu.memory_space<vmem>>, vector<8x64xf32>,
    return
  }
}

module attributes {stable_mosaic.version = 11 : i64} {
  func.func @_bn_relu_mm_kernel(%arg0: memref<8x64xbf16, #tpu.memory_space<vmem>>, %arg1: memref<1x64xf32, #tpu.memory_space<vmem>>, %arg2: memref<1x64xf32, #tpu.memory_space<vmem>>, %arg3: memref<64x32xbf16, #tpu.memory_space<vmem>>, %arg4: memref<8x32xbf16, #tpu.memory_space<vmem>>) attributes {dimension_semantics = [], scalar_prefetch = 0 : i64, scratch_operands = 0 : i64, tpu.core_type = #tpu.core_type<tc>} {
    %c0 = arith.constant 0 : index
    %c0_0 = arith.constant 0 : index
    %0 = vector.load %arg0[%c0, %c0_0] : memref<8x64xbf16, #tpu.memory_space<vmem>>, vector<8x64xbf16>
    %1 = arith.extf %0 : vector<8x64xbf16> to vector<8x64xf32>
    %cst = arith.constant dense<0.000000e+00> : vector<64xf32>
    %2 = vector.multi_reduction <add>, %1, %cst [0] : vector<8x64xf32> to vector<64xf32>
    %3 = vector.shape_cast %2 : vector<64xf32> to vector<1x64xf32>
    %cst_1 = arith.constant 8.000000e+00 : f32
    %4 = vector.broadcast %cst_1 : f32 to vector<1x64xf32>
    %5 = arith.divf %3, %4 : vector<1x64xf32>
    %6 = vector.broadcast %5 : vector<1x64xf32> to vector<8x64xf32>
    %7 = arith.subf %1, %6 : vector<8x64xf32>
    %8 = arith.mulf %7, %7 : vector<8x64xf32>
    %cst_2 = arith.constant dense<0.000000e+00> : vector<64xf32>
    %9 = vector.multi_reduction <add>, %8, %cst_2 [0] : vector<8x64xf32> to vector<64xf32>
    %10 = vector.shape_cast %9 : vector<64xf32> to vector<1x64xf32>
    %cst_3 = arith.constant 8.000000e+00 : f32
    %11 = vector.broadcast %cst_3 : f32 to vector<1x64xf32>
    %12 = arith.divf %10, %11 : vector<1x64xf32>
    %c0_4 = arith.constant 0 : index
    %c0_5 = arith.constant 0 : index
    %13 = vector.load %arg1[%c0_4, %c0_5] : memref<1x64xf32, #tpu.memory_space<vmem>>, vector<1x64xf32>
    %cst_6 = arith.constant 9.99999974E-6 : f32
    %14 = vector.broadcast %cst_6 : f32 to vector<1x64xf32>
    %15 = arith.addf %12, %14 : vector<1x64xf32>
    %16 = math.rsqrt %15 : vector<1x64xf32>
    %17 = arith.mulf %13, %16 : vector<1x64xf32>
    %18 = vector.broadcast %17 : vector<1x64xf32> to vector<8x64xf32>
    %19 = arith.mulf %1, %18 : vector<8x64xf32>
    %c0_7 = arith.constant 0 : index
    %c0_8 = arith.constant 0 : index
    %20 = vector.load %arg2[%c0_7, %c0_8] : memref<1x64xf32, #tpu.memory_space<vmem>>, vector<1x64xf32>
    %21 = arith.mulf %5, %17 : vector<1x64xf32>
    %22 = arith.subf %20, %21 : vector<1x64xf32>
    %23 = vector.broadcast %22 : vector<1x64xf32> to vector<8x64xf32>
    %24 = arith.addf %19, %23 : vector<8x64xf32>
    %cst_9 = arith.constant 0.000000e+00 : f32
    %25 = vector.broadcast %cst_9 : f32 to vector<8x64xf32>
    %26 = arith.maximumf %24, %25 : vector<8x64xf32>
    %27 = arith.truncf %26 : vector<8x64xf32> to vector<8x64xbf16>
    %c0_10 = arith.constant 0 : index
    %c0_11 = arith.constant 0 : index
    %28 = vector.load %arg3[%c0_10, %c0_11] : memref<64x32xbf16, #tpu.memory_space<vmem>>, vector<64x32xbf16>
    %cst_12 = arith.constant dense<0.000000e+00> : vector<8x32xf32>
    %29 = tpu.matmul %27, %28, %cst_12 {dimension_numbers = #tpu.dot_dimension_numbers<[1], [0], [0], [1], [0, 0, 1, 1], [], []>} : vector<8x64xbf16>, vector<64x32xbf16>, vector<8x32xf32> -> vector<8x32xf32>
    %30 = arith.truncf %29 : vector<8x32xf32> to vector<8x32xbf16>
    %c0_13 = arith.constant 0 : index
    %c0_14 = arith.constant 0 : index
    %31 = vector.load %arg4[%c0_13, %c0_14] : memref<8x32xbf16, #tpu.memory_space<vmem>>, vector<8x32xbf16>
    tpu.vector_store %arg4[%c0_13, %c0_14], %30 {strides = array<i32>} : memref<8x32xbf16, #tpu.memory_space<vmem>>, vector<8x32xbf16>,
    return
  }
}

module attributes {stable_mosaic.version = 11 : i64} {
  func.func @_dense_stage1_kernel(%arg0: memref<2x32xbf16, #tpu.memory_space<vmem>>, %arg1: memref<1x32xf32, #tpu.memory_space<vmem>>, %arg2: memref<1x32xf32, #tpu.memory_space<vmem>>, %arg3: memref<32x64xbf16, #tpu.memory_space<vmem>>, %arg4: memref<1x64xf32, #tpu.memory_space<vmem>>, %arg5: memref<1x64xf32, #tpu.memory_space<vmem>>, %arg6: memref<2x64xf32, #tpu.memory_space<vmem>>) attributes {dimension_semantics = [], scalar_prefetch = 0 : i64, scratch_operands = 0 : i64, tpu.core_type = #tpu.core_type<tc>} {
    %c0 = arith.constant 0 : index
    %c0_0 = arith.constant 0 : index
    %0 = vector.load %arg0[%c0, %c0_0] : memref<2x32xbf16, #tpu.memory_space<vmem>>, vector<2x32xbf16>
    %1 = arith.extf %0 : vector<2x32xbf16> to vector<2x32xf32>
    %cst = arith.constant dense<0.000000e+00> : vector<32xf32>
    %2 = vector.multi_reduction <add>, %1, %cst [0] : vector<2x32xf32> to vector<32xf32>
    %3 = vector.shape_cast %2 : vector<32xf32> to vector<1x32xf32>
    %cst_1 = arith.constant 2.000000e+00 : f32
    %4 = vector.broadcast %cst_1 : f32 to vector<1x32xf32>
    %5 = arith.divf %3, %4 : vector<1x32xf32>
    %6 = vector.broadcast %5 : vector<1x32xf32> to vector<2x32xf32>
    %7 = arith.subf %1, %6 : vector<2x32xf32>
    %8 = arith.mulf %7, %7 : vector<2x32xf32>
    %cst_2 = arith.constant dense<0.000000e+00> : vector<32xf32>
    %9 = vector.multi_reduction <add>, %8, %cst_2 [0] : vector<2x32xf32> to vector<32xf32>
    %10 = vector.shape_cast %9 : vector<32xf32> to vector<1x32xf32>
    %cst_3 = arith.constant 2.000000e+00 : f32
    %11 = vector.broadcast %cst_3 : f32 to vector<1x32xf32>
    %12 = arith.divf %10, %11 : vector<1x32xf32>
    %c0_4 = arith.constant 0 : index
    %c0_5 = arith.constant 0 : index
    %13 = vector.load %arg1[%c0_4, %c0_5] : memref<1x32xf32, #tpu.memory_space<vmem>>, vector<1x32xf32>
    %cst_6 = arith.constant 9.99999974E-6 : f32
    %14 = vector.broadcast %cst_6 : f32 to vector<1x32xf32>
    %15 = arith.addf %12, %14 : vector<1x32xf32>
    %16 = math.rsqrt %15 : vector<1x32xf32>
    %17 = arith.mulf %13, %16 : vector<1x32xf32>
    %18 = vector.broadcast %17 : vector<1x32xf32> to vector<2x32xf32>
    %19 = arith.mulf %1, %18 : vector<2x32xf32>
    %c0_7 = arith.constant 0 : index
    %c0_8 = arith.constant 0 : index
    %20 = vector.load %arg2[%c0_7, %c0_8] : memref<1x32xf32, #tpu.memory_space<vmem>>, vector<1x32xf32>
    %21 = arith.mulf %5, %17 : vector<1x32xf32>
    %22 = arith.subf %20, %21 : vector<1x32xf32>
    %23 = vector.broadcast %22 : vector<1x32xf32> to vector<2x32xf32>
    %24 = arith.addf %19, %23 : vector<2x32xf32>
    %cst_9 = arith.constant 0.000000e+00 : f32
    %25 = vector.broadcast %cst_9 : f32 to vector<2x32xf32>
    %26 = arith.maximumf %24, %25 : vector<2x32xf32>
    %27 = arith.truncf %26 : vector<2x32xf32> to vector<2x32xbf16>
    %c0_10 = arith.constant 0 : index
    %c0_11 = arith.constant 0 : index
    %28 = vector.load %arg3[%c0_10, %c0_11] : memref<32x64xbf16, #tpu.memory_space<vmem>>, vector<32x64xbf16>
    %cst_12 = arith.constant dense<0.000000e+00> : vector<2x64xf32>
    %29 = tpu.matmul %27, %28, %cst_12 {dimension_numbers = #tpu.dot_dimension_numbers<[1], [0], [0], [1], [0, 0, 1, 1], [], []>} : vector<2x32xbf16>, vector<32x64xbf16>, vector<2x64xf32> -> vector<2x64xf32>
    %cst_13 = arith.constant dense<0.000000e+00> : vector<64xf32>
    %30 = vector.multi_reduction <add>, %29, %cst_13 [0] : vector<2x64xf32> to vector<64xf32>
    %31 = vector.shape_cast %30 : vector<64xf32> to vector<1x64xf32>
    %cst_14 = arith.constant 2.000000e+00 : f32
    %32 = vector.broadcast %cst_14 : f32 to vector<1x64xf32>
    %33 = arith.divf %31, %32 : vector<1x64xf32>
    %34 = vector.broadcast %33 : vector<1x64xf32> to vector<2x64xf32>
    %35 = arith.subf %29, %34 : vector<2x64xf32>
    %36 = arith.mulf %35, %35 : vector<2x64xf32>
    %cst_15 = arith.constant dense<0.000000e+00> : vector<64xf32>
    %37 = vector.multi_reduction <add>, %36, %cst_15 [0] : vector<2x64xf32> to vector<64xf32>
    %38 = vector.shape_cast %37 : vector<64xf32> to vector<1x64xf32>
    %cst_16 = arith.constant 2.000000e+00 : f32
    %39 = vector.broadcast %cst_16 : f32 to vector<1x64xf32>
    %40 = arith.divf %38, %39 : vector<1x64xf32>
    %c0_17 = arith.constant 0 : index
    %c0_18 = arith.constant 0 : index
    %41 = vector.load %arg4[%c0_17, %c0_18] : memref<1x64xf32, #tpu.memory_space<vmem>>, vector<1x64xf32>
    %cst_19 = arith.constant 9.99999974E-6 : f32
    %42 = vector.broadcast %cst_19 : f32 to vector<1x64xf32>
    %43 = arith.addf %40, %42 : vector<1x64xf32>
    %44 = math.rsqrt %43 : vector<1x64xf32>
    %45 = arith.mulf %41, %44 : vector<1x64xf32>
    %46 = vector.broadcast %45 : vector<1x64xf32> to vector<2x64xf32>
    %47 = arith.mulf %29, %46 : vector<2x64xf32>
    %c0_20 = arith.constant 0 : index
    %c0_21 = arith.constant 0 : index
    %48 = vector.load %arg5[%c0_20, %c0_21] : memref<1x64xf32, #tpu.memory_space<vmem>>, vector<1x64xf32>
    %49 = arith.mulf %33, %45 : vector<1x64xf32>
    %50 = arith.subf %48, %49 : vector<1x64xf32>
    %51 = vector.broadcast %50 : vector<1x64xf32> to vector<2x64xf32>
    %52 = arith.addf %47, %51 : vector<2x64xf32>
    %cst_22 = arith.constant 0.000000e+00 : f32
    %53 = vector.broadcast %cst_22 : f32 to vector<2x64xf32>
    %54 = arith.maximumf %52, %53 : vector<2x64xf32>
    %c0_23 = arith.constant 0 : index
    %c0_24 = arith.constant 0 : index
    %55 = vector.load %arg6[%c0_23, %c0_24] : memref<2x64xf32, #tpu.memory_space<vmem>>, vector<2x64xf32>
    tpu.vector_store %arg6[%c0_23, %c0_24], %54 {strides = array<i32>} : memref<2x64xf32, #tpu.memory_space<vmem>>, vector<2x64xf32>,
    return
  }
}

module attributes {stable_mosaic.version = 11 : i64} {
  func.func @_conv3x3_taps_kernel(%arg0: memref<26x64xf32, #tpu.memory_space<vmem>>, %arg1: memref<9x64x16xbf16, #tpu.memory_space<vmem>>, %arg2: memref<18x16xbf16, #tpu.memory_space<vmem>>) attributes {dimension_semantics = [], scalar_prefetch = 0 : i64, scratch_operands = 0 : i64, tpu.core_type = #tpu.core_type<tc>} {
    %cst = arith.constant 0.000000e+00 : f32
    %0 = vector.broadcast %cst : f32 to vector<18x16xf32>
    %c0 = arith.constant 0 : index
    %c0_0 = arith.constant 0 : index
    %1 = vector.load %arg0[%c0, %c0_0] : memref<26x64xf32, #tpu.memory_space<vmem>>, vector<18x64xf32>
    %2 = arith.truncf %1 : vector<18x64xf32> to vector<18x64xbf16>
    %c0_1 = arith.constant 0 : index
    %c0_2 = arith.constant 0 : index
    %c0_3 = arith.constant 0 : index
    %3 = vector.load %arg1[%c0_1, %c0_2, %c0_3] : memref<9x64x16xbf16, #tpu.memory_space<vmem>>, vector<1x64x16xbf16>
    %4 = vector.shape_cast %3 : vector<1x64x16xbf16> to vector<64x16xbf16>
    %cst_4 = arith.constant dense<0.000000e+00> : vector<18x16xf32>
    %5 = tpu.matmul %2, %4, %cst_4 {dimension_numbers = #tpu.dot_dimension_numbers<[1], [0], [0], [1], [0, 0, 1, 1], [], []>} : vector<18x64xbf16>, vector<64x16xbf16>, vector<18x16xf32> -> vector<18x16xf32>
    %6 = arith.addf %0, %5 : vector<18x16xf32>
    %c1 = arith.constant 1 : index
    %c0_5 = arith.constant 0 : index
    %7 = vector.load %arg0[%c1, %c0_5] : memref<26x64xf32, #tpu.memory_space<vmem>>, vector<18x64xf32>
    %8 = arith.truncf %7 : vector<18x64xf32> to vector<18x64xbf16>
    %c1_6 = arith.constant 1 : index
    %c0_7 = arith.constant 0 : index
    %c0_8 = arith.constant 0 : index
    %9 = vector.load %arg1[%c1_6, %c0_7, %c0_8] : memref<9x64x16xbf16, #tpu.memory_space<vmem>>, vector<1x64x16xbf16>
    %10 = vector.shape_cast %9 : vector<1x64x16xbf16> to vector<64x16xbf16>
    %cst_9 = arith.constant dense<0.000000e+00> : vector<18x16xf32>
    %11 = tpu.matmul %8, %10, %cst_9 {dimension_numbers = #tpu.dot_dimension_numbers<[1], [0], [0], [1], [0, 0, 1, 1], [], []>} : vector<18x64xbf16>, vector<64x16xbf16>, vector<18x16xf32> -> vector<18x16xf32>
    %12 = arith.addf %6, %11 : vector<18x16xf32>
    %c2 = arith.constant 2 : index
    %c0_10 = arith.constant 0 : index
    %13 = vector.load %arg0[%c2, %c0_10] : memref<26x64xf32, #tpu.memory_space<vmem>>, vector<18x64xf32>
    %14 = arith.truncf %13 : vector<18x64xf32> to vector<18x64xbf16>
    %c2_11 = arith.constant 2 : index
    %c0_12 = arith.constant 0 : index
    %c0_13 = arith.constant 0 : index
    %15 = vector.load %arg1[%c2_11, %c0_12, %c0_13] : memref<9x64x16xbf16, #tpu.memory_space<vmem>>, vector<1x64x16xbf16>
    %16 = vector.shape_cast %15 : vector<1x64x16xbf16> to vector<64x16xbf16>
    %cst_14 = arith.constant dense<0.000000e+00> : vector<18x16xf32>
    %17 = tpu.matmul %14, %16, %cst_14 {dimension_numbers = #tpu.dot_dimension_numbers<[1], [0], [0], [1], [0, 0, 1, 1], [], []>} : vector<18x64xbf16>, vector<64x16xbf16>, vector<18x16xf32> -> vector<18x16xf32>
    %18 = arith.addf %12, %17 : vector<18x16xf32>
    %c3 = arith.constant 3 : index
    %c0_15 = arith.constant 0 : index
    %19 = vector.load %arg0[%c3, %c0_15] : memref<26x64xf32, #tpu.memory_space<vmem>>, vector<18x64xf32>
    %20 = arith.truncf %19 : vector<18x64xf32> to vector<18x64xbf16>
    %c3_16 = arith.constant 3 : index
    %c0_17 = arith.constant 0 : index
    %c0_18 = arith.constant 0 : index
    %21 = vector.load %arg1[%c3_16, %c0_17, %c0_18] : memref<9x64x16xbf16, #tpu.memory_space<vmem>>, vector<1x64x16xbf16>
    %22 = vector.shape_cast %21 : vector<1x64x16xbf16> to vector<64x16xbf16>
    %cst_19 = arith.constant dense<0.000000e+00> : vector<18x16xf32>
    %23 = tpu.matmul %20, %22, %cst_19 {dimension_numbers = #tpu.dot_dimension_numbers<[1], [0], [0], [1], [0, 0, 1, 1], [], []>} : vector<18x64xbf16>, vector<64x16xbf16>, vector<18x16xf32> -> vector<18x16xf32>
    %24 = arith.addf %18, %23 : vector<18x16xf32>
    %c4 = arith.constant 4 : index
    %c0_20 = arith.constant 0 : index
    %25 = vector.load %arg0[%c4, %c0_20] : memref<26x64xf32, #tpu.memory_space<vmem>>, vector<18x64xf32>
    %26 = arith.truncf %25 : vector<18x64xf32> to vector<18x64xbf16>
    %c4_21 = arith.constant 4 : index
    %c0_22 = arith.constant 0 : index
    %c0_23 = arith.constant 0 : index
    %27 = vector.load %arg1[%c4_21, %c0_22, %c0_23] : memref<9x64x16xbf16, #tpu.memory_space<vmem>>, vector<1x64x16xbf16>
    %28 = vector.shape_cast %27 : vector<1x64x16xbf16> to vector<64x16xbf16>
    %cst_24 = arith.constant dense<0.000000e+00> : vector<18x16xf32>
    %29 = tpu.matmul %26, %28, %cst_24 {dimension_numbers = #tpu.dot_dimension_numbers<[1], [0], [0], [1], [0, 0, 1, 1], [], []>} : vector<18x64xbf16>, vector<64x16xbf16>, vector<18x16xf32> -> vector<18x16xf32>
    %30 = arith.addf %24, %29 : vector<18x16xf32>
    %c5 = arith.constant 5 : index
    %c0_25 = arith.constant 0 : index
    %31 = vector.load %arg0[%c5, %c0_25] : memref<26x64xf32, #tpu.memory_space<vmem>>, vector<18x64xf32>
    %32 = arith.truncf %31 : vector<18x64xf32> to vector<18x64xbf16>
    %c5_26 = arith.constant 5 : index
    %c0_27 = arith.constant 0 : index
    %c0_28 = arith.constant 0 : index
    %33 = vector.load %arg1[%c5_26, %c0_27, %c0_28] : memref<9x64x16xbf16, #tpu.memory_space<vmem>>, vector<1x64x16xbf16>
    %34 = vector.shape_cast %33 : vector<1x64x16xbf16> to vector<64x16xbf16>
    %cst_29 = arith.constant dense<0.000000e+00> : vector<18x16xf32>
    %35 = tpu.matmul %32, %34, %cst_29 {dimension_numbers = #tpu.dot_dimension_numbers<[1], [0], [0], [1], [0, 0, 1, 1], [], []>} : vector<18x64xbf16>, vector<64x16xbf16>, vector<18x16xf32> -> vector<18x16xf32>
    %36 = arith.addf %30, %35 : vector<18x16xf32>
    %c6 = arith.constant 6 : index
    %c0_30 = arith.constant 0 : index
    %37 = vector.load %arg0[%c6, %c0_30] : memref<26x64xf32, #tpu.memory_space<vmem>>, vector<18x64xf32>
    %38 = arith.truncf %37 : vector<18x64xf32> to vector<18x64xbf16>
    %c6_31 = arith.constant 6 : index
    %c0_32 = arith.constant 0 : index
    %c0_33 = arith.constant 0 : index
    %39 = vector.load %arg1[%c6_31, %c0_32, %c0_33] : memref<9x64x16xbf16, #tpu.memory_space<vmem>>, vector<1x64x16xbf16>
    %40 = vector.shape_cast %39 : vector<1x64x16xbf16> to vector<64x16xbf16>
    %cst_34 = arith.constant dense<0.000000e+00> : vector<18x16xf32>
    %41 = tpu.matmul %38, %40, %cst_34 {dimension_numbers = #tpu.dot_dimension_numbers<[1], [0], [0], [1], [0, 0, 1, 1], [], []>} : vector<18x64xbf16>, vector<64x16xbf16>, vector<18x16xf32> -> vector<18x16xf32>
    %42 = arith.addf %36, %41 : vector<18x16xf32>
    %c7 = arith.constant 7 : index
    %c0_35 = arith.constant 0 : index
    %43 = vector.load %arg0[%c7, %c0_35] : memref<26x64xf32, #tpu.memory_space<vmem>>, vector<18x64xf32>
    %44 = arith.truncf %43 : vector<18x64xf32> to vector<18x64xbf16>
    %c7_36 = arith.constant 7 : index
    %c0_37 = arith.constant 0 : index
    %c0_38 = arith.constant 0 : index
    %45 = vector.load %arg1[%c7_36, %c0_37, %c0_38] : memref<9x64x16xbf16, #tpu.memory_space<vmem>>, vector<1x64x16xbf16>
    %46 = vector.shape_cast %45 : vector<1x64x16xbf16> to vector<64x16xbf16>
    %cst_39 = arith.constant dense<0.000000e+00> : vector<18x16xf32>
    %47 = tpu.matmul %44, %46, %cst_39 {dimension_numbers = #tpu.dot_dimension_numbers<[1], [0], [0], [1], [0, 0, 1, 1], [], []>} : vector<18x64xbf16>, vector<64x16xbf16>, vector<18x16xf32> -> vector<18x16xf32>
    %48 = arith.addf %42, %47 : vector<18x16xf32>
    %c8 = arith.constant 8 : index
    %c0_40 = arith.constant 0 : index
    %49 = vector.load %arg0[%c8, %c0_40] : memref<26x64xf32, #tpu.memory_space<vmem>>, vector<18x64xf32>
    %50 = arith.truncf %49 : vector<18x64xf32> to vector<18x64xbf16>
    %c8_41 = arith.constant 8 : index
    %c0_42 = arith.constant 0 : index
    %c0_43 = arith.constant 0 : index
    %51 = vector.load %arg1[%c8_41, %c0_42, %c0_43] : memref<9x64x16xbf16, #tpu.memory_space<vmem>>, vector<1x64x16xbf16>
    %52 = vector.shape_cast %51 : vector<1x64x16xbf16> to vector<64x16xbf16>
    %cst_44 = arith.constant dense<0.000000e+00> : vector<18x16xf32>
    %53 = tpu.matmul %50, %52, %cst_44 {dimension_numbers = #tpu.dot_dimension_numbers<[1], [0], [0], [1], [0, 0, 1, 1], [], []>} : vector<18x64xbf16>, vector<64x16xbf16>, vector<18x16xf32> -> vector<18x16xf32>
    %54 = arith.addf %48, %53 : vector<18x16xf32>
    %55 = arith.truncf %54 : vector<18x16xf32> to vector<18x16xbf16>
    %c0_45 = arith.constant 0 : index
    %c0_46 = arith.constant 0 : index
    %56 = vector.load %arg2[%c0_45, %c0_46] : memref<18x16xbf16, #tpu.memory_space<vmem>>, vector<18x16xbf16>
    tpu.vector_store %arg2[%c0_45, %c0_46], %55 {strides = array<i32>} : memref<18x16xbf16, #tpu.memory_space<vmem>>, vector<18x16xbf16>,
    return
  }
}

module attributes {stable_mosaic.version = 11 : i64} {
  func.func @_dense_stage1_kernel(%arg0: memref<2x48xbf16, #tpu.memory_space<vmem>>, %arg1: memref<1x48xf32, #tpu.memory_space<vmem>>, %arg2: memref<1x48xf32, #tpu.memory_space<vmem>>, %arg3: memref<48x64xbf16, #tpu.memory_space<vmem>>, %arg4: memref<1x64xf32, #tpu.memory_space<vmem>>, %arg5: memref<1x64xf32, #tpu.memory_space<vmem>>, %arg6: memref<2x64xf32, #tpu.memory_space<vmem>>) attributes {dimension_semantics = [], scalar_prefetch = 0 : i64, scratch_operands = 0 : i64, tpu.core_type = #tpu.core_type<tc>} {
    %c0 = arith.constant 0 : index
    %c0_0 = arith.constant 0 : index
    %0 = vector.load %arg0[%c0, %c0_0] : memref<2x48xbf16, #tpu.memory_space<vmem>>, vector<2x48xbf16>
    %1 = arith.extf %0 : vector<2x48xbf16> to vector<2x48xf32>
    %cst = arith.constant dense<0.000000e+00> : vector<48xf32>
    %2 = vector.multi_reduction <add>, %1, %cst [0] : vector<2x48xf32> to vector<48xf32>
    %3 = vector.shape_cast %2 : vector<48xf32> to vector<1x48xf32>
    %cst_1 = arith.constant 2.000000e+00 : f32
    %4 = vector.broadcast %cst_1 : f32 to vector<1x48xf32>
    %5 = arith.divf %3, %4 : vector<1x48xf32>
    %6 = vector.broadcast %5 : vector<1x48xf32> to vector<2x48xf32>
    %7 = arith.subf %1, %6 : vector<2x48xf32>
    %8 = arith.mulf %7, %7 : vector<2x48xf32>
    %cst_2 = arith.constant dense<0.000000e+00> : vector<48xf32>
    %9 = vector.multi_reduction <add>, %8, %cst_2 [0] : vector<2x48xf32> to vector<48xf32>
    %10 = vector.shape_cast %9 : vector<48xf32> to vector<1x48xf32>
    %cst_3 = arith.constant 2.000000e+00 : f32
    %11 = vector.broadcast %cst_3 : f32 to vector<1x48xf32>
    %12 = arith.divf %10, %11 : vector<1x48xf32>
    %c0_4 = arith.constant 0 : index
    %c0_5 = arith.constant 0 : index
    %13 = vector.load %arg1[%c0_4, %c0_5] : memref<1x48xf32, #tpu.memory_space<vmem>>, vector<1x48xf32>
    %cst_6 = arith.constant 9.99999974E-6 : f32
    %14 = vector.broadcast %cst_6 : f32 to vector<1x48xf32>
    %15 = arith.addf %12, %14 : vector<1x48xf32>
    %16 = math.rsqrt %15 : vector<1x48xf32>
    %17 = arith.mulf %13, %16 : vector<1x48xf32>
    %18 = vector.broadcast %17 : vector<1x48xf32> to vector<2x48xf32>
    %19 = arith.mulf %1, %18 : vector<2x48xf32>
    %c0_7 = arith.constant 0 : index
    %c0_8 = arith.constant 0 : index
    %20 = vector.load %arg2[%c0_7, %c0_8] : memref<1x48xf32, #tpu.memory_space<vmem>>, vector<1x48xf32>
    %21 = arith.mulf %5, %17 : vector<1x48xf32>
    %22 = arith.subf %20, %21 : vector<1x48xf32>
    %23 = vector.broadcast %22 : vector<1x48xf32> to vector<2x48xf32>
    %24 = arith.addf %19, %23 : vector<2x48xf32>
    %cst_9 = arith.constant 0.000000e+00 : f32
    %25 = vector.broadcast %cst_9 : f32 to vector<2x48xf32>
    %26 = arith.maximumf %24, %25 : vector<2x48xf32>
    %27 = arith.truncf %26 : vector<2x48xf32> to vector<2x48xbf16>
    %c0_10 = arith.constant 0 : index
    %c0_11 = arith.constant 0 : index
    %28 = vector.load %arg3[%c0_10, %c0_11] : memref<48x64xbf16, #tpu.memory_space<vmem>>, vector<48x64xbf16>
    %cst_12 = arith.constant dense<0.000000e+00> : vector<2x64xf32>
    %29 = tpu.matmul %27, %28, %cst_12 {dimension_numbers = #tpu.dot_dimension_numbers<[1], [0], [0], [1], [0, 0, 1, 1], [], []>} : vector<2x48xbf16>, vector<48x64xbf16>, vector<2x64xf32> -> vector<2x64xf32>
    %cst_13 = arith.constant dense<0.000000e+00> : vector<64xf32>
    %30 = vector.multi_reduction <add>, %29, %cst_13 [0] : vector<2x64xf32> to vector<64xf32>
    %31 = vector.shape_cast %30 : vector<64xf32> to vector<1x64xf32>
    %cst_14 = arith.constant 2.000000e+00 : f32
    %32 = vector.broadcast %cst_14 : f32 to vector<1x64xf32>
    %33 = arith.divf %31, %32 : vector<1x64xf32>
    %34 = vector.broadcast %33 : vector<1x64xf32> to vector<2x64xf32>
    %35 = arith.subf %29, %34 : vector<2x64xf32>
    %36 = arith.mulf %35, %35 : vector<2x64xf32>
    %cst_15 = arith.constant dense<0.000000e+00> : vector<64xf32>
    %37 = vector.multi_reduction <add>, %36, %cst_15 [0] : vector<2x64xf32> to vector<64xf32>
    %38 = vector.shape_cast %37 : vector<64xf32> to vector<1x64xf32>
    %cst_16 = arith.constant 2.000000e+00 : f32
    %39 = vector.broadcast %cst_16 : f32 to vector<1x64xf32>
    %40 = arith.divf %38, %39 : vector<1x64xf32>
    %c0_17 = arith.constant 0 : index
    %c0_18 = arith.constant 0 : index
    %41 = vector.load %arg4[%c0_17, %c0_18] : memref<1x64xf32, #tpu.memory_space<vmem>>, vector<1x64xf32>
    %cst_19 = arith.constant 9.99999974E-6 : f32
    %42 = vector.broadcast %cst_19 : f32 to vector<1x64xf32>
    %43 = arith.addf %40, %42 : vector<1x64xf32>
    %44 = math.rsqrt %43 : vector<1x64xf32>
    %45 = arith.mulf %41, %44 : vector<1x64xf32>
    %46 = vector.broadcast %45 : vector<1x64xf32> to vector<2x64xf32>
    %47 = arith.mulf %29, %46 : vector<2x64xf32>
    %c0_20 = arith.constant 0 : index
    %c0_21 = arith.constant 0 : index
    %48 = vector.load %arg5[%c0_20, %c0_21] : memref<1x64xf32, #tpu.memory_space<vmem>>, vector<1x64xf32>
    %49 = arith.mulf %33, %45 : vector<1x64xf32>
    %50 = arith.subf %48, %49 : vector<1x64xf32>
    %51 = vector.broadcast %50 : vector<1x64xf32> to vector<2x64xf32>
    %52 = arith.addf %47, %51 : vector<2x64xf32>
    %cst_22 = arith.constant 0.000000e+00 : f32
    %53 = vector.broadcast %cst_22 : f32 to vector<2x64xf32>
    %54 = arith.maximumf %52, %53 : vector<2x64xf32>
    %c0_23 = arith.constant 0 : index
    %c0_24 = arith.constant 0 : index
    %55 = vector.load %arg6[%c0_23, %c0_24] : memref<2x64xf32, #tpu.memory_space<vmem>>, vector<2x64xf32>
    tpu.vector_store %arg6[%c0_23, %c0_24], %54 {strides = array<i32>} : memref<2x64xf32, #tpu.memory_space<vmem>>, vector<2x64xf32>,
    return
  }
}

module attributes {stable_mosaic.version = 11 : i64} {
  func.func @_head_kernel(%arg0: memref<2x64xbf16, #tpu.memory_space<vmem>>, %arg1: memref<1x64xf32, #tpu.memory_space<vmem>>, %arg2: memref<1x64xf32, #tpu.memory_space<vmem>>, %arg3: memref<2x2xf32, #tpu.memory_space<vmem>>, %arg4: memref<64x2xf32, #tpu.memory_space<vmem>>, %arg5: memref<1x2xf32, #tpu.memory_space<vmem>>, %arg6: memref<2x2xf32, #tpu.memory_space<vmem>>) attributes {dimension_semantics = [], scalar_prefetch = 0 : i64, scratch_operands = 0 : i64, tpu.core_type = #tpu.core_type<tc>} {
    %c0 = arith.constant 0 : index
    %c0_0 = arith.constant 0 : index
    %0 = vector.load %arg0[%c0, %c0_0] : memref<2x64xbf16, #tpu.memory_space<vmem>>, vector<2x64xbf16>
    %1 = arith.extf %0 : vector<2x64xbf16> to vector<2x64xf32>
    %cst = arith.constant dense<0.000000e+00> : vector<64xf32>
    %2 = vector.multi_reduction <add>, %1, %cst [0] : vector<2x64xf32> to vector<64xf32>
    %3 = vector.shape_cast %2 : vector<64xf32> to vector<1x64xf32>
    %cst_1 = arith.constant 2.000000e+00 : f32
    %4 = vector.broadcast %cst_1 : f32 to vector<1x64xf32>
    %5 = arith.divf %3, %4 : vector<1x64xf32>
    %6 = vector.broadcast %5 : vector<1x64xf32> to vector<2x64xf32>
    %7 = arith.subf %1, %6 : vector<2x64xf32>
    %8 = arith.mulf %7, %7 : vector<2x64xf32>
    %cst_2 = arith.constant dense<0.000000e+00> : vector<64xf32>
    %9 = vector.multi_reduction <add>, %8, %cst_2 [0] : vector<2x64xf32> to vector<64xf32>
    %10 = vector.shape_cast %9 : vector<64xf32> to vector<1x64xf32>
    %cst_3 = arith.constant 2.000000e+00 : f32
    %11 = vector.broadcast %cst_3 : f32 to vector<1x64xf32>
    %12 = arith.divf %10, %11 : vector<1x64xf32>
    %c0_4 = arith.constant 0 : index
    %c0_5 = arith.constant 0 : index
    %13 = vector.load %arg1[%c0_4, %c0_5] : memref<1x64xf32, #tpu.memory_space<vmem>>, vector<1x64xf32>
    %cst_6 = arith.constant 9.99999974E-6 : f32
    %14 = vector.broadcast %cst_6 : f32 to vector<1x64xf32>
    %15 = arith.addf %12, %14 : vector<1x64xf32>
    %16 = math.rsqrt %15 : vector<1x64xf32>
    %17 = arith.mulf %13, %16 : vector<1x64xf32>
    %18 = vector.broadcast %17 : vector<1x64xf32> to vector<2x64xf32>
    %19 = arith.mulf %1, %18 : vector<2x64xf32>
    %c0_7 = arith.constant 0 : index
    %c0_8 = arith.constant 0 : index
    %20 = vector.load %arg2[%c0_7, %c0_8] : memref<1x64xf32, #tpu.memory_space<vmem>>, vector<1x64xf32>
    %21 = arith.mulf %5, %17 : vector<1x64xf32>
    %22 = arith.subf %20, %21 : vector<1x64xf32>
    %23 = vector.broadcast %22 : vector<1x64xf32> to vector<2x64xf32>
    %24 = arith.addf %19, %23 : vector<2x64xf32>
    %cst_9 = arith.constant 0.000000e+00 : f32
    %25 = vector.broadcast %cst_9 : f32 to vector<2x64xf32>
    %26 = arith.maximumf %24, %25 : vector<2x64xf32>
    %c0_10 = arith.constant 0 : index
    %c0_11 = arith.constant 0 : index
    %27 = vector.load %arg3[%c0_10, %c0_11] : memref<2x2xf32, #tpu.memory_space<vmem>>, vector<2x2xf32>
    %cst_12 = arith.constant dense<0.000000e+00> : vector<2x64xf32>
    %28 = tpu.matmul %27, %26, %cst_12 {dimension_numbers = #tpu.dot_dimension_numbers<[1], [0], [0], [1], [0, 0, 1, 1], [], []>} : vector<2x2xf32>, vector<2x64xf32>, vector<2x64xf32> -> vector<2x64xf32>
    %c0_13 = arith.constant 0 : index
    %c0_14 = arith.constant 0 : index
    %29 = vector.load %arg4[%c0_13, %c0_14] : memref<64x2xf32, #tpu.memory_space<vmem>>, vector<64x2xf32>
    %cst_15 = arith.constant dense<0.000000e+00> : vector<2x2xf32>
    %30 = tpu.matmul %28, %29, %cst_15 {dimension_numbers = #tpu.dot_dimension_numbers<[1], [0], [0], [1], [0, 0, 1, 1], [], []>} : vector<2x64xf32>, vector<64x2xf32>, vector<2x2xf32> -> vector<2x2xf32>
    %c0_16 = arith.constant 0 : index
    %c0_17 = arith.constant 0 : index
    %31 = vector.load %arg5[%c0_16, %c0_17] : memref<1x2xf32, #tpu.memory_space<vmem>>, vector<1x2xf32>
    %32 = vector.broadcast %31 : vector<1x2xf32> to vector<2x2xf32>
    %33 = arith.addf %30, %32 : vector<2x2xf32>
    %c0_18 = arith.constant 0 : index
    %c0_19 = arith.constant 0 : index
    %34 = vector.load %arg6[%c0_18, %c0_19] : memref<2x2xf32, #tpu.memory_space<vmem>>, vector<2x2xf32>
    tpu.vector_store %arg6[%c0_18, %c0_19], %33 {strides = array<i32>} : memref<2x2xf32, #tpu.memory_space<vmem>>, vector<2x2xf32>,
    return
  }
}

</mosaic_0001>

<bundles_post_ra>
// kernel: densenet_forward.21
= control target key start
LH: loop header
LB: loop body
LE: loop exit
PB: predicated region body
PF: predicated region fallthrough
CT: control target
= control target key end

     0   :  { %vm359_vm0 = vcmask 1041408   ;;  %vm262_vm1 = vcmask 293888   ;;  %vm532_vm2 = vcmask 261120   ;;  %vm1214_vm7 = vcmask 257024   ;;  %s2578_s1 = inlined_call_operand.vmem [shape: bf16[36,32], index: 1, kind: input, shape index: {}]   ;;  %s2579_s0 = inlined_call_operand.vmem [shape: bf16[512,36], index: 0, kind: input, shape index: {}]   ;;  %s2580_s2 = inlined_call_operand.vmem [shape: f32[1,32], index: 2, kind: input, shape index: {}]   ;;  %s2581_s3 = inlined_call_operand.vmem [shape: f32[1,32], index: 3, kind: input, shape index: {}]   ;;  %s2582_s4 = inlined_call_operand.vmem [shape: bf16[512,32], index: 4, kind: output, shape index: {}]  }
   0x1   :  { %v86_v0 = vld [vmem:[%s2578_s1 + $0x10] sm:$0x3]  ;;  %v1484_v4 = vld [vmem:[%s2578_s1 + $0x8] sm:$0xff]  ;;  %v1483_v5 = vld [vmem:[%s2578_s1] sm:$0xff] }
   0x2   :  { %v256_v1 = vunpack.c.l.b16 %v86_v0  ;;  %v1451_v6 = vld [vmem:[%s2579_s0] sm:$0xff]  ;;  %v1452_v8 = vld [vmem:[%s2579_s0 + $0x8] sm:$0xff]  ;;  %v1453_v11 = vld [vmem:[%s2579_s0 + $0x10] sm:$0xff] }
   0x3   :  { %v1459_v7 = vld [vmem:[%s2579_s0 + $0x40] sm:$0xff]  ;;  %v1460_v9 = vld [vmem:[%s2579_s0 + $0x48] sm:$0xff]  ;;  %v1461_v12 = vld [vmem:[%s2579_s0 + $0x50] sm:$0xff] }
   0x4   :  { %v259_v2 = vpack.c.b16 %v256_v1, %v256_v1  ;;  %v1467_v10 = vld [vmem:[%s2579_s0 + $0x80] sm:$0xff]  ;;  %v1468_v13 = vld [vmem:[%s2579_s0 + $0x88] sm:$0xff]  ;;  %v1454_v14 = vld [vmem:[%s2579_s0 + $0x18] sm:$0xff] }
   0x5   :  { %v1462_v15 = vld [vmem:[%s2579_s0 + $0x58] sm:$0xff]  ;;  %v1469_v16 = vld [vmem:[%s2579_s0 + $0x90] sm:$0xff]  ;;  %v1475_v17 = vld [vmem:[%s2579_s0 + $0xc0] sm:$0xff] }
   0x6   :  { %v361_v3 = vsel %vm359_vm0, %v259_v2, 0  ;;  %v1455_v18 = vld [vmem:[%s2579_s0 + $0x20] sm:$0xff]  ;;  %v1470_v20 = vld [vmem:[%s2579_s0 + $0x98] sm:$0xff]  ;;  %v1476_v21 = vld [vmem:[%s2579_s0 + $0xc8] sm:$0xff] }
   0x7   :  { %368 = vmatpush.bf16.msra.mxu0 %v361_v3  ;;  %1485 = vmatpush.bf16.msra.mxu1 %v361_v3  ;;  %v1463_v19 = vld [vmem:[%s2579_s0 + $0x60] sm:$0xff]  ;;  %v1456_v22 = vld [vmem:[%s2579_s0 + $0x28] sm:$0xff]  ;;  %v1477_v25 = vld [vmem:[%s2579_s0 + $0xd0] sm:$0xff] }
   0x8   :  { %1486 = vmatpush.bf16.msra.mxu2 %v361_v3  ;;  %1487 = vmatpush.bf16.msra.mxu3 %v361_v3  ;;  %v1464_v23 = vld [vmem:[%s2579_s0 + $0x68] sm:$0xff]  ;;  %v1471_v24 = vld [vmem:[%s2579_s0 + $0xa0] sm:$0xff]  ;;  %v1457_v26 = vld [vmem:[%s2579_s0 + $0x30] sm:$0xff] }
   0x9   :  { %v1465_v27 = vld [vmem:[%s2579_s0 + $0x70] sm:$0xff]  ;;  %v1472_v28 = vld [vmem:[%s2579_s0 + $0xa8] sm:$0xff]  ;;  %v1478_v29 = vld [vmem:[%s2579_s0 + $0xd8] sm:$0xff] }
   0xa   :  { %v1458_v30 = vld [vmem:[%s2579_s0 + $0x38] sm:$0xff]  ;;  %v1473_v32 = vld [vmem:[%s2579_s0 + $0xb0] sm:$0xff]  ;;  %v1479_v33 = vld [vmem:[%s2579_s0 + $0xe0] sm:$0xff] }
   0xb   :  { %369 = vmatpush.bf16.msra.mxu0 %v1484_v4  ;;  %1488 = vmatpush.bf16.msra.mxu1 %v1484_v4  ;;  %v1466_v31 = vld [vmem:[%s2579_s0 + $0x78] sm:$0xff]  ;;  %v1480_v37 = vld [vmem:[%s2579_s0 + $0xe8] sm:$0xff]  ;;  %v1481_v41 = vld [vmem:[%s2579_s0 + $0xf0] sm:$0xff] }
   0xc   :  { %1489 = vmatpush.bf16.msra.mxu2 %v1484_v4  ;;  %1490 = vmatpush.bf16.msra.mxu3 %v1484_v4  ;;  %v1474_v36 = vld [vmem:[%s2579_s0 + $0xb8] sm:$0xff] }
   0xd   :  { %v1482_v47 = vld [vmem:[%s2579_s0 + $0xf8] sm:$0xff] }
   0xf   :  { %370 = vmatpush.bf16.msra.mxu0 %v1483_v5  ;;  %1491 = vmatpush.bf16.msra.mxu1 %v1483_v5 }
  0x10   :  { %1492 = vmatpush.bf16.msra.mxu2 %v1483_v5  ;;  %1493 = vmatpush.bf16.msra.mxu3 %v1483_v5 }
  0x12   :  { %1419 = vmatmul.msk.bf16.vlgmr.msra.gmra.mxu0 %vm262_vm1, %v1451_v6  ;;  %1427 = vmatmul.msk.bf16.vlgmr.msra.gmra.mxu1 %vm262_vm1, %v1459_v7 }
  0x13   :  { %1435 = vmatmul.msk.bf16.vlgmr.msra.gmra.mxu2 %vm262_vm1, %v1467_v10  ;;  %1443 = vmatmul.msk.bf16.vlgmr.msra.gmra.mxu3 %vm262_vm1, %v1475_v17 }
  0x22   :  { %1420 = vmatmul.msk.bf16.gmra.mxu0 %vm262_vm1, %v1452_v8  ;;  %1428 = vmatmul.msk.bf16.gmra.mxu1 %vm262_vm1, %v1460_v9 }
  0x23   :  { %1436 = vmatmul.msk.bf16.gmra.mxu2 %vm262_vm1, %v1468_v13  ;;  %1444 = vmatmul.msk.bf16.gmra.mxu3 %vm262_vm1, %v1476_v21 }
  0x32   :  { %1421 = vmatmul.msk.bf16.gmra.mxu0 %vm262_vm1, %v1453_v11  ;;  %1429 = vmatmul.msk.bf16.gmra.mxu1 %vm262_vm1, %v1461_v12 }
  0x33   :  { %1437 = vmatmul.msk.bf16.gmra.mxu2 %vm262_vm1, %v1469_v16  ;;  %1445 = vmatmul.msk.bf16.gmra.mxu3 %vm262_vm1, %v1477_v25 }
  0x42   :  { %1422 = vmatmul.msk.bf16.gmra.mxu0 %vm262_vm1, %v1454_v14  ;;  %1430 = vmatmul.msk.bf16.gmra.mxu1 %vm262_vm1, %v1462_v15 }
  0x43   :  { %1438 = vmatmul.msk.bf16.gmra.mxu2 %vm262_vm1, %v1470_v20  ;;  %1446 = vmatmul.msk.bf16.gmra.mxu3 %vm262_vm1, %v1478_v29 }
  0x52   :  { %1423 = vmatmul.msk.bf16.gmra.mxu0 %vm262_vm1, %v1455_v18  ;;  %1431 = vmatmul.msk.bf16.gmra.mxu1 %vm262_vm1, %v1463_v19 }
  0x53   :  { %1439 = vmatmul.msk.bf16.gmra.mxu2 %vm262_vm1, %v1471_v24  ;;  %1447 = vmatmul.msk.bf16.gmra.mxu3 %vm262_vm1, %v1479_v33 }
  0x62   :  { %1424 = vmatmul.msk.bf16.gmra.mxu0 %vm262_vm1, %v1456_v22  ;;  %1432 = vmatmul.msk.bf16.gmra.mxu1 %vm262_vm1, %v1464_v23 }
  0x63   :  { %1440 = vmatmul.msk.bf16.gmra.mxu2 %vm262_vm1, %v1472_v28  ;;  %1448 = vmatmul.msk.bf16.gmra.mxu3 %vm262_vm1, %v1480_v37 }
  0x72   :  { %1425 = vmatmul.msk.bf16.gmra.mxu0 %vm262_vm1, %v1457_v26  ;;  %1433 = vmatmul.msk.bf16.gmra.mxu1 %vm262_vm1, %v1465_v27 }
  0x73   :  { %1441 = vmatmul.msk.bf16.gmra.mxu2 %vm262_vm1, %v1473_v32  ;;  %1449 = vmatmul.msk.bf16.gmra.mxu3 %vm262_vm1, %v1481_v41 }
  0x82   :  { %1426 = vmatmul.msk.bf16.gmra.mxu0 %vm262_vm1, %v1458_v30  ;;  %1434 = vmatmul.msk.bf16.gmra.mxu1 %vm262_vm1, %v1466_v31 }
  0x83   :  { %1442 = vmatmul.msk.bf16.gmra.mxu2 %vm262_vm1, %v1474_v36  ;;  %1450 = vmatmul.msk.bf16.gmra.mxu3 %vm262_vm1, %v1482_v47 }
  0x8f   :  { %v1646_v34 = vpop.f32.mrf.mxu0  ;;  %v1648_v35 = vpop.f32.mrf.mxu1 }
  0x90   :  { %v533_v7 = vsel %vm532_vm2, %v1646_v34, 0.0 }
  0x96   :  { %v1674_v45 = vpop.f32.mrf.mxu2  ;;  %v1708_v61 = vpop.f32.mrf.mxu3 }
  0x97   :  { %v1658_v38 = vpop.f32.mrf.mxu0  ;;  %v1660_v39 = vpop.f32.mrf.mxu1  ;;  %2634 = vst [vmem:[#allocation3_spill] sm:$0xff] %v1674_v45 }
  0x98   :  { %v534_v4 = vsel %vm532_vm2, %v1658_v38, 0.0 }
  0x99   :  { %v535_v9 = vadd.f32 %v534_v4, %v533_v7 }
  0x9e   :  { %v1686_v50 = vpop.f32.mrf.mxu2  ;;  %v1716_v1 = vpop.f32.mrf.mxu3 }
  0x9f   :  { %v1662_v40 = vpop.f32.mrf.mxu0  ;;  %v1667_v42 = vpop.f32.mrf.mxu1  ;;  %2637 = vst [vmem:[#allocation6_spill] sm:$0xff] %v1686_v50 }
  0xa0   :  { %v536_v8 = vsel %vm532_vm2, %v1662_v40, 0.0 }
  0xa1   :  { %v537_v11 = vadd.f32 %v536_v8, %v535_v9 }
  0xa6   :  { %v1692_v53 = vpop.f32.mrf.mxu2  ;;  %v1726_v6 = vpop.f32.mrf.mxu3 }
  0xa7   :  { %v1670_v43 = vpop.f32.mrf.mxu0  ;;  %v1672_v44 = vpop.f32.mrf.mxu1  ;;  %2642 = vst [vmem:[#allocation11_spill] sm:$0xff] %v1726_v6 }
  0xa8   :  { %2633 = vst [vmem:[#allocation2_spill] sm:$0xff] %v1670_v43  ;;  %v538_v10 = vsel %vm532_vm2, %v1670_v43, 0.0 }
  0xa9   :  { %v539_v14 = vadd.f32 %v538_v10, %v537_v11 }
  0xae   :  { %v1698_v56 = vpop.f32.mrf.mxu2  ;;  %v1746_v21 = vpop.f32.mrf.mxu3 }
  0xaf   :  { %v1676_v46 = vpop.f32.mrf.mxu0  ;;  %v1684_v49 = vpop.f32.mrf.mxu1  ;;  %2638 = vst [vmem:[#allocation7_spill] sm:$0xff] %v1698_v56 }
  0xb0   :  { %2635 = vst [vmem:[#allocation4_spill] sm:$0xff] %v1676_v46  ;;  %v540_v13 = vsel %vm532_vm2, %v1676_v46, 0.0 }
  0xb1   :  { %v541_v16 = vadd.f32 %v540_v13, %v539_v14  ;;  %2644 = vst [vmem:[#allocation13_spill] sm:$0xff] %v1746_v21 }
  0xb6   :  { %v1704_v59 = vpop.f32.mrf.mxu2  ;;  %v1766_v41 = vpop.f32.mrf.mxu3 }
  0xb7   :  { %v1682_v48 = vpop.f32.mrf.mxu0  ;;  %v1690_v52 = vpop.f32.mrf.mxu1  ;;  %2639 = vst [vmem:[#allocation8_spill] sm:$0xff] %v1704_v59 }
  0xb8   :  { %2636 = vst [vmem:[#allocation5_spill] sm:$0xff] %v1682_v48  ;;  %v542_v15 = vsel %vm532_vm2, %v1682_v48, 0.0 }
  0xb9   :  { %v543_v20 = vadd.f32 %v542_v15, %v541_v16  ;;  %2647 = vst [vmem:[#allocation16_spill] sm:$0xff] %v1766_v41 }
  0xbe   :  { %v1714_v0 = vpop.f32.mrf.mxu2 }
  0xbf   :  { %v1688_v51 = vpop.f32.mrf.mxu0  ;;  %v1696_v55 = vpop.f32.mrf.mxu1  ;;  %2640 = vst [vmem:[#allocation9_spill] sm:$0xff] %v1714_v0 }
  0xc0   :  { %v544_v18 = vsel %vm532_vm2, %v1688_v51, 0.0 }
  0xc1   :  { %v545_v23 = vadd.f32 %v544_v18, %v543_v20  ;;  %v1782_v20 = vpop.f32.mrf.mxu3 }
  0xc2   :  { %2650 = vst [vmem:[#allocation19_spill] sm:$0xff] %v1782_v20 }
  0xc6   :  { %v1724_v5 = vpop.f32.mrf.mxu2 }
  0xc7   :  { %v1694_v54 = vpop.f32.mrf.mxu0  ;;  %v1702_v58 = vpop.f32.mrf.mxu1  ;;  %2641 = vst [vmem:[#allocation10_spill] sm:$0xff] %v1724_v5 }
  0xc8   :  { %v546_v22 = vsel %vm532_vm2, %v1694_v54, 0.0 }
  0xc9   :  { %v547_v26 = vadd.f32 %v546_v22, %v545_v23  ;;  %v564_v22 = vsel %vm532_vm2, %v1648_v35, 0.0 }
  0xce   :  { %v1744_v19 = vpop.f32.mrf.mxu2 }
  0xcf   :  { %v1700_v57 = vpop.f32.mrf.mxu0  ;;  %v1712_v63 = vpop.f32.mrf.mxu1 }
  0xd0   :  { %v548_v25 = vsel %vm532_vm2, %v1700_v57, 0.0 }
  0xd1   :  { %v549_v28 = vadd.f32 %v548_v25, %v547_v26  ;;  %v566_v25 = vsel %vm532_vm2, %v1660_v39, 0.0 }
  0xd6   :  { %v1762_v33 = vpop.f32.mrf.mxu2 }
  0xd7   :  { %v1706_v60 = vpop.f32.mrf.mxu0  ;;  %v1720_v3 = vpop.f32.mrf.mxu1  ;;  %2646 = vst [vmem:[#allocation15_spill] sm:$0xff] %v1762_v33 }
  0xd8   :  { %v550_v27 = vsel %vm532_vm2, %v1706_v60, 0.0 }
  0xd9   :  { %v551_v30 = vadd.f32 %v550_v27, %v549_v28  ;;  %v568_v27 = vsel %vm532_vm2, %v1667_v42, 0.0 }
  0xde   :  { %v1780_v18 = vpop.f32.mrf.mxu2 }
  0xdf   :  { %v1710_v62 = vpop.f32.mrf.mxu0  ;;  %v1740_v17 = vpop.f32.mrf.mxu1  ;;  %2649 = vst [vmem:[#allocation18_spill] sm:$0xff] %v1780_v18 }
  0xe0   :  { %2643 = vst [vmem:[#allocation12_spill] sm:$0xff] %v1740_v17  ;;  %v552_v29 = vsel %vm532_vm2, %v1710_v62, 0.0 }
  0xe1   :  { %v553_v36 = vadd.f32 %v552_v29, %v551_v30  ;;  %v570_v29 = vsel %vm532_vm2, %v1672_v44, 0.0 }
  0xe7   :  { %v1718_v2 = vpop.f32.mrf.mxu0  ;;  %v1758_v31 = vpop.f32.mrf.mxu1 }
  0xe8   :  { %2645 = vst [vmem:[#allocation14_spill] sm:$0xff] %v1758_v31  ;;  %v554_v32 = vsel %vm532_vm2, %v1718_v2, 0.0 }
  0xe9   :  { %v555_v4 = vadd.f32 %v554_v32, %v553_v36  ;;  %v572_v36 = vsel %vm532_vm2, %v1684_v49, 0.0 }
  0xef   :  { %v1734_v12 = vpop.f32.mrf.mxu0  ;;  %v1776_v14 = vpop.f32.mrf.mxu1 }
  0xf0   :  { %v556_v47 = vsel %vm532_vm2, %v1734_v12, 0.0  ;;  %2648 = vst [vmem:[#allocation17_spill] sm:$0xff] %v1776_v14 }
  0xf1   :  { %v557_v8 = vadd.f32 %v556_v47, %v555_v4  ;;  %v1796_v4 = vpop.f32.mrf.mxu2 }
  0xf2   :  { %2652 = vst [vmem:[#allocation21_spill] sm:$0xff] %v1796_v4 }
  0xf7   :  { %v1750_v24 = vpop.f32.mrf.mxu0  ;;  %v1792_v32 = vpop.f32.mrf.mxu1 }
  0xf8   :  { %v558_v7 = vsel %vm532_vm2, %v1750_v24, 0.0  ;;  %2651 = vst [vmem:[#allocation20_spill] sm:$0xff] %v1792_v32 }
  0xf9   :  { %v559_v10 = vadd.f32 %v558_v7, %v557_v8  ;;  %v1798_v7 = vpop.f32.mrf.mxu3  ;;  %v574_v8 = vsel %vm532_vm2, %v1690_v52, 0.0 }
  0xfa   :  { %2653 = vst [vmem:[#allocation22_spill] sm:$0xff] %v1798_v7 }
  0xff   :  { %v1764_v37 = vpop.f32.mrf.mxu0 }
 0x100   :  { %v560_v9 = vsel %vm532_vm2, %v1764_v37, 0.0 }
 0x101   :  { %v561_v11 = vadd.f32 %v560_v9, %v559_v10  ;;  %v576_v10 = vsel %vm532_vm2, %v1696_v55, 0.0 }
 0x107   :  { %v1774_v13 = vpop.f32.mrf.mxu0 }
 0x108   :  { %v562_v15 = vsel %vm532_vm2, %v1774_v13, 0.0 }
 0x109   :  { %v563_v16 = vadd.f32 %v562_v15, %v561_v11  ;;  %v578_v15 = vsel %vm532_vm2, %v1702_v58, 0.0 }
 0x10b   :  { %v565_v23 = vadd.f32 %v564_v22, %v563_v16  ;;  %v580_v22 = vsel %vm532_vm2, %v1712_v63, 0.0 }
 0x10d   :  { %v567_v26 = vadd.f32 %v566_v25, %v565_v23  ;;  %v1808_v25 = vpop.f32.mrf.mxu1 }
 0x10e   :  { %2654 = vst [vmem:[#allocation23_spill] sm:$0xff] %v1808_v25 }
 0x10f   :  { %v569_v28 = vadd.f32 %v568_v27, %v567_v26  ;;  %v582_v26 = vsel %vm532_vm2, %v1720_v3, 0.0 }
 0x111   :  { %v571_v30 = vadd.f32 %v570_v29, %v569_v28  ;;  %v1812_v28 = vpop.f32.mrf.mxu2  ;;  %v1814_v29 = vpop.f32.mrf.mxu3 }
 0x112   :  { %2655 = vst [vmem:[#allocation24_spill] sm:$0xff] %v1814_v29 }
 0x113   :  { %v573_v47 = vadd.f32 %v572_v36, %v571_v30  ;;  %v584_v30 = vsel %vm532_vm2, %v1740_v17, 0.0 }
 0x115   :  { %v575_v9 = vadd.f32 %v574_v8, %v573_v47  ;;  %v586_v47 = vsel %vm532_vm2, %v1758_v31, 0.0 }
 0x117   :  { %v577_v11 = vadd.f32 %v576_v10, %v575_v9  ;;  %v588_v9 = vsel %vm532_vm2, %v1776_v14, 0.0 }
 0x119   :  { %v579_v16 = vadd.f32 %v578_v15, %v577_v11  ;;  %v590_v11 = vsel %vm532_vm2, %v1792_v32, 0.0 }
 0x11b   :  { %v581_v23 = vadd.f32 %v580_v22, %v579_v16  ;;  %v1824_v16 = vpop.f32.mrf.mxu1  ;;  %v592_v22 = vsel %vm532_vm2, %v1808_v25, 0.0 }
 0x11c   :  { %2656 = vst [vmem:[#allocation25_spill] sm:$0xff] %v1824_v16 }
 0x11d   :  { %v583_v27 = vadd.f32 %v582_v26, %v581_v23  ;;  %v1828_v26 = vpop.f32.mrf.mxu2 }
 0x11f   :  { %v585_v36 = vadd.f32 %v584_v30, %v583_v27  ;;  %v1830_v27 = vpop.f32.mrf.mxu3  ;;  %v594_v30 = vsel %vm532_vm2, %v1824_v16, 0.0 }
 0x120   :  { %2657 = vst [vmem:[#allocation26_spill] sm:$0xff] %v1830_v27 }
 0x121   :  { %v587_v8 = vadd.f32 %v586_v47, %v585_v36  ;;  %v596_v47 = vsel %vm532_vm2, %v1674_v45, 0.0 }
 0x123   :  { %v589_v10 = vadd.f32 %v588_v9, %v587_v8  ;;  %v598_v9 = vsel %vm532_vm2, %v1686_v50, 0.0 }
 0x125   :  { %v591_v15 = vadd.f32 %v590_v11, %v589_v10  ;;  %v600_v11 = vsel %vm532_vm2, %v1692_v53, 0.0  ;;  %v1842_v32 = vpop.f32.mrf.mxu2 }
 0x126   :  { %2658 = vst [vmem:[#allocation27_spill] sm:$0xff] %v1842_v32 }
 0x127   :  { %v593_v23 = vadd.f32 %v592_v22, %v591_v15  ;;  %v602_v22 = vsel %vm532_vm2, %v1698_v56, 0.0  ;;  %v1844_v16 = vpop.f32.mrf.mxu3 }
 0x128   :  { %2659 = vst [vmem:[#allocation28_spill] sm:$0xff] %v1844_v16 }
 0x129   :  { %v595_v36 = vadd.f32 %v594_v30, %v593_v23  ;;  %v604_v23 = vsel %vm532_vm2, %v1704_v59, 0.0 }
 0x12b   :  { %v597_v8 = vadd.f32 %v596_v47, %v595_v36  ;;  %v606_v36 = vsel %vm532_vm2, %v1714_v0, 0.0 }
 0x12d   :  { %v599_v10 = vadd.f32 %v598_v9, %v597_v8  ;;  %v608_v8 = vsel %vm532_vm2, %v1724_v5, 0.0  ;;  %v1856_v56 = vpop.f32.mrf.mxu2 }
 0x12f   :  { %v601_v15 = vadd.f32 %v600_v11, %v599_v10  ;;  %v610_v10 = vsel %vm532_vm2, %v1744_v19, 0.0  ;;  %v1858_v59 = vpop.f32.mrf.mxu3 }
 0x130   :  { %2660 = vst [vmem:[#allocation29_spill] sm:$0xff] %v1858_v59 }
 0x131   :  { %v603_v25 = vadd.f32 %v602_v22, %v601_v15  ;;  %v612_v15 = vsel %vm532_vm2, %v1762_v33, 0.0 }
 0x133   :  { %v605_v30 = vadd.f32 %v604_v23, %v603_v25  ;;  %v614_v25 = vsel %vm532_vm2, %v1780_v18, 0.0 }
 0x135   :  { %v607_v47 = vadd.f32 %v606_v36, %v605_v30  ;;  %v616_v30 = vsel %vm532_vm2, %v1796_v4, 0.0  ;;  %v1870_v33 = vpop.f32.mrf.mxu2 }
 0x136   :  { %2661 = vst [vmem:[#allocation30_spill] sm:$0xff] %v1870_v33 }
 0x137   :  { %v609_v9 = vadd.f32 %v608_v8, %v607_v47  ;;  %v618_v47 = vsel %vm532_vm2, %v1812_v28, 0.0  ;;  %v1872_v18 = vpop.f32.mrf.mxu3 }
 0x138   :  { %2662 = vst [vmem:[#allocation31_spill] sm:$0xff] %v1872_v18 }
 0x139   :  { %v611_v11 = vadd.f32 %v610_v10, %v609_v9  ;;  %v620_v9 = vsel %vm532_vm2, %v1828_v26, 0.0 }
 0x13b   :  { %v613_v22 = vadd.f32 %v612_v15, %v611_v11  ;;  %v622_v11 = vsel %vm532_vm2, %v1842_v32, 0.0 }
 0x13d   :  { %v615_v23 = vadd.f32 %v614_v25, %v613_v22  ;;  %v624_v22 = vsel %vm532_vm2, %v1856_v56, 0.0 }
 0x13f   :  { %v617_v36 = vadd.f32 %v616_v30, %v615_v23  ;;  %v626_v23 = vsel %vm532_vm2, %v1870_v33, 0.0  ;;  %v1884_v32 = vpop.f32.mrf.mxu3 }
 0x140   :  { %2663 = vst [vmem:[#allocation32_spill] sm:$0xff] %v1884_v32 }
 0x141   :  { %v619_v8 = vadd.f32 %v618_v47, %v617_v36  ;;  %v628_v36 = vsel %vm532_vm2, %v1708_v61, 0.0 }
 0x143   :  { %v621_v10 = vadd.f32 %v620_v9, %v619_v8  ;;  %v630_v8 = vsel %vm532_vm2, %v1716_v1, 0.0 }
 0x145   :  { %v623_v15 = vadd.f32 %v622_v11, %v621_v10  ;;  %v632_v10 = vsel %vm532_vm2, %v1726_v6, 0.0 }
 0x147   :  { %v625_v25 = vadd.f32 %v624_v22, %v623_v15  ;;  %v634_v15 = vsel %vm532_vm2, %v1746_v21, 0.0  ;;  %v1896_v6 = vpop.f32.mrf.mxu3 }
 0x148   :  { %2664 = vst [vmem:[#allocation33_spill] sm:$0xff] %v1896_v6 }
 0x149   :  { %v627_v30 = vadd.f32 %v626_v23, %v625_v25  ;;  %v636_v25 = vsel %vm532_vm2, %v1766_v41, 0.0 }
 0x14b   :  { %v629_v47 = vadd.f32 %v628_v36, %v627_v30  ;;  %v638_v30 = vsel %vm532_vm2, %v1782_v20, 0.0 }
 0x14d   :  { %v631_v9 = vadd.f32 %v630_v8, %v629_v47  ;;  %v640_v47 = vsel %vm532_vm2, %v1798_v7, 0.0 }
 0x14f   :  { %v633_v11 = vadd.f32 %v632_v10, %v631_v9  ;;  %v642_v9 = vsel %vm532_vm2, %v1814_v29, 0.0  ;;  %v1906_v29 = vpop.f32.mrf.mxu3 }
 0x150   :  { %2665 = vst [vmem:[#allocation34_spill] sm:$0xff] %v1906_v29 }
 0x151   :  { %v635_v22 = vadd.f32 %v634_v15, %v633_v11  ;;  %v644_v11 = vsel %vm532_vm2, %v1830_v27, 0.0 }
 0x153   :  { %v637_v23 = vadd.f32 %v636_v25, %v635_v22  ;;  %v646_v22 = vsel %vm532_vm2, %v1844_v16, 0.0 }
 0x155   :  { %v639_v36 = vadd.f32 %v638_v30, %v637_v23  ;;  %v648_v23 = vsel %vm532_vm2, %v1858_v59, 0.0 }
 0x157   :  { %v641_v8 = vadd.f32 %v640_v47, %v639_v36  ;;  %v650_v36 = vsel %vm532_vm2, %v1872_v18, 0.0  ;;  %v1914_v59 = vpop.f32.mrf.mxu3 }
 0x159   :  { %v643_v10 = vadd.f32 %v642_v9, %v641_v8  ;;  %v652_v8 = vsel %vm532_vm2, %v1884_v32, 0.0 }
 0x15b   :  { %v645_v15 = vadd.f32 %v644_v11, %v643_v10  ;;  %v654_v10 = vsel %vm532_vm2, %v1896_v6, 0.0 }
 0x15d   :  { %v647_v25 = vadd.f32 %v646_v22, %v645_v15  ;;  %v656_v15 = vsel %vm532_vm2, %v1906_v29, 0.0 }
 0x15f   :  { %v649_v30 = vadd.f32 %v648_v23, %v647_v25  ;;  %v658_v25 = vsel %vm532_vm2, %v1914_v59, 0.0 }
 0x161   :  { %v651_v47 = vadd.f32 %v650_v36, %v649_v30  ;;  %v1499_v30 = vmov 512.0  }
 0x162   :  { %1495 = vrcp.f32 %v1499_v30 }
 0x163   :  { %v653_v9 = vadd.f32 %v652_v8, %v651_v47 }
 0x165   :  { %v655_v11 = vadd.f32 %v654_v10, %v653_v9 }
 0x167   :  { %v657_v22 = vadd.f32 %v656_v15, %v655_v11 }
 0x168   :  { %v1496_v18 = vpop.eup %1495 }
 0x169   :  { %v659_v23 = vadd.f32 %v658_v25, %v657_v22  ;;  %v667_v47 = vmul.f32 512.0, %v1496_v18  ;;  %vm671_vm3 = vweird.f32 %v1496_v18 }
 0x16b   :  { %v660_v36 = vrot.slane %v659_v23, 4  ;;  %v668_v16 = vsub.f32 1.0, %v667_v47 }
 0x16d   :  { %v661_v32 = vadd.f32 %v660_v36, %v659_v23  ;;  %v669_v9 = vmul.f32 %v1496_v18, %v668_v16 }
 0x16f   :  { %v662_v8 = vrot.slane %v661_v32, 2  ;;  %v670_v27 = vadd.f32 %v1496_v18, %v669_v9 }
 0x171   :  { %v663_v6 = vadd.f32 %v662_v8, %v661_v32  ;;  %v1918_v15 = vsel %vm671_vm3, %v1496_v18, %v670_v27 }
 0x173   :  { %v664_v10 = vrot.slane %v663_v6, 1 }
 0x175   :  { %v665_v11 = vadd.f32 %v664_v10, %v663_v6 }
 0x177   :  { %v1921_v29 = vmul.f32 %v1918_v15, %v665_v11 }
 0x179   :  { %v674_v22 = vsub.f32 %v1646_v34, %v1921_v29  ;;  %v675_v25 = vsub.f32 %v1658_v38, %v1921_v29  ;;  %v676_v23 = vsub.f32 %v1662_v40, %v1921_v29  ;;  %v677_v32 = vsub.f32 %v1670_v43, %v1921_v29 }
 0x17a   :  { %v678_v6 = vsub.f32 %v1676_v46, %v1921_v29  ;;  %v679_v27 = vsub.f32 %v1682_v48, %v1921_v29  ;;  %v680_v10 = vsub.f32 %v1688_v51, %v1921_v29  ;;  %v681_v46 = vsub.f32 %v1694_v54, %v1921_v29 }
 0x17b   :  { %v738_v16 = vmul.f32 %v674_v22, %v674_v22  ;;  %v739_v30 = vmul.f32 %v675_v25, %v675_v25  ;;  %v740_v18 = vmul.f32 %v676_v23, %v676_v23  ;;  %v741_v36 = vmul.f32 %v677_v32, %v677_v32 }
 0x17c   :  { %v742_v11 = vmul.f32 %v678_v6, %v678_v6  ;;  %v743_v23 = vmul.f32 %v679_v27, %v679_v27  ;;  %v682_v32 = vsub.f32 %v1700_v57, %v1921_v29  ;;  %v683_v6 = vsub.f32 %v1706_v60, %v1921_v29 }
 0x17d   :  { %v802_v47 = vsel %vm532_vm2, %v738_v16, 0.0  ;;  %v803_v8 = vsel %vm532_vm2, %v739_v30, 0.0  ;;  %v805_v22 = vsel %vm532_vm2, %v740_v18, 0.0  ;;  %v807_v43 = vsel %vm532_vm2, %v741_v36, 0.0 }
 0x17e   :  { %v804_v9 = vadd.f32 %v803_v8, %v802_v47  ;;  %v744_v16 = vmul.f32 %v680_v10, %v680_v10  ;;  %v809_v30 = vsel %vm532_vm2, %v742_v11, 0.0  ;;  %v745_v8 = vmul.f32 %v681_v46, %v681_v46 }
 0x17f   :  { %v811_v18 = vsel %vm532_vm2, %v743_v23, 0.0  ;;  %v684_v27 = vsub.f32 %v1710_v62, %v1921_v29  ;;  %v685_v10 = vsub.f32 %v1718_v2, %v1921_v29  ;;  %v686_v46 = vsub.f32 %v1734_v12, %v1921_v29 }
 0x180   :  { %v806_v25 = vadd.f32 %v805_v22, %v804_v9  ;;  %v746_v22 = vmul.f32 %v682_v32, %v682_v32  ;;  %v687_v32 = vsub.f32 %v1750_v24, %v1921_v29 }
 0x182   :  { %v808_v48 = vadd.f32 %v807_v43, %v806_v25  ;;  %v813_v43 = vsel %vm532_vm2, %v744_v16, 0.0  ;;  %v747_v25 = vmul.f32 %v683_v6, %v683_v6  ;;  %v817_v23 = vsel %vm532_vm2, %v746_v22, 0.0 }
 0x183   :  { %v688_v6 = vsub.f32 %v1764_v37, %v1921_v29 }
 0x184   :  { %v810_v47 = vadd.f32 %v809_v30, %v808_v48  ;;  %v815_v48 = vsel %vm532_vm2, %v745_v8, 0.0  ;;  %v748_v30 = vmul.f32 %v684_v27, %v684_v27  ;;  %v819_v16 = vsel %vm532_vm2, %v747_v25, 0.0 }
 0x185   :  { %v689_v27 = vsub.f32 %v1774_v13, %v1921_v29 }
 0x186   :  { %v812_v9 = vadd.f32 %v811_v18, %v810_v47  ;;  %v749_v18 = vmul.f32 %v685_v10, %v685_v10  ;;  %v821_v8 = vsel %vm532_vm2, %v748_v30, 0.0  ;;  %v690_v10 = vsub.f32 %v1648_v35, %v1921_v29 }
 0x188   :  { %v814_v36 = vadd.f32 %v813_v43, %v812_v9  ;;  %v750_v43 = vmul.f32 %v686_v46, %v686_v46  ;;  %v823_v22 = vsel %vm532_vm2, %v749_v18, 0.0  ;;  %v691_v46 = vsub.f32 %v1660_v39, %v1921_v29 }
 0x18a   :  { %v816_v11 = vadd.f32 %v815_v48, %v814_v36  ;;  %v751_v48 = vmul.f32 %v687_v32, %v687_v32  ;;  %v825_v25 = vsel %vm532_vm2, %v750_v43, 0.0  ;;  %v692_v32 = vsub.f32 %v1667_v42, %v1921_v29 }
 0x18c   :  { %v818_v47 = vadd.f32 %v817_v23, %v816_v11  ;;  %v752_v23 = vmul.f32 %v688_v6, %v688_v6  ;;  %v827_v30 = vsel %vm532_vm2, %v751_v48, 0.0  ;;  %v693_v6 = vsub.f32 %v1672_v44, %v1921_v29 }
 0x18e   :  { %v820_v9 = vadd.f32 %v819_v16, %v818_v47  ;;  %v753_v16 = vmul.f32 %v689_v27, %v689_v27  ;;  %v829_v18 = vsel %vm532_vm2, %v752_v23, 0.0  ;;  %v694_v27 = vsub.f32 %v1684_v49, %v1921_v29 }
 0x190   :  { %v822_v36 = vadd.f32 %v821_v8, %v820_v9  ;;  %v754_v8 = vmul.f32 %v690_v10, %v690_v10  ;;  %v831_v43 = vsel %vm532_vm2, %v753_v16, 0.0  ;;  %v695_v10 = vsub.f32 %v1690_v52, %v1921_v29 }
 0x192   :  { %v824_v11 = vadd.f32 %v823_v22, %v822_v36  ;;  %v755_v22 = vmul.f32 %v691_v46, %v691_v46  ;;  %v833_v48 = vsel %vm532_vm2, %v754_v8, 0.0  ;;  %v696_v46 = vsub.f32 %v1696_v55, %v1921_v29 }
 0x194   :  { %v826_v47 = vadd.f32 %v825_v25, %v824_v11  ;;  %v756_v25 = vmul.f32 %v692_v32, %v692_v32  ;;  %v835_v23 = vsel %vm532_vm2, %v755_v22, 0.0  ;;  %v697_v32 = vsub.f32 %v1702_v58, %v1921_v29 }
 0x196   :  { %v828_v9 = vadd.f32 %v827_v30, %v826_v47  ;;  %v757_v30 = vmul.f32 %v693_v6, %v693_v6  ;;  %v837_v16 = vsel %vm532_vm2, %v756_v25, 0.0  ;;  %v698_v6 = vsub.f32 %v1712_v63, %v1921_v29 }
 0x198   :  { %v830_v36 = vadd.f32 %v829_v18, %v828_v9  ;;  %v758_v18 = vmul.f32 %v694_v27, %v694_v27  ;;  %v839_v8 = vsel %vm532_vm2, %v757_v30, 0.0  ;;  %v699_v27 = vsub.f32 %v1720_v3, %v1921_v29 }
 0x19a   :  { %v832_v11 = vadd.f32 %v831_v43, %v830_v36  ;;  %v759_v43 = vmul.f32 %v695_v10, %v695_v10  ;;  %v841_v22 = vsel %vm532_vm2, %v758_v18, 0.0  ;;  %v700_v10 = vsub.f32 %v1740_v17, %v1921_v29 }
 0x19c   :  { %v834_v47 = vadd.f32 %v833_v48, %v832_v11  ;;  %v760_v48 = vmul.f32 %v696_v46, %v696_v46  ;;  %v843_v25 = vsel %vm532_vm2, %v759_v43, 0.0  ;;  %v701_v46 = vsub.f32 %v1758_v31, %v1921_v29 }
 0x19e   :  { %v836_v9 = vadd.f32 %v835_v23, %v834_v47  ;;  %v761_v23 = vmul.f32 %v697_v32, %v697_v32  ;;  %v845_v30 = vsel %vm532_vm2, %v760_v48, 0.0  ;;  %v702_v32 = vsub.f32 %v1776_v14, %v1921_v29 }
 0x19f   :  { %v765_v17 = vmul.f32 %v701_v46, %v701_v46  ;;  %v706_v46 = vsub.f32 %v1674_v45, %v1921_v29 }
 0x1a0   :  { %v838_v36 = vadd.f32 %v837_v16, %v836_v9  ;;  %v762_v16 = vmul.f32 %v698_v6, %v698_v6  ;;  %v847_v18 = vsel %vm532_vm2, %v761_v23, 0.0  ;;  %v766_v31 = vmul.f32 %v702_v32, %v702_v32 }
 0x1a1   :  { %v707_v32 = vsub.f32 %v1686_v50, %v1921_v29 }
 0x1a2   :  { %v840_v11 = vadd.f32 %v839_v8, %v838_v36  ;;  %v763_v8 = vmul.f32 %v699_v27, %v699_v27  ;;  %v849_v43 = vsel %vm532_vm2, %v762_v16, 0.0  ;;  %v855_v16 = vsel %vm532_vm2, %v765_v17, 0.0 }
 0x1a3   :  { %v771_v45 = vmul.f32 %v707_v32, %v707_v32  ;;  %v712_v32 = vsub.f32 %v1724_v5, %v1921_v29 }
 0x1a4   :  { %v842_v47 = vadd.f32 %v841_v22, %v840_v11  ;;  %v764_v22 = vmul.f32 %v700_v10, %v700_v10  ;;  %v851_v48 = vsel %vm532_vm2, %v763_v8, 0.0  ;;  %v857_v8 = vsel %vm532_vm2, %v766_v31, 0.0 }
 0x1a6   :  { %v844_v9 = vadd.f32 %v843_v25, %v842_v47  ;;  %v2666_v25 = vld [vmem:[#allocation20_spill] sm:$0xff]  ;;  %v853_v23 = vsel %vm532_vm2, %v764_v22, 0.0 }
 0x1a7   :  { %v703_v6 = vsub.f32 %v2666_v25, %v1921_v29 }
 0x1a8   :  { %v846_v36 = vadd.f32 %v845_v30, %v844_v9  ;;  %v2667_v30 = vld [vmem:[#allocation23_spill] sm:$0xff] }
 0x1a9   :  { %v704_v27 = vsub.f32 %v2667_v30, %v1921_v29  ;;  %v767_v14 = vmul.f32 %v703_v6, %v703_v6  ;;  %v708_v6 = vsub.f32 %v1692_v53, %v1921_v29 }
 0x1aa   :  { %v848_v11 = vadd.f32 %v847_v18, %v846_v36  ;;  %v2668_v18 = vld [vmem:[#allocation25_spill] sm:$0xff] }
 0x1ab   :  { %v705_v10 = vsub.f32 %v2668_v18, %v1921_v29  ;;  %v859_v22 = vsel %vm532_vm2, %v767_v14, 0.0  ;;  %v772_v50 = vmul.f32 %v708_v6, %v708_v6  ;;  %v713_v6 = vsub.f32 %v1744_v19, %v1921_v29 }
 0x1ac   :  { %v850_v47 = vadd.f32 %v849_v43, %v848_v11  ;;  %v768_v43 = vmul.f32 %v704_v27, %v704_v27 }
 0x1ad   :  { %v777_v5 = vmul.f32 %v713_v6, %v713_v6  ;;  %v718_v6 = vsub.f32 %v1828_v26, %v1921_v29 }
 0x1ae   :  { %v852_v9 = vadd.f32 %v851_v48, %v850_v47  ;;  %v769_v48 = vmul.f32 %v705_v10, %v705_v10  ;;  %v861_v17 = vsel %vm532_vm2, %v768_v43, 0.0  ;;  %v867_v43 = vsel %vm532_vm2, %v771_v45, 0.0 }
 0x1b0   :  { %v854_v36 = vadd.f32 %v853_v23, %v852_v9  ;;  %v770_v23 = vmul.f32 %v706_v46, %v706_v46  ;;  %v863_v31 = vsel %vm532_vm2, %v769_v48, 0.0  ;;  %v711_v46 = vsub.f32 %v1714_v0, %v1921_v29 }
 0x1b1   :  { %v869_v48 = vsel %vm532_vm2, %v772_v50, 0.0  ;;  %v776_v0 = vmul.f32 %v712_v32, %v712_v32  ;;  %v717_v32 = vsub.f32 %v1812_v28, %v1921_v29 }
 0x1b2   :  { %v856_v11 = vadd.f32 %v855_v16, %v854_v36  ;;  %v2669_v16 = vld [vmem:[#allocation7_spill] sm:$0xff]  ;;  %v865_v14 = vsel %vm532_vm2, %v770_v23, 0.0 }
 0x1b3   :  { %v709_v27 = vsub.f32 %v2669_v16, %v1921_v29 }
 0x1b4   :  { %v858_v47 = vadd.f32 %v857_v8, %v856_v11  ;;  %v2670_v8 = vld [vmem:[#allocation8_spill] sm:$0xff] }
 0x1b5   :  { %v710_v10 = vsub.f32 %v2670_v8, %v1921_v29 }
 0x1b6   :  { %v860_v9 = vadd.f32 %v859_v22, %v858_v47  ;;  %v773_v22 = vmul.f32 %v709_v27, %v709_v27 }
 0x1b8   :  { %v862_v36 = vadd.f32 %v861_v17, %v860_v9  ;;  %v774_v17 = vmul.f32 %v710_v10, %v710_v10  ;;  %v871_v23 = vsel %vm532_vm2, %v773_v22, 0.0  ;;  %v877_v22 = vsel %vm532_vm2, %v776_v0, 0.0 }
 0x1ba   :  { %v864_v11 = vadd.f32 %v863_v31, %v862_v36  ;;  %v775_v31 = vmul.f32 %v711_v46, %v711_v46  ;;  %v873_v45 = vsel %vm532_vm2, %v774_v17, 0.0  ;;  %v716_v46 = vsub.f32 %v1796_v4, %v1921_v29 }
 0x1bb   :  { %v879_v17 = vsel %vm532_vm2, %v777_v5, 0.0  ;;  %v781_v4 = vmul.f32 %v717_v32, %v717_v32  ;;  %v722_v32 = vsub.f32 %v1708_v61, %v1921_v29 }
 0x1bc   :  { %v866_v47 = vadd.f32 %v865_v14, %v864_v11  ;;  %v2671_v14 = vld [vmem:[#allocation15_spill] sm:$0xff]  ;;  %v875_v50 = vsel %vm532_vm2, %v775_v31, 0.0 }
 0x1bd   :  { %v714_v27 = vsub.f32 %v2671_v14, %v1921_v29 }
 0x1be   :  { %v868_v9 = vadd.f32 %v867_v43, %v866_v47  ;;  %v2672_v43 = vld [vmem:[#allocation18_spill] sm:$0xff] }
 0x1bf   :  { %v715_v10 = vsub.f32 %v2672_v43, %v1921_v29 }
 0x1c0   :  { %v870_v36 = vadd.f32 %v869_v48, %v868_v9  ;;  %v778_v48 = vmul.f32 %v714_v27, %v714_v27 }
 0x1c2   :  { %v872_v11 = vadd.f32 %v871_v23, %v870_v36  ;;  %v779_v23 = vmul.f32 %v715_v10, %v715_v10  ;;  %v881_v31 = vsel %vm532_vm2, %v778_v48, 0.0  ;;  %v720_v10 = vsub.f32 %v1856_v56, %v1921_v29 }
 0x1c3   :  { %v887_v48 = vsel %vm532_vm2, %v781_v4, 0.0 }
 0x1c4   :  { %v874_v47 = vadd.f32 %v873_v45, %v872_v11  ;;  %v780_v45 = vmul.f32 %v716_v46, %v716_v46  ;;  %v883_v0 = vsel %vm532_vm2, %v779_v23, 0.0  ;;  %v721_v46 = vsub.f32 %v1870_v33, %v1921_v29 }
 0x1c5   :  { %v786_v33 = vmul.f32 %v722_v32, %v722_v32  ;;  %v727_v32 = vsub.f32 %v1782_v20, %v1921_v29 }
 0x1c6   :  { %v876_v9 = vadd.f32 %v875_v50, %v874_v47  ;;  %v2673_v50 = vld [vmem:[#allocation27_spill] sm:$0xff]  ;;  %v885_v5 = vsel %vm532_vm2, %v780_v45, 0.0 }
 0x1c7   :  { %v719_v27 = vsub.f32 %v2673_v50, %v1921_v29 }
 0x1c8   :  { %v878_v36 = vadd.f32 %v877_v22, %v876_v9  ;;  %v782_v22 = vmul.f32 %v718_v6, %v718_v6  ;;  %v723_v6 = vsub.f32 %v1716_v1, %v1921_v29 }
 0x1ca   :  { %v880_v11 = vadd.f32 %v879_v17, %v878_v36  ;;  %v783_v17 = vmul.f32 %v719_v27, %v719_v27  ;;  %v889_v23 = vsel %vm532_vm2, %v782_v22, 0.0 }
 0x1cc   :  { %v882_v47 = vadd.f32 %v881_v31, %v880_v11  ;;  %v784_v31 = vmul.f32 %v720_v10, %v720_v10  ;;  %v891_v45 = vsel %vm532_vm2, %v783_v17, 0.0  ;;  %v725_v10 = vsub.f32 %v1746_v21, %v1921_v29 }
 0x1cd   :  { %v897_v17 = vsel %vm532_vm2, %v786_v33, 0.0 }
 0x1ce   :  { %v884_v9 = vadd.f32 %v883_v0, %v882_v47  ;;  %v785_v0 = vmul.f32 %v721_v46, %v721_v46  ;;  %v893_v4 = vsel %vm532_vm2, %v784_v31, 0.0  ;;  %v726_v46 = vsub.f32 %v1766_v41, %v1921_v29 }
 0x1cf   :  { %v791_v41 = vmul.f32 %v727_v32, %v727_v32 }
 0x1d0   :  { %v886_v36 = vadd.f32 %v885_v5, %v884_v9  ;;  %v2674_v5 = vld [vmem:[#allocation11_spill] sm:$0xff]  ;;  %v895_v22 = vsel %vm532_vm2, %v785_v0, 0.0 }
 0x1d1   :  { %v724_v27 = vsub.f32 %v2674_v5, %v1921_v29 }
 0x1d2   :  { %v888_v11 = vadd.f32 %v887_v48, %v886_v36  ;;  %v787_v48 = vmul.f32 %v723_v6, %v723_v6  ;;  %v728_v6 = vsub.f32 %v1798_v7, %v1921_v29 }
 0x1d4   :  { %v890_v47 = vadd.f32 %v889_v23, %v888_v11  ;;  %v788_v23 = vmul.f32 %v724_v27, %v724_v27  ;;  %v899_v31 = vsel %vm532_vm2, %v787_v48, 0.0  ;;  %v792_v20 = vmul.f32 %v728_v6, %v728_v6 }
 0x1d6   :  { %v892_v9 = vadd.f32 %v891_v45, %v890_v47  ;;  %v789_v45 = vmul.f32 %v725_v10, %v725_v10  ;;  %v901_v0 = vsel %vm532_vm2, %v788_v23, 0.0  ;;  %v907_v23 = vsel %vm532_vm2, %v791_v41, 0.0 }
 0x1d8   :  { %v894_v36 = vadd.f32 %v893_v4, %v892_v9  ;;  %v790_v4 = vmul.f32 %v726_v46, %v726_v46  ;;  %v903_v33 = vsel %vm532_vm2, %v789_v45, 0.0  ;;  %v909_v45 = vsel %vm532_vm2, %v792_v20, 0.0 }
 0x1da   :  { %v896_v11 = vadd.f32 %v895_v22, %v894_v36  ;;  %v2675_v22 = vld [vmem:[#allocation24_spill] sm:$0xff]  ;;  %v905_v48 = vsel %vm532_vm2, %v790_v4, 0.0 }
 0x1db   :  { %v729_v27 = vsub.f32 %v2675_v22, %v1921_v29 }
 0x1dc   :  { %v898_v47 = vadd.f32 %v897_v17, %v896_v11  ;;  %v2676_v17 = vld [vmem:[#allocation26_spill] sm:$0xff] }
 0x1dd   :  { %v730_v10 = vsub.f32 %v2676_v17, %v1921_v29  ;;  %v793_v7 = vmul.f32 %v729_v27, %v729_v27 }
 0x1de   :  { %v900_v9 = vadd.f32 %v899_v31, %v898_v47  ;;  %v2677_v31 = vld [vmem:[#allocation28_spill] sm:$0xff] }
 0x1df   :  { %v731_v46 = vsub.f32 %v2677_v31, %v1921_v29  ;;  %v794_v22 = vmul.f32 %v730_v10, %v730_v10  ;;  %v911_v4 = vsel %vm532_vm2, %v793_v7, 0.0 }
 0x1e0   :  { %v902_v36 = vadd.f32 %v901_v0, %v900_v9  ;;  %v2678_v0 = vld [vmem:[#allocation29_spill] sm:$0xff] }
 0x1e1   :  { %v732_v32 = vsub.f32 %v2678_v0, %v1921_v29  ;;  %v795_v17 = vmul.f32 %v731_v46, %v731_v46  ;;  %v913_v41 = vsel %vm532_vm2, %v794_v22, 0.0 }
 0x1e2   :  { %v904_v11 = vadd.f32 %v903_v33, %v902_v36  ;;  %v2679_v33 = vld [vmem:[#allocation31_spill] sm:$0xff] }
 0x1e3   :  { %v733_v6 = vsub.f32 %v2679_v33, %v1921_v29  ;;  %v796_v31 = vmul.f32 %v732_v32, %v732_v32  ;;  %v915_v20 = vsel %vm532_vm2, %v795_v17, 0.0  ;;  %v737_v32 = vsub.f32 %v1914_v59, %v1921_v29 }
 0x1e4   :  { %v906_v47 = vadd.f32 %v905_v48, %v904_v11  ;;  %v2680_v48 = vld [vmem:[#allocation32_spill] sm:$0xff] }
 0x1e5   :  { %v734_v27 = vsub.f32 %v2680_v48, %v1921_v29  ;;  %v797_v0 = vmul.f32 %v733_v6, %v733_v6  ;;  %v917_v7 = vsel %vm532_vm2, %v796_v31, 0.0  ;;  %v801_v17 = vmul.f32 %v737_v32, %v737_v32 }
 0x1e6   :  { %v908_v9 = vadd.f32 %v907_v23, %v906_v47  ;;  %v2681_v23 = vld [vmem:[#allocation33_spill] sm:$0xff] }
 0x1e7   :  { %v735_v10 = vsub.f32 %v2681_v23, %v1921_v29  ;;  %v798_v33 = vmul.f32 %v734_v27, %v734_v27  ;;  %v919_v22 = vsel %vm532_vm2, %v797_v0, 0.0  ;;  %v927_v31 = vsel %vm532_vm2, %v801_v17, 0.0 }
 0x1e8   :  { %v910_v36 = vadd.f32 %v909_v45, %v908_v9  ;;  %v2682_v45 = vld [vmem:[#allocation34_spill] sm:$0xff] }
 0x1e9   :  { %v736_v46 = vsub.f32 %v2682_v45, %v1921_v29  ;;  %v921_v6 = vsel %vm532_vm2, %v798_v33, 0.0 }
 0x1ea   :  { %v912_v11 = vadd.f32 %v911_v4, %v910_v36  ;;  %v799_v4 = vmul.f32 %v735_v10, %v735_v10 }
 0x1ec   :  { %v914_v47 = vadd.f32 %v913_v41, %v912_v11  ;;  %v800_v41 = vmul.f32 %v736_v46, %v736_v46 }
 0x1ee   :  { %v916_v9 = vadd.f32 %v915_v20, %v914_v47  ;;  %v923_v47 = vsel %vm532_vm2, %v799_v4, 0.0  ;;  %v925_v27 = vsel %vm532_vm2, %v800_v41, 0.0 }
 0x1f0   :  { %v918_v36 = vadd.f32 %v917_v7, %v916_v9 }
 0x1f2   :  { %v920_v11 = vadd.f32 %v919_v22, %v918_v36 }
 0x1f4   :  { %v922_v23 = vadd.f32 %v921_v6, %v920_v11 }
 0x1f6   :  { %v924_v20 = vadd.f32 %v923_v47, %v922_v23 }
 0x1f8   :  { %v926_v45 = vadd.f32 %v925_v27, %v924_v20 }
 0x1fa   :  { %v928_v9 = vadd.f32 %v927_v31, %v926_v45  ;;  %v936_v45 = vld [vmem:[%s2580_s2] sm:$0x1] }
 0x1fc   :  { %v929_v7 = vrot.slane %v928_v9, 4 }
 0x1fe   :  { %v930_v48 = vadd.f32 %v929_v7, %v928_v9 }
 0x200   :  { %v931_v10 = vrot.slane %v930_v48, 2 }
 0x202   :  { %v932_v21 = vadd.f32 %v931_v10, %v930_v48 }
 0x204   :  { %v933_v0 = vrot.slane %v932_v21, 1 }
 0x206   :  { %v934_v36 = vadd.f32 %v933_v0, %v932_v21  ;;  %v2683_v0 = vld [vmem:[#allocation2_spill] sm:$0xff] }
 0x208   :  { %v935_v46 = vmul.f32 %v934_v36, %v1918_v15  ;;  %v1016_v15 = vld [vmem:[%s2581_s3] sm:$0x1] }
 0x20a   :  { %v937_v33 = vadd.f32 1e-05, %v935_v46 }
 0x20c   :  { %1497 = vrsqrt.f32 %v937_v33  ;;  %vm944_vm5 = vweird.f32 %v937_v33 }
 0x212   :  { %v1498_v32 = vpop.eup %1497 }
 0x213   :  { %v939_v22 = vmul.f32 %v1498_v32, %v937_v33  ;;  %vm945_vm4 = vweird.f32 %v1498_v32 }
 0x214   :  { %vm946_vm6 = vmor %vm944_vm5, %vm945_vm4 }
 0x215   :  { %v940_v4 = vmul.f32 %v1498_v32, %v939_v22  ;;  %v2685_v22 = vld [vmem:[#allocation5_spill] sm:$0xff] }
 0x217   :  { %v941_v23 = vmul.f32 0.5, %v940_v4 }
 0x219   :  { %v942_v11 = vsub.f32 1.5, %v941_v23 }
 0x21b   :  { %v943_v41 = vmul.f32 %v1498_v32, %v942_v11 }
 0x21d   :  { %v947_v48 = vsel %vm946_vm6, %v1498_v32, %v943_v41 }
 0x21e   :  { %v948_v6 = vmul.f32 %v947_v48, %v936_v45 }
 0x220   :  { %v1017_v21 = vmul.f32 %v948_v6, %v1921_v29  ;;  %v2123_v47 = vperm.slane %v948_v6, 0 }
 0x222   :  { %v1018_v17 = vsub.f32 %v1016_v15, %v1017_v21  ;;  %v1015_v27 = vmul.f32 %v2123_v47, %v1914_v59  ;;  %v952_v9 = vmul.f32 %v2123_v47, %v1646_v34  ;;  %v953_v29 = vmul.f32 %v2123_v47, %v1658_v38  ;;  %v2684_v59 = vld [vmem:[#allocation4_spill] sm:$0xff] }
 0x223   :  { %v954_v7 = vmul.f32 %v2123_v47, %v1662_v40  ;;  %v955_v36 = vmul.f32 %v2123_v47, %v2683_v0  ;;  %v956_v33 = vmul.f32 %v2123_v47, %v2684_v59  ;;  %v957_v34 = vmul.f32 %v2123_v47, %v2685_v22 }
 0x224   :  { %v2125_v20 = vperm.slane %v1018_v17, 0  ;;  %v958_v40 = vmul.f32 %v2123_v47, %v1688_v51  ;;  %v959_v11 = vmul.f32 %v2123_v47, %v1694_v54  ;;  %v960_v48 = vmul.f32 %v2123_v47, %v1700_v57 }
 0x225   :  { %v961_v15 = vmul.f32 %v2123_v47, %v1706_v60  ;;  %v962_v51 = vmul.f32 %v2123_v47, %v1710_v62  ;;  %v963_v54 = vmul.f32 %v2123_v47, %v1718_v2  ;;  %v964_v57 = vmul.f32 %v2123_v47, %v1734_v12 }
 0x226   :  { %v2130_v31 = vadd.f32 %v2125_v20, %v1015_v27  ;;  %v1022_v10 = vadd.f32 %v2125_v20, %v952_v9  ;;  %v1023_v46 = vadd.f32 %v2125_v20, %v953_v29  ;;  %v1024_v32 = vadd.f32 %v2125_v20, %v954_v7 }
 0x227   :  { %v1025_v38 = vadd.f32 %v2125_v20, %v955_v36  ;;  %v1026_v4 = vadd.f32 %v2125_v20, %v956_v33  ;;  %v1027_v41 = vadd.f32 %v2125_v20, %v957_v34  ;;  %v1028_v6 = vadd.f32 %v2125_v20, %v958_v40 }
 0x228   :  { %v1086_v23 = vmax.f32 %v1022_v10, 0.0  ;;  %v1087_v45 = vmax.f32 %v1023_v46, 0.0  ;;  %v1088_v21 = vmax.f32 %v1024_v32, 0.0  ;;  %v1029_v17 = vadd.f32 %v2125_v20, %v959_v11 }
 0x229   :  { %v1089_v27 = vmax.f32 %v1025_v38, 0.0  ;;  %v1030_v9 = vadd.f32 %v2125_v20, %v960_v48  ;;  %v1090_v29 = vmax.f32 %v1026_v4, 0.0  ;;  %v1031_v10 = vadd.f32 %v2125_v20, %v961_v15 }
 0x22a   :  { %v1150_v7 = vpack.c.bf16 %v1086_v23, %v1086_v23  ;;  %v1091_v0 = vmax.f32 %v1027_v41, 0.0  ;;  %v1151_v60 = vpack.c.bf16 %v1087_v45, %v1087_v45  ;;  %v965_v62 = vmul.f32 %v2123_v47, %v1750_v24 }
 0x22b   :  { %v1032_v36 = vadd.f32 %v2125_v20, %v962_v51  ;;  %v1092_v46 = vmax.f32 %v1028_v6, 0.0  ;;  %v1152_v59 = vpack.c.bf16 %v1088_v21, %v1088_v21  ;;  %v1033_v2 = vadd.f32 %v2125_v20, %v963_v54 }
 0x22c   :  { %v1093_v33 = vmax.f32 %v1029_v17, 0.0  ;;  %v1153_v32 = vpack.c.bf16 %v1089_v27, %v1089_v27  ;;  %v966_v22 = vmul.f32 %v2123_v47, %v1764_v37  ;;  %v1034_v12 = vadd.f32 %v2125_v20, %v964_v57  ;;  %1215 = vst.msk [vmem:[%s2582_s4] sm:$0xf] %vm1214_vm7, %v1150_v7 }
 0x22d   :  { %v1094_v34 = vmax.f32 %v1030_v9, 0.0  ;;  %v1154_v38 = vpack.c.bf16 %v1090_v29, %v1090_v29  ;;  %v967_v24 = vmul.f32 %v2123_v47, %v1774_v13  ;;  %v1035_v40 = vadd.f32 %v2125_v20, %v965_v62  ;;  %1216 = vst.msk [vmem:[%s2582_s4 + $0x4] sm:$0xf] %vm1214_vm7, %v1151_v60 }
 0x22e   :  { %v1095_v4 = vmax.f32 %v1031_v10, 0.0  ;;  %v1155_v23 = vpack.c.bf16 %v1091_v0, %v1091_v0  ;;  %v968_v37 = vmul.f32 %v2123_v47, %v1648_v35  ;;  %v1036_v11 = vadd.f32 %v2125_v20, %v966_v22  ;;  %1217 = vst.msk [vmem:[%s2582_s4 + $0x8] sm:$0xf] %vm1214_vm7, %v1152_v59 }
 0x22f   :  { %v1096_v41 = vmax.f32 %v1032_v36, 0.0  ;;  %v1156_v45 = vpack.c.bf16 %v1092_v46, %v1092_v46  ;;  %v969_v13 = vmul.f32 %v2123_v47, %v1660_v39  ;;  %v1037_v48 = vadd.f32 %v2125_v20, %v967_v24  ;;  %1218 = vst.msk [vmem:[%s2582_s4 + $0xc] sm:$0xf] %vm1214_vm7, %v1153_v32 }
 0x230   :  { %v1097_v6 = vmax.f32 %v1033_v2, 0.0  ;;  %v1157_v21 = vpack.c.bf16 %v1093_v33, %v1093_v33  ;;  %v970_v35 = vmul.f32 %v2123_v47, %v1667_v42  ;;  %v1038_v15 = vadd.f32 %v2125_v20, %v968_v37  ;;  %1219 = vst.msk [vmem:[%s2582_s4 + $0x10] sm:$0xf] %vm1214_vm7, %v1154_v38 }
 0x231   :  { %v1098_v51 = vmax.f32 %v1034_v12, 0.0  ;;  %v1158_v17 = vpack.c.bf16 %v1094_v34, %v1094_v34  ;;  %v971_v39 = vmul.f32 %v2123_v47, %v1672_v44  ;;  %v1039_v27 = vadd.f32 %v2125_v20, %v969_v13  ;;  %1220 = vst.msk [vmem:[%s2582_s4 + $0x14] sm:$0xf] %vm1214_vm7, %v1155_v23 }
 0x232   :  { %v1099_v54 = vmax.f32 %v1035_v40, 0.0  ;;  %v1159_v9 = vpack.c.bf16 %v1095_v4, %v1095_v4  ;;  %v972_v42 = vmul.f32 %v2123_v47, %v1684_v49  ;;  %v1040_v29 = vadd.f32 %v2125_v20, %v970_v35  ;;  %1221 = vst.msk [vmem:[%s2582_s4 + $0x18] sm:$0xf] %vm1214_vm7, %v1156_v45 }
 0x233   :  { %v1100_v7 = vmax.f32 %v1036_v11, 0.0  ;;  %v1160_v57 = vpack.c.bf16 %v1096_v41, %v1096_v41  ;;  %v973_v44 = vmul.f32 %v2123_v47, %v1690_v52  ;;  %v1041_v10 = vadd.f32 %v2125_v20, %v971_v39  ;;  %1222 = vst.msk [vmem:[%s2582_s4 + $0x1c] sm:$0xf] %vm1214_vm7, %v1157_v21 }
 0x234   :  { %v1101_v0 = vmax.f32 %v1037_v48, 0.0  ;;  %v1161_v60 = vpack.c.bf16 %v1097_v6, %v1097_v6  ;;  %v974_v49 = vmul.f32 %v2123_v47, %v1696_v55  ;;  %v1042_v62 = vadd.f32 %v2125_v20, %v972_v42  ;;  %1223 = vst.msk [vmem:[%s2582_s4 + $0x20] sm:$0xf] %vm1214_vm7, %v1158_v17  ;;  %v2688_v48 = vld [vmem:[#allocation17_spill] sm:$0xff] }
 0x235   :  { %v1102_v36 = vmax.f32 %v1038_v15, 0.0  ;;  %v1162_v46 = vpack.c.bf16 %v1098_v51, %v1098_v51  ;;  %v975_v52 = vmul.f32 %v2123_v47, %v1702_v58  ;;  %v1043_v59 = vadd.f32 %v2125_v20, %v973_v44  ;;  %1224 = vst.msk [vmem:[%s2582_s4 + $0x24] sm:$0xf] %vm1214_vm7, %v1159_v9 }
 0x236   :  { %v1103_v2 = vmax.f32 %v1039_v27, 0.0  ;;  %v1163_v33 = vpack.c.bf16 %v1099_v54, %v1099_v54  ;;  %v976_v55 = vmul.f32 %v2123_v47, %v1712_v63  ;;  %v1044_v32 = vadd.f32 %v2125_v20, %v974_v49  ;;  %1225 = vst.msk [vmem:[%s2582_s4 + $0x28] sm:$0xf] %vm1214_vm7, %v1160_v57  ;;  %v2686_v63 = vld [vmem:[#allocation12_spill] sm:$0xff] }
 0x237   :  { %v1104_v22 = vmax.f32 %v1040_v29, 0.0  ;;  %v1164_v12 = vpack.c.bf16 %v1100_v7, %v1100_v7  ;;  %v977_v58 = vmul.f32 %v2123_v47, %v1720_v3  ;;  %v1045_v34 = vadd.f32 %v2125_v20, %v975_v52  ;;  %1226 = vst.msk [vmem:[%s2582_s4 + $0x2c] sm:$0xf] %vm1214_vm7, %v1161_v60  ;;  %v2687_v3 = vld [vmem:[#allocation14_spill] sm:$0xff] }
 0x238   :  { %v1105_v38 = vmax.f32 %v1041_v10, 0.0  ;;  %v1165_v24 = vpack.c.bf16 %v1101_v0, %v1101_v0  ;;  %v978_v40 = vmul.f32 %v2123_v47, %v2686_v63  ;;  %v1046_v4 = vadd.f32 %v2125_v20, %v976_v55  ;;  %1227 = vst.msk [vmem:[%s2582_s4 + $0x30] sm:$0xf] %vm1214_vm7, %v1162_v46 }
 0x239   :  { %v1106_v23 = vmax.f32 %v1042_v62, 0.0  ;;  %v1166_v37 = vpack.c.bf16 %v1102_v36, %v1102_v36  ;;  %v979_v11 = vmul.f32 %v2123_v47, %v2687_v3  ;;  %v1047_v41 = vadd.f32 %v2125_v20, %v977_v58  ;;  %1228 = vst.msk [vmem:[%s2582_s4 + $0x34] sm:$0xf] %vm1214_vm7, %v1163_v33 }
 0x23a   :  { %v1107_v45 = vmax.f32 %v1043_v59, 0.0  ;;  %v1167_v13 = vpack.c.bf16 %v1103_v2, %v1103_v2  ;;  %v980_v6 = vmul.f32 %v2123_v47, %v2688_v48  ;;  %v1048_v21 = vadd.f32 %v2125_v20, %v978_v40  ;;  %1229 = vst.msk [vmem:[%s2582_s4 + $0x38] sm:$0xf] %vm1214_vm7, %v1164_v12 }
 0x23b   :  { %v1108_v35 = vmax.f32 %v1044_v32, 0.0  ;;  %v1168_v15 = vpack.c.bf16 %v1104_v22, %v1104_v22  ;;  %v981_v51 = vmul.f32 %v2123_v47, %v2666_v25  ;;  %v1049_v17 = vadd.f32 %v2125_v20, %v979_v11  ;;  %1230 = vst.msk [vmem:[%s2582_s4 + $0x3c] sm:$0xf] %vm1214_vm7, %v1165_v24 }
 0x23c   :  { %v1109_v39 = vmax.f32 %v1045_v34, 0.0  ;;  %v1169_v27 = vpack.c.bf16 %v1105_v38, %v1105_v38  ;;  %v982_v54 = vmul.f32 %v2123_v47, %v2667_v30  ;;  %v1050_v9 = vadd.f32 %v2125_v20, %v980_v6  ;;  %1231 = vst.msk [vmem:[%s2582_s4 + $0x40] sm:$0xf] %vm1214_vm7, %v1166_v37  ;;  %v2689_v30 = vld [vmem:[#allocation3_spill] sm:$0xff] }
 0x23d   :  { %v1110_v42 = vmax.f32 %v1046_v4, 0.0  ;;  %v1170_v29 = vpack.c.bf16 %v1106_v23, %v1106_v23  ;;  %v983_v25 = vmul.f32 %v2123_v47, %v2668_v18  ;;  %v1051_v7 = vadd.f32 %v2125_v20, %v981_v51  ;;  %1232 = vst.msk [vmem:[%s2582_s4 + $0x44] sm:$0xf] %vm1214_vm7, %v1167_v13  ;;  %v2690_v18 = vld [vmem:[#allocation6_spill] sm:$0xff] }
 0x23e   :  { %v1111_v57 = vmax.f32 %v1047_v41, 0.0  ;;  %v1171_v44 = vpack.c.bf16 %v1107_v45, %v1107_v45  ;;  %v984_v10 = vmul.f32 %v2123_v47, %v2689_v30  ;;  %v1052_v0 = vadd.f32 %v2125_v20, %v982_v54  ;;  %1233 = vst.msk [vmem:[%s2582_s4 + $0x48] sm:$0xf] %vm1214_vm7, %v1168_v15 }
 0x23f   :  { %v1112_v60 = vmax.f32 %v1048_v21, 0.0  ;;  %v1172_v49 = vpack.c.bf16 %v1108_v35, %v1108_v35  ;;  %v985_v62 = vmul.f32 %v2123_v47, %v2690_v18  ;;  %v1053_v36 = vadd.f32 %v2125_v20, %v983_v25  ;;  %1234 = vst.msk [vmem:[%s2582_s4 + $0x4c] sm:$0xf] %vm1214_vm7, %v1169_v27 }
 0x240   :  { %v1113_v46 = vmax.f32 %v1049_v17, 0.0  ;;  %v1173_v52 = vpack.c.bf16 %v1109_v39, %v1109_v39  ;;  %v986_v59 = vmul.f32 %v2123_v47, %v1692_v53  ;;  %v1054_v2 = vadd.f32 %v2125_v20, %v984_v10  ;;  %1235 = vst.msk [vmem:[%s2582_s4 + $0x50] sm:$0xf] %vm1214_vm7, %v1170_v29 }
 0x241   :  { %v1114_v33 = vmax.f32 %v1050_v9, 0.0  ;;  %v1174_v55 = vpack.c.bf16 %v1110_v42, %v1110_v42  ;;  %v987_v32 = vmul.f32 %v2123_v47, %v2669_v16  ;;  %v1055_v22 = vadd.f32 %v2125_v20, %v985_v62  ;;  %1236 = vst.msk [vmem:[%s2582_s4 + $0x54] sm:$0xf] %vm1214_vm7, %v1171_v44  ;;  %v2691_v16 = vld [vmem:[#allocation9_spill] sm:$0xff] }
 0x242   :  { %v1115_v12 = vmax.f32 %v1051_v7, 0.0  ;;  %v1175_v58 = vpack.c.bf16 %v1111_v57, %v1111_v57  ;;  %v988_v53 = vmul.f32 %v2123_v47, %v2670_v8  ;;  %v1056_v34 = vadd.f32 %v2125_v20, %v986_v59  ;;  %1237 = vst.msk [vmem:[%s2582_s4 + $0x58] sm:$0xf] %vm1214_vm7, %v1172_v49  ;;  %v2692_v8 = vld [vmem:[#allocation10_spill] sm:$0xff] }
 0x243   :  { %v1116_v38 = vmax.f32 %v1052_v0, 0.0  ;;  %v1176_v24 = vpack.c.bf16 %v1112_v60, %v1112_v60  ;;  %v989_v63 = vmul.f32 %v2123_v47, %v2691_v16  ;;  %v1057_v40 = vadd.f32 %v2125_v20, %v987_v32  ;;  %1238 = vst.msk [vmem:[%s2582_s4 + $0x5c] sm:$0xf] %vm1214_vm7, %v1173_v52 }
 0x244   :  { %v1117_v4 = vmax.f32 %v1053_v36, 0.0  ;;  %v1177_v23 = vpack.c.bf16 %v1113_v46, %v1113_v46  ;;  %v990_v37 = vmul.f32 %v2123_v47, %v2692_v8  ;;  %v1058_v3 = vadd.f32 %v2125_v20, %v988_v53  ;;  %1239 = vst.msk [vmem:[%s2582_s4 + $0x60] sm:$0xf] %vm1214_vm7, %v1174_v55 }
 0x245   :  { %v1118_v11 = vmax.f32 %v1054_v2, 0.0  ;;  %v1178_v41 = vpack.c.bf16 %v1114_v33, %v1114_v33  ;;  %v991_v45 = vmul.f32 %v2123_v47, %v1744_v19  ;;  %v1059_v13 = vadd.f32 %v2125_v20, %v989_v63  ;;  %1240 = vst.msk [vmem:[%s2582_s4 + $0x64] sm:$0xf] %vm1214_vm7, %v1175_v58 }
 0x246   :  { %v1119_v48 = vmax.f32 %v1055_v22, 0.0  ;;  %v1179_v6 = vpack.c.bf16 %v1115_v12, %v1115_v12  ;;  %v992_v21 = vmul.f32 %v2123_v47, %v2671_v14  ;;  %v1060_v35 = vadd.f32 %v2125_v20, %v990_v37  ;;  %1241 = vst.msk [vmem:[%s2582_s4 + $0x68] sm:$0xf] %vm1214_vm7, %v1176_v24  ;;  %v2693_v14 = vld [vmem:[#allocation21_spill] sm:$0xff] }
 0x247   :  { %v1120_v15 = vmax.f32 %v1056_v34, 0.0  ;;  %v1180_v51 = vpack.c.bf16 %v1116_v38, %v1116_v38  ;;  %v993_v19 = vmul.f32 %v2123_v47, %v2672_v43  ;;  %v1061_v17 = vadd.f32 %v2125_v20, %v991_v45  ;;  %1242 = vst.msk [vmem:[%s2582_s4 + $0x6c] sm:$0xf] %vm1214_vm7, %v1177_v23 }
 0x248   :  { %v1121_v39 = vmax.f32 %v1057_v40, 0.0  ;;  %v1181_v27 = vpack.c.bf16 %v1117_v4, %v1117_v4  ;;  %v994_v54 = vmul.f32 %v2123_v47, %v2693_v14  ;;  %v1062_v9 = vadd.f32 %v2125_v20, %v992_v21  ;;  %1243 = vst.msk [vmem:[%s2582_s4 + $0x70] sm:$0xf] %vm1214_vm7, %v1178_v41  ;;  %v2697_v41 = vld [vmem:[#allocation19_spill] sm:$0xff]  ;;  %v2698_v21 = vld [vmem:[#allocation22_spill] sm:$0xff] }
 0x249   :  { %v1122_v42 = vmax.f32 %v1058_v3, 0.0  ;;  %v1182_v29 = vpack.c.bf16 %v1118_v11, %v1118_v11  ;;  %v995_v43 = vmul.f32 %v2123_v47, %v1812_v28  ;;  %v1063_v25 = vadd.f32 %v2125_v20, %v993_v19  ;;  %1244 = vst.msk [vmem:[%s2582_s4 + $0x74] sm:$0xf] %vm1214_vm7, %v1179_v6 }
 0x24a   :  { %v1123_v7 = vmax.f32 %v1059_v13, 0.0  ;;  %v1183_v57 = vpack.c.bf16 %v1119_v48, %v1119_v48  ;;  %v996_v44 = vmul.f32 %v2123_v47, %v1828_v26  ;;  %v1064_v30 = vadd.f32 %v2125_v20, %v994_v54  ;;  %1245 = vst.msk [vmem:[%s2582_s4 + $0x78] sm:$0xf] %vm1214_vm7, %v1180_v51 }
 0x24b   :  { %v1124_v10 = vmax.f32 %v1060_v35, 0.0  ;;  %v1184_v0 = vpack.c.bf16 %v1120_v15, %v1120_v15  ;;  %v997_v28 = vmul.f32 %v2123_v47, %v2673_v50  ;;  %v1065_v60 = vadd.f32 %v2125_v20, %v995_v43  ;;  %1246 = vst.msk [vmem:[%s2582_s4 + $0x7c] sm:$0xf] %vm1214_vm7, %v1181_v27  ;;  %v2694_v50 = vld [vmem:[#allocation30_spill] sm:$0xff] }
 0x24c   :  { %v1125_v49 = vmax.f32 %v1061_v17, 0.0  ;;  %v1185_v18 = vpack.c.bf16 %v1121_v39, %v1121_v39  ;;  %v998_v26 = vmul.f32 %v2123_v47, %v1856_v56  ;;  %v1066_v62 = vadd.f32 %v2125_v20, %v996_v44  ;;  %1247 = vst.msk [vmem:[%s2582_s4 + $0x80] sm:$0xf] %vm1214_vm7, %v1182_v29  ;;  %v2699_v17 = vld [vmem:[#allocation24_spill] sm:$0xff] }
 0x24d   :  { %v1126_v36 = vmax.f32 %v1062_v9, 0.0  ;;  %v1186_v46 = vpack.c.bf16 %v1122_v42, %v1122_v42  ;;  %v999_v52 = vmul.f32 %v2123_v47, %v2694_v50  ;;  %v1067_v59 = vadd.f32 %v2125_v20, %v997_v28  ;;  %1248 = vst.msk [vmem:[%s2582_s4 + $0x84] sm:$0xf] %vm1214_vm7, %v1183_v57  ;;  %v2700_v9 = vld [vmem:[#allocation26_spill] sm:$0xff] }
 0x24e   :  { %v1127_v2 = vmax.f32 %v1063_v25, 0.0  ;;  %v1187_v33 = vpack.c.bf16 %v1123_v7, %v1123_v7  ;;  %v1000_v56 = vmul.f32 %v2123_v47, %v1708_v61  ;;  %v1068_v55 = vadd.f32 %v2125_v20, %v998_v26  ;;  %1249 = vst.msk [vmem:[%s2582_s4 + $0x88] sm:$0xf] %vm1214_vm7, %v1184_v0  ;;  %v2701_v7 = vld [vmem:[#allocation28_spill] sm:$0xff]  ;;  %v2702_v0 = vld [vmem:[#allocation29_spill] sm:$0xff]  ;;  %v2703_v26 = vld [vmem:[#allocation31_spill] sm:$0xff] }
 0x24f   :  { %v1128_v32 = vmax.f32 %v1064_v30, 0.0  ;;  %v1188_v22 = vpack.c.bf16 %v1124_v10, %v1124_v10  ;;  %v1001_v12 = vmul.f32 %v2123_v47, %v1716_v1  ;;  %v1069_v58 = vadd.f32 %v2125_v20, %v999_v52  ;;  %1250 = vst.msk [vmem:[%s2582_s4 + $0x8c] sm:$0xf] %vm1214_vm7, %v1185_v18  ;;  %v2695_v1 = vld [vmem:[#allocation13_spill] sm:$0xff]  ;;  %v2704_v52 = vld [vmem:[#allocation32_spill] sm:$0xff] }
 0x250   :  { %v1129_v53 = vmax.f32 %v1065_v60, 0.0  ;;  %v1189_v34 = vpack.c.bf16 %v1125_v49, %v1125_v49  ;;  %v1002_v61 = vmul.f32 %v2123_v47, %v2674_v5  ;;  %v1070_v38 = vadd.f32 %v2125_v20, %v1000_v56  ;;  %1251 = vst.msk [vmem:[%s2582_s4 + $0x90] sm:$0xf] %vm1214_vm7, %v1186_v46  ;;  %v2696_v5 = vld [vmem:[#allocation16_spill] sm:$0xff] }
 0x251   :  { %v1130_v24 = vmax.f32 %v1066_v62, 0.0  ;;  %v1190_v16 = vpack.c.bf16 %v1126_v36, %v1126_v36  ;;  %v1003_v63 = vmul.f32 %v2123_v47, %v2695_v1  ;;  %v1071_v40 = vadd.f32 %v2125_v20, %v1001_v12  ;;  %1252 = vst.msk [vmem:[%s2582_s4 + $0x94] sm:$0xf] %vm1214_vm7, %v1187_v33 }
 0x252   :  { %v1131_v4 = vmax.f32 %v1067_v59, 0.0  ;;  %v1191_v23 = vpack.c.bf16 %v1127_v2, %v1127_v2  ;;  %v1004_v8 = vmul.f32 %v2123_v47, %v2696_v5  ;;  %v1072_v37 = vadd.f32 %v2125_v20, %v1002_v61  ;;  %1253 = vst.msk [vmem:[%s2582_s4 + $0x98] sm:$0xf] %vm1214_vm7, %v1188_v22 }
 0x253   :  { %v1132_v3 = vmax.f32 %v1068_v55, 0.0  ;;  %v1192_v11 = vpack.c.bf16 %v1128_v32, %v1128_v32  ;;  %v1005_v45 = vmul.f32 %v2123_v47, %v2697_v41  ;;  %v1073_v13 = vadd.f32 %v2125_v20, %v1003_v63  ;;  %1254 = vst.msk [vmem:[%s2582_s4 + $0x9c] sm:$0xf] %vm1214_vm7, %v1189_v34  ;;  %v2705_v55 = vld [vmem:[#allocation33_spill] sm:$0xff] }
 0x254   :  { %v1133_v48 = vmax.f32 %v1069_v58, 0.0  ;;  %v1193_v6 = vpack.c.bf16 %v1129_v53, %v1129_v53  ;;  %v1006_v35 = vmul.f32 %v2123_v47, %v2698_v21  ;;  %v1074_v15 = vadd.f32 %v2125_v20, %v1004_v8  ;;  %1255 = vst.msk [vmem:[%s2582_s4 + $0xa0] sm:$0xf] %vm1214_vm7, %v1190_v16  ;;  %v2706_v53 = vld [vmem:[#allocation34_spill] sm:$0xff] }
 0x255   :  { %v1134_v51 = vmax.f32 %v1070_v38, 0.0  ;;  %v1194_v19 = vpack.c.bf16 %v1130_v24, %v1130_v24  ;;  %v1007_v39 = vmul.f32 %v2123_v47, %v2699_v17  ;;  %v1075_v27 = vadd.f32 %v2125_v20, %v1005_v45  ;;  %1256 = vst.msk [vmem:[%s2582_s4 + $0xa4] sm:$0xf] %vm1214_vm7, %v1191_v23 }
 0x256   :  { %v1135_v14 = vmax.f32 %v1071_v40, 0.0  ;;  %v1195_v54 = vpack.c.bf16 %v1131_v4, %v1131_v4  ;;  %v1008_v42 = vmul.f32 %v2123_v47, %v2700_v9  ;;  %v1076_v29 = vadd.f32 %v2125_v20, %v1006_v35  ;;  %1257 = vst.msk [vmem:[%s2582_s4 + $0xa8] sm:$0xf] %vm1214_vm7, %v1192_v11 }
 0x257   :  { %v1136_v43 = vmax.f32 %v1072_v37, 0.0  ;;  %v1196_v25 = vpack.c.bf16 %v1132_v3, %v1132_v3  ;;  %v1009_v57 = vmul.f32 %v2123_v47, %v2701_v7  ;;  %v1077_v44 = vadd.f32 %v2125_v20, %v1007_v39  ;;  %1258 = vst.msk [vmem:[%s2582_s4 + $0xac] sm:$0xf] %vm1214_vm7, %v1193_v6 }
 0x258   :  { %v1137_v30 = vmax.f32 %v1073_v13, 0.0  ;;  %v1197_v10 = vpack.c.bf16 %v1133_v48, %v1133_v48  ;;  %v1010_v28 = vmul.f32 %v2123_v47, %v2702_v0  ;;  %v1078_v60 = vadd.f32 %v2125_v20, %v1008_v42  ;;  %1259 = vst.msk [vmem:[%s2582_s4 + $0xb0] sm:$0xf] %vm1214_vm7, %v1194_v19 }
 0x259   :  { %v1138_v49 = vmax.f32 %v1074_v15, 0.0  ;;  %v1198_v18 = vpack.c.bf16 %v1134_v51, %v1134_v51  ;;  %v1011_v62 = vmul.f32 %v2123_v47, %v2703_v26  ;;  %v1079_v36 = vadd.f32 %v2125_v20, %v1009_v57  ;;  %1260 = vst.msk [vmem:[%s2582_s4 + $0xb4] sm:$0xf] %vm1214_vm7, %v1195_v54 }
 0x25a   :  { %v1139_v46 = vmax.f32 %v1075_v27, 0.0  ;;  %v1199_v50 = vpack.c.bf16 %v1135_v14, %v1135_v14  ;;  %v1012_v59 = vmul.f32 %v2123_v47, %v2704_v52  ;;  %v1080_v2 = vadd.f32 %v2125_v20, %v1010_v28  ;;  %1261 = vst.msk [vmem:[%s2582_s4 + $0xb8] sm:$0xf] %vm1214_vm7, %v1196_v25 }
 0x25b   :  { %v1140_v33 = vmax.f32 %v1076_v29, 0.0  ;;  %v1200_v56 = vpack.c.bf16 %v1136_v43, %v1136_v43  ;;  %v1013_v32 = vmul.f32 %v2123_v47, %v2705_v55  ;;  %v1081_v22 = vadd.f32 %v2125_v20, %v1011_v62  ;;  %1262 = vst.msk [vmem:[%s2582_s4 + $0xbc] sm:$0xf] %vm1214_vm7, %v1197_v10 }
 0x25c   :  { %v1141_v12 = vmax.f32 %v1077_v44, 0.0  ;;  %v1201_v58 = vpack.c.bf16 %v1137_v30, %v1137_v30  ;;  %v1014_v34 = vmul.f32 %v2123_v47, %v2706_v53  ;;  %v1082_v61 = vadd.f32 %v2125_v20, %v1012_v59  ;;  %1263 = vst.msk [vmem:[%s2582_s4 + $0xc0] sm:$0xf] %vm1214_vm7, %v1198_v18 }
 0x25d   :  { %v1142_v38 = vmax.f32 %v1078_v60, 0.0  ;;  %v1202_v24 = vpack.c.bf16 %v1138_v49, %v1138_v49  ;;  %v1083_v16 = vadd.f32 %v2125_v20, %v1013_v32  ;;  %v1143_v1 = vmax.f32 %v1079_v36, 0.0  ;;  %1264 = vst.msk [vmem:[%s2582_s4 + $0xc4] sm:$0xf] %vm1214_vm7, %v1199_v50 }
 0x25e   :  { %v1203_v63 = vpack.c.bf16 %v1139_v46, %v1139_v46  ;;  %v1084_v47 = vadd.f32 %v2125_v20, %v1014_v34  ;;  %v1144_v40 = vmax.f32 %v1080_v2, 0.0  ;;  %v1204_v4 = vpack.c.bf16 %v1140_v33, %v1140_v33  ;;  %1265 = vst.msk [vmem:[%s2582_s4 + $0xc8] sm:$0xf] %vm1214_vm7, %v1200_v56 }
 0x25f   :  { %v1145_v23 = vmax.f32 %v1081_v22, 0.0  ;;  %v1205_v5 = vpack.c.bf16 %v1141_v12, %v1141_v12  ;;  %1266 = vst.msk [vmem:[%s2582_s4 + $0xcc] sm:$0xf] %vm1214_vm7, %v1201_v58  ;;  %v1146_v8 = vmax.f32 %v1082_v61, 0.0  ;;  %v1206_v37 = vpack.c.bf16 %v1142_v38, %v1142_v38 }
 0x260   :  { %1267 = vst.msk [vmem:[%s2582_s4 + $0xd0] sm:$0xf] %vm1214_vm7, %v1202_v24  ;;  %v1147_v20 = vmax.f32 %v1083_v16, 0.0  ;;  %v1207_v3 = vpack.c.bf16 %v1143_v1, %v1143_v1  ;;  %v1148_v11 = vmax.f32 %v1084_v47, 0.0  ;;  %v1208_v41 = vpack.c.bf16 %v1144_v40, %v1144_v40 }
 0x261   :  { %1268 = vst.msk [vmem:[%s2582_s4 + $0xd4] sm:$0xf] %vm1214_vm7, %v1203_v63  ;;  %v1149_v45 = vmax.f32 %v2130_v31, 0.0  ;;  %v1209_v13 = vpack.c.bf16 %v1145_v23, %v1145_v23  ;;  %v1210_v48 = vpack.c.bf16 %v1146_v8, %v1146_v8 }
 0x262   :  { %1269 = vst.msk [vmem:[%s2582_s4 + $0xd8] sm:$0xf] %vm1214_vm7, %v1204_v4  ;;  %v1211_v6 = vpack.c.bf16 %v1147_v20, %v1147_v20  ;;  %v1212_v21 = vpack.c.bf16 %v1148_v11, %v1148_v11 }
 0x263   :  { %1270 = vst.msk [vmem:[%s2582_s4 + $0xdc] sm:$0xf] %vm1214_vm7, %v1205_v5  ;;  %v1213_v31 = vpack.c.bf16 %v1149_v45, %v1149_v45 }
 0x264   :  { %1271 = vst.msk [vmem:[%s2582_s4 + $0xe0] sm:$0xf] %vm1214_vm7, %v1206_v37 }
 0x265   :  { %1272 = vst.msk [vmem:[%s2582_s4 + $0xe4] sm:$0xf] %vm1214_vm7, %v1207_v3 }
 0x266   :  { %1273 = vst.msk [vmem:[%s2582_s4 + $0xe8] sm:$0xf] %vm1214_vm7, %v1208_v41 }
 0x267   :  { %1274 = vst.msk [vmem:[%s2582_s4 + $0xec] sm:$0xf] %vm1214_vm7, %v1209_v13 }
 0x268   :  { %1275 = vst.msk [vmem:[%s2582_s4 + $0xf0] sm:$0xf] %vm1214_vm7, %v1210_v48 }
 0x269   :  { %1276 = vst.msk [vmem:[%s2582_s4 + $0xf4] sm:$0xf] %vm1214_vm7, %v1211_v6 }
 0x26a   :  { %1277 = vst.msk [vmem:[%s2582_s4 + $0xf8] sm:$0xf] %vm1214_vm7, %v1212_v21 }
 0x26b   :  { %1278 = vst.msk [vmem:[%s2582_s4 + $0xfc] sm:$0xf] %vm1214_vm7, %v1213_v31 }

// kernel: densenet_forward.22
= control target key start
LH: loop header
LB: loop body
LE: loop exit
PB: predicated region body
PF: predicated region fallthrough
CT: control target
= control target key end

     0   :  { %vm56_vm0 = vcmask 261120   ;;  %v608_v39 = vmov 128.0   ;;  %vm339_vm5 = vcmask 523264   ;;  %s1026_s3 = inlined_call_operand.vmem [shape: bf16[32,64], index: 3, kind: input, shape index: {}]   ;;  %s1027_s0 = inlined_call_operand.vmem [shape: bf16[128,32], index: 0, kind: input, shape index: {}]   ;;  %s1028_s1 = inlined_call_operand.vmem [shape: f32[1,32], index: 1, kind: input, shape index: {}]   ;;  %s1029_s2 = inlined_call_operand.vmem [shape: f32[1,32], index: 2, kind: input, shape index: {}]   ;;  %s1030_s4 = inlined_call_operand.vmem [shape: f32[1,64], index: 4, kind: input, shape index: {}]   ;;  %s1031_s5 = inlined_call_operand.vmem [shape: f32[1,64], index: 5, kind: input, shape index: {}]   ;;  %s1032_s6 = inlined_call_operand.vmem [shape: f32[128,64], index: 6, kind: output, shape index: {}]  }
   0x1   :  { %v555_v0 = vld [vmem:[%s1026_s3 + $0x8] sm:$0xff]  ;;  %v557_v1 = vld [vmem:[%s1027_s0] sm:$0xff]   ;;  %v589_v7 = vld [vmem:[%s1027_s0 + $0x10] sm:$0xff]   ;;  %602 = vrcp.f32 %v608_v39 }
   0x2   :  { %v650_v2 = vunpack.c.l.bf16 %v557_v1  ;;  %v652_v3 = vunpack.c.h.bf16 %v557_v1  ;;  %v588_v4 = vld [vmem:[%s1027_s0 + $0x8] sm:$0xff]   ;;  %296 = vmatpush.bf16.msra.mxu0 %v555_v0  ;;  %595 = vmatpush.bf16.msra.mxu1 %v555_v0  ;;  %v554_v5 = vld [vmem:[%s1026_s3] sm:$0xff]  ;;  %v667_v9 = vunpack.c.l.bf16 %v589_v7  ;;  %v590_v12 = vld [vmem:[%s1027_s0 + $0x18] sm:$0xff]   ;;  %v678_v15 = vunpack.c.h.bf16 %v589_v7 }
   0x3   :  { %v660_v6 = vunpack.c.l.bf16 %v588_v4  ;;  %596 = vmatpush.bf16.msra.mxu2 %v555_v0  ;;  %v665_v8 = vunpack.c.h.bf16 %v588_v4  ;;  %597 = vmatpush.bf16.msra.mxu3 %v555_v0  ;;  %v682_v18 = vunpack.c.l.bf16 %v590_v12  ;;  %v591_v20 = vld [vmem:[%s1027_s0 + $0x20] sm:$0xff]   ;;  %v689_v22 = vunpack.c.h.bf16 %v590_v12  ;;  %v592_v27 = vld [vmem:[%s1027_s0 + $0x28] sm:$0xff]   ;;  %v593_v34 = vld [vmem:[%s1027_s0 + $0x30] sm:$0xff]  }
   0x4   :  { %v57_v10 = vsel %vm56_vm0, %v650_v2, 0.0  ;;  %v58_v11 = vsel %vm56_vm0, %v652_v3, 0.0  ;;  %v64_v19 = vsel %vm56_vm0, %v667_v9, 0.0  ;;  %v66_v23 = vsel %vm56_vm0, %v678_v15, 0.0  ;;  %v594_v42 = vld [vmem:[%s1027_s0 + $0x38] sm:$0xff]  }
   0x5   :  { %v59_v13 = vadd.f32 %v58_v11, %v57_v10  ;;  %v60_v14 = vsel %vm56_vm0, %v660_v6, 0.0  ;;  %v62_v16 = vsel %vm56_vm0, %v665_v8, 0.0  ;;  %v693_v25 = vunpack.c.l.bf16 %v591_v20 }
   0x6   :  { %297 = vmatpush.bf16.msra.mxu0 %v554_v5  ;;  %598 = vmatpush.bf16.msra.mxu1 %v554_v5  ;;  %v68_v26 = vsel %vm56_vm0, %v682_v18, 0.0  ;;  %v700_v29 = vunpack.c.h.bf16 %v591_v20  ;;  %v70_v30 = vsel %vm56_vm0, %v689_v22, 0.0  ;;  %v704_v32 = vunpack.c.l.bf16 %v592_v27 }
   0x7   :  { %599 = vmatpush.bf16.msra.mxu2 %v554_v5  ;;  %600 = vmatpush.bf16.msra.mxu3 %v554_v5  ;;  %v61_v17 = vadd.f32 %v60_v14, %v59_v13  ;;  %v72_v33 = vsel %vm56_vm0, %v693_v25, 0.0  ;;  %v711_v36 = vunpack.c.h.bf16 %v592_v27  ;;  %v715_v40 = vunpack.c.l.bf16 %v593_v34  ;;  %v603_v49 = vpop.eup %602 }
   0x8   :  { %v74_v37 = vsel %vm56_vm0, %v700_v29, 0.0  ;;  %v76_v41 = vsel %vm56_vm0, %v704_v32, 0.0  ;;  %v722_v44 = vunpack.c.h.bf16 %v593_v34  ;;  %v726_v47 = vunpack.c.l.bf16 %v594_v42 }
   0x9   :  { %v63_v21 = vadd.f32 %v62_v16, %v61_v17  ;;  %v78_v45 = vsel %vm56_vm0, %v711_v36, 0.0  ;;  %v80_v48 = vsel %vm56_vm0, %v715_v40, 0.0  ;;  %v730_v51 = vunpack.c.h.bf16 %v594_v42 }
   0xa   :  { %v82_v52 = vsel %vm56_vm0, %v722_v44, 0.0  ;;  %v84_v54 = vsel %vm56_vm0, %v726_v47, 0.0  ;;  %v95_v55 = vmul.f32 128.0, %v603_v49  ;;  %vm99_vm1 = vweird.f32 %v603_v49 }
   0xb   :  { %v65_v24 = vadd.f32 %v64_v19, %v63_v21  ;;  %v86_v57 = vsel %vm56_vm0, %v730_v51, 0.0 }
   0xc   :  { %v96_v59 = vsub.f32 1.0, %v95_v55 }
   0xd   :  { %v67_v28 = vadd.f32 %v66_v23, %v65_v24 }
   0xe   :  { %v97_v62 = vmul.f32 %v603_v49, %v96_v59 }
   0xf   :  { %v69_v31 = vadd.f32 %v68_v26, %v67_v28 }
  0x10   :  { %v98_v1 = vadd.f32 %v603_v49, %v97_v62 }
  0x11   :  { %v71_v35 = vadd.f32 %v70_v30, %v69_v31 }
  0x12   :  { %v738_v7 = vsel %vm99_vm1, %v603_v49, %v98_v1 }
  0x13   :  { %v73_v38 = vadd.f32 %v72_v33, %v71_v35 }
  0x15   :  { %v75_v43 = vadd.f32 %v74_v37, %v73_v38 }
  0x17   :  { %v77_v46 = vadd.f32 %v76_v41, %v75_v43 }
  0x19   :  { %v79_v50 = vadd.f32 %v78_v45, %v77_v46 }
  0x1b   :  { %v81_v53 = vadd.f32 %v80_v48, %v79_v50 }
  0x1d   :  { %v83_v56 = vadd.f32 %v82_v52, %v81_v53 }
  0x1f   :  { %v85_v58 = vadd.f32 %v84_v54, %v83_v56 }
  0x21   :  { %v87_v60 = vadd.f32 %v86_v57, %v85_v58 }
  0x23   :  { %v88_v61 = vrot.slane %v87_v60, 4 }
  0x25   :  { %v89_v63 = vadd.f32 %v88_v61, %v87_v60 }
  0x27   :  { %v90_v0 = vrot.slane %v89_v63, 2 }
  0x29   :  { %v91_v4 = vadd.f32 %v90_v0, %v89_v63 }
  0x2b   :  { %v92_v5 = vrot.slane %v91_v4, 1 }
  0x2d   :  { %v93_v10 = vadd.f32 %v92_v5, %v91_v4 }
  0x2f   :  { %v741_v11 = vmul.f32 %v738_v7, %v93_v10 }
  0x31   :  { %v102_v12 = vsub.f32 %v650_v2, %v741_v11  ;;  %v103_v13 = vsub.f32 %v652_v3, %v741_v11  ;;  %v104_v14 = vsub.f32 %v660_v6, %v741_v11  ;;  %v105_v16 = vsub.f32 %v665_v8, %v741_v11 }
  0x32   :  { %v106_v17 = vsub.f32 %v667_v9, %v741_v11  ;;  %v107_v23 = vsub.f32 %v678_v15, %v741_v11  ;;  %v108_v26 = vsub.f32 %v682_v18, %v741_v11  ;;  %v109_v34 = vsub.f32 %v689_v22, %v741_v11 }
  0x33   :  { %v118_v19 = vmul.f32 %v102_v12, %v102_v12  ;;  %v119_v20 = vmul.f32 %v103_v13, %v103_v13  ;;  %v120_v21 = vmul.f32 %v104_v14, %v104_v14  ;;  %v121_v24 = vmul.f32 %v105_v16, %v105_v16 }
  0x34   :  { %v122_v27 = vmul.f32 %v106_v17, %v106_v17  ;;  %v123_v35 = vmul.f32 %v107_v23, %v107_v23  ;;  %v110_v39 = vsub.f32 %v693_v25, %v741_v11  ;;  %v124_v41 = vmul.f32 %v108_v26, %v108_v26 }
  0x35   :  { %v134_v28 = vsel %vm56_vm0, %v118_v19, 0.0  ;;  %v135_v30 = vsel %vm56_vm0, %v119_v20, 0.0  ;;  %v137_v31 = vsel %vm56_vm0, %v120_v21, 0.0  ;;  %v139_v37 = vsel %vm56_vm0, %v121_v24, 0.0 }
  0x36   :  { %v136_v33 = vadd.f32 %v135_v30, %v134_v28  ;;  %v141_v42 = vsel %vm56_vm0, %v122_v27, 0.0  ;;  %v111_v45 = vsub.f32 %v700_v29, %v741_v11  ;;  %v125_v46 = vmul.f32 %v109_v34, %v109_v34 }
  0x37   :  { %v143_v48 = vsel %vm56_vm0, %v123_v35, 0.0  ;;  %v112_v50 = vsub.f32 %v704_v32, %v741_v11  ;;  %v126_v52 = vmul.f32 %v110_v39, %v110_v39  ;;  %v145_v53 = vsel %vm56_vm0, %v124_v41, 0.0 }
  0x38   :  { %v138_v38 = vadd.f32 %v137_v31, %v136_v33  ;;  %v113_v55 = vsub.f32 %v711_v36, %v741_v11  ;;  %v127_v56 = vmul.f32 %v111_v45, %v111_v45  ;;  %v147_v57 = vsel %vm56_vm0, %v125_v46, 0.0 }
  0x39   :  { %v114_v59 = vsub.f32 %v715_v40, %v741_v11  ;;  %v128_v60 = vmul.f32 %v112_v50, %v112_v50  ;;  %v149_v61 = vsel %vm56_vm0, %v126_v52, 0.0  ;;  %v115_v63 = vsub.f32 %v722_v44, %v741_v11 }
  0x3a   :  { %v140_v43 = vadd.f32 %v139_v37, %v138_v38  ;;  %v129_v0 = vmul.f32 %v113_v55, %v113_v55  ;;  %v151_v1 = vsel %vm56_vm0, %v127_v56, 0.0  ;;  %v116_v5 = vsub.f32 %v726_v47, %v741_v11 }
  0x3b   :  { %v130_v10 = vmul.f32 %v114_v59, %v114_v59  ;;  %v153_v12 = vsel %vm56_vm0, %v128_v60, 0.0  ;;  %v117_v14 = vsub.f32 %v730_v51, %v741_v11  ;;  %v131_v16 = vmul.f32 %v115_v63, %v115_v63 }
  0x3c   :  { %v142_v49 = vadd.f32 %v141_v42, %v140_v43  ;;  %v155_v17 = vsel %vm56_vm0, %v129_v0, 0.0  ;;  %v132_v20 = vmul.f32 %v116_v5, %v116_v5 }
  0x3d   :  { %v157_v21 = vsel %vm56_vm0, %v130_v10, 0.0  ;;  %v133_v24 = vmul.f32 %v117_v14, %v117_v14  ;;  %v159_v26 = vsel %vm56_vm0, %v131_v16, 0.0 }
  0x3e   :  { %v144_v54 = vadd.f32 %v143_v48, %v142_v49  ;;  %v161_v28 = vsel %vm56_vm0, %v132_v20, 0.0 }
  0x3f   :  { %v163_v31 = vsel %vm56_vm0, %v133_v24, 0.0 }
  0x40   :  { %v146_v58 = vadd.f32 %v145_v53, %v144_v54  ;;  %v172_v53 = vld [vmem:[%s1028_s1] sm:$0x1] }
  0x42   :  { %v148_v62 = vadd.f32 %v147_v57, %v146_v58  ;;  %v204_v57 = vld [vmem:[%s1029_s2] sm:$0x1] }
  0x44   :  { %v150_v4 = vadd.f32 %v149_v61, %v148_v62 }
  0x46   :  { %v152_v13 = vadd.f32 %v151_v1, %v150_v4 }
  0x48   :  { %v154_v19 = vadd.f32 %v153_v12, %v152_v13 }
  0x4a   :  { %v156_v23 = vadd.f32 %v155_v17, %v154_v19 }
  0x4c   :  { %v158_v27 = vadd.f32 %v157_v21, %v156_v23 }
  0x4e   :  { %v160_v30 = vadd.f32 %v159_v26, %v158_v27 }
  0x50   :  { %v162_v33 = vadd.f32 %v161_v28, %v160_v30 }
  0x52   :  { %v164_v34 = vadd.f32 %v163_v31, %v162_v33 }
  0x54   :  { %v165_v35 = vrot.slane %v164_v34, 4 }
  0x56   :  { %v166_v37 = vadd.f32 %v165_v35, %v164_v34 }
  0x58   :  { %v167_v38 = vrot.slane %v166_v37, 2 }
  0x5a   :  { %v168_v39 = vadd.f32 %v167_v38, %v166_v37 }
  0x5c   :  { %v169_v41 = vrot.slane %v168_v39, 1 }
  0x5e   :  { %v170_v42 = vadd.f32 %v169_v41, %v168_v39 }
  0x60   :  { %v171_v43 = vmul.f32 %v170_v42, %v738_v7 }
  0x62   :  { %v173_v45 = vadd.f32 1e-05, %v171_v43 }
  0x64   :  { %604 = vrsqrt.f32 %v173_v45  ;;  %vm180_vm2 = vweird.f32 %v173_v45 }
  0x6a   :  { %v605_v46 = vpop.eup %604 }
  0x6b   :  { %v175_v48 = vmul.f32 %v605_v46, %v173_v45  ;;  %vm181_vm3 = vweird.f32 %v605_v46 }
  0x6c   :  { %vm182_vm4 = vmor %vm180_vm2, %vm181_vm3 }
  0x6d   :  { %v176_v49 = vmul.f32 %v605_v46, %v175_v48 }
  0x6f   :  { %v177_v50 = vmul.f32 0.5, %v176_v49 }
  0x71   :  { %v178_v52 = vsub.f32 1.5, %v177_v50 }
  0x73   :  { %v179_v54 = vmul.f32 %v605_v46, %v178_v52 }
  0x75   :  { %v183_v55 = vsel %vm182_vm4, %v605_v46, %v179_v54 }
  0x76   :  { %v184_v56 = vmul.f32 %v183_v55, %v172_v53 }
  0x78   :  { %v186_v58 = vperm.slane %v184_v56, 0  ;;  %v205_v59 = vmul.f32 %v184_v56, %v741_v11 }
  0x7a   :  { %v188_v60 = vmul.f32 %v650_v2, %v186_v58  ;;  %v189_v61 = vmul.f32 %v652_v3, %v186_v58  ;;  %v206_v62 = vsub.f32 %v204_v57, %v205_v59  ;;  %v192_v63 = vmul.f32 %v667_v9, %v186_v58 }
  0x7b   :  { %v193_v0 = vmul.f32 %v678_v15, %v186_v58  ;;  %v196_v1 = vmul.f32 %v693_v25, %v186_v58  ;;  %v197_v4 = vmul.f32 %v700_v29, %v186_v58  ;;  %v200_v5 = vmul.f32 %v715_v40, %v186_v58 }
  0x7c   :  { %v208_v10 = vperm.slane %v206_v62, 0  ;;  %v201_v12 = vmul.f32 %v722_v44, %v186_v58  ;;  %v190_v28 = vmul.f32 %v660_v6, %v186_v58  ;;  %v191_v30 = vmul.f32 %v665_v8, %v186_v58 }
  0x7d   :  { %v194_v31 = vmul.f32 %v682_v18, %v186_v58  ;;  %v195_v33 = vmul.f32 %v689_v22, %v186_v58  ;;  %v198_v34 = vmul.f32 %v704_v32, %v186_v58  ;;  %v199_v35 = vmul.f32 %v711_v36, %v186_v58 }
  0x7e   :  { %v210_v13 = vadd.f32 %v208_v10, %v188_v60  ;;  %v211_v11 = vadd.f32 %v208_v10, %v189_v61  ;;  %v214_v14 = vadd.f32 %v208_v10, %v192_v63  ;;  %v215_v2 = vadd.f32 %v208_v10, %v193_v0 }
  0x7f   :  { %v218_v16 = vadd.f32 %v208_v10, %v196_v1  ;;  %v219_v3 = vadd.f32 %v208_v10, %v197_v4  ;;  %v222_v17 = vadd.f32 %v208_v10, %v200_v5  ;;  %v223_v19 = vadd.f32 %v208_v10, %v201_v12 }
  0x80   :  { %v226_v9 = vmax.f32 %v210_v13, 0.0  ;;  %v227_v20 = vmax.f32 %v211_v11, 0.0  ;;  %v230_v15 = vmax.f32 %v214_v14, 0.0  ;;  %v231_v21 = vmax.f32 %v215_v2, 0.0 }
  0x81   :  { %v234_v25 = vmax.f32 %v218_v16, 0.0  ;;  %v235_v23 = vmax.f32 %v219_v3, 0.0  ;;  %v238_v29 = vmax.f32 %v222_v17, 0.0  ;;  %v239_v24 = vmax.f32 %v223_v19, 0.0 }
  0x82   :  { %v242_v40 = vpack.c.bf16 %v227_v20, %v226_v9  ;;  %v244_v26 = vpack.c.bf16 %v231_v21, %v230_v15  ;;  %v202_v6 = vmul.f32 %v726_v47, %v186_v58  ;;  %v203_v8 = vmul.f32 %v730_v51, %v186_v58 }
  0x83   :  { %v246_v27 = vpack.c.bf16 %v235_v23, %v234_v25  ;;  %v248_v44 = vpack.c.bf16 %v239_v24, %v238_v29  ;;  %v212_v37 = vadd.f32 %v208_v10, %v190_v28  ;;  %v213_v38 = vadd.f32 %v208_v10, %v191_v30 }
  0x84   :  { %546 = vmatmul.msk.bf16.vlgmr.msra.gmra.mxu0 %vm56_vm0, %v242_v40  ;;  %548 = vmatmul.msk.bf16.vlgmr.msra.gmra.mxu1 %vm56_vm0, %v244_v26  ;;  %v216_v39 = vadd.f32 %v208_v10, %v194_v31  ;;  %v217_v41 = vadd.f32 %v208_v10, %v195_v33  ;;  %v220_v42 = vadd.f32 %v208_v10, %v198_v34 }
  0x85   :  { %550 = vmatmul.msk.bf16.vlgmr.msra.gmra.mxu2 %vm56_vm0, %v246_v27  ;;  %552 = vmatmul.msk.bf16.vlgmr.msra.gmra.mxu3 %vm56_vm0, %v248_v44  ;;  %v221_v18 = vadd.f32 %v208_v10, %v199_v35  ;;  %v224_v43 = vadd.f32 %v208_v10, %v202_v6  ;;  %v225_v22 = vadd.f32 %v208_v10, %v203_v8  ;;  %v228_v45 = vmax.f32 %v212_v37, 0.0 }
  0x86   :  { %v229_v32 = vmax.f32 %v213_v38, 0.0  ;;  %v232_v46 = vmax.f32 %v216_v39, 0.0  ;;  %v233_v48 = vmax.f32 %v217_v41, 0.0  ;;  %v236_v49 = vmax.f32 %v220_v42, 0.0 }
  0x87   :  { %v237_v50 = vmax.f32 %v221_v18, 0.0  ;;  %v240_v52 = vmax.f32 %v224_v43, 0.0  ;;  %v241_v36 = vmax.f32 %v225_v22, 0.0 }
  0x88   :  { %v243_v53 = vpack.c.bf16 %v229_v32, %v228_v45  ;;  %v245_v47 = vpack.c.bf16 %v233_v48, %v232_v46 }
  0x89   :  { %v247_v54 = vpack.c.bf16 %v237_v50, %v236_v49  ;;  %v249_v51 = vpack.c.bf16 %v241_v36, %v240_v52 }
  0x94   :  { %547 = vmatmul.msk.bf16.gmra.mxu0 %vm56_vm0, %v243_v53  ;;  %549 = vmatmul.msk.bf16.gmra.mxu1 %vm56_vm0, %v245_v47 }
  0x95   :  { %551 = vmatmul.msk.bf16.gmra.mxu2 %vm56_vm0, %v247_v54  ;;  %553 = vmatmul.msk.bf16.gmra.mxu3 %vm56_vm0, %v249_v51 }
 0x101   :  { %v823_v55 = vpop.f32.mrf.mxu0  ;;  %v825_v56 = vpop.f32.mrf.mxu1 }
 0x102   :  { %v340_v1 = vsel %vm339_vm5, %v823_v55, 0.0  ;;  %v347_v2 = vsel %vm339_vm5, %v825_v56, 0.0 }
 0x108   :  { %v829_v58 = vpop.f32.mrf.mxu2  ;;  %v835_v61 = vpop.f32.mrf.mxu3 }
 0x109   :  { %v827_v57 = vpop.f32.mrf.mxu0  ;;  %v831_v59 = vpop.f32.mrf.mxu1  ;;  %v355_v23 = vsel %vm339_vm5, %v829_v58, 0.0  ;;  %v363_v33 = vsel %vm339_vm5, %v835_v61, 0.0 }
 0x10a   :  { %v341_v63 = vsel %vm339_vm5, %v827_v57, 0.0  ;;  %v349_v17 = vsel %vm339_vm5, %v831_v59, 0.0 }
 0x10b   :  { %v342_v5 = vadd.f32 %v341_v63, %v340_v1 }
 0x110   :  { %v837_v62 = vpop.f32.mrf.mxu2  ;;  %v851_v14 = vpop.f32.mrf.mxu3 }
 0x111   :  { %v833_v60 = vpop.f32.mrf.mxu0  ;;  %v841_v0 = vpop.f32.mrf.mxu1  ;;  %v357_v40 = vsel %vm339_vm5, %v837_v62, 0.0  ;;  %v365_v35 = vsel %vm339_vm5, %v851_v14, 0.0 }
 0x112   :  { %v343_v4 = vsel %vm339_vm5, %v833_v60, 0.0  ;;  %v351_v20 = vsel %vm339_vm5, %v841_v0, 0.0 }
 0x113   :  { %v344_v10 = vadd.f32 %v343_v4, %v342_v5 }
 0x118   :  { %v855_v3 = vpop.f32.mrf.mxu2  ;;  %v867_v24 = vpop.f32.mrf.mxu3 }
 0x119   :  { %v847_v12 = vpop.f32.mrf.mxu0  ;;  %v859_v19 = vpop.f32.mrf.mxu1  ;;  %v359_v44 = vsel %vm339_vm5, %v855_v3, 0.0  ;;  %v367_v37 = vsel %vm339_vm5, %v867_v24, 0.0 }
 0x11a   :  { %v345_v13 = vsel %vm339_vm5, %v847_v12, 0.0  ;;  %v353_v21 = vsel %vm339_vm5, %v859_v19, 0.0 }
 0x11b   :  { %v346_v11 = vadd.f32 %v345_v13, %v344_v10 }
 0x11d   :  { %v348_v16 = vadd.f32 %v347_v2, %v346_v11 }
 0x11f   :  { %v350_v9 = vadd.f32 %v349_v17, %v348_v16 }
 0x120   :  { %v871_v27 = vpop.f32.mrf.mxu2  ;;  %v881_v8 = vpop.f32.mrf.mxu3 }
 0x121   :  { %v352_v15 = vadd.f32 %v351_v20, %v350_v9  ;;  %v361_v30 = vsel %vm339_vm5, %v871_v27, 0.0  ;;  %v369_v39 = vsel %vm339_vm5, %v881_v8, 0.0 }
 0x123   :  { %v354_v25 = vadd.f32 %v353_v21, %v352_v15 }
 0x125   :  { %v356_v29 = vadd.f32 %v355_v23, %v354_v25 }
 0x127   :  { %v358_v26 = vadd.f32 %v357_v40, %v356_v29 }
 0x129   :  { %v360_v28 = vadd.f32 %v359_v44, %v358_v26 }
 0x12b   :  { %v362_v31 = vadd.f32 %v361_v30, %v360_v28 }
 0x12d   :  { %v364_v34 = vadd.f32 %v363_v33, %v362_v31 }
 0x12f   :  { %v366_v6 = vadd.f32 %v365_v35, %v364_v34 }
 0x131   :  { %v368_v38 = vadd.f32 %v367_v37, %v366_v6 }
 0x133   :  { %v370_v41 = vadd.f32 %v369_v39, %v368_v38 }
 0x135   :  { %v371_v42 = vrot.slane %v370_v41, 4 }
 0x137   :  { %v372_v18 = vadd.f32 %v371_v42, %v370_v41 }
 0x139   :  { %v373_v43 = vrot.slane %v372_v18, 2 }
 0x13b   :  { %v374_v22 = vadd.f32 %v373_v43, %v372_v18 }
 0x13d   :  { %v375_v45 = vrot.slane %v374_v22, 1 }
 0x13f   :  { %v376_v32 = vadd.f32 %v375_v45, %v374_v22 }
 0x141   :  { %v888_v46 = vmul.f32 %v376_v32, %v738_v7 }
 0x143   :  { %v378_v48 = vsub.f32 %v823_v55, %v888_v46  ;;  %v379_v49 = vsub.f32 %v827_v57, %v888_v46  ;;  %v380_v50 = vsub.f32 %v833_v60, %v888_v46  ;;  %v381_v52 = vsub.f32 %v847_v12, %v888_v46 }
 0x144   :  { %v382_v47 = vsub.f32 %v825_v56, %v888_v46  ;;  %v383_v51 = vsub.f32 %v831_v59, %v888_v46  ;;  %v384_v10 = vsub.f32 %v841_v0, %v888_v46  ;;  %v385_v16 = vsub.f32 %v859_v19, %v888_v46 }
 0x145   :  { %v394_v36 = vmul.f32 %v378_v48, %v378_v48  ;;  %v395_v53 = vmul.f32 %v379_v49, %v379_v49  ;;  %v396_v54 = vmul.f32 %v380_v50, %v380_v50  ;;  %v397_v63 = vmul.f32 %v381_v52, %v381_v52 }
 0x146   :  { %v398_v13 = vmul.f32 %v382_v47, %v382_v47  ;;  %v399_v17 = vmul.f32 %v383_v51, %v383_v51  ;;  %v386_v15 = vsub.f32 %v829_v58, %v888_v46  ;;  %v400_v21 = vmul.f32 %v384_v10, %v384_v10 }
 0x147   :  { %v410_v1 = vsel %vm339_vm5, %v394_v36, 0.0  ;;  %v411_v4 = vsel %vm339_vm5, %v395_v53, 0.0  ;;  %v413_v11 = vsel %vm339_vm5, %v396_v54, 0.0  ;;  %v415_v9 = vsel %vm339_vm5, %v397_v63, 0.0 }
 0x148   :  { %v412_v5 = vadd.f32 %v411_v4, %v410_v1  ;;  %v417_v25 = vsel %vm339_vm5, %v398_v13, 0.0  ;;  %v387_v29 = vsub.f32 %v837_v62, %v888_v46  ;;  %v401_v40 = vmul.f32 %v385_v16, %v385_v16 }
 0x149   :  { %v419_v26 = vsel %vm339_vm5, %v399_v17, 0.0  ;;  %v388_v28 = vsub.f32 %v855_v3, %v888_v46  ;;  %v402_v30 = vmul.f32 %v386_v15, %v386_v15  ;;  %v421_v31 = vsel %vm339_vm5, %v400_v21, 0.0 }
 0x14a   :  { %v414_v2 = vadd.f32 %v413_v11, %v412_v5  ;;  %v389_v34 = vsub.f32 %v871_v27, %v888_v46  ;;  %v403_v35 = vmul.f32 %v387_v29, %v387_v29  ;;  %v423_v6 = vsel %vm339_vm5, %v401_v40, 0.0 }
 0x14b   :  { %v390_v38 = vsub.f32 %v835_v61, %v888_v46  ;;  %v404_v39 = vmul.f32 %v388_v28, %v388_v28  ;;  %v425_v41 = vsel %vm339_vm5, %v402_v30, 0.0  ;;  %v391_v18 = vsub.f32 %v851_v14, %v888_v46  ;;  %v448_v30 = vld [vmem:[%s1030_s4] sm:$0x1] }
 0x14c   :  { %v416_v20 = vadd.f32 %v415_v9, %v414_v2  ;;  %v405_v43 = vmul.f32 %v389_v34, %v389_v34  ;;  %v427_v22 = vsel %vm339_vm5, %v403_v35, 0.0  ;;  %v392_v32 = vsub.f32 %v867_v24, %v888_v46 }
 0x14d   :  { %v406_v48 = vmul.f32 %v390_v38, %v390_v38  ;;  %v429_v49 = vsel %vm339_vm5, %v404_v39, 0.0  ;;  %v393_v52 = vsub.f32 %v881_v8, %v888_v46  ;;  %v407_v36 = vmul.f32 %v391_v18, %v391_v18 }
 0x14e   :  { %v418_v23 = vadd.f32 %v417_v25, %v416_v20  ;;  %v431_v53 = vsel %vm339_vm5, %v405_v43, 0.0  ;;  %v408_v54 = vmul.f32 %v392_v32, %v392_v32 }
 0x14f   :  { %v433_v51 = vsel %vm339_vm5, %v406_v48, 0.0  ;;  %v409_v1 = vmul.f32 %v393_v52, %v393_v52  ;;  %v435_v4 = vsel %vm339_vm5, %v407_v36, 0.0 }
 0x150   :  { %v420_v44 = vadd.f32 %v419_v26, %v418_v23  ;;  %v437_v10 = vsel %vm339_vm5, %v408_v54, 0.0 }
 0x151   :  { %v439_v11 = vsel %vm339_vm5, %v409_v1, 0.0 }
 0x152   :  { %v422_v33 = vadd.f32 %v421_v31, %v420_v44 }
 0x154   :  { %v424_v37 = vadd.f32 %v423_v6, %v422_v33 }
 0x156   :  { %v426_v42 = vadd.f32 %v425_v41, %v424_v37 }
 0x158   :  { %v428_v45 = vadd.f32 %v427_v22, %v426_v42 }
 0x15a   :  { %v430_v50 = vadd.f32 %v429_v49, %v428_v45 }
 0x15c   :  { %v432_v47 = vadd.f32 %v431_v53, %v430_v50 }
 0x15e   :  { %v434_v63 = vadd.f32 %v433_v51, %v432_v47 }
 0x160   :  { %v436_v5 = vadd.f32 %v435_v4, %v434_v63 }
 0x162   :  { %v438_v13 = vadd.f32 %v437_v10, %v436_v5 }
 0x164   :  { %v440_v2 = vadd.f32 %v439_v11, %v438_v13 }
 0x166   :  { %v441_v16 = vrot.slane %v440_v2, 4 }
 0x168   :  { %v442_v17 = vadd.f32 %v441_v16, %v440_v2 }
 0x16a   :  { %v443_v9 = vrot.slane %v442_v17, 2 }
 0x16c   :  { %v444_v20 = vadd.f32 %v443_v9, %v442_v17 }
 0x16e   :  { %v445_v15 = vrot.slane %v444_v20, 1 }
 0x170   :  { %v446_v21 = vadd.f32 %v445_v15, %v444_v20 }
 0x172   :  { %v447_v25 = vmul.f32 %v446_v21, %v738_v7  ;;  %v480_v7 = vld [vmem:[%s1031_s5] sm:$0x1] }
 0x174   :  { %v449_v23 = vadd.f32 1e-05, %v447_v25 }
 0x176   :  { %606 = vrsqrt.f32 %v449_v23  ;;  %vm456_vm7 = vweird.f32 %v449_v23 }
 0x17c   :  { %v607_v29 = vpop.eup %606 }
 0x17d   :  { %v451_v40 = vmul.f32 %v607_v29, %v449_v23  ;;  %vm457_vm6 = vweird.f32 %v607_v29 }
 0x17e   :  { %vm458_vm8 = vmor %vm456_vm7, %vm457_vm6 }
 0x17f   :  { %v452_v26 = vmul.f32 %v607_v29, %v451_v40 }
 0x181   :  { %v453_v44 = vmul.f32 0.5, %v452_v26 }
 0x183   :  { %v454_v28 = vsub.f32 1.5, %v453_v44 }
 0x185   :  { %v455_v31 = vmul.f32 %v607_v29, %v454_v28 }
 0x187   :  { %v459_v33 = vsel %vm458_vm8, %v607_v29, %v455_v31 }
 0x188   :  { %v460_v34 = vmul.f32 %v459_v33, %v448_v30 }
 0x18a   :  { %v481_v35 = vmul.f32 %v460_v34, %v888_v46  ;;  %v462_v6 = vperm.slane %v460_v34, 0 }
 0x18c   :  { %v482_v37 = vsub.f32 %v480_v7, %v481_v35  ;;  %v464_v38 = vmul.f32 %v462_v6, %v823_v55  ;;  %v465_v39 = vmul.f32 %v462_v6, %v827_v57  ;;  %v466_v41 = vmul.f32 %v462_v6, %v833_v60 }
 0x18d   :  { %v467_v18 = vmul.f32 %v462_v6, %v847_v12  ;;  %v468_v43 = vmul.f32 %v462_v6, %v825_v56  ;;  %v469_v32 = vmul.f32 %v462_v6, %v831_v59  ;;  %v470_v49 = vmul.f32 %v462_v6, %v841_v0 }
 0x18e   :  { %v484_v42 = vperm.slane %v482_v37, 0  ;;  %v471_v55 = vmul.f32 %v462_v6, %v859_v19  ;;  %v472_v57 = vmul.f32 %v462_v6, %v829_v58  ;;  %v473_v56 = vmul.f32 %v462_v6, %v837_v62 }
 0x18f   :  { %v474_v51 = vmul.f32 %v462_v6, %v855_v3  ;;  %v475_v58 = vmul.f32 %v462_v6, %v871_v27  ;;  %v476_v62 = vmul.f32 %v462_v6, %v835_v61  ;;  %v477_v4 = vmul.f32 %v462_v6, %v851_v14 }
 0x190   :  { %v486_v22 = vadd.f32 %v484_v42, %v464_v38  ;;  %v487_v45 = vadd.f32 %v484_v42, %v465_v39  ;;  %v488_v46 = vadd.f32 %v484_v42, %v466_v41  ;;  %v489_v48 = vadd.f32 %v484_v42, %v467_v18 }
 0x191   :  { %v490_v50 = vadd.f32 %v484_v42, %v468_v43  ;;  %v491_v52 = vadd.f32 %v484_v42, %v469_v32  ;;  %v492_v60 = vadd.f32 %v484_v42, %v470_v49  ;;  %v493_v47 = vadd.f32 %v484_v42, %v471_v55 }
 0x192   :  { %v502_v36 = vmax.f32 %v486_v22, 0.0  ;;  %v503_v53 = vmax.f32 %v487_v45, 0.0  ;;  %v504_v12 = vmax.f32 %v488_v46, 0.0  ;;  %v505_v54 = vmax.f32 %v489_v48, 0.0 }
 0x193   :  { %v494_v59 = vadd.f32 %v484_v42, %v472_v57  ;;  %v506_v63 = vmax.f32 %v490_v50, 0.0  ;;  %v495_v0 = vadd.f32 %v484_v42, %v473_v56  ;;  %v507_v19 = vmax.f32 %v491_v52, 0.0 }
 0x194   :  { %518 = vst.msk [vmem:[%s1032_s6] sm:$0xff] %vm339_vm5, %v502_v36  ;;  %v496_v1 = vadd.f32 %v484_v42, %v474_v51  ;;  %v508_v3 = vmax.f32 %v492_v60, 0.0  ;;  %v497_v5 = vadd.f32 %v484_v42, %v475_v58  ;;  %v509_v27 = vmax.f32 %v493_v47, 0.0 }
 0x195   :  { %519 = vst.msk [vmem:[%s1032_s6 + $0x8] sm:$0xff] %vm339_vm5, %v503_v53  ;;  %v478_v10 = vmul.f32 %v462_v6, %v867_v24  ;;  %v498_v13 = vadd.f32 %v484_v42, %v476_v62  ;;  %v510_v61 = vmax.f32 %v494_v59, 0.0  ;;  %v479_v11 = vmul.f32 %v462_v6, %v881_v8 }
 0x196   :  { %520 = vst.msk [vmem:[%s1032_s6 + $0x10] sm:$0xff] %vm339_vm5, %v504_v12  ;;  %v499_v2 = vadd.f32 %v484_v42, %v477_v4  ;;  %v511_v14 = vmax.f32 %v495_v0, 0.0  ;;  %v512_v17 = vmax.f32 %v496_v1, 0.0  ;;  %v513_v9 = vmax.f32 %v497_v5, 0.0 }
 0x197   :  { %521 = vst.msk [vmem:[%s1032_s6 + $0x18] sm:$0xff] %vm339_vm5, %v505_v54  ;;  %v500_v16 = vadd.f32 %v484_v42, %v478_v10  ;;  %v501_v24 = vadd.f32 %v484_v42, %v479_v11  ;;  %v514_v8 = vmax.f32 %v498_v13, 0.0 }
 0x198   :  { %522 = vst.msk [vmem:[%s1032_s6 + $0x20] sm:$0xff] %vm339_vm5, %v506_v63  ;;  %v515_v20 = vmax.f32 %v499_v2, 0.0 }
 0x199   :  { %523 = vst.msk [vmem:[%s1032_s6 + $0x28] sm:$0xff] %vm339_vm5, %v507_v19  ;;  %v516_v15 = vmax.f32 %v500_v16, 0.0  ;;  %v517_v21 = vmax.f32 %v501_v24, 0.0 }
 0x19a   :  { %524 = vst.msk [vmem:[%s1032_s6 + $0x30] sm:$0xff] %vm339_vm5, %v508_v3 }
 0x19b   :  { %525 = vst.msk [vmem:[%s1032_s6 + $0x38] sm:$0xff] %vm339_vm5, %v509_v27 }
 0x19c   :  { %526 = vst.msk [vmem:[%s1032_s6 + $0x40] sm:$0xff] %vm339_vm5, %v510_v61 }
 0x19d   :  { %527 = vst.msk [vmem:[%s1032_s6 + $0x48] sm:$0xff] %vm339_vm5, %v511_v14 }
 0x19e   :  { %528 = vst.msk [vmem:[%s1032_s6 + $0x50] sm:$0xff] %vm339_vm5, %v512_v17 }
 0x19f   :  { %529 = vst.msk [vmem:[%s1032_s6 + $0x58] sm:$0xff] %vm339_vm5, %v513_v9 }
 0x1a0   :  { %530 = vst.msk [vmem:[%s1032_s6 + $0x60] sm:$0xff] %vm339_vm5, %v514_v8 }
 0x1a1   :  { %531 = vst.msk [vmem:[%s1032_s6 + $0x68] sm:$0xff] %vm339_vm5, %v515_v20 }
 0x1a2   :  { %532 = vst.msk [vmem:[%s1032_s6 + $0x70] sm:$0xff] %vm339_vm5, %v516_v15 }
 0x1a3   :  { %533 = vst.msk [vmem:[%s1032_s6 + $0x78] sm:$0xff] %vm339_vm5, %v517_v21 }

// kernel: densenet_forward.24
= control target key start
LH: loop header
LB: loop body
LE: loop exit
PB: predicated region body
PF: predicated region fallthrough
CT: control target
= control target key end

     0   :  { %vm56_vm0 = vcmask 392192   ;;  %v624_v40 = vmov 128.0   ;;  %vm347_vm5 = vcmask 523264   ;;  %s1045_s3 = inlined_call_operand.vmem [shape: bf16[48,64], index: 3, kind: input, shape index: {}]   ;;  %s1046_s0 = inlined_call_operand.vmem [shape: bf16[128,48], index: 0, kind: input, shape index: {}]   ;;  %s1047_s1 = inlined_call_operand.vmem [shape: f32[1,48], index: 1, kind: input, shape index: {}]   ;;  %s1048_s2 = inlined_call_operand.vmem [shape: f32[1,48], index: 2, kind: input, shape index: {}]   ;;  %s1049_s4 = inlined_call_operand.vmem [shape: f32[1,64], index: 4, kind: input, shape index: {}]   ;;  %s1050_s5 = inlined_call_operand.vmem [shape: f32[1,64], index: 5, kind: input, shape index: {}]   ;;  %s1051_s6 = inlined_call_operand.vmem [shape: f32[128,64], index: 6, kind: output, shape index: {}]  }
   0x1   :  { %v568_v0 = vld [vmem:[%s1045_s3 + $0x10] sm:$0xff]  ;;  %v570_v1 = vld [vmem:[%s1046_s0] sm:$0xff]   ;;  %v601_v2 = vld [vmem:[%s1046_s0 + $0x8] sm:$0xff]   ;;  %618 = vrcp.f32 %v624_v40 }
   0x2   :  { %303 = vmatpush.bf16.msra.mxu0 %v568_v0  ;;  %608 = vmatpush.bf16.msra.mxu1 %v568_v0  ;;  %v567_v3 = vld [vmem:[%s1045_s3 + $0x8] sm:$0xff]  ;;  %v672_v4 = vunpack.c.l.bf16 %v570_v1  ;;  %v674_v5 = vunpack.c.h.bf16 %v570_v1  ;;  %v676_v6 = vunpack.c.l.bf16 %v601_v2  ;;  %v602_v7 = vld [vmem:[%s1046_s0 + $0x10] sm:$0xff]   ;;  %v681_v8 = vunpack.c.h.bf16 %v601_v2  ;;  %v566_v9 = vld [vmem:[%s1045_s3] sm:$0xff] }
   0x3   :  { %609 = vmatpush.bf16.msra.mxu2 %v568_v0  ;;  %610 = vmatpush.bf16.msra.mxu3 %v568_v0  ;;  %v686_v10 = vunpack.c.l.bf16 %v602_v7  ;;  %v603_v14 = vld [vmem:[%s1046_s0 + $0x18] sm:$0xff]   ;;  %v697_v16 = vunpack.c.h.bf16 %v602_v7  ;;  %v604_v21 = vld [vmem:[%s1046_s0 + $0x20] sm:$0xff]   ;;  %v605_v28 = vld [vmem:[%s1046_s0 + $0x28] sm:$0xff]  }
   0x4   :  { %v57_v11 = vsel %vm56_vm0, %v672_v4, 0.0  ;;  %v58_v12 = vsel %vm56_vm0, %v674_v5, 0.0  ;;  %v60_v13 = vsel %vm56_vm0, %v676_v6, 0.0  ;;  %v62_v17 = vsel %vm56_vm0, %v681_v8, 0.0  ;;  %v606_v35 = vld [vmem:[%s1046_s0 + $0x30] sm:$0xff]   ;;  %v607_v43 = vld [vmem:[%s1046_s0 + $0x38] sm:$0xff]  }
   0x5   :  { %v59_v15 = vadd.f32 %v58_v12, %v57_v11  ;;  %v701_v19 = vunpack.c.l.bf16 %v603_v14  ;;  %v64_v20 = vsel %vm56_vm0, %v686_v10, 0.0  ;;  %v708_v23 = vunpack.c.h.bf16 %v603_v14 }
   0x6   :  { %304 = vmatpush.bf16.msra.mxu0 %v567_v3  ;;  %611 = vmatpush.bf16.msra.mxu1 %v567_v3  ;;  %v66_v24 = vsel %vm56_vm0, %v697_v16, 0.0  ;;  %v712_v26 = vunpack.c.l.bf16 %v604_v21  ;;  %v719_v30 = vunpack.c.h.bf16 %v604_v21  ;;  %v723_v33 = vunpack.c.l.bf16 %v605_v28 }
   0x7   :  { %612 = vmatpush.bf16.msra.mxu2 %v567_v3  ;;  %613 = vmatpush.bf16.msra.mxu3 %v567_v3  ;;  %v61_v18 = vadd.f32 %v60_v13, %v59_v15  ;;  %v68_v27 = vsel %vm56_vm0, %v701_v19, 0.0  ;;  %v70_v31 = vsel %vm56_vm0, %v708_v23, 0.0  ;;  %v730_v37 = vunpack.c.h.bf16 %v605_v28  ;;  %v619_v50 = vpop.eup %618 }
   0x8   :  { %v72_v34 = vsel %vm56_vm0, %v712_v26, 0.0  ;;  %v74_v38 = vsel %vm56_vm0, %v719_v30, 0.0  ;;  %v734_v41 = vunpack.c.l.bf16 %v606_v35  ;;  %v76_v42 = vsel %vm56_vm0, %v723_v33, 0.0 }
   0x9   :  { %v63_v22 = vadd.f32 %v62_v17, %v61_v18  ;;  %v741_v45 = vunpack.c.h.bf16 %v606_v35  ;;  %v78_v46 = vsel %vm56_vm0, %v730_v37, 0.0  ;;  %v745_v48 = vunpack.c.l.bf16 %v607_v43 }
   0xa   :  { %305 = vmatpush.bf16.msra.mxu0 %v566_v9  ;;  %614 = vmatpush.bf16.msra.mxu1 %v566_v9  ;;  %v80_v49 = vsel %vm56_vm0, %v734_v41, 0.0  ;;  %v749_v52 = vunpack.c.h.bf16 %v607_v43  ;;  %v95_v56 = vmul.f32 128.0, %v619_v50  ;;  %vm99_vm1 = vweird.f32 %v619_v50 }
   0xb   :  { %615 = vmatpush.bf16.msra.mxu2 %v566_v9  ;;  %616 = vmatpush.bf16.msra.mxu3 %v566_v9  ;;  %v65_v25 = vadd.f32 %v64_v20, %v63_v22  ;;  %v82_v53 = vsel %vm56_vm0, %v741_v45, 0.0  ;;  %v84_v55 = vsel %vm56_vm0, %v745_v48, 0.0 }
   0xc   :  { %v86_v58 = vsel %vm56_vm0, %v749_v52, 0.0  ;;  %v96_v60 = vsub.f32 1.0, %v95_v56 }
   0xd   :  { %v67_v29 = vadd.f32 %v66_v24, %v65_v25 }
   0xe   :  { %v97_v63 = vmul.f32 %v619_v50, %v96_v60 }
   0xf   :  { %v69_v32 = vadd.f32 %v68_v27, %v67_v29 }
  0x10   :  { %v98_v2 = vadd.f32 %v619_v50, %v97_v63 }
  0x11   :  { %v71_v36 = vadd.f32 %v70_v31, %v69_v32 }
  0x12   :  { %v757_v9 = vsel %vm99_vm1, %v619_v50, %v98_v2 }
  0x13   :  { %v73_v39 = vadd.f32 %v72_v34, %v71_v36 }
  0x15   :  { %v75_v44 = vadd.f32 %v74_v38, %v73_v39 }
  0x17   :  { %v77_v47 = vadd.f32 %v76_v42, %v75_v44 }
  0x19   :  { %v79_v51 = vadd.f32 %v78_v46, %v77_v47 }
  0x1b   :  { %v81_v54 = vadd.f32 %v80_v49, %v79_v51 }
  0x1d   :  { %v83_v57 = vadd.f32 %v82_v53, %v81_v54 }
  0x1f   :  { %v85_v59 = vadd.f32 %v84_v55, %v83_v57 }
  0x21   :  { %v87_v61 = vadd.f32 %v86_v58, %v85_v59 }
  0x23   :  { %v88_v62 = vrot.slane %v87_v61, 4 }
  0x25   :  { %v89_v0 = vadd.f32 %v88_v62, %v87_v61 }
  0x27   :  { %v90_v1 = vrot.slane %v89_v0, 2 }
  0x29   :  { %v91_v3 = vadd.f32 %v90_v1, %v89_v0 }
  0x2b   :  { %v92_v7 = vrot.slane %v91_v3, 1 }
  0x2d   :  { %v93_v11 = vadd.f32 %v92_v7, %v91_v3 }
  0x2f   :  { %v760_v12 = vmul.f32 %v757_v9, %v93_v11 }
  0x31   :  { %v102_v13 = vsub.f32 %v672_v4, %v760_v12  ;;  %v103_v14 = vsub.f32 %v674_v5, %v760_v12  ;;  %v104_v15 = vsub.f32 %v676_v6, %v760_v12  ;;  %v105_v17 = vsub.f32 %v681_v8, %v760_v12 }
  0x32   :  { %v106_v18 = vsub.f32 %v686_v10, %v760_v12  ;;  %v107_v24 = vsub.f32 %v697_v16, %v760_v12  ;;  %v108_v27 = vsub.f32 %v701_v19, %v760_v12  ;;  %v109_v35 = vsub.f32 %v708_v23, %v760_v12 }
  0x33   :  { %v118_v20 = vmul.f32 %v102_v13, %v102_v13  ;;  %v119_v21 = vmul.f32 %v103_v14, %v103_v14  ;;  %v120_v22 = vmul.f32 %v104_v15, %v104_v15  ;;  %v121_v25 = vmul.f32 %v105_v17, %v105_v17 }
  0x34   :  { %v122_v28 = vmul.f32 %v106_v18, %v106_v18  ;;  %v123_v36 = vmul.f32 %v107_v24, %v107_v24  ;;  %v110_v40 = vsub.f32 %v712_v26, %v760_v12  ;;  %v124_v42 = vmul.f32 %v108_v27, %v108_v27 }
  0x35   :  { %v134_v29 = vsel %vm56_vm0, %v118_v20, 0.0  ;;  %v135_v31 = vsel %vm56_vm0, %v119_v21, 0.0  ;;  %v137_v32 = vsel %vm56_vm0, %v120_v22, 0.0  ;;  %v139_v38 = vsel %vm56_vm0, %v121_v25, 0.0 }
  0x36   :  { %v136_v34 = vadd.f32 %v135_v31, %v134_v29  ;;  %v141_v43 = vsel %vm56_vm0, %v122_v28, 0.0  ;;  %v111_v46 = vsub.f32 %v719_v30, %v760_v12  ;;  %v125_v47 = vmul.f32 %v109_v35, %v109_v35 }
  0x37   :  { %v143_v49 = vsel %vm56_vm0, %v123_v36, 0.0  ;;  %v112_v51 = vsub.f32 %v723_v33, %v760_v12  ;;  %v126_v53 = vmul.f32 %v110_v40, %v110_v40  ;;  %v145_v54 = vsel %vm56_vm0, %v124_v42, 0.0 }
  0x38   :  { %v138_v39 = vadd.f32 %v137_v32, %v136_v34  ;;  %v113_v56 = vsub.f32 %v730_v37, %v760_v12  ;;  %v127_v57 = vmul.f32 %v111_v46, %v111_v46  ;;  %v147_v58 = vsel %vm56_vm0, %v125_v47, 0.0 }
  0x39   :  { %v114_v60 = vsub.f32 %v734_v41, %v760_v12  ;;  %v128_v61 = vmul.f32 %v112_v51, %v112_v51  ;;  %v149_v62 = vsel %vm56_vm0, %v126_v53, 0.0  ;;  %v115_v0 = vsub.f32 %v741_v45, %v760_v12 }
  0x3a   :  { %v140_v44 = vadd.f32 %v139_v38, %v138_v39  ;;  %v129_v1 = vmul.f32 %v113_v56, %v113_v56  ;;  %v151_v2 = vsel %vm56_vm0, %v127_v57, 0.0  ;;  %v116_v7 = vsub.f32 %v745_v48, %v760_v12 }
  0x3b   :  { %v130_v11 = vmul.f32 %v114_v60, %v114_v60  ;;  %v153_v13 = vsel %vm56_vm0, %v128_v61, 0.0  ;;  %v117_v15 = vsub.f32 %v749_v52, %v760_v12  ;;  %v131_v17 = vmul.f32 %v115_v0, %v115_v0 }
  0x3c   :  { %v142_v50 = vadd.f32 %v141_v43, %v140_v44  ;;  %v155_v18 = vsel %vm56_vm0, %v129_v1, 0.0  ;;  %v132_v21 = vmul.f32 %v116_v7, %v116_v7 }
  0x3d   :  { %v157_v22 = vsel %vm56_vm0, %v130_v11, 0.0  ;;  %v133_v25 = vmul.f32 %v117_v15, %v117_v15  ;;  %v159_v27 = vsel %vm56_vm0, %v131_v17, 0.0 }
  0x3e   :  { %v144_v55 = vadd.f32 %v143_v49, %v142_v50  ;;  %v161_v29 = vsel %vm56_vm0, %v132_v21, 0.0 }
  0x3f   :  { %v163_v32 = vsel %vm56_vm0, %v133_v25, 0.0 }
  0x40   :  { %v146_v59 = vadd.f32 %v145_v54, %v144_v55  ;;  %v172_v54 = vld [vmem:[%s1047_s1] sm:$0x1] }
  0x42   :  { %v148_v63 = vadd.f32 %v147_v58, %v146_v59  ;;  %v204_v58 = vld [vmem:[%s1048_s2] sm:$0x1] }
  0x44   :  { %v150_v3 = vadd.f32 %v149_v62, %v148_v63 }
  0x46   :  { %v152_v14 = vadd.f32 %v151_v2, %v150_v3 }
  0x48   :  { %v154_v20 = vadd.f32 %v153_v13, %v152_v14 }
  0x4a   :  { %v156_v24 = vadd.f32 %v155_v18, %v154_v20 }
  0x4c   :  { %v158_v28 = vadd.f32 %v157_v22, %v156_v24 }
  0x4e   :  { %v160_v31 = vadd.f32 %v159_v27, %v158_v28 }
  0x50   :  { %v162_v34 = vadd.f32 %v161_v29, %v160_v31 }
  0x52   :  { %v164_v35 = vadd.f32 %v163_v32, %v162_v34 }
  0x54   :  { %v165_v36 = vrot.slane %v164_v35, 4 }
  0x56   :  { %v166_v38 = vadd.f32 %v165_v36, %v164_v35 }
  0x58   :  { %v167_v39 = vrot.slane %v166_v38, 2 }
  0x5a   :  { %v168_v40 = vadd.f32 %v167_v39, %v166_v38 }
  0x5c   :  { %v169_v42 = vrot.slane %v168_v40, 1 }
  0x5e   :  { %v170_v43 = vadd.f32 %v169_v42, %v168_v40 }
  0x60   :  { %v171_v44 = vmul.f32 %v170_v43, %v757_v9 }
  0x62   :  { %v173_v46 = vadd.f32 1e-05, %v171_v44 }
  0x64   :  { %620 = vrsqrt.f32 %v173_v46  ;;  %vm180_vm2 = vweird.f32 %v173_v46 }
  0x6a   :  { %v621_v47 = vpop.eup %620 }
  0x6b   :  { %v175_v49 = vmul.f32 %v621_v47, %v173_v46  ;;  %vm181_vm3 = vweird.f32 %v621_v47 }
  0x6c   :  { %vm182_vm4 = vmor %vm180_vm2, %vm181_vm3 }
  0x6d   :  { %v176_v50 = vmul.f32 %v621_v47, %v175_v49 }
  0x6f   :  { %v177_v51 = vmul.f32 0.5, %v176_v50 }
  0x71   :  { %v178_v53 = vsub.f32 1.5, %v177_v51 }
  0x73   :  { %v179_v55 = vmul.f32 %v621_v47, %v178_v53 }
  0x75   :  { %v183_v56 = vsel %vm182_vm4, %v621_v47, %v179_v55 }
  0x76   :  { %v184_v57 = vmul.f32 %v183_v56, %v172_v54 }
  0x78   :  { %v186_v59 = vperm.slane %v184_v57, 0  ;;  %v205_v60 = vmul.f32 %v184_v57, %v760_v12 }
  0x7a   :  { %v188_v61 = vmul.f32 %v672_v4, %v186_v59  ;;  %v189_v62 = vmul.f32 %v674_v5, %v186_v59  ;;  %v206_v63 = vsub.f32 %v204_v58, %v205_v60  ;;  %v192_v0 = vmul.f32 %v686_v10, %v186_v59 }
  0x7b   :  { %v193_v1 = vmul.f32 %v697_v16, %v186_v59  ;;  %v196_v2 = vmul.f32 %v712_v26, %v186_v59  ;;  %v197_v3 = vmul.f32 %v719_v30, %v186_v59  ;;  %v200_v7 = vmul.f32 %v734_v41, %v186_v59 }
  0x7c   :  { %v208_v11 = vperm.slane %v206_v63, 0  ;;  %v201_v13 = vmul.f32 %v741_v45, %v186_v59  ;;  %v190_v29 = vmul.f32 %v676_v6, %v186_v59  ;;  %v191_v31 = vmul.f32 %v681_v8, %v186_v59 }
  0x7d   :  { %v194_v32 = vmul.f32 %v701_v19, %v186_v59  ;;  %v195_v34 = vmul.f32 %v708_v23, %v186_v59  ;;  %v198_v35 = vmul.f32 %v723_v33, %v186_v59  ;;  %v199_v36 = vmul.f32 %v730_v37, %v186_v59 }
  0x7e   :  { %v210_v14 = vadd.f32 %v208_v11, %v188_v61  ;;  %v211_v12 = vadd.f32 %v208_v11, %v189_v62  ;;  %v214_v15 = vadd.f32 %v208_v11, %v192_v0  ;;  %v215_v4 = vadd.f32 %v208_v11, %v193_v1 }
  0x7f   :  { %v218_v17 = vadd.f32 %v208_v11, %v196_v2  ;;  %v219_v5 = vadd.f32 %v208_v11, %v197_v3  ;;  %v222_v18 = vadd.f32 %v208_v11, %v200_v7  ;;  %v223_v20 = vadd.f32 %v208_v11, %v201_v13 }
  0x80   :  { %v226_v10 = vmax.f32 %v210_v14, 0.0  ;;  %v227_v21 = vmax.f32 %v211_v12, 0.0  ;;  %v230_v16 = vmax.f32 %v214_v15, 0.0  ;;  %v231_v22 = vmax.f32 %v215_v4, 0.0 }
  0x81   :  { %v234_v26 = vmax.f32 %v218_v17, 0.0  ;;  %v235_v24 = vmax.f32 %v219_v5, 0.0  ;;  %v238_v30 = vmax.f32 %v222_v18, 0.0  ;;  %v239_v25 = vmax.f32 %v223_v20, 0.0 }
  0x82   :  { %v242_v41 = vpack.c.bf16 %v227_v21, %v226_v10  ;;  %v244_v27 = vpack.c.bf16 %v231_v22, %v230_v16  ;;  %v202_v6 = vmul.f32 %v745_v48, %v186_v59  ;;  %v203_v8 = vmul.f32 %v749_v52, %v186_v59 }
  0x83   :  { %v246_v28 = vpack.c.bf16 %v235_v24, %v234_v26  ;;  %v248_v45 = vpack.c.bf16 %v239_v25, %v238_v30  ;;  %v212_v38 = vadd.f32 %v208_v11, %v190_v29  ;;  %v213_v39 = vadd.f32 %v208_v11, %v191_v31 }
  0x84   :  { %558 = vmatmul.msk.bf16.vlgmr.msra.gmra.mxu0 %vm56_vm0, %v242_v41  ;;  %560 = vmatmul.msk.bf16.vlgmr.msra.gmra.mxu1 %vm56_vm0, %v244_v27  ;;  %v216_v40 = vadd.f32 %v208_v11, %v194_v32  ;;  %v217_v42 = vadd.f32 %v208_v11, %v195_v34  ;;  %v220_v43 = vadd.f32 %v208_v11, %v198_v35 }
  0x85   :  { %562 = vmatmul.msk.bf16.vlgmr.msra.gmra.mxu2 %vm56_vm0, %v246_v28  ;;  %564 = vmatmul.msk.bf16.vlgmr.msra.gmra.mxu3 %vm56_vm0, %v248_v45  ;;  %v221_v19 = vadd.f32 %v208_v11, %v199_v36  ;;  %v224_v44 = vadd.f32 %v208_v11, %v202_v6  ;;  %v225_v23 = vadd.f32 %v208_v11, %v203_v8  ;;  %v228_v46 = vmax.f32 %v212_v38, 0.0 }
  0x86   :  { %v229_v33 = vmax.f32 %v213_v39, 0.0  ;;  %v232_v47 = vmax.f32 %v216_v40, 0.0  ;;  %v233_v49 = vmax.f32 %v217_v42, 0.0  ;;  %v236_v50 = vmax.f32 %v220_v43, 0.0 }
  0x87   :  { %v237_v51 = vmax.f32 %v221_v19, 0.0  ;;  %v240_v53 = vmax.f32 %v224_v44, 0.0  ;;  %v241_v37 = vmax.f32 %v225_v23, 0.0 }
  0x88   :  { %v243_v54 = vpack.c.bf16 %v229_v33, %v228_v46  ;;  %v245_v48 = vpack.c.bf16 %v233_v49, %v232_v47 }
  0x89   :  { %v247_v55 = vpack.c.bf16 %v237_v51, %v236_v50  ;;  %v249_v52 = vpack.c.bf16 %v241_v37, %v240_v53 }
  0x94   :  { %559 = vmatmul.msk.bf16.gmra.mxu0 %vm56_vm0, %v243_v54  ;;  %561 = vmatmul.msk.bf16.gmra.mxu1 %vm56_vm0, %v245_v48 }
  0x95   :  { %563 = vmatmul.msk.bf16.gmra.mxu2 %vm56_vm0, %v247_v55  ;;  %565 = vmatmul.msk.bf16.gmra.mxu3 %vm56_vm0, %v249_v52 }
 0x101   :  { %v842_v56 = vpop.f32.mrf.mxu0  ;;  %v844_v57 = vpop.f32.mrf.mxu1 }
 0x102   :  { %v348_v2 = vsel %vm347_vm5, %v842_v56, 0.0  ;;  %v355_v4 = vsel %vm347_vm5, %v844_v57, 0.0 }
 0x108   :  { %v848_v59 = vpop.f32.mrf.mxu2  ;;  %v854_v62 = vpop.f32.mrf.mxu3 }
 0x109   :  { %v846_v58 = vpop.f32.mrf.mxu0  ;;  %v850_v60 = vpop.f32.mrf.mxu1  ;;  %v363_v24 = vsel %vm347_vm5, %v848_v59, 0.0  ;;  %v371_v34 = vsel %vm347_vm5, %v854_v62, 0.0 }
 0x10a   :  { %v349_v0 = vsel %vm347_vm5, %v846_v58, 0.0  ;;  %v357_v18 = vsel %vm347_vm5, %v850_v60, 0.0 }
 0x10b   :  { %v350_v7 = vadd.f32 %v349_v0, %v348_v2 }
 0x110   :  { %v856_v63 = vpop.f32.mrf.mxu2  ;;  %v870_v15 = vpop.f32.mrf.mxu3 }
 0x111   :  { %v852_v61 = vpop.f32.mrf.mxu0  ;;  %v860_v1 = vpop.f32.mrf.mxu1  ;;  %v365_v41 = vsel %vm347_vm5, %v856_v63, 0.0  ;;  %v373_v36 = vsel %vm347_vm5, %v870_v15, 0.0 }
 0x112   :  { %v351_v3 = vsel %vm347_vm5, %v852_v61, 0.0  ;;  %v359_v21 = vsel %vm347_vm5, %v860_v1, 0.0 }
 0x113   :  { %v352_v11 = vadd.f32 %v351_v3, %v350_v7 }
 0x118   :  { %v874_v5 = vpop.f32.mrf.mxu2  ;;  %v886_v25 = vpop.f32.mrf.mxu3 }
 0x119   :  { %v866_v13 = vpop.f32.mrf.mxu0  ;;  %v878_v20 = vpop.f32.mrf.mxu1  ;;  %v367_v45 = vsel %vm347_vm5, %v874_v5, 0.0  ;;  %v375_v38 = vsel %vm347_vm5, %v886_v25, 0.0 }
 0x11a   :  { %v353_v14 = vsel %vm347_vm5, %v866_v13, 0.0  ;;  %v361_v22 = vsel %vm347_vm5, %v878_v20, 0.0 }
 0x11b   :  { %v354_v12 = vadd.f32 %v353_v14, %v352_v11 }
 0x11d   :  { %v356_v17 = vadd.f32 %v355_v4, %v354_v12 }
 0x11f   :  { %v358_v10 = vadd.f32 %v357_v18, %v356_v17 }
 0x120   :  { %v890_v28 = vpop.f32.mrf.mxu2  ;;  %v900_v8 = vpop.f32.mrf.mxu3 }
 0x121   :  { %v360_v16 = vadd.f32 %v359_v21, %v358_v10  ;;  %v369_v31 = vsel %vm347_vm5, %v890_v28, 0.0  ;;  %v377_v40 = vsel %vm347_vm5, %v900_v8, 0.0 }
 0x123   :  { %v362_v26 = vadd.f32 %v361_v22, %v360_v16 }
 0x125   :  { %v364_v30 = vadd.f32 %v363_v24, %v362_v26 }
 0x127   :  { %v366_v27 = vadd.f32 %v365_v41, %v364_v30 }
 0x129   :  { %v368_v29 = vadd.f32 %v367_v45, %v366_v27 }
 0x12b   :  { %v370_v32 = vadd.f32 %v369_v31, %v368_v29 }
 0x12d   :  { %v372_v35 = vadd.f32 %v371_v34, %v370_v32 }
 0x12f   :  { %v374_v6 = vadd.f32 %v373_v36, %v372_v35 }
 0x131   :  { %v376_v39 = vadd.f32 %v375_v38, %v374_v6 }
 0x133   :  { %v378_v42 = vadd.f32 %v377_v40, %v376_v39 }
 0x135   :  { %v379_v43 = vrot.slane %v378_v42, 4 }
 0x137   :  { %v380_v19 = vadd.f32 %v379_v43, %v378_v42 }
 0x139   :  { %v381_v44 = vrot.slane %v380_v19, 2 }
 0x13b   :  { %v382_v23 = vadd.f32 %v381_v44, %v380_v19 }
 0x13d   :  { %v383_v46 = vrot.slane %v382_v23, 1 }
 0x13f   :  { %v384_v33 = vadd.f32 %v383_v46, %v382_v23 }
 0x141   :  { %v907_v47 = vmul.f32 %v384_v33, %v757_v9 }
 0x143   :  { %v386_v49 = vsub.f32 %v842_v56, %v907_v47  ;;  %v387_v50 = vsub.f32 %v846_v58, %v907_v47  ;;  %v388_v51 = vsub.f32 %v852_v61, %v907_v47  ;;  %v389_v53 = vsub.f32 %v866_v13, %v907_v47 }
 0x144   :  { %v390_v48 = vsub.f32 %v844_v57, %v907_v47  ;;  %v391_v52 = vsub.f32 %v850_v60, %v907_v47  ;;  %v392_v11 = vsub.f32 %v860_v1, %v907_v47  ;;  %v393_v17 = vsub.f32 %v878_v20, %v907_v47 }
 0x145   :  { %v402_v37 = vmul.f32 %v386_v49, %v386_v49  ;;  %v403_v54 = vmul.f32 %v387_v50, %v387_v50  ;;  %v404_v55 = vmul.f32 %v388_v51, %v388_v51  ;;  %v405_v0 = vmul.f32 %v389_v53, %v389_v53 }
 0x146   :  { %v406_v14 = vmul.f32 %v390_v48, %v390_v48  ;;  %v407_v18 = vmul.f32 %v391_v52, %v391_v52  ;;  %v394_v16 = vsub.f32 %v848_v59, %v907_v47  ;;  %v408_v22 = vmul.f32 %v392_v11, %v392_v11 }
 0x147   :  { %v418_v2 = vsel %vm347_vm5, %v402_v37, 0.0  ;;  %v419_v3 = vsel %vm347_vm5, %v403_v54, 0.0  ;;  %v421_v12 = vsel %vm347_vm5, %v404_v55, 0.0  ;;  %v423_v10 = vsel %vm347_vm5, %v405_v0, 0.0 }
 0x148   :  { %v420_v7 = vadd.f32 %v419_v3, %v418_v2  ;;  %v425_v26 = vsel %vm347_vm5, %v406_v14, 0.0  ;;  %v395_v30 = vsub.f32 %v856_v63, %v907_v47  ;;  %v409_v41 = vmul.f32 %v393_v17, %v393_v17 }
 0x149   :  { %v427_v27 = vsel %vm347_vm5, %v407_v18, 0.0  ;;  %v396_v29 = vsub.f32 %v874_v5, %v907_v47  ;;  %v410_v31 = vmul.f32 %v394_v16, %v394_v16  ;;  %v429_v32 = vsel %vm347_vm5, %v408_v22, 0.0 }
 0x14a   :  { %v422_v4 = vadd.f32 %v421_v12, %v420_v7  ;;  %v397_v35 = vsub.f32 %v890_v28, %v907_v47  ;;  %v411_v36 = vmul.f32 %v395_v30, %v395_v30  ;;  %v431_v6 = vsel %vm347_vm5, %v409_v41, 0.0 }
 0x14b   :  { %v398_v39 = vsub.f32 %v854_v62, %v907_v47  ;;  %v412_v40 = vmul.f32 %v396_v29, %v396_v29  ;;  %v433_v42 = vsel %vm347_vm5, %v410_v31, 0.0  ;;  %v399_v19 = vsub.f32 %v870_v15, %v907_v47  ;;  %v456_v31 = vld [vmem:[%s1049_s4] sm:$0x1] }
 0x14c   :  { %v424_v21 = vadd.f32 %v423_v10, %v422_v4  ;;  %v413_v44 = vmul.f32 %v397_v35, %v397_v35  ;;  %v435_v23 = vsel %vm347_vm5, %v411_v36, 0.0  ;;  %v400_v33 = vsub.f32 %v886_v25, %v907_v47 }
 0x14d   :  { %v414_v49 = vmul.f32 %v398_v39, %v398_v39  ;;  %v437_v50 = vsel %vm347_vm5, %v412_v40, 0.0  ;;  %v401_v53 = vsub.f32 %v900_v8, %v907_v47  ;;  %v415_v37 = vmul.f32 %v399_v19, %v399_v19 }
 0x14e   :  { %v426_v24 = vadd.f32 %v425_v26, %v424_v21  ;;  %v439_v54 = vsel %vm347_vm5, %v413_v44, 0.0  ;;  %v416_v55 = vmul.f32 %v400_v33, %v400_v33 }
 0x14f   :  { %v441_v52 = vsel %vm347_vm5, %v414_v49, 0.0  ;;  %v417_v2 = vmul.f32 %v401_v53, %v401_v53  ;;  %v443_v3 = vsel %vm347_vm5, %v415_v37, 0.0 }
 0x150   :  { %v428_v45 = vadd.f32 %v427_v27, %v426_v24  ;;  %v445_v11 = vsel %vm347_vm5, %v416_v55, 0.0 }
 0x151   :  { %v447_v12 = vsel %vm347_vm5, %v417_v2, 0.0 }
 0x152   :  { %v430_v34 = vadd.f32 %v429_v32, %v428_v45 }
 0x154   :  { %v432_v38 = vadd.f32 %v431_v6, %v430_v34 }
 0x156   :  { %v434_v43 = vadd.f32 %v433_v42, %v432_v38 }
 0x158   :  { %v436_v46 = vadd.f32 %v435_v23, %v434_v43 }
 0x15a   :  { %v438_v51 = vadd.f32 %v437_v50, %v436_v46 }
 0x15c   :  { %v440_v48 = vadd.f32 %v439_v54, %v438_v51 }
 0x15e   :  { %v442_v0 = vadd.f32 %v441_v52, %v440_v48 }
 0x160   :  { %v444_v7 = vadd.f32 %v443_v3, %v442_v0 }
 0x162   :  { %v446_v14 = vadd.f32 %v445_v11, %v444_v7 }
 0x164   :  { %v448_v4 = vadd.f32 %v447_v12, %v446_v14 }
 0x166   :  { %v449_v17 = vrot.slane %v448_v4, 4 }
 0x168   :  { %v450_v18 = vadd.f32 %v449_v17, %v448_v4 }
 0x16a   :  { %v451_v10 = vrot.slane %v450_v18, 2 }
 0x16c   :  { %v452_v21 = vadd.f32 %v451_v10, %v450_v18 }
 0x16e   :  { %v453_v16 = vrot.slane %v452_v21, 1 }
 0x170   :  { %v454_v22 = vadd.f32 %v453_v16, %v452_v21 }
 0x172   :  { %v455_v26 = vmul.f32 %v454_v22, %v757_v9  ;;  %v488_v9 = vld [vmem:[%s1050_s5] sm:$0x1] }
 0x174   :  { %v457_v24 = vadd.f32 1e-05, %v455_v26 }
 0x176   :  { %622 = vrsqrt.f32 %v457_v24  ;;  %vm464_vm7 = vweird.f32 %v457_v24 }
 0x17c   :  { %v623_v30 = vpop.eup %622 }
 0x17d   :  { %v459_v41 = vmul.f32 %v623_v30, %v457_v24  ;;  %vm465_vm6 = vweird.f32 %v623_v30 }
 0x17e   :  { %vm466_vm8 = vmor %vm464_vm7, %vm465_vm6 }
 0x17f   :  { %v460_v27 = vmul.f32 %v623_v30, %v459_v41 }
 0x181   :  { %v461_v45 = vmul.f32 0.5, %v460_v27 }
 0x183   :  { %v462_v29 = vsub.f32 1.5, %v461_v45 }
 0x185   :  { %v463_v32 = vmul.f32 %v623_v30, %v462_v29 }
 0x187   :  { %v467_v34 = vsel %vm466_vm8, %v623_v30, %v463_v32 }
 0x188   :  { %v468_v35 = vmul.f32 %v467_v34, %v456_v31 }
 0x18a   :  { %v489_v36 = vmul.f32 %v468_v35, %v907_v47  ;;  %v470_v6 = vperm.slane %v468_v35, 0 }
 0x18c   :  { %v490_v38 = vsub.f32 %v488_v9, %v489_v36  ;;  %v472_v39 = vmul.f32 %v470_v6, %v842_v56  ;;  %v473_v40 = vmul.f32 %v470_v6, %v846_v58  ;;  %v474_v42 = vmul.f32 %v470_v6, %v852_v61 }
 0x18d   :  { %v475_v19 = vmul.f32 %v470_v6, %v866_v13  ;;  %v476_v44 = vmul.f32 %v470_v6, %v844_v57  ;;  %v477_v33 = vmul.f32 %v470_v6, %v850_v60  ;;  %v478_v50 = vmul.f32 %v470_v6, %v860_v1 }
 0x18e   :  { %v492_v43 = vperm.slane %v490_v38, 0  ;;  %v479_v56 = vmul.f32 %v470_v6, %v878_v20  ;;  %v480_v58 = vmul.f32 %v470_v6, %v848_v59  ;;  %v481_v57 = vmul.f32 %v470_v6, %v856_v63 }
 0x18f   :  { %v482_v52 = vmul.f32 %v470_v6, %v874_v5  ;;  %v483_v59 = vmul.f32 %v470_v6, %v890_v28  ;;  %v484_v63 = vmul.f32 %v470_v6, %v854_v62  ;;  %v485_v3 = vmul.f32 %v470_v6, %v870_v15 }
 0x190   :  { %v494_v23 = vadd.f32 %v492_v43, %v472_v39  ;;  %v495_v46 = vadd.f32 %v492_v43, %v473_v40  ;;  %v496_v47 = vadd.f32 %v492_v43, %v474_v42  ;;  %v497_v49 = vadd.f32 %v492_v43, %v475_v19 }
 0x191   :  { %v498_v51 = vadd.f32 %v492_v43, %v476_v44  ;;  %v499_v53 = vadd.f32 %v492_v43, %v477_v33  ;;  %v500_v61 = vadd.f32 %v492_v43, %v478_v50  ;;  %v501_v48 = vadd.f32 %v492_v43, %v479_v56 }
 0x192   :  { %v510_v37 = vmax.f32 %v494_v23, 0.0  ;;  %v511_v54 = vmax.f32 %v495_v46, 0.0  ;;  %v512_v13 = vmax.f32 %v496_v47, 0.0  ;;  %v513_v55 = vmax.f32 %v497_v49, 0.0 }
 0x193   :  { %v502_v60 = vadd.f32 %v492_v43, %v480_v58  ;;  %v514_v0 = vmax.f32 %v498_v51, 0.0  ;;  %v503_v1 = vadd.f32 %v492_v43, %v481_v57  ;;  %v515_v20 = vmax.f32 %v499_v53, 0.0 }
 0x194   :  { %526 = vst.msk [vmem:[%s1051_s6] sm:$0xff] %vm347_vm5, %v510_v37  ;;  %v504_v2 = vadd.f32 %v492_v43, %v482_v52  ;;  %v516_v5 = vmax.f32 %v500_v61, 0.0  ;;  %v505_v7 = vadd.f32 %v492_v43, %v483_v59  ;;  %v517_v28 = vmax.f32 %v501_v48, 0.0 }
 0x195   :  { %527 = vst.msk [vmem:[%s1051_s6 + $0x8] sm:$0xff] %vm347_vm5, %v511_v54  ;;  %v486_v11 = vmul.f32 %v470_v6, %v886_v25  ;;  %v506_v14 = vadd.f32 %v492_v43, %v484_v63  ;;  %v518_v62 = vmax.f32 %v502_v60, 0.0  ;;  %v487_v12 = vmul.f32 %v470_v6, %v900_v8 }
 0x196   :  { %528 = vst.msk [vmem:[%s1051_s6 + $0x10] sm:$0xff] %vm347_vm5, %v512_v13  ;;  %v507_v4 = vadd.f32 %v492_v43, %v485_v3  ;;  %v519_v15 = vmax.f32 %v503_v1, 0.0  ;;  %v520_v18 = vmax.f32 %v504_v2, 0.0  ;;  %v521_v10 = vmax.f32 %v505_v7, 0.0 }
 0x197   :  { %529 = vst.msk [vmem:[%s1051_s6 + $0x18] sm:$0xff] %vm347_vm5, %v513_v55  ;;  %v508_v17 = vadd.f32 %v492_v43, %v486_v11  ;;  %v509_v25 = vadd.f32 %v492_v43, %v487_v12  ;;  %v522_v8 = vmax.f32 %v506_v14, 0.0 }
 0x198   :  { %530 = vst.msk [vmem:[%s1051_s6 + $0x20] sm:$0xff] %vm347_vm5, %v514_v0  ;;  %v523_v21 = vmax.f32 %v507_v4, 0.0 }
 0x199   :  { %531 = vst.msk [vmem:[%s1051_s6 + $0x28] sm:$0xff] %vm347_vm5, %v515_v20  ;;  %v524_v16 = vmax.f32 %v508_v17, 0.0  ;;  %v525_v22 = vmax.f32 %v509_v25, 0.0 }
 0x19a   :  { %532 = vst.msk [vmem:[%s1051_s6 + $0x30] sm:$0xff] %vm347_vm5, %v516_v5 }
 0x19b   :  { %533 = vst.msk [vmem:[%s1051_s6 + $0x38] sm:$0xff] %vm347_vm5, %v517_v28 }
 0x19c   :  { %534 = vst.msk [vmem:[%s1051_s6 + $0x40] sm:$0xff] %vm347_vm5, %v518_v62 }
 0x19d   :  { %535 = vst.msk [vmem:[%s1051_s6 + $0x48] sm:$0xff] %vm347_vm5, %v519_v15 }
 0x19e   :  { %536 = vst.msk [vmem:[%s1051_s6 + $0x50] sm:$0xff] %vm347_vm5, %v520_v18 }
 0x19f   :  { %537 = vst.msk [vmem:[%s1051_s6 + $0x58] sm:$0xff] %vm347_vm5, %v521_v10 }
 0x1a0   :  { %538 = vst.msk [vmem:[%s1051_s6 + $0x60] sm:$0xff] %vm347_vm5, %v522_v8 }
 0x1a1   :  { %539 = vst.msk [vmem:[%s1051_s6 + $0x68] sm:$0xff] %vm347_vm5, %v523_v21 }
 0x1a2   :  { %540 = vst.msk [vmem:[%s1051_s6 + $0x70] sm:$0xff] %vm347_vm5, %v524_v16 }
 0x1a3   :  { %541 = vst.msk [vmem:[%s1051_s6 + $0x78] sm:$0xff] %vm347_vm5, %v525_v22 }

// kernel: densenet_forward.26
= control target key start
LH: loop header
LB: loop body
LE: loop exit
PB: predicated region body
PF: predicated region fallthrough
CT: control target
= control target key end

     0   :  { %vm50_vm0 = vcmask 523264   ;;  %v470_v41 = vmov 128.0   ;;  %vm365_vm5 = vcmask 257024   ;;  %s745_s3 = inlined_call_operand.vmem [shape: bf16[64,32], index: 3, kind: input, shape index: {}]   ;;  %s746_s0 = inlined_call_operand.vmem [shape: bf16[128,64], index: 0, kind: input, shape index: {}]   ;;  %s747_s1 = inlined_call_operand.vmem [shape: f32[1,64], index: 1, kind: input, shape index: {}]   ;;  %s748_s2 = inlined_call_operand.vmem [shape: f32[1,64], index: 2, kind: input, shape index: {}]   ;;  %s749_s4 = inlined_call_operand.vmem [shape: bf16[128,32], index: 4, kind: output, shape index: {}]  }
   0x1   :  { %v413_v0 = vld [vmem:[%s745_s3 + $0x18] sm:$0xff]  ;;  %v415_v1 = vld [vmem:[%s746_s0] sm:$0xff]   ;;  %v446_v2 = vld [vmem:[%s746_s0 + $0x8] sm:$0xff]   ;;  %466 = vrcp.f32 %v470_v41 }
   0x2   :  { %304 = vmatpush.bf16.msra.mxu0 %v413_v0  ;;  %453 = vmatpush.bf16.msra.mxu1 %v413_v0  ;;  %v412_v3 = vld [vmem:[%s745_s3 + $0x10] sm:$0xff]  ;;  %v508_v4 = vunpack.c.l.bf16 %v415_v1  ;;  %v510_v5 = vunpack.c.h.bf16 %v415_v1  ;;  %v512_v6 = vunpack.c.l.bf16 %v446_v2  ;;  %v517_v8 = vunpack.c.h.bf16 %v446_v2  ;;  %v411_v9 = vld [vmem:[%s745_s3 + $0x8] sm:$0xff]  ;;  %v448_v14 = vld [vmem:[%s746_s0 + $0x18] sm:$0xff]  }
   0x3   :  { %454 = vmatpush.bf16.msra.mxu2 %v413_v0  ;;  %455 = vmatpush.bf16.msra.mxu3 %v413_v0  ;;  %v447_v7 = vld [vmem:[%s746_s0 + $0x10] sm:$0xff]   ;;  %v410_v19 = vld [vmem:[%s745_s3] sm:$0xff]  ;;  %v540_v20 = vunpack.c.l.bf16 %v448_v14  ;;  %v547_v24 = vunpack.c.h.bf16 %v448_v14  ;;  %v450_v29 = vld [vmem:[%s746_s0 + $0x28] sm:$0xff]  }
   0x4   :  { %v522_v10 = vunpack.c.l.bf16 %v447_v7  ;;  %v51_v11 = vsel %vm50_vm0, %v508_v4, 0.0  ;;  %v52_v12 = vsel %vm50_vm0, %v510_v5, 0.0  ;;  %v54_v13 = vsel %vm50_vm0, %v512_v6, 0.0  ;;  %v449_v22 = vld [vmem:[%s746_s0 + $0x20] sm:$0xff]   ;;  %v451_v36 = vld [vmem:[%s746_s0 + $0x30] sm:$0xff]   ;;  %v452_v44 = vld [vmem:[%s746_s0 + $0x38] sm:$0xff]  }
   0x5   :  { %v53_v15 = vadd.f32 %v52_v12, %v51_v11  ;;  %v533_v16 = vunpack.c.h.bf16 %v447_v7  ;;  %v56_v17 = vsel %vm50_vm0, %v517_v8, 0.0  ;;  %v551_v27 = vunpack.c.l.bf16 %v449_v22 }
   0x6   :  { %305 = vmatpush.bf16.msra.mxu0 %v412_v3  ;;  %456 = vmatpush.bf16.msra.mxu1 %v412_v3  ;;  %v58_v21 = vsel %vm50_vm0, %v522_v10, 0.0  ;;  %v62_v28 = vsel %vm50_vm0, %v540_v20, 0.0  ;;  %v558_v31 = vunpack.c.h.bf16 %v449_v22  ;;  %v64_v32 = vsel %vm50_vm0, %v547_v24, 0.0 }
   0x7   :  { %457 = vmatpush.bf16.msra.mxu2 %v412_v3  ;;  %458 = vmatpush.bf16.msra.mxu3 %v412_v3  ;;  %v55_v18 = vadd.f32 %v54_v13, %v53_v15  ;;  %v60_v25 = vsel %vm50_vm0, %v533_v16, 0.0  ;;  %v562_v34 = vunpack.c.l.bf16 %v450_v29  ;;  %v66_v35 = vsel %vm50_vm0, %v551_v27, 0.0  ;;  %v467_v51 = vpop.eup %466 }
   0x8   :  { %v569_v38 = vunpack.c.h.bf16 %v450_v29  ;;  %v68_v39 = vsel %vm50_vm0, %v558_v31, 0.0  ;;  %v573_v42 = vunpack.c.l.bf16 %v451_v36  ;;  %v580_v46 = vunpack.c.h.bf16 %v451_v36 }
   0x9   :  { %v57_v23 = vadd.f32 %v56_v17, %v55_v18  ;;  %v70_v43 = vsel %vm50_vm0, %v562_v34, 0.0  ;;  %v584_v49 = vunpack.c.l.bf16 %v452_v44  ;;  %v588_v53 = vunpack.c.h.bf16 %v452_v44 }
   0xa   :  { %306 = vmatpush.bf16.msra.mxu0 %v411_v9  ;;  %459 = vmatpush.bf16.msra.mxu1 %v411_v9  ;;  %v72_v47 = vsel %vm50_vm0, %v569_v38, 0.0  ;;  %v74_v50 = vsel %vm50_vm0, %v573_v42, 0.0  ;;  %v76_v54 = vsel %vm50_vm0, %v580_v46, 0.0  ;;  %v89_v57 = vmul.f32 128.0, %v467_v51 }
   0xb   :  { %460 = vmatpush.bf16.msra.mxu2 %v411_v9  ;;  %461 = vmatpush.bf16.msra.mxu3 %v411_v9  ;;  %v59_v26 = vadd.f32 %v58_v21, %v57_v23  ;;  %v78_v56 = vsel %vm50_vm0, %v584_v49, 0.0  ;;  %v80_v59 = vsel %vm50_vm0, %v588_v53, 0.0  ;;  %vm93_vm1 = vweird.f32 %v467_v51 }
   0xc   :  { %v90_v61 = vsub.f32 1.0, %v89_v57 }
   0xd   :  { %v61_v30 = vadd.f32 %v60_v25, %v59_v26 }
   0xe   :  { %307 = vmatpush.bf16.msra.mxu0 %v410_v19  ;;  %462 = vmatpush.bf16.msra.mxu1 %v410_v19  ;;  %v91_v0 = vmul.f32 %v467_v51, %v90_v61 }
   0xf   :  { %463 = vmatpush.bf16.msra.mxu2 %v410_v19  ;;  %464 = vmatpush.bf16.msra.mxu3 %v410_v19  ;;  %v63_v33 = vadd.f32 %v62_v28, %v61_v30 }
  0x10   :  { %v92_v3 = vadd.f32 %v467_v51, %v91_v0 }
  0x11   :  { %v65_v37 = vadd.f32 %v64_v32, %v63_v33 }
  0x12   :  { %v596_v11 = vsel %vm93_vm1, %v467_v51, %v92_v3 }
  0x13   :  { %v67_v40 = vadd.f32 %v66_v35, %v65_v37 }
  0x15   :  { %v69_v45 = vadd.f32 %v68_v39, %v67_v40 }
  0x17   :  { %v71_v48 = vadd.f32 %v70_v43, %v69_v45 }
  0x19   :  { %v73_v52 = vadd.f32 %v72_v47, %v71_v48 }
  0x1b   :  { %v75_v55 = vadd.f32 %v74_v50, %v73_v52 }
  0x1d   :  { %v77_v58 = vadd.f32 %v76_v54, %v75_v55 }
  0x1f   :  { %v79_v60 = vadd.f32 %v78_v56, %v77_v58 }
  0x21   :  { %v81_v62 = vadd.f32 %v80_v59, %v79_v60 }
  0x23   :  { %v82_v63 = vrot.slane %v81_v62, 4 }
  0x25   :  { %v83_v1 = vadd.f32 %v82_v63, %v81_v62 }
  0x27   :  { %v84_v2 = vrot.slane %v83_v1, 2 }
  0x29   :  { %v85_v7 = vadd.f32 %v84_v2, %v83_v1 }
  0x2b   :  { %v86_v9 = vrot.slane %v85_v7, 1 }
  0x2d   :  { %v87_v12 = vadd.f32 %v86_v9, %v85_v7 }
  0x2f   :  { %v599_v13 = vmul.f32 %v596_v11, %v87_v12 }
  0x31   :  { %v96_v14 = vsub.f32 %v508_v4, %v599_v13  ;;  %v97_v15 = vsub.f32 %v510_v5, %v599_v13  ;;  %v98_v17 = vsub.f32 %v512_v6, %v599_v13  ;;  %v99_v18 = vsub.f32 %v517_v8, %v599_v13 }
  0x32   :  { %v100_v19 = vsub.f32 %v522_v10, %v599_v13  ;;  %v101_v25 = vsub.f32 %v533_v16, %v599_v13  ;;  %v102_v28 = vsub.f32 %v540_v20, %v599_v13  ;;  %v103_v36 = vsub.f32 %v547_v24, %v599_v13 }
  0x33   :  { %v112_v21 = vmul.f32 %v96_v14, %v96_v14  ;;  %v113_v22 = vmul.f32 %v97_v15, %v97_v15  ;;  %v114_v23 = vmul.f32 %v98_v17, %v98_v17  ;;  %v115_v26 = vmul.f32 %v99_v18, %v99_v18 }
  0x34   :  { %v116_v29 = vmul.f32 %v100_v19, %v100_v19  ;;  %v117_v37 = vmul.f32 %v101_v25, %v101_v25  ;;  %v104_v41 = vsub.f32 %v551_v27, %v599_v13  ;;  %v118_v43 = vmul.f32 %v102_v28, %v102_v28 }
  0x35   :  { %v128_v30 = vsel %vm50_vm0, %v112_v21, 0.0  ;;  %v129_v32 = vsel %vm50_vm0, %v113_v22, 0.0  ;;  %v131_v33 = vsel %vm50_vm0, %v114_v23, 0.0  ;;  %v133_v39 = vsel %vm50_vm0, %v115_v26, 0.0 }
  0x36   :  { %v130_v35 = vadd.f32 %v129_v32, %v128_v30  ;;  %v135_v44 = vsel %vm50_vm0, %v116_v29, 0.0  ;;  %v105_v47 = vsub.f32 %v558_v31, %v599_v13  ;;  %v119_v48 = vmul.f32 %v103_v36, %v103_v36 }
  0x37   :  { %v137_v50 = vsel %vm50_vm0, %v117_v37, 0.0  ;;  %v106_v52 = vsub.f32 %v562_v34, %v599_v13  ;;  %v120_v54 = vmul.f32 %v104_v41, %v104_v41  ;;  %v139_v55 = vsel %vm50_vm0, %v118_v43, 0.0 }
  0x38   :  { %v132_v40 = vadd.f32 %v131_v33, %v130_v35  ;;  %v107_v57 = vsub.f32 %v569_v38, %v599_v13  ;;  %v121_v58 = vmul.f32 %v105_v47, %v105_v47  ;;  %v141_v59 = vsel %vm50_vm0, %v119_v48, 0.0 }
  0x39   :  { %v108_v61 = vsub.f32 %v573_v42, %v599_v13  ;;  %v122_v62 = vmul.f32 %v106_v52, %v106_v52  ;;  %v143_v63 = vsel %vm50_vm0, %v120_v54, 0.0  ;;  %v109_v1 = vsub.f32 %v580_v46, %v599_v13 }
  0x3a   :  { %v134_v45 = vadd.f32 %v133_v39, %v132_v40  ;;  %v123_v2 = vmul.f32 %v107_v57, %v107_v57  ;;  %v145_v3 = vsel %vm50_vm0, %v121_v58, 0.0  ;;  %v110_v9 = vsub.f32 %v584_v49, %v599_v13 }
  0x3b   :  { %v124_v12 = vmul.f32 %v108_v61, %v108_v61  ;;  %v147_v14 = vsel %vm50_vm0, %v122_v62, 0.0  ;;  %v111_v17 = vsub.f32 %v588_v53, %v599_v13  ;;  %v125_v18 = vmul.f32 %v109_v1, %v109_v1 }
  0x3c   :  { %v136_v51 = vadd.f32 %v135_v44, %v134_v45  ;;  %v149_v19 = vsel %vm50_vm0, %v123_v2, 0.0  ;;  %v126_v22 = vmul.f32 %v110_v9, %v110_v9 }
  0x3d   :  { %v151_v23 = vsel %vm50_vm0, %v124_v12, 0.0  ;;  %v127_v26 = vmul.f32 %v111_v17, %v111_v17  ;;  %v153_v28 = vsel %vm50_vm0, %v125_v18, 0.0 }
  0x3e   :  { %v138_v56 = vadd.f32 %v137_v50, %v136_v51  ;;  %v155_v30 = vsel %vm50_vm0, %v126_v22, 0.0 }
  0x3f   :  { %v157_v33 = vsel %vm50_vm0, %v127_v26, 0.0 }
  0x40   :  { %v140_v60 = vadd.f32 %v139_v55, %v138_v56  ;;  %v166_v55 = vld [vmem:[%s747_s1] sm:$0x1] }
  0x42   :  { %v142_v0 = vadd.f32 %v141_v59, %v140_v60 }
  0x44   :  { %v144_v7 = vadd.f32 %v143_v63, %v142_v0 }
  0x46   :  { %v146_v15 = vadd.f32 %v145_v3, %v144_v7 }
  0x48   :  { %v148_v21 = vadd.f32 %v147_v14, %v146_v15 }
  0x4a   :  { %v150_v25 = vadd.f32 %v149_v19, %v148_v21 }
  0x4c   :  { %v152_v29 = vadd.f32 %v151_v23, %v150_v25 }
  0x4e   :  { %v154_v32 = vadd.f32 %v153_v28, %v152_v29 }
  0x50   :  { %v156_v35 = vadd.f32 %v155_v30, %v154_v32 }
  0x52   :  { %v158_v36 = vadd.f32 %v157_v33, %v156_v35 }
  0x54   :  { %v159_v37 = vrot.slane %v158_v36, 4 }
  0x56   :  { %v160_v39 = vadd.f32 %v159_v37, %v158_v36 }
  0x58   :  { %v161_v40 = vrot.slane %v160_v39, 2 }
  0x5a   :  { %v162_v41 = vadd.f32 %v161_v40, %v160_v39 }
  0x5c   :  { %v163_v43 = vrot.slane %v162_v41, 1 }
  0x5e   :  { %v164_v44 = vadd.f32 %v163_v43, %v162_v41 }
  0x60   :  { %v165_v45 = vmul.f32 %v164_v44, %v596_v11  ;;  %v198_v11 = vld [vmem:[%s748_s2] sm:$0x1] }
  0x62   :  { %v167_v47 = vadd.f32 1e-05, %v165_v45 }
  0x64   :  { %468 = vrsqrt.f32 %v167_v47  ;;  %vm174_vm2 = vweird.f32 %v167_v47 }
  0x6a   :  { %v469_v48 = vpop.eup %468 }
  0x6b   :  { %v169_v50 = vmul.f32 %v469_v48, %v167_v47  ;;  %vm175_vm3 = vweird.f32 %v469_v48 }
  0x6c   :  { %vm176_vm4 = vmor %vm174_vm2, %vm175_vm3 }
  0x6d   :  { %v170_v51 = vmul.f32 %v469_v48, %v169_v50 }
  0x6f   :  { %v171_v52 = vmul.f32 0.5, %v170_v51 }
  0x71   :  { %v172_v54 = vsub.f32 1.5, %v171_v52 }
  0x73   :  { %v173_v56 = vmul.f32 %v469_v48, %v172_v54 }
  0x75   :  { %v177_v57 = vsel %vm176_vm4, %v469_v48, %v173_v56 }
  0x76   :  { %v178_v58 = vmul.f32 %v177_v57, %v166_v55 }
  0x78   :  { %v180_v59 = vperm.slane %v178_v58, 0  ;;  %v199_v60 = vmul.f32 %v178_v58, %v599_v13 }
  0x7a   :  { %v182_v61 = vmul.f32 %v508_v4, %v180_v59  ;;  %v183_v62 = vmul.f32 %v510_v5, %v180_v59  ;;  %v200_v63 = vsub.f32 %v198_v11, %v199_v60  ;;  %v186_v0 = vmul.f32 %v522_v10, %v180_v59 }
  0x7b   :  { %v187_v1 = vmul.f32 %v533_v16, %v180_v59  ;;  %v190_v2 = vmul.f32 %v551_v27, %v180_v59  ;;  %v191_v3 = vmul.f32 %v558_v31, %v180_v59  ;;  %v194_v7 = vmul.f32 %v573_v42, %v180_v59 }
  0x7c   :  { %v202_v9 = vperm.slane %v200_v63, 0  ;;  %v195_v12 = vmul.f32 %v580_v46, %v180_v59  ;;  %v184_v29 = vmul.f32 %v512_v6, %v180_v59  ;;  %v185_v30 = vmul.f32 %v517_v8, %v180_v59 }
  0x7d   :  { %v188_v32 = vmul.f32 %v540_v20, %v180_v59  ;;  %v189_v33 = vmul.f32 %v547_v24, %v180_v59  ;;  %v192_v35 = vmul.f32 %v562_v34, %v180_v59  ;;  %v193_v36 = vmul.f32 %v569_v38, %v180_v59 }
  0x7e   :  { %v204_v14 = vadd.f32 %v202_v9, %v182_v61  ;;  %v205_v13 = vadd.f32 %v202_v9, %v183_v62  ;;  %v208_v15 = vadd.f32 %v202_v9, %v186_v0  ;;  %v209_v4 = vadd.f32 %v202_v9, %v187_v1 }
  0x7f   :  { %v212_v17 = vadd.f32 %v202_v9, %v190_v2  ;;  %v213_v5 = vadd.f32 %v202_v9, %v191_v3  ;;  %v216_v18 = vadd.f32 %v202_v9, %v194_v7  ;;  %v217_v19 = vadd.f32 %v202_v9, %v195_v12 }
  0x80   :  { %v220_v10 = vmax.f32 %v204_v14, 0.0  ;;  %v221_v21 = vmax.f32 %v205_v13, 0.0  ;;  %v224_v16 = vmax.f32 %v208_v15, 0.0  ;;  %v225_v22 = vmax.f32 %v209_v4, 0.0 }
  0x81   :  { %v228_v27 = vmax.f32 %v212_v17, 0.0  ;;  %v229_v23 = vmax.f32 %v213_v5, 0.0  ;;  %v232_v31 = vmax.f32 %v216_v18, 0.0  ;;  %v233_v25 = vmax.f32 %v217_v19, 0.0 }
  0x82   :  { %v236_v42 = vpack.c.bf16 %v221_v21, %v220_v10  ;;  %v238_v26 = vpack.c.bf16 %v225_v22, %v224_v16  ;;  %v196_v6 = vmul.f32 %v584_v49, %v180_v59  ;;  %v197_v8 = vmul.f32 %v588_v53, %v180_v59 }
  0x83   :  { %v240_v28 = vpack.c.bf16 %v229_v23, %v228_v27  ;;  %v242_v46 = vpack.c.bf16 %v233_v25, %v232_v31  ;;  %v206_v37 = vadd.f32 %v202_v9, %v184_v29  ;;  %v207_v39 = vadd.f32 %v202_v9, %v185_v30 }
  0x84   :  { %402 = vmatmul.msk.bf16.vlgmr.msra.gmra.mxu0 %vm50_vm0, %v236_v42  ;;  %404 = vmatmul.msk.bf16.vlgmr.msra.gmra.mxu1 %vm50_vm0, %v238_v26  ;;  %v210_v40 = vadd.f32 %v202_v9, %v188_v32  ;;  %v211_v41 = vadd.f32 %v202_v9, %v189_v33  ;;  %v214_v43 = vadd.f32 %v202_v9, %v192_v35 }
  0x85   :  { %406 = vmatmul.msk.bf16.vlgmr.msra.gmra.mxu2 %vm50_vm0, %v240_v28  ;;  %408 = vmatmul.msk.bf16.vlgmr.msra.gmra.mxu3 %vm50_vm0, %v242_v46  ;;  %v215_v20 = vadd.f32 %v202_v9, %v193_v36  ;;  %v218_v44 = vadd.f32 %v202_v9, %v196_v6  ;;  %v219_v24 = vadd.f32 %v202_v9, %v197_v8  ;;  %v222_v45 = vmax.f32 %v206_v37, 0.0 }
  0x86   :  { %v223_v34 = vmax.f32 %v207_v39, 0.0  ;;  %v226_v47 = vmax.f32 %v210_v40, 0.0  ;;  %v227_v48 = vmax.f32 %v211_v41, 0.0  ;;  %v230_v50 = vmax.f32 %v214_v43, 0.0 }
  0x87   :  { %v231_v51 = vmax.f32 %v215_v20, 0.0  ;;  %v234_v52 = vmax.f32 %v218_v44, 0.0  ;;  %v235_v38 = vmax.f32 %v219_v24, 0.0 }
  0x88   :  { %v237_v54 = vpack.c.bf16 %v223_v34, %v222_v45  ;;  %v239_v49 = vpack.c.bf16 %v227_v48, %v226_v47 }
  0x89   :  { %v241_v55 = vpack.c.bf16 %v231_v51, %v230_v50  ;;  %v243_v53 = vpack.c.bf16 %v235_v38, %v234_v52 }
  0x94   :  { %403 = vmatmul.msk.bf16.gmra.mxu0 %vm50_vm0, %v237_v54  ;;  %405 = vmatmul.msk.bf16.gmra.mxu1 %vm50_vm0, %v239_v49 }
  0x95   :  { %407 = vmatmul.msk.bf16.gmra.mxu2 %vm50_vm0, %v241_v55  ;;  %409 = vmatmul.msk.bf16.gmra.mxu3 %vm50_vm0, %v243_v53 }
 0x101   :  { %v309_v56 = vpop.f32.mrf.mxu0  ;;  %v319_v57 = vpop.f32.mrf.mxu1 }
 0x102   :  { %v349_v58 = vpack.c.bf16 %v309_v56, %v309_v56  ;;  %v353_v11 = vpack.c.bf16 %v319_v57, %v319_v57 }
 0x104   :  { %366 = vst.msk [vmem:[%s749_s4] sm:$0xf] %vm365_vm5, %v349_v58 }
 0x105   :  { %370 = vst.msk [vmem:[%s749_s4 + $0x10] sm:$0xf] %vm365_vm5, %v353_v11 }
 0x108   :  { %v329_v59 = vpop.f32.mrf.mxu2  ;;  %v339_v60 = vpop.f32.mrf.mxu3 }
 0x109   :  { %v357_v61 = vpack.c.bf16 %v329_v59, %v329_v59  ;;  %v361_v62 = vpack.c.bf16 %v339_v60, %v339_v60  ;;  %v311_v63 = vpop.f32.mrf.mxu0  ;;  %v321_v0 = vpop.f32.mrf.mxu1 }
 0x10a   :  { %v350_v1 = vpack.c.bf16 %v311_v63, %v311_v63  ;;  %v354_v2 = vpack.c.bf16 %v321_v0, %v321_v0 }
 0x10b   :  { %374 = vst.msk [vmem:[%s749_s4 + $0x20] sm:$0xf] %vm365_vm5, %v357_v61 }
 0x10c   :  { %378 = vst.msk [vmem:[%s749_s4 + $0x30] sm:$0xf] %vm365_vm5, %v361_v62 }
 0x10d   :  { %367 = vst.msk [vmem:[%s749_s4 + $0x4] sm:$0xf] %vm365_vm5, %v350_v1 }
 0x10e   :  { %371 = vst.msk [vmem:[%s749_s4 + $0x14] sm:$0xf] %vm365_vm5, %v354_v2 }
 0x110   :  { %v331_v3 = vpop.f32.mrf.mxu2  ;;  %v341_v7 = vpop.f32.mrf.mxu3 }
 0x111   :  { %v358_v9 = vpack.c.bf16 %v331_v3, %v331_v3  ;;  %v362_v12 = vpack.c.bf16 %v341_v7, %v341_v7  ;;  %v314_v14 = vpop.f32.mrf.mxu0  ;;  %v324_v13 = vpop.f32.mrf.mxu1 }
 0x112   :  { %v351_v15 = vpack.c.bf16 %v314_v14, %v314_v14  ;;  %v355_v4 = vpack.c.bf16 %v324_v13, %v324_v13 }
 0x113   :  { %375 = vst.msk [vmem:[%s749_s4 + $0x24] sm:$0xf] %vm365_vm5, %v358_v9 }
 0x114   :  { %379 = vst.msk [vmem:[%s749_s4 + $0x34] sm:$0xf] %vm365_vm5, %v362_v12 }
 0x115   :  { %368 = vst.msk [vmem:[%s749_s4 + $0x8] sm:$0xf] %vm365_vm5, %v351_v15 }
 0x116   :  { %372 = vst.msk [vmem:[%s749_s4 + $0x18] sm:$0xf] %vm365_vm5, %v355_v4 }
 0x118   :  { %v334_v17 = vpop.f32.mrf.mxu2  ;;  %v344_v5 = vpop.f32.mrf.mxu3 }
 0x119   :  { %v359_v18 = vpack.c.bf16 %v334_v17, %v334_v17  ;;  %v363_v19 = vpack.c.bf16 %v344_v5, %v344_v5  ;;  %v316_v10 = vpop.f32.mrf.mxu0  ;;  %v326_v21 = vpop.f32.mrf.mxu1 }
 0x11a   :  { %v352_v16 = vpack.c.bf16 %v316_v10, %v316_v10  ;;  %v356_v22 = vpack.c.bf16 %v326_v21, %v326_v21 }
 0x11b   :  { %376 = vst.msk [vmem:[%s749_s4 + $0x28] sm:$0xf] %vm365_vm5, %v359_v18 }
 0x11c   :  { %380 = vst.msk [vmem:[%s749_s4 + $0x38] sm:$0xf] %vm365_vm5, %v363_v19 }
 0x11d   :  { %369 = vst.msk [vmem:[%s749_s4 + $0xc] sm:$0xf] %vm365_vm5, %v352_v16 }
 0x11e   :  { %373 = vst.msk [vmem:[%s749_s4 + $0x1c] sm:$0xf] %vm365_vm5, %v356_v22 }
 0x120   :  { %v336_v27 = vpop.f32.mrf.mxu2  ;;  %v346_v23 = vpop.f32.mrf.mxu3 }
 0x121   :  { %v360_v31 = vpack.c.bf16 %v336_v27, %v336_v27  ;;  %v364_v25 = vpack.c.bf16 %v346_v23, %v346_v23 }
 0x123   :  { %377 = vst.msk [vmem:[%s749_s4 + $0x2c] sm:$0xf] %vm365_vm5, %v360_v31 }
 0x124   :  { %381 = vst.msk [vmem:[%s749_s4 + $0x3c] sm:$0xf] %vm365_vm5, %v364_v25 }

// kernel: densenet_forward.23
= control target key start
LH: loop header
LB: loop body
LE: loop exit
PB: predicated region body
PF: predicated region fallthrough
CT: control target
= control target key end

     0   :  { %vm129_vm0 = vcmask 523264   ;;  %vm1859_vm1 = vcmask 125952   ;;  %s3509_s1 = inlined_call_operand.vmem [shape: bf16[9,64,16], index: 1, kind: input, shape index: {}]   ;;  %s3510_s0 = inlined_call_operand.vmem [shape: f32[222,64], index: 0, kind: input, shape index: {}]   ;;  %s3511_s2 = inlined_call_operand.vmem [shape: bf16[200,16], index: 2, kind: output, shape index: {}]  }
   0x1   :  { %v2221_v0 = vld [vmem:[%s3509_s1 + $0x38] sm:$0xff]  ;;  %v2220_v1 = vld [vmem:[%s3509_s1 + $0x30] sm:$0xff]  ;;  %v2219_v2 = vld [vmem:[%s3509_s1 + $0x28] sm:$0xff] }
   0x2   :  { %173 = vmatpush.bf16.msra.mxu0 %v2221_v0  ;;  %2250 = vmatpush.bf16.msra.mxu1 %v2221_v0  ;;  %v2218_v3 = vld [vmem:[%s3509_s1 + $0x20] sm:$0xff]  ;;  %v59_v5 = vld [vmem:[%s3510_s0 + $0x9] sm:$0xff]  ;;  %v76_v8 = vld [vmem:[%s3510_s0 + $0x91] sm:$0xff] }
   0x3   :  { %2252 = vmatpush.bf16.msra.mxu3 %v2221_v0  ;;  %2251 = vmatpush.bf16.msra.mxu2 %v2221_v0  ;;  %v58_v4 = vld [vmem:[%s3510_s0 + $0x1] sm:$0xff]  ;;  %v67_v7 = vld [vmem:[%s3510_s0 + $0x49] sm:$0xff]  ;;  %v77_v9 = vld [vmem:[%s3510_s0 + $0x99] sm:$0xff] }
   0x4   :  { %v66_v6 = vld [vmem:[%s3510_s0 + $0x41] sm:$0xff]  ;;  %v2217_v10 = vld [vmem:[%s3509_s1 + $0x18] sm:$0xff]  ;;  %v83_v13 = vpack.c.bf16 %v59_v5, %v58_v4  ;;  %v92_v15 = vpack.c.bf16 %v77_v9, %v76_v8  ;;  %v2216_v16 = vld [vmem:[%s3509_s1 + $0x10] sm:$0xff] }
   0x5   :  { %v2229_v11 = vld [vmem:[%s3509_s1 + $0x78] sm:$0xff]  ;;  %v87_v14 = vpack.c.bf16 %v67_v7, %v66_v6  ;;  %v2228_v17 = vld [vmem:[%s3509_s1 + $0x70] sm:$0xff]  ;;  %v2215_v19 = vld [vmem:[%s3509_s1 + $0x8] sm:$0xff] }
   0x6   :  { %174 = vmatpush.bf16.msra.mxu0 %v2220_v1  ;;  %2253 = vmatpush.bf16.msra.mxu1 %v2220_v1  ;;  %v2233_v12 = vld [vmem:[%s3509_s1 + $0x98] sm:$0xff]  ;;  %v2232_v18 = vld [vmem:[%s3509_s1 + $0x90] sm:$0xff]  ;;  %v74_v20 = vld [vmem:[%s3510_s0 + $0x81] sm:$0xff] }
   0x7   :  { %2255 = vmatpush.bf16.msra.mxu3 %v2220_v1  ;;  %2254 = vmatpush.bf16.msra.mxu2 %v2220_v1  ;;  %v75_v21 = vld [vmem:[%s3510_s0 + $0x89] sm:$0xff]  ;;  %v2225_v22 = vld [vmem:[%s3509_s1 + $0x58] sm:$0xff]  ;;  %v78_v31 = vld [vmem:[%s3510_s0 + $0xa1] sm:$0xff] }
   0x8   :  { %v2227_v23 = vld [vmem:[%s3509_s1 + $0x68] sm:$0xff]  ;;  %v91_v25 = vpack.c.bf16 %v75_v21, %v74_v20  ;;  %v2224_v26 = vld [vmem:[%s3509_s1 + $0x50] sm:$0xff]  ;;  %v61_v28 = vld [vmem:[%s3510_s0 + $0x19] sm:$0xff] }
   0x9   :  { %v2231_v24 = vld [vmem:[%s3509_s1 + $0x88] sm:$0xff]  ;;  %v60_v27 = vld [vmem:[%s3510_s0 + $0x11] sm:$0xff]  ;;  %v69_v30 = vld [vmem:[%s3510_s0 + $0x59] sm:$0xff] }
   0xa   :  { %175 = vmatpush.bf16.msra.mxu0 %v2219_v2  ;;  %2256 = vmatpush.bf16.msra.mxu1 %v2219_v2  ;;  %v68_v29 = vld [vmem:[%s3510_s0 + $0x51] sm:$0xff]  ;;  %v79_v32 = vld [vmem:[%s3510_s0 + $0xa9] sm:$0xff]  ;;  %v84_v33 = vpack.c.bf16 %v61_v28, %v60_v27  ;;  %v2226_v37 = vld [vmem:[%s3509_s1 + $0x60] sm:$0xff] }
   0xb   :  { %2258 = vmatpush.bf16.msra.mxu3 %v2219_v2  ;;  %2257 = vmatpush.bf16.msra.mxu2 %v2219_v2  ;;  %v88_v34 = vpack.c.bf16 %v69_v30, %v68_v29  ;;  %v93_v35 = vpack.c.bf16 %v79_v32, %v78_v31  ;;  %v2223_v36 = vld [vmem:[%s3509_s1 + $0x48] sm:$0xff]  ;;  %v2214_v38 = vld [vmem:[%s3509_s1] sm:$0xff]  ;;  %v2241_v43 = vld [vmem:[%s3509_s1 + $0xd8] sm:$0xff] }
   0xc   :  { %v2222_v39 = vld [vmem:[%s3509_s1 + $0x40] sm:$0xff]  ;;  %v379_v42 = vld [vmem:[%s3510_s0 + $0xa] sm:$0xff]  ;;  %v2245_v54 = vld [vmem:[%s3509_s1 + $0xf8] sm:$0xff] }
   0xd   :  { %v2230_v40 = vld [vmem:[%s3509_s1 + $0x80] sm:$0xff]  ;;  %v63_v46 = vld [vmem:[%s3510_s0 + $0x29] sm:$0xff]  ;;  %v80_v49 = vld [vmem:[%s3510_s0 + $0xb1] sm:$0xff] }
   0xe   :  { %176 = vmatpush.bf16.msra.mxu0 %v2218_v3  ;;  %2259 = vmatpush.bf16.msra.mxu1 %v2218_v3  ;;  %v378_v41 = vld [vmem:[%s3510_s0 + $0x2] sm:$0xff]  ;;  %v81_v50 = vld [vmem:[%s3510_s0 + $0xb9] sm:$0xff]  ;;  %v64_v60 = vld [vmem:[%s3510_s0 + $0x31] sm:$0xff] }
   0xf   :  { %2261 = vmatpush.bf16.msra.mxu3 %v2218_v3  ;;  %2260 = vmatpush.bf16.msra.mxu2 %v2218_v3  ;;  %v403_v44 = vpack.c.bf16 %v379_v42, %v378_v41  ;;  %v62_v45 = vld [vmem:[%s3510_s0 + $0x21] sm:$0xff]  ;;  %v71_v48 = vld [vmem:[%s3510_s0 + $0x69] sm:$0xff]  ;;  %v94_v53 = vpack.c.bf16 %v81_v50, %v80_v49  ;;  %v2237_v55 = vld [vmem:[%s3509_s1 + $0xb8] sm:$0xff] }
  0x10   :  { %v70_v47 = vld [vmem:[%s3510_s0 + $0x61] sm:$0xff]  ;;  %v85_v51 = vpack.c.bf16 %v63_v46, %v62_v45  ;;  %v2249_v56 = vld [vmem:[%s3509_s1 + $0x118] sm:$0xff]  ;;  %v383_v4 = vld [vmem:[%s3510_s0 + $0x2a] sm:$0xff] }
  0x11   :  { %1913 = vmatmul.msk.bf16.vlgmr.msra.gmra.mxu0 %vm129_vm0, %v83_v13  ;;  %1917 = vmatmul.msk.bf16.vlgmr.msra.gmra.mxu1 %vm129_vm0, %v87_v14  ;;  %v89_v52 = vpack.c.bf16 %v71_v48, %v70_v47  ;;  %v381_v57 = vld [vmem:[%s3510_s0 + $0x1a] sm:$0xff]  ;;  %v587_v58 = vld [vmem:[%s3510_s0 + $0x12] sm:$0xff]  ;;  %v589_v5 = vld [vmem:[%s3510_s0 + $0x22] sm:$0xff] }
  0x12   :  { %309 = vmatpush.bf16.msrb.mxu1 %v2217_v10  ;;  %908 = vmatpush.bf16.msrb.mxu0 %v2233_v12  ;;  %v404_v59 = vpack.c.bf16 %v381_v57, %v587_v58  ;;  %v65_v61 = vld [vmem:[%s3510_s0 + $0x39] sm:$0xff]  ;;  %v72_v62 = vld [vmem:[%s3510_s0 + $0x71] sm:$0xff]  ;;  %v82_v0 = vld [vmem:[%s3510_s0 + $0xc1] sm:$0xff]  ;;  %v405_v6 = vpack.c.bf16 %v383_v4, %v589_v5  ;;  %v611_v13 = vpack.c.bf16 %v587_v58, %v379_v42 }
  0x13   :  { %700 = vmatpush.bf16.msrb.mxu3 %v2229_v11  ;;  %492 = vmatpush.bf16.msrb.mxu2 %v2225_v22  ;;  %v73_v63 = vld [vmem:[%s3510_s0 + $0x79] sm:$0xff]  ;;  %v86_v1 = vpack.c.bf16 %v65_v61, %v64_v60  ;;  %v95_v3 = vpack.c.bf16 %v82_v0, %v82_v0  ;;  %v13_v8 = vld [vmem:[%s3510_s0 + $0x8] sm:$0xff]  ;;  %v2236_v27 = vld [vmem:[%s3509_s1 + $0xb0] sm:$0xff] }
  0x14   :  { %1922 = vmatmul.msk.bf16.vlgmr.msra.gmra.mxu3 %vm129_vm0, %v92_v15  ;;  %1921 = vmatmul.msk.bf16.vlgmr.msra.gmra.mxu2 %vm129_vm0, %v91_v25  ;;  %v90_v2 = vpack.c.bf16 %v73_v63, %v72_v62  ;;  %v12_v7 = vld [vmem:[%s3510_s0] sm:$0xff]  ;;  %v794_v9 = vld [vmem:[%s3510_s0 + $0xb] sm:$0xff]  ;;  %v795_v10 = vld [vmem:[%s3510_s0 + $0x13] sm:$0xff] }
  0x15   :  { %v37_v11 = vpack.c.bf16 %v13_v8, %v12_v7  ;;  %v819_v12 = vpack.c.bf16 %v795_v10, %v794_v9  ;;  %v385_v14 = vld [vmem:[%s3510_s0 + $0x3a] sm:$0xff]  ;;  %v591_v15 = vld [vmem:[%s3510_s0 + $0x32] sm:$0xff]  ;;  %v797_v20 = vld [vmem:[%s3510_s0 + $0x23] sm:$0xff] }
  0x16   :  { %310 = vmatpush.bf16.msrb.mxu1 %v2216_v16  ;;  %909 = vmatpush.bf16.msrb.mxu0 %v2232_v18  ;;  %v406_v16 = vpack.c.bf16 %v385_v14, %v591_v15  ;;  %v15_v18 = vld [vmem:[%s3510_s0 + $0x18] sm:$0xff]  ;;  %v2244_v25 = vld [vmem:[%s3509_s1 + $0xf0] sm:$0xff]  ;;  %v593_v29 = vld [vmem:[%s3510_s0 + $0x42] sm:$0xff] }
  0x17   :  { %701 = vmatpush.bf16.msrb.mxu3 %v2228_v17  ;;  %493 = vmatpush.bf16.msrb.mxu2 %v2224_v26  ;;  %v14_v17 = vld [vmem:[%s3510_s0 + $0x10] sm:$0xff]  ;;  %v16_v31 = vld [vmem:[%s3510_s0 + $0x20] sm:$0xff]  ;;  %v17_v32 = vld [vmem:[%s3510_s0 + $0x28] sm:$0xff]  ;;  %v614_v47 = vpack.c.bf16 %v593_v29, %v385_v14 }
  0x18   :  { %v38_v21 = vpack.c.bf16 %v15_v18, %v14_v17  ;;  %v387_v26 = vld [vmem:[%s3510_s0 + $0x4a] sm:$0xff]  ;;  %v19_v42 = vld [vmem:[%s3510_s0 + $0x38] sm:$0xff]  ;;  %v597_v48 = vld [vmem:[%s3510_s0 + $0x62] sm:$0xff] }
  0x19   :  { %v2248_v28 = vld [vmem:[%s3509_s1 + $0x110] sm:$0xff]  ;;  %v407_v30 = vpack.c.bf16 %v387_v26, %v593_v29  ;;  %v2592_v0 = vld [vmem:[%s3510_s0 + $0x7a] sm:$0xff]  ;;  %v805_v8 = vld [vmem:[%s3510_s0 + $0x63] sm:$0xff] }
  0x1a   :  { %311 = vmatpush.bf16.msrb.mxu1 %v2215_v19  ;;  %910 = vmatpush.bf16.msrb.mxu0 %v2231_v24  ;;  %v796_v19 = vld [vmem:[%s3510_s0 + $0x1b] sm:$0xff]  ;;  %v2240_v24 = vld [vmem:[%s3509_s1 + $0xd0] sm:$0xff] }
  0x1b   :  { %702 = vmatpush.bf16.msrb.mxu3 %v2227_v23  ;;  %494 = vmatpush.bf16.msrb.mxu2 %v2223_v36  ;;  %v820_v22 = vpack.c.bf16 %v797_v20, %v796_v19  ;;  %v612_v23 = vpack.c.bf16 %v589_v5, %v381_v57  ;;  %v18_v41 = vld [vmem:[%s3510_s0 + $0x30] sm:$0xff]  ;;  %v804_v7 = vld [vmem:[%s3510_s0 + $0x5b] sm:$0xff] }
  0x1c   :  { %v40_v45 = vpack.c.bf16 %v19_v42, %v18_v41  ;;  %v2557_v49 = vld [vmem:[%s3510_s0 + $0x6a] sm:$0xff]  ;;  %v599_v61 = vld [vmem:[%s3510_s0 + $0x72] sm:$0xff] }
  0x1d   :  { %v409_v50 = vpack.c.bf16 %v2557_v49, %v597_v48  ;;  %v26_v42 = vld [vmem:[%s3510_s0 + $0x70] sm:$0xff] }
  0x1e   :  { %312 = vmatpush.bf16.msrb.mxu1 %v2214_v38  ;;  %911 = vmatpush.bf16.msrb.mxu0 %v2230_v40  ;;  %v595_v38 = vld [vmem:[%s3510_s0 + $0x52] sm:$0xff] }
  0x1f   :  { %703 = vmatpush.bf16.msrb.mxu3 %v2226_v37  ;;  %495 = vmatpush.bf16.msrb.mxu2 %v2222_v39  ;;  %v613_v37 = vpack.c.bf16 %v591_v15, %v383_v4  ;;  %v389_v39 = vld [vmem:[%s3510_s0 + $0x5a] sm:$0xff]  ;;  %v22_v4 = vld [vmem:[%s3510_s0 + $0x50] sm:$0xff] }
  0x20   :  { %v408_v40 = vpack.c.bf16 %v389_v39, %v595_v38  ;;  %v616_v15 = vpack.c.bf16 %v597_v48, %v389_v39  ;;  %v603_v39 = vld [vmem:[%s3510_s0 + $0x92] sm:$0xff] }
  0x21   :  { %1914 = vmatmul.msk.bf16.gmra.mxu0 %vm129_vm0, %v84_v33  ;;  %1918 = vmatmul.msk.bf16.gmra.mxu1 %vm129_vm0, %v88_v34  ;;  %v798_v33 = vld [vmem:[%s3510_s0 + $0x2b] sm:$0xff]  ;;  %v799_v34 = vld [vmem:[%s3510_s0 + $0x33] sm:$0xff] }
  0x22   :  { %1116 = vmatpush.bf16.msra.mxu1 %v2237_v55  ;;  %1740 = vmatpush.bf16.msra.mxu0 %v2249_v56  ;;  %v821_v36 = vpack.c.bf16 %v799_v34, %v798_v33  ;;  %v617_v34 = vpack.c.bf16 %v599_v61, %v2557_v49 }
  0x23   :  { %1324 = vmatpush.bf16.msra.mxu2 %v2241_v43  ;;  %1532 = vmatpush.bf16.msra.mxu3 %v2245_v54  ;;  %v800_v43 = vld [vmem:[%s3510_s0 + $0x3b] sm:$0xff]  ;;  %v803_v54 = vld [vmem:[%s3510_s0 + $0x53] sm:$0xff] }
  0x24   :  { %1923 = vmatmul.msk.bf16.gmra.mxu3 %vm129_vm0, %v93_v35  ;;  %1979 = vmatmul.msk.bf16.vlgmr.msrb.gmra.mxu2 %vm129_vm0, %v403_v44  ;;  %v39_v35 = vpack.c.bf16 %v17_v32, %v16_v31  ;;  %v801_v44 = vld [vmem:[%s3510_s0 + $0x43] sm:$0xff] }
  0x25   :  { %v822_v46 = vpack.c.bf16 %v801_v44, %v800_v43  ;;  %v27_v43 = vld [vmem:[%s3510_s0 + $0x78] sm:$0xff] }
  0x26   :  { %1117 = vmatpush.bf16.msra.mxu1 %v2236_v27  ;;  %1741 = vmatpush.bf16.msra.mxu0 %v2248_v28  ;;  %v807_v27 = vld [vmem:[%s3510_s0 + $0x73] sm:$0xff]  ;;  %v808_v44 = vld [vmem:[%s3510_s0 + $0x7b] sm:$0xff]  ;;  %v44_v48 = vpack.c.bf16 %v27_v43, %v26_v42 }
  0x27   :  { %1325 = vmatpush.bf16.msra.mxu2 %v2240_v24  ;;  %1533 = vmatpush.bf16.msra.mxu3 %v2244_v25  ;;  %v24_v24 = vld [vmem:[%s3510_s0 + $0x60] sm:$0xff]  ;;  %v25_v25 = vld [vmem:[%s3510_s0 + $0x68] sm:$0xff] }
  0x31   :  { %1915 = vmatmul.msk.bf16.gmra.mxu0 %vm129_vm0, %v85_v51  ;;  %1919 = vmatmul.msk.bf16.gmra.mxu1 %vm129_vm0, %v89_v52  ;;  %v20_v51 = vld [vmem:[%s3510_s0 + $0x40] sm:$0xff]  ;;  %v21_v52 = vld [vmem:[%s3510_s0 + $0x48] sm:$0xff] }
  0x32   :  { %v41_v55 = vpack.c.bf16 %v21_v52, %v20_v51 }
  0x34   :  { %1924 = vmatmul.msk.bf16.gmra.mxu3 %vm129_vm0, %v94_v53  ;;  %1980 = vmatmul.msk.bf16.gmra.mxu2 %vm129_vm0, %v404_v59  ;;  %v802_v53 = vld [vmem:[%s3510_s0 + $0x4b] sm:$0xff]  ;;  %v615_v59 = vpack.c.bf16 %v595_v38, %v387_v26 }
  0x35   :  { %v823_v56 = vpack.c.bf16 %v803_v54, %v802_v53  ;;  %v806_v26 = vld [vmem:[%s3510_s0 + $0x6b] sm:$0xff] }
  0x36   :  { %v825_v31 = vpack.c.bf16 %v807_v27, %v806_v26 }
  0x41   :  { %1916 = vmatmul.msk.bf16.gmra.mxu0 %vm129_vm0, %v86_v1  ;;  %1920 = vmatmul.msk.bf16.gmra.mxu1 %vm129_vm0, %v90_v2  ;;  %v2239_v1 = vld [vmem:[%s3509_s1 + $0xc8] sm:$0xff] }
  0x42   :  { %v2243_v2 = vld [vmem:[%s3509_s1 + $0xe8] sm:$0xff]  ;;  %1326 = vmatpush.bf16.msra.mxu2 %v2239_v1  ;;  %v28_v1 = vld [vmem:[%s3510_s0 + $0x80] sm:$0xff] }
  0x43   :  { %1534 = vmatpush.bf16.msra.mxu3 %v2243_v2  ;;  %v29_v2 = vld [vmem:[%s3510_s0 + $0x88] sm:$0xff] }
  0x44   :  { %1925 = vmatmul.msk.bf16.gmra.mxu3 %vm129_vm0, %v95_v3  ;;  %1981 = vmatmul.msk.bf16.gmra.mxu2 %vm129_vm0, %v405_v6  ;;  %v410_v3 = vpack.c.bf16 %v2592_v0, %v599_v61  ;;  %v23_v6 = vld [vmem:[%s3510_s0 + $0x58] sm:$0xff]  ;;  %v2727_v61 = vld [vmem:[%s3510_s0 + $0xaa] sm:$0xff] }
  0x45   :  { %v42_v10 = vpack.c.bf16 %v23_v6, %v22_v4  ;;  %v811_v4 = vld [vmem:[%s3510_s0 + $0x93] sm:$0xff] }
  0x51   :  { %1942 = vmatmul.msk.bf16.vlgmr.msrb.gmra.mxu1 %vm129_vm0, %v37_v11  ;;  %2053 = vmatmul.msk.bf16.vlgmr.msrb.gmra.mxu0 %vm129_vm0, %v819_v12  ;;  %v824_v11 = vpack.c.bf16 %v805_v8, %v804_v7  ;;  %v2235_v12 = vld [vmem:[%s3509_s1 + $0xa8] sm:$0xff]  ;;  %v45_v8 = vpack.c.bf16 %v29_v2, %v28_v1 }
  0x52   :  { %1118 = vmatpush.bf16.msra.mxu1 %v2235_v12 }
  0x54   :  { %2016 = vmatmul.msk.bf16.vlgmr.msrb.gmra.mxu3 %vm129_vm0, %v611_v13  ;;  %1982 = vmatmul.msk.bf16.gmra.mxu2 %vm129_vm0, %v406_v16  ;;  %v2247_v16 = vld [vmem:[%s3509_s1 + $0x108] sm:$0xff] }
  0x55   :  { %1742 = vmatpush.bf16.msra.mxu0 %v2247_v16  ;;  %v2238_v16 = vld [vmem:[%s3509_s1 + $0xc0] sm:$0xff] }
  0x56   :  { %1327 = vmatpush.bf16.msra.mxu2 %v2238_v16 }
  0x61   :  { %1943 = vmatmul.msk.bf16.gmra.mxu1 %vm129_vm0, %v38_v21  ;;  %2054 = vmatmul.msk.bf16.gmra.mxu0 %vm129_vm0, %v820_v22  ;;  %v601_v21 = vld [vmem:[%s3510_s0 + $0x82] sm:$0xff]  ;;  %v2645_v22 = vld [vmem:[%s3510_s0 + $0x8a] sm:$0xff] }
  0x62   :  { %v618_v52 = vpack.c.bf16 %v601_v21, %v2592_v0 }
  0x64   :  { %2017 = vmatmul.msk.bf16.gmra.mxu3 %vm129_vm0, %v612_v23  ;;  %1983 = vmatmul.msk.bf16.gmra.mxu2 %vm129_vm0, %v407_v30  ;;  %v411_v23 = vpack.c.bf16 %v2645_v22, %v601_v21  ;;  %v43_v30 = vpack.c.bf16 %v25_v25, %v24_v24  ;;  %v2242_v21 = vld [vmem:[%s3509_s1 + $0xe0] sm:$0xff] }
  0x65   :  { %v2234_v24 = vld [vmem:[%s3509_s1 + $0xa0] sm:$0xff]  ;;  %1535 = vmatpush.bf16.msra.mxu3 %v2242_v21 }
  0x66   :  { %1119 = vmatpush.bf16.msra.mxu1 %v2234_v24  ;;  %v2246_v25 = vld [vmem:[%s3509_s1 + $0x100] sm:$0xff] }
  0x67   :  { %1743 = vmatpush.bf16.msra.mxu0 %v2246_v25  ;;  %v814_v25 = vld [vmem:[%s3510_s0 + $0xab] sm:$0xff] }
  0x71   :  { %1944 = vmatmul.msk.bf16.gmra.mxu1 %vm129_vm0, %v39_v35  ;;  %2055 = vmatmul.msk.bf16.gmra.mxu0 %vm129_vm0, %v821_v36 }
  0x74   :  { %2018 = vmatmul.msk.bf16.gmra.mxu3 %vm129_vm0, %v613_v37  ;;  %1984 = vmatmul.msk.bf16.gmra.mxu2 %vm129_vm0, %v408_v40  ;;  %v2685_v40 = vld [vmem:[%s3510_s0 + $0x9a] sm:$0xff] }
  0x75   :  { %v412_v41 = vpack.c.bf16 %v2685_v40, %v603_v39 }
  0x81   :  { %1945 = vmatmul.msk.bf16.gmra.mxu1 %vm129_vm0, %v40_v45  ;;  %2056 = vmatmul.msk.bf16.gmra.mxu0 %vm129_vm0, %v822_v46  ;;  %v809_v45 = vld [vmem:[%s3510_s0 + $0x83] sm:$0xff] }
  0x82   :  { %v826_v49 = vpack.c.bf16 %v809_v45, %v808_v44  ;;  %v30_v44 = vld [vmem:[%s3510_s0 + $0x90] sm:$0xff]  ;;  %v31_v45 = vld [vmem:[%s3510_s0 + $0x98] sm:$0xff] }
  0x84   :  { %2019 = vmatmul.msk.bf16.gmra.mxu3 %vm129_vm0, %v614_v47  ;;  %1985 = vmatmul.msk.bf16.gmra.mxu2 %vm129_vm0, %v409_v50 }
  0x8e   :  { %v2573_v57 = vpop.f32.mrf.mxu0  ;;  %v2575_v58 = vpop.f32.mrf.mxu1 }
  0x91   :  { %1946 = vmatmul.msk.bf16.gmra.mxu1 %vm129_vm0, %v41_v55  ;;  %2057 = vmatmul.msk.bf16.gmra.mxu0 %vm129_vm0, %v823_v56 }
  0x94   :  { %2020 = vmatmul.msk.bf16.gmra.mxu3 %vm129_vm0, %v615_v59  ;;  %1986 = vmatmul.msk.bf16.gmra.mxu2 %vm129_vm0, %v410_v3  ;;  %v605_v59 = vld [vmem:[%s3510_s0 + $0xa2] sm:$0xff]  ;;  %v810_v3 = vld [vmem:[%s3510_s0 + $0x8b] sm:$0xff] }
  0x95   :  { %v413_v0 = vpack.c.bf16 %v2727_v61, %v605_v59 }
  0x96   :  { %v2585_v62 = vpop.f32.mrf.mxu0  ;;  %v2587_v63 = vpop.f32.mrf.mxu1 }
  0x97   :  { %v2580_v60 = vpop.f32.mrf.mxu3  ;;  %v2605_v5 = vpop.f32.mrf.mxu2 }
  0x9e   :  { %v2621_v13 = vpop.f32.mrf.mxu0  ;;  %v2623_v14 = vpop.f32.mrf.mxu1 }
  0x9f   :  { %v2616_v9 = vpop.f32.mrf.mxu3  ;;  %v2631_v17 = vpop.f32.mrf.mxu2 }
  0xa1   :  { %1947 = vmatmul.msk.bf16.gmra.mxu1 %vm129_vm0, %v42_v10  ;;  %2058 = vmatmul.msk.bf16.gmra.mxu0 %vm129_vm0, %v824_v11  ;;  %v827_v10 = vpack.c.bf16 %v811_v4, %v810_v3  ;;  %v620_v4 = vpack.c.bf16 %v605_v59, %v2685_v40 }
  0xa4   :  { %2021 = vmatmul.msk.bf16.gmra.mxu3 %vm129_vm0, %v616_v15  ;;  %1987 = vmatmul.msk.bf16.gmra.mxu2 %vm129_vm0, %v411_v23  ;;  %v619_v15 = vpack.c.bf16 %v603_v39, %v2645_v22 }
  0xa6   :  { %v2635_v19 = vpop.f32.mrf.mxu0  ;;  %v2637_v20 = vpop.f32.mrf.mxu1 }
  0xa7   :  { %v2633_v18 = vpop.f32.mrf.mxu3  ;;  %v497_v28 = vpop.f32.mrf.mxu2 }
  0xae   :  { %v2663_v32 = vpop.f32.mrf.mxu0  ;;  %v2665_v33 = vpop.f32.mrf.mxu1 }
  0xaf   :  { %v2661_v29 = vpop.f32.mrf.mxu3  ;;  %v2671_v35 = vpop.f32.mrf.mxu2 }
  0xb1   :  { %1948 = vmatmul.msk.bf16.gmra.mxu1 %vm129_vm0, %v43_v30  ;;  %2059 = vmatmul.msk.bf16.gmra.mxu0 %vm129_vm0, %v825_v31 }
  0xb4   :  { %2022 = vmatmul.msk.bf16.gmra.mxu3 %vm129_vm0, %v617_v34  ;;  %1988 = vmatmul.msk.bf16.gmra.mxu2 %vm129_vm0, %v412_v41  ;;  %v607_v34 = vld [vmem:[%s3510_s0 + $0xb2] sm:$0xff] }
  0xb6   :  { %v2675_v37 = vpop.f32.mrf.mxu0  ;;  %v2677_v38 = vpop.f32.mrf.mxu1 }
  0xb7   :  { %v2673_v36 = vpop.f32.mrf.mxu3  ;;  %v2701_v46 = vpop.f32.mrf.mxu2 }
  0xbe   :  { %v2705_v50 = vpop.f32.mrf.mxu0  ;;  %v2707_v51 = vpop.f32.mrf.mxu1 }
  0xbf   :  { %v2703_v47 = vpop.f32.mrf.mxu3  ;;  %v2713_v53 = vpop.f32.mrf.mxu2 }
  0xc1   :  { %1949 = vmatmul.msk.bf16.gmra.mxu1 %vm129_vm0, %v44_v48  ;;  %2060 = vmatmul.msk.bf16.gmra.mxu0 %vm129_vm0, %v826_v49  ;;  %v813_v48 = vld [vmem:[%s3510_s0 + $0xa3] sm:$0xff] }
  0xc4   :  { %2023 = vmatmul.msk.bf16.gmra.mxu3 %vm129_vm0, %v618_v52  ;;  %1989 = vmatmul.msk.bf16.gmra.mxu2 %vm129_vm0, %v413_v0  ;;  %v46_v52 = vpack.c.bf16 %v31_v45, %v30_v44 }
  0xc6   :  { %v2717_v55 = vpop.f32.mrf.mxu0  ;;  %v2719_v56 = vpop.f32.mrf.mxu1 }
  0xc7   :  { %v2715_v54 = vpop.f32.mrf.mxu3  ;;  %v2743_v6 = vpop.f32.mrf.mxu2 }
  0xce   :  { %v314_v11 = vpop.f32.mrf.mxu1  ;;  %v913_v12 = vpop.f32.mrf.mxu0 }
  0xcf   :  { %v240_v7 = vpop.f32.mrf.mxu3  ;;  %v315_v23 = vadd.f32 %v314_v11, %v2573_v57  ;;  %v2762_v26 = vpop.f32.mrf.mxu2 }
  0xd1   :  { %1950 = vmatmul.msk.bf16.gmra.mxu1 %vm129_vm0, %v45_v8  ;;  %2061 = vmatmul.msk.bf16.gmra.mxu0 %vm129_vm0, %v827_v10  ;;  %v561_v22 = vadd.f32 %v497_v28, %v315_v23  ;;  %v2770_v28 = vld [vmem:[%s3510_s0 + $0xba] sm:$0xff] }
  0xd2   :  { %v414_v41 = vpack.c.bf16 %v2770_v28, %v607_v34 }
  0xd4   :  { %2024 = vmatmul.msk.bf16.gmra.mxu3 %vm129_vm0, %v619_v15  ;;  %1990 = vmatmul.msk.bf16.gmra.mxu2 %vm129_vm0, %v414_v41 }
  0xd6   :  { %v316_v30 = vpop.f32.mrf.mxu1  ;;  %v915_v31 = vpop.f32.mrf.mxu0 }
  0xd7   :  { %v705_v57 = vpop.f32.mrf.mxu3  ;;  %v317_v39 = vadd.f32 %v316_v30, %v2585_v62  ;;  %v812_v62 = vld [vmem:[%s3510_s0 + $0x9b] sm:$0xff]  ;;  %v2790_v49 = vpop.f32.mrf.mxu2 }
  0xd8   :  { %v769_v27 = vadd.f32 %v705_v57, %v561_v22  ;;  %v828_v0 = vpack.c.bf16 %v813_v48, %v812_v62  ;;  %v33_v22 = vld [vmem:[%s3510_s0 + $0xa8] sm:$0xff] }
  0xd9   :  { %v562_v43 = vadd.f32 %v2671_v35, %v317_v39 }
  0xda   :  { %v2774_v42 = vadd.f32 %v913_v12, %v769_v27 }
  0xde   :  { %v319_v2 = vpop.f32.mrf.mxu1  ;;  %v918_v3 = vpop.f32.mrf.mxu0 }
  0xdf   :  { %v707_v35 = vpop.f32.mrf.mxu3  ;;  %v320_v7 = vadd.f32 %v319_v2, %v2621_v13  ;;  %v2800_v11 = vpop.f32.mrf.mxu2  ;;  %v609_v13 = vld [vmem:[%s3510_s0 + $0xc2] sm:$0xff] }
  0xe0   :  { %v770_v1 = vadd.f32 %v707_v35, %v562_v43  ;;  %v415_v59 = vpack.c.bf16 %v609_v13, %v609_v13  ;;  %v621_v43 = vpack.c.bf16 %v607_v34, %v2727_v61  ;;  %v2842_v61 = vld [vmem:[%s3510_s0 + $0x1c] sm:$0xff] }
  0xe1   :  { %1951 = vmatmul.msk.bf16.gmra.mxu1 %vm129_vm0, %v46_v52  ;;  %2062 = vmatmul.msk.bf16.gmra.mxu0 %vm129_vm0, %v828_v0  ;;  %v563_v10 = vadd.f32 %v2701_v46, %v320_v7  ;;  %v32_v46 = vld [vmem:[%s3510_s0 + $0xa0] sm:$0xff]  ;;  %v35_v7 = vld [vmem:[%s3510_s0 + $0xb8] sm:$0xff] }
  0xe2   :  { %v2794_v8 = vadd.f32 %v915_v31, %v770_v1  ;;  %v47_v27 = vpack.c.bf16 %v33_v22, %v32_v46 }
  0xe4   :  { %2025 = vmatmul.msk.bf16.gmra.mxu3 %vm129_vm0, %v620_v4  ;;  %1991 = vmatmul.msk.bf16.gmra.mxu2 %vm129_vm0, %v415_v59  ;;  %v34_v4 = vld [vmem:[%s3510_s0 + $0xb0] sm:$0xff] }
  0xe6   :  { %v321_v16 = vpop.f32.mrf.mxu1  ;;  %v920_v21 = vpop.f32.mrf.mxu0 }
  0xe7   :  { %v710_v12 = vpop.f32.mrf.mxu3  ;;  %v322_v40 = vadd.f32 %v321_v16, %v2635_v19  ;;  %v815_v19 = vld [vmem:[%s3510_s0 + $0xb3] sm:$0xff]  ;;  %v2822_v57 = vpop.f32.mrf.mxu2 }
  0xe8   :  { %v771_v15 = vadd.f32 %v710_v12, %v563_v10  ;;  %v829_v30 = vpack.c.bf16 %v815_v19, %v814_v25  ;;  %v817_v10 = vld [vmem:[%s3510_s0 + $0xc3] sm:$0xff] }
  0xe9   :  { %v564_v24 = vadd.f32 %v2713_v53, %v322_v40 }
  0xea   :  { %v2806_v23 = vadd.f32 %v918_v3, %v771_v15  ;;  %v48_v15 = vpack.c.bf16 %v35_v7, %v34_v4 }
  0xee   :  { %v324_v39 = vpop.f32.mrf.mxu1  ;;  %v923_v41 = vpop.f32.mrf.mxu0 }
  0xef   :  { %v712_v53 = vpop.f32.mrf.mxu3  ;;  %v325_v44 = vadd.f32 %v324_v39, %v2663_v32  ;;  %v2832_v48 = vpop.f32.mrf.mxu2  ;;  %v2837_v32 = vld [vmem:[%s3510_s0 + $0x14] sm:$0xff] }
  0xf0   :  { %v772_v31 = vadd.f32 %v712_v53, %v564_v24  ;;  %v1235_v34 = vpack.c.bf16 %v2842_v61, %v2837_v32  ;;  %v622_v24 = vpack.c.bf16 %v609_v13, %v2770_v28  ;;  %v2883_v28 = vld [vmem:[%s3510_s0 + $0x2c] sm:$0xff] }
  0xf1   :  { %1952 = vmatmul.msk.bf16.gmra.mxu1 %vm129_vm0, %v47_v27  ;;  %2063 = vmatmul.msk.bf16.gmra.mxu0 %vm129_vm0, %v829_v30  ;;  %v565_v62 = vadd.f32 %v2743_v6, %v325_v44  ;;  %v818_v44 = vld [vmem:[%s3510_s0 + $0xcb] sm:$0xff] }
  0xf2   :  { %v2826_v45 = vadd.f32 %v920_v21, %v772_v31 }
  0xf4   :  { %2026 = vmatmul.msk.bf16.gmra.mxu3 %vm129_vm0, %v621_v43  ;;  %2127 = vmatmul.msk.bf16.vlgmr.msra.gmra.mxu2 %vm129_vm0, %v1235_v34  ;;  %v36_v43 = vld [vmem:[%s3510_s0 + $0xc0] sm:$0xff] }
  0xf6   :  { %v326_v0 = vpop.f32.mrf.mxu1  ;;  %v925_v1 = vpop.f32.mrf.mxu0 }
  0xf7   :  { %v715_v35 = vpop.f32.mrf.mxu3  ;;  %v327_v6 = vadd.f32 %v326_v0, %v2675_v37  ;;  %v816_v37 = vld [vmem:[%s3510_s0 + $0xbb] sm:$0xff]  ;;  %v2863_v12 = vpop.f32.mrf.mxu2  ;;  %v831_v0 = vpack.c.bf16 %v818_v44, %v818_v44 }
  0xf8   :  { %v773_v52 = vadd.f32 %v715_v35, %v565_v62  ;;  %v830_v16 = vpack.c.bf16 %v817_v10, %v816_v37 }
  0xf9   :  { %v566_v3 = vadd.f32 %v2762_v26, %v327_v6 }
  0xfa   :  { %v2847_v2 = vadd.f32 %v923_v41, %v773_v52  ;;  %v49_v52 = vpack.c.bf16 %v36_v43, %v36_v43 }
  0xfe   :  { %v329_v40 = vpop.f32.mrf.mxu1  ;;  %v928_v59 = vpop.f32.mrf.mxu0 }
  0xff   :  { %v717_v26 = vpop.f32.mrf.mxu3  ;;  %v330_v46 = vadd.f32 %v329_v40, %v2705_v50  ;;  %v2873_v19 = vpop.f32.mrf.mxu2  ;;  %v2878_v50 = vld [vmem:[%s3510_s0 + $0x24] sm:$0xff] }
 0x100   :  { %v774_v21 = vadd.f32 %v717_v26, %v566_v3  ;;  %v1236_v13 = vpack.c.bf16 %v2883_v28, %v2878_v50 }
 0x101   :  { %1953 = vmatmul.msk.bf16.gmra.mxu1 %vm129_vm0, %v48_v15  ;;  %2064 = vmatmul.msk.bf16.gmra.mxu0 %vm129_vm0, %v830_v16  ;;  %v567_v25 = vadd.f32 %v2790_v49, %v330_v46  ;;  %v1002_v46 = vld [vmem:[%s3510_s0 + $0xc] sm:$0xff] }
 0x102   :  { %v2867_v22 = vadd.f32 %v925_v1, %v774_v21  ;;  %v2920_v21 = vld [vmem:[%s3510_s0 + $0x3c] sm:$0xff] }
 0x104   :  { %2027 = vmatmul.msk.bf16.gmra.mxu3 %vm129_vm0, %v622_v24  ;;  %2128 = vmatmul.msk.bf16.gmra.mxu2 %vm129_vm0, %v1236_v13 }
 0x106   :  { %v331_v30 = vpop.f32.mrf.mxu1  ;;  %v930_v31 = vpop.f32.mrf.mxu0 }
 0x107   :  { %v720_v53 = vpop.f32.mrf.mxu3  ;;  %v332_v49 = vadd.f32 %v331_v30, %v2717_v55  ;;  %v610_v55 = vld [vmem:[%s3510_s0 + $0xca] sm:$0xff]  ;;  %v2901_v62 = vpop.f32.mrf.mxu2 }
 0x108   :  { %v775_v27 = vadd.f32 %v720_v53, %v567_v25  ;;  %v623_v34 = vpack.c.bf16 %v610_v55, %v610_v55  ;;  %v1626_v25 = vld [vmem:[%s3510_s0 + $0x16] sm:$0xff] }
 0x109   :  { %v568_v41 = vadd.f32 %v2800_v11, %v332_v49  ;;  %v1418_v53 = vld [vmem:[%s3510_s0 + $0x15] sm:$0xff] }
 0x10a   :  { %v2888_v39 = vadd.f32 %v928_v59, %v775_v27 }
 0x10e   :  { %v334_v1 = vpop.f32.mrf.mxu1  ;;  %v933_v6 = vpop.f32.mrf.mxu0 }
 0x10f   :  { %v722_v35 = vpop.f32.mrf.mxu3  ;;  %v335_v3 = vadd.f32 %v334_v1, %v2575_v58  ;;  %v2910_v37 = vpop.f32.mrf.mxu2  ;;  %v2915_v58 = vld [vmem:[%s3510_s0 + $0x34] sm:$0xff] }
 0x110   :  { %v776_v11 = vadd.f32 %v722_v35, %v568_v41  ;;  %v1237_v40 = vpack.c.bf16 %v2920_v21, %v2915_v58 }
 0x111   :  { %1954 = vmatmul.msk.bf16.gmra.mxu1 %vm129_vm0, %v49_v52  ;;  %2065 = vmatmul.msk.bf16.gmra.mxu0 %vm129_vm0, %v831_v0  ;;  %v569_v7 = vadd.f32 %v2822_v57, %v335_v3 }
 0x112   :  { %v2904_v4 = vadd.f32 %v930_v31, %v776_v11  ;;  %v1027_v31 = vpack.c.bf16 %v2837_v32, %v1002_v46 }
 0x114   :  { %2028 = vmatmul.msk.bf16.gmra.mxu3 %vm129_vm0, %v623_v34  ;;  %2129 = vmatmul.msk.bf16.gmra.mxu2 %vm129_vm0, %v1237_v40  ;;  %v2964_v34 = vld [vmem:[%s3510_s0 + $0x4c] sm:$0xff]  ;;  %v1028_v40 = vpack.c.bf16 %v2878_v50, %v2842_v61 }
 0x116   :  { %v336_v15 = vpop.f32.mrf.mxu1  ;;  %v935_v16 = vpop.f32.mrf.mxu0 }
 0x117   :  { %v725_v10 = vpop.f32.mrf.mxu3  ;;  %v337_v57 = vadd.f32 %v336_v15, %v2587_v63  ;;  %v1627_v63 = vld [vmem:[%s3510_s0 + $0x1e] sm:$0xff]  ;;  %v2944_v27 = vpop.f32.mrf.mxu2  ;;  %v1629_v15 = vld [vmem:[%s3510_s0 + $0x2e] sm:$0xff] }
 0x118   :  { %v777_v26 = vadd.f32 %v725_v10, %v569_v7  ;;  %v1651_v49 = vpack.c.bf16 %v1627_v63, %v1626_v25 }
 0x119   :  { %v570_v24 = vadd.f32 %v2832_v48, %v337_v57  ;;  %v1419_v48 = vld [vmem:[%s3510_s0 + $0x1d] sm:$0xff] }
 0x11a   :  { %v2925_v59 = vadd.f32 %v933_v6, %v777_v26  ;;  %v1443_v44 = vpack.c.bf16 %v1419_v48, %v1418_v53  ;;  %v1628_v26 = vld [vmem:[%s3510_s0 + $0x26] sm:$0xff] }
 0x11e   :  { %v339_v41 = vpop.f32.mrf.mxu1  ;;  %v938_v43 = vpop.f32.mrf.mxu0 }
 0x11f   :  { %v727_v30 = vpop.f32.mrf.mxu3  ;;  %v340_v55 = vadd.f32 %v339_v41, %v2623_v14  ;;  %v2954_v0 = vpop.f32.mrf.mxu2  ;;  %v2959_v14 = vld [vmem:[%s3510_s0 + $0x44] sm:$0xff] }
 0x120   :  { %v778_v13 = vadd.f32 %v727_v30, %v570_v24  ;;  %v1238_v3 = vpack.c.bf16 %v2964_v34, %v2959_v14  ;;  %v1652_v24 = vpack.c.bf16 %v1629_v15, %v1628_v26 }
 0x121   :  { %2090 = vmatmul.msk.bf16.vlgmr.msra.gmra.mxu1 %vm129_vm0, %v1027_v31  ;;  %2201 = vmatmul.msk.bf16.vlgmr.msra.gmra.mxu0 %vm129_vm0, %v1651_v49  ;;  %v571_v52 = vadd.f32 %v2863_v12, %v340_v55 }
 0x122   :  { %v2948_v35 = vadd.f32 %v935_v16, %v778_v13  ;;  %v1421_v16 = vld [vmem:[%s3510_s0 + $0x2d] sm:$0xff] }
 0x124   :  { %2164 = vmatmul.msk.bf16.vlgmr.msra.gmra.mxu3 %vm129_vm0, %v1443_v44  ;;  %2130 = vmatmul.msk.bf16.gmra.mxu2 %vm129_vm0, %v1238_v3 }
 0x126   :  { %v341_v1 = vpop.f32.mrf.mxu1  ;;  %v940_v6 = vpop.f32.mrf.mxu0 }
 0x127   :  { %v730_v32 = vpop.f32.mrf.mxu3  ;;  %v342_v12 = vadd.f32 %v341_v1, %v2637_v20  ;;  %v1420_v20 = vld [vmem:[%s3510_s0 + $0x25] sm:$0xff]  ;;  %v2985_v57 = vpop.f32.mrf.mxu2  ;;  %v1423_v1 = vld [vmem:[%s3510_s0 + $0x3d] sm:$0xff] }
 0x128   :  { %v779_v11 = vadd.f32 %v730_v32, %v571_v52  ;;  %v1444_v53 = vpack.c.bf16 %v1421_v16, %v1420_v20  ;;  %v1630_v32 = vld [vmem:[%s3510_s0 + $0x36] sm:$0xff] }
 0x129   :  { %v572_v10 = vadd.f32 %v2873_v19, %v342_v12  ;;  %v1029_v12 = vpack.c.bf16 %v2915_v58, %v2883_v28 }
 0x12a   :  { %v2969_v7 = vadd.f32 %v938_v43, %v779_v11  ;;  %v3006_v43 = vld [vmem:[%s3510_s0 + $0x5c] sm:$0xff] }
 0x12b   :  { %v1631_v11 = vld [vmem:[%s3510_s0 + $0x3e] sm:$0xff] }
 0x12c   :  { %v1653_v3 = vpack.c.bf16 %v1631_v11, %v1630_v32 }
 0x12e   :  { %v344_v25 = vpop.f32.mrf.mxu1  ;;  %v943_v63 = vpop.f32.mrf.mxu0 }
 0x12f   :  { %v732_v19 = vpop.f32.mrf.mxu3  ;;  %v345_v48 = vadd.f32 %v344_v25, %v2665_v33  ;;  %v2996_v49 = vpop.f32.mrf.mxu2  ;;  %v3001_v33 = vld [vmem:[%s3510_s0 + $0x54] sm:$0xff] }
 0x130   :  { %v780_v46 = vadd.f32 %v732_v19, %v572_v10  ;;  %v1239_v44 = vpack.c.bf16 %v3006_v43, %v3001_v33 }
 0x131   :  { %2091 = vmatmul.msk.bf16.gmra.mxu1 %vm129_vm0, %v1028_v40  ;;  %2202 = vmatmul.msk.bf16.gmra.mxu0 %vm129_vm0, %v1652_v24  ;;  %v573_v31 = vadd.f32 %v2901_v62, %v345_v48 }
 0x132   :  { %v2990_v30 = vadd.f32 %v940_v6, %v780_v46 }
 0x134   :  { %2165 = vmatmul.msk.bf16.gmra.mxu3 %vm129_vm0, %v1444_v53  ;;  %2131 = vmatmul.msk.bf16.gmra.mxu2 %vm129_vm0, %v1239_v44 }
 0x136   :  { %v346_v13 = vpop.f32.mrf.mxu1  ;;  %v945_v41 = vpop.f32.mrf.mxu0 }
 0x137   :  { %v735_v61 = vpop.f32.mrf.mxu3  ;;  %v347_v62 = vadd.f32 %v346_v13, %v2677_v38  ;;  %v1422_v38 = vld [vmem:[%s3510_s0 + $0x35] sm:$0xff]  ;;  %v3027_v6 = vpop.f32.mrf.mxu2  ;;  %v1425_v13 = vld [vmem:[%s3510_s0 + $0x4d] sm:$0xff] }
 0x138   :  { %v781_v50 = vadd.f32 %v735_v61, %v573_v31  ;;  %v1445_v20 = vpack.c.bf16 %v1423_v1, %v1422_v38  ;;  %v1632_v61 = vld [vmem:[%s3510_s0 + $0x46] sm:$0xff] }
 0x139   :  { %v574_v52 = vadd.f32 %v2910_v37, %v347_v62  ;;  %v1030_v62 = vpack.c.bf16 %v2959_v14, %v2920_v21 }
 0x13a   :  { %v3011_v55 = vadd.f32 %v943_v63, %v781_v50  ;;  %v3048_v63 = vld [vmem:[%s3510_s0 + $0x6c] sm:$0xff] }
 0x13b   :  { %v1633_v50 = vld [vmem:[%s3510_s0 + $0x4e] sm:$0xff] }
 0x13c   :  { %v1654_v44 = vpack.c.bf16 %v1633_v50, %v1632_v61 }
 0x13e   :  { %v349_v26 = vpop.f32.mrf.mxu1  ;;  %v948_v15 = vpop.f32.mrf.mxu0 }
 0x13f   :  { %v737_v37 = vpop.f32.mrf.mxu3  ;;  %v350_v16 = vadd.f32 %v349_v26, %v2707_v51  ;;  %v3038_v24 = vpop.f32.mrf.mxu2  ;;  %v3043_v51 = vld [vmem:[%s3510_s0 + $0x64] sm:$0xff] }
 0x140   :  { %v782_v10 = vadd.f32 %v737_v37, %v574_v52  ;;  %v1240_v53 = vpack.c.bf16 %v3048_v63, %v3043_v51 }
 0x141   :  { %2092 = vmatmul.msk.bf16.gmra.mxu1 %vm129_vm0, %v1029_v12  ;;  %2203 = vmatmul.msk.bf16.gmra.mxu0 %vm129_vm0, %v1653_v3  ;;  %v575_v40 = vadd.f32 %v2944_v27, %v350_v16 }
 0x142   :  { %v3032_v19 = vadd.f32 %v945_v41, %v782_v10 }
 0x144   :  { %2166 = vmatmul.msk.bf16.gmra.mxu3 %vm129_vm0, %v1445_v20  ;;  %2132 = vmatmul.msk.bf16.gmra.mxu2 %vm129_vm0, %v1240_v53 }
 0x146   :  { %v351_v46 = vpop.f32.mrf.mxu1  ;;  %v950_v25 = vpop.f32.mrf.mxu0 }
 0x147   :  { %v740_v28 = vpop.f32.mrf.mxu3  ;;  %v352_v27 = vadd.f32 %v351_v46, %v2719_v56  ;;  %v1424_v56 = vld [vmem:[%s3510_s0 + $0x45] sm:$0xff]  ;;  %v3069_v41 = vpop.f32.mrf.mxu2  ;;  %v1427_v46 = vld [vmem:[%s3510_s0 + $0x5d] sm:$0xff] }
 0x148   :  { %v783_v58 = vadd.f32 %v740_v28, %v575_v40  ;;  %v1446_v38 = vpack.c.bf16 %v1425_v13, %v1424_v56  ;;  %v1634_v28 = vld [vmem:[%s3510_s0 + $0x56] sm:$0xff] }
 0x149   :  { %v576_v31 = vadd.f32 %v2954_v0, %v352_v27  ;;  %v1031_v27 = vpack.c.bf16 %v3001_v33, %v2964_v34 }
 0x14a   :  { %v3053_v48 = vadd.f32 %v948_v15, %v783_v58  ;;  %v3090_v15 = vld [vmem:[%s3510_s0 + $0x7c] sm:$0xff] }
 0x14b   :  { %v1635_v58 = vld [vmem:[%s3510_s0 + $0x5e] sm:$0xff] }
 0x14c   :  { %v1655_v53 = vpack.c.bf16 %v1635_v58, %v1634_v28 }
 0x14e   :  { %v354_v32 = vpop.f32.mrf.mxu1  ;;  %v953_v11 = vpop.f32.mrf.mxu0 }
 0x14f   :  { %v742_v0 = vpop.f32.mrf.mxu3  ;;  %v355_v1 = vadd.f32 %v354_v32, %v2605_v5  ;;  %v3080_v3 = vpop.f32.mrf.mxu2  ;;  %v3085_v5 = vld [vmem:[%s3510_s0 + $0x74] sm:$0xff] }
 0x150   :  { %v784_v52 = vadd.f32 %v742_v0, %v576_v31  ;;  %v1241_v20 = vpack.c.bf16 %v3090_v15, %v3085_v5 }
 0x151   :  { %2093 = vmatmul.msk.bf16.gmra.mxu1 %vm129_vm0, %v1030_v62  ;;  %2204 = vmatmul.msk.bf16.gmra.mxu0 %vm129_vm0, %v1654_v44  ;;  %v577_v12 = vadd.f32 %v2985_v57, %v355_v1 }
 0x152   :  { %v3074_v37 = vadd.f32 %v950_v25, %v784_v52 }
 0x154   :  { %2167 = vmatmul.msk.bf16.gmra.mxu3 %vm129_vm0, %v1446_v38  ;;  %2133 = vmatmul.msk.bf16.gmra.mxu2 %vm129_vm0, %v1241_v20 }
 0x156   :  { %v356_v10 = vpop.f32.mrf.mxu1  ;;  %v955_v26 = vpop.f32.mrf.mxu0 }
 0x157   :  { %v745_v21 = vpop.f32.mrf.mxu3  ;;  %v357_v57 = vadd.f32 %v356_v10, %v2631_v17  ;;  %v1426_v17 = vld [vmem:[%s3510_s0 + $0x55] sm:$0xff]  ;;  %v3111_v25 = vpop.f32.mrf.mxu2  ;;  %v1429_v10 = vld [vmem:[%s3510_s0 + $0x6d] sm:$0xff] }
 0x158   :  { %v785_v14 = vadd.f32 %v745_v21, %v577_v12  ;;  %v1447_v56 = vpack.c.bf16 %v1427_v46, %v1426_v17  ;;  %v1636_v21 = vld [vmem:[%s3510_s0 + $0x66] sm:$0xff] }
 0x159   :  { %v578_v40 = vadd.f32 %v2996_v49, %v357_v57  ;;  %v1032_v57 = vpack.c.bf16 %v3043_v51, %v3006_v43 }
 0x15a   :  { %v3095_v16 = vadd.f32 %v953_v11, %v785_v14  ;;  %v3132_v11 = vld [vmem:[%s3510_s0 + $0x8c] sm:$0xff] }
 0x15b   :  { %v1637_v14 = vld [vmem:[%s3510_s0 + $0x6e] sm:$0xff] }
 0x15c   :  { %v1656_v20 = vpack.c.bf16 %v1637_v14, %v1636_v21 }
 0x15e   :  { %v359_v61 = vpop.f32.mrf.mxu1  ;;  %v958_v50 = vpop.f32.mrf.mxu0 }
 0x15f   :  { %v747_v49 = vpop.f32.mrf.mxu3  ;;  %v360_v13 = vadd.f32 %v359_v61, %v2580_v60  ;;  %v3122_v44 = vpop.f32.mrf.mxu2  ;;  %v3127_v60 = vld [vmem:[%s3510_s0 + $0x84] sm:$0xff] }
 0x160   :  { %v786_v31 = vadd.f32 %v747_v49, %v578_v40  ;;  %v1242_v38 = vpack.c.bf16 %v3132_v11, %v3127_v60 }
 0x161   :  { %2094 = vmatmul.msk.bf16.gmra.mxu1 %vm129_vm0, %v1031_v27  ;;  %2205 = vmatmul.msk.bf16.gmra.mxu0 %vm129_vm0, %v1655_v53  ;;  %v579_v62 = vadd.f32 %v3027_v6, %v360_v13 }
 0x162   :  { %v3116_v0 = vadd.f32 %v955_v26, %v786_v31 }
 0x164   :  { %2168 = vmatmul.msk.bf16.gmra.mxu3 %vm129_vm0, %v1447_v56  ;;  %2134 = vmatmul.msk.bf16.gmra.mxu2 %vm129_vm0, %v1242_v38 }
 0x166   :  { %v361_v52 = vpop.f32.mrf.mxu1  ;;  %v960_v32 = vpop.f32.mrf.mxu0 }
 0x167   :  { %v750_v34 = vpop.f32.mrf.mxu3  ;;  %v362_v6 = vadd.f32 %v361_v52, %v2616_v9  ;;  %v1428_v9 = vld [vmem:[%s3510_s0 + $0x65] sm:$0xff]  ;;  %v3153_v26 = vpop.f32.mrf.mxu2  ;;  %v1431_v52 = vld [vmem:[%s3510_s0 + $0x7d] sm:$0xff] }
 0x168   :  { %v787_v33 = vadd.f32 %v750_v34, %v579_v62  ;;  %v1448_v17 = vpack.c.bf16 %v1429_v10, %v1428_v9  ;;  %v1638_v34 = vld [vmem:[%s3510_s0 + $0x76] sm:$0xff] }
 0x169   :  { %v580_v12 = vadd.f32 %v3038_v24, %v362_v6  ;;  %v1033_v6 = vpack.c.bf16 %v3085_v5, %v3048_v63 }
 0x16a   :  { %v3137_v1 = vadd.f32 %v958_v50, %v787_v33  ;;  %v3167_v50 = vld [vmem:[%s3510_s0 + $0x94] sm:$0xff]  ;;  %v1639_v33 = vld [vmem:[%s3510_s0 + $0x7e] sm:$0xff] }
 0x16b   :  { %v1657_v38 = vpack.c.bf16 %v1639_v33, %v1638_v34 }
 0x16e   :  { %v364_v28 = vpop.f32.mrf.mxu1  ;;  %v963_v58 = vpop.f32.mrf.mxu0 }
 0x16f   :  { %v752_v24 = vpop.f32.mrf.mxu3  ;;  %v365_v46 = vadd.f32 %v364_v28, %v2633_v18  ;;  %v559_v53 = vpop.f32.mrf.mxu2  ;;  %v3172_v18 = vld [vmem:[%s3510_s0 + $0x9c] sm:$0xff] }
 0x170   :  { %v788_v40 = vadd.f32 %v752_v24, %v580_v12  ;;  %v1640_v53 = vld [vmem:[%s3510_s0 + $0x86] sm:$0xff] }
 0x171   :  { %2095 = vmatmul.msk.bf16.gmra.mxu1 %vm129_vm0, %v1032_v57  ;;  %2206 = vmatmul.msk.bf16.gmra.mxu0 %vm129_vm0, %v1656_v20  ;;  %v581_v27 = vadd.f32 %v3069_v41, %v365_v46  ;;  %v1243_v41 = vpack.c.bf16 %v3172_v18, %v3167_v50 }
 0x172   :  { %v3158_v49 = vadd.f32 %v960_v32, %v788_v40 }
 0x174   :  { %2169 = vmatmul.msk.bf16.gmra.mxu3 %vm129_vm0, %v1448_v17  ;;  %2135 = vmatmul.msk.bf16.gmra.mxu2 %vm129_vm0, %v1243_v41 }
 0x176   :  { %v366_v51 = vpop.f32.mrf.mxu1  ;;  %v965_v61 = vpop.f32.mrf.mxu0 }
 0x177   :  { %v755_v31 = vpop.f32.mrf.mxu3  ;;  %v367_v56 = vadd.f32 %v366_v51, %v2661_v29  ;;  %v1430_v29 = vld [vmem:[%s3510_s0 + $0x75] sm:$0xff]  ;;  %v3193_v32 = vpop.f32.mrf.mxu2 }
 0x178   :  { %v789_v43 = vadd.f32 %v755_v31, %v581_v27  ;;  %v1449_v9 = vpack.c.bf16 %v1431_v52, %v1430_v29  ;;  %v1641_v31 = vld [vmem:[%s3510_s0 + $0x8e] sm:$0xff] }
 0x179   :  { %v582_v62 = vadd.f32 %v3080_v3, %v367_v56  ;;  %v1658_v56 = vpack.c.bf16 %v1641_v31, %v1640_v53 }
 0x17a   :  { %v3177_v13 = vadd.f32 %v963_v58, %v789_v43  ;;  %v3214_v58 = vld [vmem:[%s3510_s0 + $0xac] sm:$0xff] }
 0x17b   :  { %v1433_v43 = vld [vmem:[%s3510_s0 + $0x8d] sm:$0xff] }
 0x17e   :  { %v369_v21 = vpop.f32.mrf.mxu1  ;;  %v968_v14 = vpop.f32.mrf.mxu0 }
 0x17f   :  { %v757_v3 = vpop.f32.mrf.mxu3  ;;  %v370_v10 = vadd.f32 %v369_v21, %v2673_v36  ;;  %v3204_v20 = vpop.f32.mrf.mxu2  ;;  %v3209_v36 = vld [vmem:[%s3510_s0 + $0xa4] sm:$0xff]  ;;  %v3256_v21 = vld [vmem:[%s3510_s0 + $0xbc] sm:$0xff] }
 0x180   :  { %v790_v12 = vadd.f32 %v757_v3, %v582_v62  ;;  %v1244_v17 = vpack.c.bf16 %v3214_v58, %v3209_v36 }
 0x181   :  { %2096 = vmatmul.msk.bf16.gmra.mxu1 %vm129_vm0, %v1033_v6  ;;  %2207 = vmatmul.msk.bf16.gmra.mxu0 %vm129_vm0, %v1657_v38  ;;  %v583_v57 = vadd.f32 %v3111_v25, %v370_v10  ;;  %v1643_v10 = vld [vmem:[%s3510_s0 + $0x9e] sm:$0xff] }
 0x182   :  { %v3198_v24 = vadd.f32 %v965_v61, %v790_v12  ;;  %v1034_v61 = vpack.c.bf16 %v3127_v60, %v3090_v15 }
 0x184   :  { %2170 = vmatmul.msk.bf16.gmra.mxu3 %vm129_vm0, %v1449_v9  ;;  %2136 = vmatmul.msk.bf16.gmra.mxu2 %vm129_vm0, %v1244_v17  ;;  %v1642_v9 = vld [vmem:[%s3510_s0 + $0x96] sm:$0xff] }
 0x186   :  { %v371_v40 = vpop.f32.mrf.mxu1  ;;  %v970_v28 = vpop.f32.mrf.mxu0 }
 0x187   :  { %v760_v63 = vpop.f32.mrf.mxu3  ;;  %v372_v25 = vadd.f32 %v371_v40, %v2703_v47  ;;  %v1432_v47 = vld [vmem:[%s3510_s0 + $0x85] sm:$0xff]  ;;  %v3235_v51 = vpop.f32.mrf.mxu2 }
 0x188   :  { %v791_v5 = vadd.f32 %v760_v63, %v583_v57  ;;  %v1450_v33 = vpack.c.bf16 %v1433_v43, %v1432_v47  ;;  %v1434_v57 = vld [vmem:[%s3510_s0 + $0x95] sm:$0xff]  ;;  %v1435_v63 = vld [vmem:[%s3510_s0 + $0x9d] sm:$0xff] }
 0x189   :  { %v584_v27 = vadd.f32 %v3122_v44, %v372_v25  ;;  %v1659_v25 = vpack.c.bf16 %v1643_v10, %v1642_v9  ;;  %v1451_v53 = vpack.c.bf16 %v1435_v63, %v1434_v57 }
 0x18a   :  { %v3219_v46 = vadd.f32 %v968_v14, %v791_v5 }
 0x18e   :  { %v374_v62 = vpop.f32.mrf.mxu1  ;;  %v973_v34 = vpop.f32.mrf.mxu0 }
 0x18f   :  { %v762_v44 = vpop.f32.mrf.mxu3  ;;  %v375_v29 = vadd.f32 %v374_v62, %v2715_v54  ;;  %v3246_v6 = vpop.f32.mrf.mxu2  ;;  %v3251_v54 = vld [vmem:[%s3510_s0 + $0xb4] sm:$0xff] }
 0x190   :  { %v792_v41 = vadd.f32 %v762_v44, %v584_v27 }
 0x191   :  { %2097 = vmatmul.msk.bf16.gmra.mxu1 %vm129_vm0, %v1034_v61  ;;  %2208 = vmatmul.msk.bf16.gmra.mxu0 %vm129_vm0, %v1658_v56  ;;  %v585_v3 = vadd.f32 %v3153_v26, %v375_v29  ;;  %v1245_v26 = vpack.c.bf16 %v3256_v21, %v3251_v54  ;;  %v1645_v29 = vld [vmem:[%s3510_s0 + $0xae] sm:$0xff] }
 0x192   :  { %v3240_v52 = vadd.f32 %v970_v28, %v792_v41  ;;  %v1035_v28 = vpack.c.bf16 %v3167_v50, %v3132_v11  ;;  %v3289_v50 = vld [vmem:[%s3510_s0 + $0xc4] sm:$0xff] }
 0x194   :  { %2171 = vmatmul.msk.bf16.gmra.mxu3 %vm129_vm0, %v1450_v33  ;;  %2137 = vmatmul.msk.bf16.gmra.mxu2 %vm129_vm0, %v1245_v26  ;;  %v1644_v33 = vld [vmem:[%s3510_s0 + $0xa6] sm:$0xff] }
 0x195   :  { %v1660_v26 = vpack.c.bf16 %v1645_v29, %v1644_v33 }
 0x196   :  { %v376_v38 = vpop.f32.mrf.mxu1  ;;  %v975_v12 = vpop.f32.mrf.mxu0 }
 0x197   :  { %v765_v15 = vpop.f32.mrf.mxu3  ;;  %v3275_v5 = vpop.f32.mrf.mxu2  ;;  %v1036_v12 = vpack.c.bf16 %v3209_v36, %v3172_v18 }
 0x198   :  { %v793_v60 = vadd.f32 %v765_v15, %v585_v3  ;;  %v1436_v3 = vld [vmem:[%s3510_s0 + $0xa5] sm:$0xff] }
 0x19a   :  { %v3260_v14 = vadd.f32 %v973_v34, %v793_v60 }
 0x19e   :  { %v1121_v17 = vpop.f32.mrf.mxu1  ;;  %v1745_v27 = vpop.f32.mrf.mxu0 }
 0x19f   :  { %v767_v40 = vpop.f32.mrf.mxu3  ;;  %v1185_v31 = vadd.f32 %v1121_v17, %v2774_v42  ;;  %v3284_v43 = vpop.f32.mrf.mxu2  ;;  %v3294_v42 = vld [vmem:[%s3510_s0 + $0xcc] sm:$0xff] }
 0x1a0   :  { %v1246_v41 = vpack.c.bf16 %v3294_v42, %v3289_v50 }
 0x1a1   :  { %2098 = vmatmul.msk.bf16.gmra.mxu1 %vm129_vm0, %v1035_v28  ;;  %2209 = vmatmul.msk.bf16.gmra.mxu0 %vm129_vm0, %v1659_v25  ;;  %v1393_v47 = vadd.f32 %v3193_v32, %v1185_v31 }
 0x1a4   :  { %2172 = vmatmul.msk.bf16.gmra.mxu3 %vm129_vm0, %v1451_v53  ;;  %2138 = vmatmul.msk.bf16.gmra.mxu2 %vm129_vm0, %v1246_v41  ;;  %v1234_v53 = vld [vmem:[%s3510_s0 + $0xd4] sm:$0xff]  ;;  %v1439_v41 = vld [vmem:[%s3510_s0 + $0xbd] sm:$0xff] }
 0x1a5   :  { %v1247_v31 = vpack.c.bf16 %v1234_v53, %v1234_v53 }
 0x1a6   :  { %v1123_v56 = vpop.f32.mrf.mxu1  ;;  %v1747_v11 = vpop.f32.mrf.mxu0 }
 0x1a7   :  { %v1537_v44 = vpop.f32.mrf.mxu3  ;;  %v1186_v62 = vadd.f32 %v1123_v56, %v2794_v8  ;;  %v1437_v8 = vld [vmem:[%s3510_s0 + $0xad] sm:$0xff]  ;;  %v3317_v60 = vpop.f32.mrf.mxu2  ;;  %v1647_v56 = vld [vmem:[%s3510_s0 + $0xbe] sm:$0xff] }
 0x1a8   :  { %v1601_v61 = vadd.f32 %v1537_v44, %v1393_v47  ;;  %v1452_v63 = vpack.c.bf16 %v1437_v8, %v1436_v3 }
 0x1a9   :  { %v1394_v15 = vadd.f32 %v3204_v20, %v1186_v62 }
 0x1aa   :  { %v1809_v32 = vadd.f32 %v1745_v27, %v1601_v61 }
 0x1ac   :  { %v1834_v34 = vpack.c.bf16 %v1809_v32, %v1809_v32 }
 0x1ae   :  { %1860 = vst.msk [vmem:[%s3511_s2] sm:$0xf] %vm1859_vm1, %v1834_v34  ;;  %v1126_v10 = vpop.f32.mrf.mxu1  ;;  %v1750_v57 = vpop.f32.mrf.mxu0  ;;  %v1037_v34 = vpack.c.bf16 %v3251_v54, %v3214_v58 }
 0x1af   :  { %v1539_v38 = vpop.f32.mrf.mxu3  ;;  %v1187_v28 = vadd.f32 %v1126_v10, %v2806_v23  ;;  %v3330_v20 = vpop.f32.mrf.mxu2 }
 0x1b0   :  { %v1602_v9 = vadd.f32 %v1539_v38, %v1394_v15 }
 0x1b1   :  { %2099 = vmatmul.msk.bf16.gmra.mxu1 %vm129_vm0, %v1036_v12  ;;  %2210 = vmatmul.msk.bf16.gmra.mxu0 %vm129_vm0, %v1660_v26  ;;  %v1395_v18 = vadd.f32 %v3235_v51, %v1187_v28  ;;  %v1646_v51 = vld [vmem:[%s3510_s0 + $0xb6] sm:$0xff]  ;;  %v1648_v28 = vld [vmem:[%s3510_s0 + $0xc6] sm:$0xff] }
 0x1b2   :  { %v1810_v40 = vadd.f32 %v1747_v11, %v1602_v9  ;;  %v1438_v11 = vld [vmem:[%s3510_s0 + $0xb5] sm:$0xff]  ;;  %v1661_v33 = vpack.c.bf16 %v1647_v56, %v1646_v51 }
 0x1b3   :  { %v1453_v15 = vpack.c.bf16 %v1439_v41, %v1438_v11 }
 0x1b4   :  { %v1835_v25 = vpack.c.bf16 %v1810_v40, %v1810_v40  ;;  %2173 = vmatmul.msk.bf16.gmra.mxu3 %vm129_vm0, %v1452_v63  ;;  %2139 = vmatmul.msk.bf16.gmra.mxu2 %vm129_vm0, %v1247_v31 }
 0x1b6   :  { %1861 = vst.msk [vmem:[%s3511_s2 + $0x4] sm:$0xf] %vm1859_vm1, %v1835_v25  ;;  %v1128_v27 = vpop.f32.mrf.mxu1  ;;  %v1752_v23 = vpop.f32.mrf.mxu0  ;;  %v1649_v25 = vld [vmem:[%s3510_s0 + $0xce] sm:$0xff] }
 0x1b7   :  { %v1542_v36 = vpop.f32.mrf.mxu3  ;;  %v1188_v44 = vadd.f32 %v1128_v27, %v2826_v45  ;;  %v3354_v32 = vpop.f32.mrf.mxu2  ;;  %v1038_v27 = vpack.c.bf16 %v3289_v50, %v3256_v21 }
 0x1b8   :  { %v1603_v17 = vadd.f32 %v1542_v36, %v1395_v18  ;;  %v1441_v18 = vld [vmem:[%s3510_s0 + $0xcd] sm:$0xff] }
 0x1b9   :  { %v1396_v45 = vadd.f32 %v3246_v6, %v1188_v44 }
 0x1ba   :  { %v1811_v47 = vadd.f32 %v1750_v57, %v1603_v17 }
 0x1bc   :  { %v1836_v61 = vpack.c.bf16 %v1811_v47, %v1811_v47 }
 0x1be   :  { %1862 = vst.msk [vmem:[%s3511_s2 + $0x8] sm:$0xf] %vm1859_vm1, %v1836_v61  ;;  %v1131_v3 = vpop.f32.mrf.mxu1  ;;  %v1755_v8 = vpop.f32.mrf.mxu0 }
 0x1bf   :  { %v1544_v62 = vpop.f32.mrf.mxu3  ;;  %v1189_v12 = vadd.f32 %v1131_v3, %v2847_v2  ;;  %v3367_v6 = vpop.f32.mrf.mxu2 }
 0x1c0   :  { %v1604_v29 = vadd.f32 %v1544_v62, %v1396_v45 }
 0x1c1   :  { %2100 = vmatmul.msk.bf16.gmra.mxu1 %vm129_vm0, %v1037_v34  ;;  %2211 = vmatmul.msk.bf16.gmra.mxu0 %vm129_vm0, %v1661_v33  ;;  %v1397_v58 = vadd.f32 %v3275_v5, %v1189_v12  ;;  %v1440_v5 = vld [vmem:[%s3510_s0 + $0xc5] sm:$0xff]  ;;  %v1650_v33 = vld [vmem:[%s3510_s0 + $0xd6] sm:$0xff] }
 0x1c2   :  { %v1812_v38 = vadd.f32 %v1752_v23, %v1604_v29  ;;  %v1662_v23 = vpack.c.bf16 %v1649_v25, %v1648_v28  ;;  %v1454_v44 = vpack.c.bf16 %v1441_v18, %v1440_v5  ;;  %v1442_v29 = vld [vmem:[%s3510_s0 + $0xd5] sm:$0xff] }
 0x1c4   :  { %v1837_v26 = vpack.c.bf16 %v1812_v38, %v1812_v38  ;;  %2174 = vmatmul.msk.bf16.gmra.mxu3 %vm129_vm0, %v1453_v15  ;;  %v1663_v15 = vpack.c.bf16 %v1650_v33, %v1650_v33 }
 0x1c6   :  { %1863 = vst.msk [vmem:[%s3511_s2 + $0xc] sm:$0xf] %vm1859_vm1, %v1837_v26  ;;  %v1133_v10 = vpop.f32.mrf.mxu1  ;;  %v1757_v2 = vpop.f32.mrf.mxu0 }
 0x1c7   :  { %v1547_v54 = vpop.f32.mrf.mxu3  ;;  %v1190_v63 = vadd.f32 %v1133_v10, %v2867_v22  ;;  %v3387_v36 = vpop.f32.mrf.mxu2 }
 0x1c8   :  { %v1605_v9 = vadd.f32 %v1547_v54, %v1397_v58  ;;  %v1455_v58 = vpack.c.bf16 %v1442_v29, %v1442_v29 }
 0x1c9   :  { %v1398_v22 = vadd.f32 %v3284_v43, %v1190_v63 }
 0x1ca   :  { %v1813_v57 = vadd.f32 %v1755_v8, %v1605_v9 }
 0x1cc   :  { %v1838_v40 = vpack.c.bf16 %v1813_v57, %v1813_v57 }
 0x1ce   :  { %1864 = vst.msk [vmem:[%s3511_s2 + $0x10] sm:$0xf] %vm1859_vm1, %v1838_v40  ;;  %v1136_v31 = vpop.f32.mrf.mxu1  ;;  %v1760_v47 = vpop.f32.mrf.mxu0 }
 0x1cf   :  { %v1549_v17 = vpop.f32.mrf.mxu3  ;;  %v1191_v51 = vadd.f32 %v1136_v31, %v2888_v39  ;;  %v1356_v43 = vpop.f32.mrf.mxu2 }
 0x1d0   :  { %v1606_v53 = vadd.f32 %v1549_v17, %v1398_v22 }
 0x1d1   :  { %2101 = vmatmul.msk.bf16.gmra.mxu1 %vm129_vm0, %v1038_v27  ;;  %2212 = vmatmul.msk.bf16.gmra.mxu0 %vm129_vm0, %v1662_v23  ;;  %v1399_v21 = vadd.f32 %v3317_v60, %v1191_v51 }
 0x1d2   :  { %v1814_v61 = vadd.f32 %v1757_v2, %v1606_v53 }
 0x1d4   :  { %v1839_v56 = vpack.c.bf16 %v1814_v61, %v1814_v61  ;;  %2175 = vmatmul.msk.bf16.gmra.mxu3 %vm129_vm0, %v1454_v44 }
 0x1d6   :  { %1865 = vst.msk [vmem:[%s3511_s2 + $0x14] sm:$0xf] %vm1859_vm1, %v1839_v56  ;;  %v1138_v41 = vpop.f32.mrf.mxu1  ;;  %v1762_v45 = vpop.f32.mrf.mxu0 }
 0x1d7   :  { %v1552_v50 = vpop.f32.mrf.mxu3  ;;  %v1192_v62 = vadd.f32 %v1138_v41, %v2904_v4  ;;  %v1359_v3 = vpop.f32.mrf.mxu2  ;;  %v1039_v4 = vpack.c.bf16 %v3294_v42, %v3294_v42 }
 0x1d8   :  { %v1607_v11 = vadd.f32 %v1552_v50, %v1399_v21 }
 0x1d9   :  { %v1400_v60 = vadd.f32 %v3330_v20, %v1192_v62 }
 0x1da   :  { %v1815_v39 = vadd.f32 %v1760_v47, %v1607_v11 }
 0x1dc   :  { %v1840_v34 = vpack.c.bf16 %v1815_v39, %v1815_v39 }
 0x1de   :  { %1866 = vst.msk [vmem:[%s3511_s2 + $0x18] sm:$0xf] %vm1859_vm1, %v1840_v34  ;;  %v1141_v12 = vpop.f32.mrf.mxu1  ;;  %v1765_v26 = vpop.f32.mrf.mxu0 }
 0x1df   :  { %v1554_v8 = vpop.f32.mrf.mxu3  ;;  %v1193_v9 = vadd.f32 %v1141_v12, %v2925_v59  ;;  %v1361_v20 = vpop.f32.mrf.mxu2 }
 0x1e0   :  { %v1608_v38 = vadd.f32 %v1554_v8, %v1400_v60 }
 0x1e1   :  { %2102 = vmatmul.msk.bf16.gmra.mxu1 %vm129_vm0, %v1039_v4  ;;  %2213 = vmatmul.msk.bf16.gmra.mxu0 %vm129_vm0, %v1663_v15  ;;  %v1401_v42 = vadd.f32 %v3354_v32, %v1193_v9 }
 0x1e2   :  { %v1816_v54 = vadd.f32 %v1762_v45, %v1608_v38 }
 0x1e4   :  { %v1841_v10 = vpack.c.bf16 %v1816_v54, %v1816_v54  ;;  %2176 = vmatmul.msk.bf16.gmra.mxu3 %vm129_vm0, %v1455_v58 }
 0x1e6   :  { %1867 = vst.msk [vmem:[%s3511_s2 + $0x1c] sm:$0xf] %vm1859_vm1, %v1841_v10  ;;  %v1143_v63 = vpop.f32.mrf.mxu1  ;;  %v1767_v40 = vpop.f32.mrf.mxu0 }
 0x1e7   :  { %v1557_v2 = vpop.f32.mrf.mxu3  ;;  %v1194_v28 = vadd.f32 %v1143_v63, %v2948_v35  ;;  %v1364_v18 = vpop.f32.mrf.mxu2 }
 0x1e8   :  { %v1609_v57 = vadd.f32 %v1557_v2, %v1401_v42 }
 0x1e9   :  { %v1402_v5 = vadd.f32 %v3367_v6, %v1194_v28 }
 0x1ea   :  { %v1817_v59 = vadd.f32 %v1765_v26, %v1609_v57 }
 0x1ec   :  { %v1842_v25 = vpack.c.bf16 %v1817_v59, %v1817_v59 }
 0x1ee   :  { %1868 = vst.msk [vmem:[%s3511_s2 + $0x20] sm:$0xf] %vm1859_vm1, %v1842_v25  ;;  %v1146_v32 = vpop.f32.mrf.mxu1  ;;  %v1770_v27 = vpop.f32.mrf.mxu0 }
 0x1ef   :  { %v1559_v22 = vpop.f32.mrf.mxu3  ;;  %v1195_v53 = vadd.f32 %v1146_v32, %v2969_v7  ;;  %v1366_v47 = vpop.f32.mrf.mxu2 }
 0x1f0   :  { %v1610_v17 = vadd.f32 %v1559_v22, %v1402_v5 }
 0x1f1   :  { %v1403_v35 = vadd.f32 %v3387_v36, %v1195_v53 }
 0x1f2   :  { %v1818_v23 = vadd.f32 %v1767_v40, %v1610_v17 }
 0x1f4   :  { %v1843_v31 = vpack.c.bf16 %v1818_v23, %v1818_v23 }
 0x1f6   :  { %1869 = vst.msk [vmem:[%s3511_s2 + $0x24] sm:$0xf] %vm1859_vm1, %v1843_v31  ;;  %v1148_v6 = vpop.f32.mrf.mxu1  ;;  %v1772_v51 = vpop.f32.mrf.mxu0 }
 0x1f7   :  { %v1562_v44 = vpop.f32.mrf.mxu3  ;;  %v1196_v21 = vadd.f32 %v1148_v6, %v2990_v30  ;;  %v1369_v11 = vpop.f32.mrf.mxu2 }
 0x1f8   :  { %v1611_v61 = vadd.f32 %v1562_v44, %v1403_v35 }
 0x1f9   :  { %v1404_v7 = vadd.f32 %v1356_v43, %v1196_v21 }
 0x1fa   :  { %v1819_v56 = vadd.f32 %v1770_v27, %v1611_v61 }
 0x1fc   :  { %v1844_v50 = vpack.c.bf16 %v1819_v56, %v1819_v56 }
 0x1fe   :  { %1870 = vst.msk [vmem:[%s3511_s2 + $0x28] sm:$0xf] %vm1859_vm1, %v1844_v50  ;;  %v1151_v39 = vpop.f32.mrf.mxu1  ;;  %v1775_v36 = vpop.f32.mrf.mxu0 }
 0x1ff   :  { %v1564_v41 = vpop.f32.mrf.mxu3  ;;  %v1197_v34 = vadd.f32 %v1151_v39, %v3011_v55  ;;  %v1371_v29 = vpop.f32.mrf.mxu2 }
 0x200   :  { %v1612_v45 = vadd.f32 %v1564_v41, %v1404_v7 }
 0x201   :  { %v1405_v30 = vadd.f32 %v1359_v3, %v1197_v34 }
 0x202   :  { %v1820_v62 = vadd.f32 %v1772_v51, %v1612_v45 }
 0x204   :  { %v1845_v33 = vpack.c.bf16 %v1820_v62, %v1820_v62 }
 0x206   :  { %1871 = vst.msk [vmem:[%s3511_s2 + $0x2c] sm:$0xf] %vm1859_vm1, %v1845_v33  ;;  %v1153_v4 = vpop.f32.mrf.mxu1  ;;  %v1777_v43 = vpop.f32.mrf.mxu0 }
 0x207   :  { %v1567_v60 = vpop.f32.mrf.mxu3  ;;  %v1198_v38 = vadd.f32 %v1153_v4, %v3032_v19  ;;  %v1374_v26 = vpop.f32.mrf.mxu2 }
 0x208   :  { %v1613_v8 = vadd.f32 %v1567_v60, %v1405_v30 }
 0x209   :  { %v1406_v55 = vadd.f32 %v1361_v20, %v1198_v38 }
 0x20a   :  { %v1821_v15 = vadd.f32 %v1775_v36, %v1613_v8 }
 0x20c   :  { %v1846_v12 = vpack.c.bf16 %v1821_v15, %v1821_v15 }
 0x20e   :  { %1872 = vst.msk [vmem:[%s3511_s2 + $0x30] sm:$0xf] %vm1859_vm1, %v1846_v12  ;;  %v1156_v9 = vpop.f32.mrf.mxu1  ;;  %v1780_v3 = vpop.f32.mrf.mxu0 }
 0x20f   :  { %v1569_v58 = vpop.f32.mrf.mxu3  ;;  %v1199_v42 = vadd.f32 %v1156_v9, %v3053_v48  ;;  %v1376_v57 = vpop.f32.mrf.mxu2 }
 0x210   :  { %v1614_v54 = vadd.f32 %v1569_v58, %v1406_v55 }
 0x211   :  { %v1407_v19 = vadd.f32 %v1364_v18, %v1199_v42 }
 0x212   :  { %v1822_v10 = vadd.f32 %v1777_v43, %v1614_v54 }
 0x214   :  { %v1847_v2 = vpack.c.bf16 %v1822_v10, %v1822_v10 }
 0x216   :  { %1873 = vst.msk [vmem:[%s3511_s2 + $0x34] sm:$0xf] %vm1859_vm1, %v1847_v2  ;;  %v1158_v59 = vpop.f32.mrf.mxu1  ;;  %v1782_v20 = vpop.f32.mrf.mxu0 }
 0x217   :  { %v1572_v63 = vpop.f32.mrf.mxu3  ;;  %v1200_v25 = vadd.f32 %v1158_v59, %v3074_v37  ;;  %v1379_v22 = vpop.f32.mrf.mxu2 }
 0x218   :  { %v1615_v40 = vadd.f32 %v1572_v63, %v1407_v19 }
 0x219   :  { %v1408_v48 = vadd.f32 %v1366_v47, %v1200_v25 }
 0x21a   :  { %v1823_v28 = vadd.f32 %v1780_v3, %v1615_v40 }
 0x21c   :  { %v1848_v5 = vpack.c.bf16 %v1823_v28, %v1823_v28 }
 0x21e   :  { %1874 = vst.msk [vmem:[%s3511_s2 + $0x38] sm:$0xf] %vm1859_vm1, %v1848_v5  ;;  %v1161_v27 = vpop.f32.mrf.mxu1  ;;  %v1785_v18 = vpop.f32.mrf.mxu0 }
 0x21f   :  { %v1574_v17 = vpop.f32.mrf.mxu3  ;;  %v1201_v53 = vadd.f32 %v1161_v27, %v3095_v16  ;;  %v1381_v35 = vpop.f32.mrf.mxu2 }
 0x220   :  { %v1616_v32 = vadd.f32 %v1574_v17, %v1408_v48 }
 0x221   :  { %v1409_v37 = vadd.f32 %v1369_v11, %v1201_v53 }
 0x222   :  { %v1824_v23 = vadd.f32 %v1782_v20, %v1616_v32 }
 0x224   :  { %v1849_v31 = vpack.c.bf16 %v1824_v23, %v1824_v23 }
 0x226   :  { %1875 = vst.msk [vmem:[%s3511_s2 + $0x3c] sm:$0xf] %vm1859_vm1, %v1849_v31  ;;  %v1163_v6 = vpop.f32.mrf.mxu1  ;;  %v1787_v47 = vpop.f32.mrf.mxu0 }
 0x227   :  { %v1577_v44 = vpop.f32.mrf.mxu3  ;;  %v1202_v56 = vadd.f32 %v1163_v6, %v3116_v0  ;;  %v1384_v50 = vpop.f32.mrf.mxu2 }
 0x228   :  { %v1617_v61 = vadd.f32 %v1577_v44, %v1409_v37 }
 0x229   :  { %v1410_v16 = vadd.f32 %v1371_v29, %v1202_v56 }
 0x22a   :  { %v1825_v51 = vadd.f32 %v1785_v18, %v1617_v61 }
 0x22c   :  { %v1850_v21 = vpack.c.bf16 %v1825_v51, %v1825_v51 }
 0x22e   :  { %1876 = vst.msk [vmem:[%s3511_s2 + $0x40] sm:$0xf] %vm1859_vm1, %v1850_v21  ;;  %v1166_v45 = vpop.f32.mrf.mxu1  ;;  %v1790_v11 = vpop.f32.mrf.mxu0 }
 0x22f   :  { %v1579_v7 = vpop.f32.mrf.mxu3  ;;  %v1203_v36 = vadd.f32 %v1166_v45, %v3137_v1  ;;  %v1386_v34 = vpop.f32.mrf.mxu2 }
 0x230   :  { %v1618_v41 = vadd.f32 %v1579_v7, %v1410_v16 }
 0x231   :  { %v1411_v0 = vadd.f32 %v1374_v26, %v1203_v36 }
 0x232   :  { %v1826_v39 = vadd.f32 %v1787_v47, %v1618_v41 }
 0x234   :  { %v1851_v62 = vpack.c.bf16 %v1826_v39, %v1826_v39 }
 0x236   :  { %1877 = vst.msk [vmem:[%s3511_s2 + $0x44] sm:$0xf] %vm1859_vm1, %v1851_v62  ;;  %v1168_v60 = vpop.f32.mrf.mxu1  ;;  %v1792_v29 = vpop.f32.mrf.mxu0 }
 0x237   :  { %v1582_v33 = vpop.f32.mrf.mxu3  ;;  %v1204_v4 = vadd.f32 %v1168_v60, %v3158_v49  ;;  %v1389_v15 = vpop.f32.mrf.mxu2 }
 0x238   :  { %v1619_v30 = vadd.f32 %v1582_v33, %v1411_v0 }
 0x239   :  { %v1412_v1 = vadd.f32 %v1376_v57, %v1204_v4 }
 0x23a   :  { %v1827_v8 = vadd.f32 %v1790_v11, %v1619_v30 }
 0x23c   :  { %v1852_v43 = vpack.c.bf16 %v1827_v8, %v1827_v8 }
 0x23e   :  { %1878 = vst.msk [vmem:[%s3511_s2 + $0x48] sm:$0xf] %vm1859_vm1, %v1852_v43  ;;  %v1171_v55 = vpop.f32.mrf.mxu1  ;;  %v1795_v26 = vpop.f32.mrf.mxu0 }
 0x23f   :  { %v1584_v38 = vpop.f32.mrf.mxu3  ;;  %v1205_v54 = vadd.f32 %v1171_v55, %v3177_v13  ;;  %v1391_v3 = vpop.f32.mrf.mxu2 }
 0x240   :  { %v1620_v12 = vadd.f32 %v1584_v38, %v1412_v1 }
 0x241   :  { %v1413_v49 = vadd.f32 %v1379_v22, %v1205_v54 }
 0x242   :  { %v1828_v58 = vadd.f32 %v1792_v29, %v1620_v12 }
 0x244   :  { %v1853_v9 = vpack.c.bf16 %v1828_v58, %v1828_v58 }
 0x246   :  { %1879 = vst.msk [vmem:[%s3511_s2 + $0x4c] sm:$0xf] %vm1859_vm1, %v1853_v9  ;;  %v1173_v2 = vpop.f32.mrf.mxu1  ;;  %v1797_v19 = vpop.f32.mrf.mxu0 }
 0x247   :  { %v1587_v10 = vpop.f32.mrf.mxu3  ;;  %v1206_v63 = vadd.f32 %v1173_v2, %v3198_v24 }
 0x248   :  { %v1621_v42 = vadd.f32 %v1587_v10, %v1413_v49 }
 0x249   :  { %v1414_v13 = vadd.f32 %v1381_v35, %v1206_v63 }
 0x24a   :  { %v1829_v57 = vadd.f32 %v1795_v26, %v1621_v42 }
 0x24c   :  { %v1854_v40 = vpack.c.bf16 %v1829_v57, %v1829_v57 }
 0x24e   :  { %1880 = vst.msk [vmem:[%s3511_s2 + $0x50] sm:$0xf] %vm1859_vm1, %v1854_v40  ;;  %v1176_v28 = vpop.f32.mrf.mxu1  ;;  %v1800_v25 = vpop.f32.mrf.mxu0 }
 0x24f   :  { %v1589_v59 = vpop.f32.mrf.mxu3  ;;  %v1207_v48 = vadd.f32 %v1176_v28, %v3219_v46 }
 0x250   :  { %v1622_v20 = vadd.f32 %v1589_v59, %v1414_v13 }
 0x251   :  { %v1415_v24 = vadd.f32 %v1384_v50, %v1207_v48 }
 0x252   :  { %v1830_v5 = vadd.f32 %v1797_v19, %v1622_v20 }
 0x254   :  { %v1855_v22 = vpack.c.bf16 %v1830_v5, %v1830_v5 }
 0x256   :  { %1881 = vst.msk [vmem:[%s3511_s2 + $0x54] sm:$0xf] %vm1859_vm1, %v1855_v22  ;;  %v1178_v27 = vpop.f32.mrf.mxu1  ;;  %v1802_v18 = vpop.f32.mrf.mxu0 }
 0x257   :  { %v1592_v17 = vpop.f32.mrf.mxu3  ;;  %v1208_v53 = vadd.f32 %v1178_v27, %v3240_v52 }
 0x258   :  { %v1623_v32 = vadd.f32 %v1592_v17, %v1415_v24 }
 0x259   :  { %v1416_v46 = vadd.f32 %v1386_v34, %v1208_v53 }
 0x25a   :  { %v1831_v23 = vadd.f32 %v1800_v25, %v1623_v32 }
 0x25c   :  { %v1856_v31 = vpack.c.bf16 %v1831_v23, %v1831_v23 }
 0x25e   :  { %1882 = vst.msk [vmem:[%s3511_s2 + $0x58] sm:$0xf] %vm1859_vm1, %v1856_v31  ;;  %v1181_v44 = vpop.f32.mrf.mxu1  ;;  %v1805_v61 = vpop.f32.mrf.mxu0 }
 0x25f   :  { %v1594_v37 = vpop.f32.mrf.mxu3  ;;  %v1209_v47 = vadd.f32 %v1181_v44, %v3260_v14 }
 0x260   :  { %v1624_v35 = vadd.f32 %v1594_v37, %v1416_v46 }
 0x261   :  { %v1417_v52 = vadd.f32 %v1389_v15, %v1209_v47 }
 0x262   :  { %v1832_v6 = vadd.f32 %v1802_v18, %v1624_v35 }
 0x264   :  { %v1857_v51 = vpack.c.bf16 %v1832_v6, %v1832_v6 }
 0x266   :  { %1883 = vst.msk [vmem:[%s3511_s2 + $0x5c] sm:$0xf] %vm1859_vm1, %v1857_v51  ;;  %v1183_v16 = vpop.f32.mrf.mxu1  ;;  %v1807_v50 = vpop.f32.mrf.mxu0 }
 0x267   :  { %v1597_v56 = vpop.f32.mrf.mxu3 }
 0x268   :  { %v1625_v21 = vadd.f32 %v1597_v56, %v1417_v52 }
 0x26a   :  { %v1833_v7 = vadd.f32 %v1805_v61, %v1625_v21 }
 0x26c   :  { %v1858_v41 = vpack.c.bf16 %v1833_v7, %v1833_v7 }
 0x26e   :  { %1884 = vst.msk [vmem:[%s3511_s2 + $0x60] sm:$0xf] %vm1859_vm1, %v1858_v41 }
 0x26f   :  { %v1599_v45 = vpop.f32.mrf.mxu3 }

// kernel: densenet_forward.27
= control target key start
LH: loop header
LB: loop body
LE: loop exit
PB: predicated region body
PF: predicated region fallthrough
CT: control target
= control target key end

     0   :  { %vm32_vm0 = vcmask 261120   ;;  %v262_v2 = vmov 32.0   ;;  %vm153_vm5 = vcmask 523264   ;;  %s382_s3 = inlined_call_operand.vmem [shape: bf16[32,64], index: 3, kind: input, shape index: {}]   ;;  %s383_s0 = inlined_call_operand.vmem [shape: bf16[32,32], index: 0, kind: input, shape index: {}]   ;;  %s384_s1 = inlined_call_operand.vmem [shape: f32[1,32], index: 1, kind: input, shape index: {}]   ;;  %s385_s2 = inlined_call_operand.vmem [shape: f32[1,32], index: 2, kind: input, shape index: {}]   ;;  %s386_s4 = inlined_call_operand.vmem [shape: f32[1,64], index: 4, kind: input, shape index: {}]   ;;  %s387_s5 = inlined_call_operand.vmem [shape: f32[1,64], index: 5, kind: input, shape index: {}]   ;;  %s388_s6 = inlined_call_operand.vmem [shape: f32[32,64], index: 6, kind: output, shape index: {}]  }
   0x1   :  { %v243_v0 = vld [vmem:[%s382_s3 + $0x8] sm:$0xff]  ;;  %v245_v1 = vld [vmem:[%s383_s0] sm:$0xff]   ;;  %256 = vrcp.f32 %v262_v2 }
   0x2   :  { %v304_v3 = vunpack.c.l.bf16 %v245_v1  ;;  %v306_v4 = vunpack.c.h.bf16 %v245_v1  ;;  %v252_v5 = vld [vmem:[%s383_s0 + $0x8] sm:$0xff]   ;;  %140 = vmatpush.bf16.msra.mxu0 %v243_v0  ;;  %253 = vmatpush.bf16.msra.mxu1 %v243_v0  ;;  %v242_v6 = vld [vmem:[%s382_s3] sm:$0xff] }
   0x3   :  { %v314_v7 = vunpack.c.l.bf16 %v252_v5  ;;  %v316_v8 = vunpack.c.h.bf16 %v252_v5  ;;  %v76_v57 = vld [vmem:[%s384_s1] sm:$0x1] }
   0x4   :  { %v33_v9 = vsel %vm32_vm0, %v304_v3, 0.0  ;;  %v34_v10 = vsel %vm32_vm0, %v306_v4, 0.0  ;;  %v96_v61 = vld [vmem:[%s385_s2] sm:$0x1] }
   0x5   :  { %v35_v11 = vadd.f32 %v34_v10, %v33_v9  ;;  %v36_v12 = vsel %vm32_vm0, %v314_v7, 0.0  ;;  %v38_v13 = vsel %vm32_vm0, %v316_v8, 0.0 }
   0x6   :  { %141 = vmatpush.bf16.msra.mxu0 %v242_v6  ;;  %254 = vmatpush.bf16.msra.mxu1 %v242_v6 }
   0x7   :  { %v257_v14 = vpop.eup %256  ;;  %v37_v15 = vadd.f32 %v36_v12, %v35_v11 }
   0x8   :  { %v47_v16 = vmul.f32 32.0, %v257_v14  ;;  %vm51_vm1 = vweird.f32 %v257_v14 }
   0x9   :  { %v39_v17 = vadd.f32 %v38_v13, %v37_v15 }
   0xa   :  { %v48_v18 = vsub.f32 1.0, %v47_v16 }
   0xb   :  { %v40_v19 = vrot.slane %v39_v17, 4 }
   0xc   :  { %v49_v20 = vmul.f32 %v257_v14, %v48_v18 }
   0xd   :  { %v41_v21 = vadd.f32 %v40_v19, %v39_v17 }
   0xe   :  { %v50_v23 = vadd.f32 %v257_v14, %v49_v20 }
   0xf   :  { %v42_v22 = vrot.slane %v41_v21, 2 }
  0x10   :  { %v326_v26 = vsel %vm51_vm1, %v257_v14, %v50_v23 }
  0x11   :  { %v43_v24 = vadd.f32 %v42_v22, %v41_v21 }
  0x13   :  { %v44_v25 = vrot.slane %v43_v24, 1 }
  0x15   :  { %v45_v27 = vadd.f32 %v44_v25, %v43_v24 }
  0x17   :  { %v53_v28 = vmul.f32 %v326_v26, %v45_v27 }
  0x19   :  { %v54_v29 = vsub.f32 %v304_v3, %v53_v28  ;;  %v55_v30 = vsub.f32 %v306_v4, %v53_v28  ;;  %v56_v31 = vsub.f32 %v314_v7, %v53_v28  ;;  %v57_v32 = vsub.f32 %v316_v8, %v53_v28 }
  0x1b   :  { %v58_v33 = vmul.f32 %v54_v29, %v54_v29  ;;  %v59_v34 = vmul.f32 %v55_v30, %v55_v30  ;;  %v60_v35 = vmul.f32 %v56_v31, %v56_v31  ;;  %v61_v36 = vmul.f32 %v57_v32, %v57_v32 }
  0x1d   :  { %v62_v37 = vsel %vm32_vm0, %v58_v33, 0.0  ;;  %v63_v38 = vsel %vm32_vm0, %v59_v34, 0.0  ;;  %v65_v39 = vsel %vm32_vm0, %v60_v35, 0.0  ;;  %v67_v41 = vsel %vm32_vm0, %v61_v36, 0.0 }
  0x1e   :  { %v64_v40 = vadd.f32 %v63_v38, %v62_v37 }
  0x20   :  { %v66_v42 = vadd.f32 %v65_v39, %v64_v40 }
  0x22   :  { %v68_v43 = vadd.f32 %v67_v41, %v66_v42 }
  0x24   :  { %v69_v44 = vrot.slane %v68_v43, 4 }
  0x26   :  { %v70_v45 = vadd.f32 %v69_v44, %v68_v43 }
  0x28   :  { %v71_v46 = vrot.slane %v70_v45, 2 }
  0x2a   :  { %v72_v47 = vadd.f32 %v71_v46, %v70_v45 }
  0x2c   :  { %v73_v48 = vrot.slane %v72_v47, 1 }
  0x2e   :  { %v74_v49 = vadd.f32 %v73_v48, %v72_v47 }
  0x30   :  { %v75_v50 = vmul.f32 %v74_v49, %v326_v26 }
  0x32   :  { %v77_v51 = vadd.f32 1e-05, %v75_v50 }
  0x34   :  { %258 = vrsqrt.f32 %v77_v51  ;;  %vm84_vm2 = vweird.f32 %v77_v51 }
  0x3a   :  { %v259_v52 = vpop.eup %258 }
  0x3b   :  { %v79_v53 = vmul.f32 %v259_v52, %v77_v51  ;;  %vm85_vm3 = vweird.f32 %v259_v52 }
  0x3c   :  { %vm86_vm4 = vmor %vm84_vm2, %vm85_vm3 }
  0x3d   :  { %v80_v54 = vmul.f32 %v259_v52, %v79_v53 }
  0x3f   :  { %v81_v55 = vmul.f32 0.5, %v80_v54 }
  0x41   :  { %v82_v56 = vsub.f32 1.5, %v81_v55 }
  0x43   :  { %v83_v58 = vmul.f32 %v259_v52, %v82_v56 }
  0x45   :  { %v87_v59 = vsel %vm86_vm4, %v259_v52, %v83_v58 }
  0x46   :  { %v88_v60 = vmul.f32 %v87_v59, %v76_v57 }
  0x48   :  { %v90_v62 = vperm.slane %v88_v60, 0  ;;  %v97_v63 = vmul.f32 %v88_v60, %v53_v28 }
  0x4a   :  { %v92_v0 = vmul.f32 %v304_v3, %v90_v62  ;;  %v93_v1 = vmul.f32 %v306_v4, %v90_v62  ;;  %v98_v2 = vsub.f32 %v96_v61, %v97_v63  ;;  %v94_v5 = vmul.f32 %v314_v7, %v90_v62  ;;  %v190_v63 = vld [vmem:[%s386_s4] sm:$0x1] }
  0x4b   :  { %v95_v6 = vmul.f32 %v316_v8, %v90_v62 }
  0x4c   :  { %v100_v9 = vperm.slane %v98_v2, 0 }
  0x4e   :  { %v102_v10 = vadd.f32 %v100_v9, %v92_v0  ;;  %v103_v11 = vadd.f32 %v100_v9, %v93_v1  ;;  %v104_v12 = vadd.f32 %v100_v9, %v94_v5  ;;  %v105_v13 = vadd.f32 %v100_v9, %v95_v6 }
  0x50   :  { %v106_v14 = vmax.f32 %v102_v10, 0.0  ;;  %v107_v15 = vmax.f32 %v103_v11, 0.0  ;;  %v108_v16 = vmax.f32 %v104_v12, 0.0  ;;  %v109_v17 = vmax.f32 %v105_v13, 0.0 }
  0x52   :  { %v110_v18 = vpack.c.bf16 %v107_v15, %v106_v14  ;;  %v111_v19 = vpack.c.bf16 %v109_v17, %v108_v16 }
  0x54   :  { %240 = vmatmul.msk.bf16.vlgmr.msra.gmra.mxu0 %vm32_vm0, %v110_v18  ;;  %241 = vmatmul.msk.bf16.vlgmr.msra.gmra.mxu1 %vm32_vm0, %v111_v19 }
  0xd1   :  { %v143_v3 = vpop.f32.mrf.mxu0  ;;  %v148_v4 = vpop.f32.mrf.mxu1 }
  0xd2   :  { %v154_v8 = vsel %vm153_vm5, %v143_v3, 0.0  ;;  %v157_v23 = vsel %vm153_vm5, %v148_v4, 0.0 }
  0xd9   :  { %v145_v7 = vpop.f32.mrf.mxu0  ;;  %v150_v22 = vpop.f32.mrf.mxu1 }
  0xda   :  { %v155_v20 = vsel %vm153_vm5, %v145_v7, 0.0  ;;  %v159_v25 = vsel %vm153_vm5, %v150_v22, 0.0 }
  0xdb   :  { %v156_v21 = vadd.f32 %v155_v20, %v154_v8 }
  0xdd   :  { %v158_v24 = vadd.f32 %v157_v23, %v156_v21 }
  0xdf   :  { %v160_v27 = vadd.f32 %v159_v25, %v158_v24 }
  0xe1   :  { %v161_v28 = vrot.slane %v160_v27, 4 }
  0xe3   :  { %v162_v29 = vadd.f32 %v161_v28, %v160_v27 }
  0xe5   :  { %v163_v30 = vrot.slane %v162_v29, 2 }
  0xe7   :  { %v164_v31 = vadd.f32 %v163_v30, %v162_v29 }
  0xe9   :  { %v165_v32 = vrot.slane %v164_v31, 1 }
  0xeb   :  { %v166_v33 = vadd.f32 %v165_v32, %v164_v31 }
  0xed   :  { %v167_v34 = vmul.f32 %v166_v33, %v326_v26 }
  0xef   :  { %v168_v35 = vsub.f32 %v143_v3, %v167_v34  ;;  %v169_v36 = vsub.f32 %v145_v7, %v167_v34  ;;  %v170_v37 = vsub.f32 %v148_v4, %v167_v34  ;;  %v171_v38 = vsub.f32 %v150_v22, %v167_v34 }
  0xf1   :  { %v172_v39 = vmul.f32 %v168_v35, %v168_v35  ;;  %v173_v40 = vmul.f32 %v169_v36, %v169_v36  ;;  %v174_v41 = vmul.f32 %v170_v37, %v170_v37  ;;  %v175_v42 = vmul.f32 %v171_v38, %v171_v38 }
  0xf3   :  { %v176_v43 = vsel %vm153_vm5, %v172_v39, 0.0  ;;  %v177_v44 = vsel %vm153_vm5, %v173_v40, 0.0  ;;  %v179_v46 = vsel %vm153_vm5, %v174_v41, 0.0  ;;  %v181_v48 = vsel %vm153_vm5, %v175_v42, 0.0 }
  0xf4   :  { %v178_v45 = vadd.f32 %v177_v44, %v176_v43 }
  0xf6   :  { %v180_v47 = vadd.f32 %v179_v46, %v178_v45 }
  0xf8   :  { %v182_v49 = vadd.f32 %v181_v48, %v180_v47 }
  0xfa   :  { %v183_v50 = vrot.slane %v182_v49, 4 }
  0xfc   :  { %v184_v51 = vadd.f32 %v183_v50, %v182_v49 }
  0xfe   :  { %v185_v52 = vrot.slane %v184_v51, 2 }
 0x100   :  { %v186_v53 = vadd.f32 %v185_v52, %v184_v51 }
 0x102   :  { %v187_v54 = vrot.slane %v186_v53, 1 }
 0x104   :  { %v188_v55 = vadd.f32 %v187_v54, %v186_v53 }
 0x106   :  { %v189_v56 = vmul.f32 %v188_v55, %v326_v26  ;;  %v210_v26 = vld [vmem:[%s387_s5] sm:$0x1] }
 0x108   :  { %v191_v57 = vadd.f32 1e-05, %v189_v56 }
 0x10a   :  { %260 = vrsqrt.f32 %v191_v57  ;;  %vm198_vm7 = vweird.f32 %v191_v57 }
 0x110   :  { %v261_v58 = vpop.eup %260 }
 0x111   :  { %v193_v59 = vmul.f32 %v261_v58, %v191_v57  ;;  %vm199_vm6 = vweird.f32 %v261_v58 }
 0x112   :  { %vm200_vm8 = vmor %vm198_vm7, %vm199_vm6 }
 0x113   :  { %v194_v60 = vmul.f32 %v261_v58, %v193_v59 }
 0x115   :  { %v195_v61 = vmul.f32 0.5, %v194_v60 }
 0x117   :  { %v196_v62 = vsub.f32 1.5, %v195_v61 }
 0x119   :  { %v197_v0 = vmul.f32 %v261_v58, %v196_v62 }
 0x11b   :  { %v201_v1 = vsel %vm200_vm8, %v261_v58, %v197_v0 }
 0x11c   :  { %v202_v2 = vmul.f32 %v201_v1, %v190_v63 }
 0x11e   :  { %v204_v5 = vperm.slane %v202_v2, 0  ;;  %v211_v6 = vmul.f32 %v202_v2, %v167_v34 }
 0x120   :  { %v212_v9 = vsub.f32 %v210_v26, %v211_v6  ;;  %v206_v10 = vmul.f32 %v204_v5, %v143_v3  ;;  %v207_v11 = vmul.f32 %v204_v5, %v145_v7  ;;  %v208_v12 = vmul.f32 %v204_v5, %v148_v4 }
 0x121   :  { %v209_v13 = vmul.f32 %v204_v5, %v150_v22 }
 0x122   :  { %v214_v14 = vperm.slane %v212_v9, 0 }
 0x124   :  { %v216_v15 = vadd.f32 %v214_v14, %v206_v10  ;;  %v217_v16 = vadd.f32 %v214_v14, %v207_v11  ;;  %v218_v17 = vadd.f32 %v214_v14, %v208_v12  ;;  %v219_v18 = vadd.f32 %v214_v14, %v209_v13 }
 0x126   :  { %v220_v19 = vmax.f32 %v216_v15, 0.0  ;;  %v221_v8 = vmax.f32 %v217_v16, 0.0  ;;  %v222_v20 = vmax.f32 %v218_v17, 0.0  ;;  %v223_v21 = vmax.f32 %v219_v18, 0.0 }
 0x128   :  { %224 = vst.msk [vmem:[%s388_s6] sm:$0xff] %vm153_vm5, %v220_v19 }
 0x129   :  { %225 = vst.msk [vmem:[%s388_s6 + $0x8] sm:$0xff] %vm153_vm5, %v221_v8 }
 0x12a   :  { %226 = vst.msk [vmem:[%s388_s6 + $0x10] sm:$0xff] %vm153_vm5, %v222_v20 }
 0x12b   :  { %227 = vst.msk [vmem:[%s388_s6 + $0x18] sm:$0xff] %vm153_vm5, %v223_v21 }

// kernel: densenet_forward.29
= control target key start
LH: loop header
LB: loop body
LE: loop exit
PB: predicated region body
PF: predicated region fallthrough
CT: control target
= control target key end

     0   :  { %v276_v1 = vmov 32.0   ;;  %vm32_vm0 = vcmask 392192   ;;  %vm161_vm5 = vcmask 523264   ;;  %s399_s3 = inlined_call_operand.vmem [shape: bf16[48,64], index: 3, kind: input, shape index: {}]   ;;  %s400_s0 = inlined_call_operand.vmem [shape: bf16[32,48], index: 0, kind: input, shape index: {}]   ;;  %s401_s1 = inlined_call_operand.vmem [shape: f32[1,48], index: 1, kind: input, shape index: {}]   ;;  %s402_s2 = inlined_call_operand.vmem [shape: f32[1,48], index: 2, kind: input, shape index: {}]   ;;  %s403_s4 = inlined_call_operand.vmem [shape: f32[1,64], index: 4, kind: input, shape index: {}]   ;;  %s404_s5 = inlined_call_operand.vmem [shape: f32[1,64], index: 5, kind: input, shape index: {}]   ;;  %s405_s6 = inlined_call_operand.vmem [shape: f32[32,64], index: 6, kind: output, shape index: {}]  }
   0x1   :  { %v256_v0 = vld [vmem:[%s399_s3 + $0x10] sm:$0xff]  ;;  %270 = vrcp.f32 %v276_v1  ;;  %v258_v2 = vld [vmem:[%s400_s0] sm:$0xff]   ;;  %v265_v3 = vld [vmem:[%s400_s0 + $0x8] sm:$0xff]  }
   0x2   :  { %147 = vmatpush.bf16.msra.mxu0 %v256_v0  ;;  %266 = vmatpush.bf16.msra.mxu1 %v256_v0  ;;  %v255_v4 = vld [vmem:[%s399_s3 + $0x8] sm:$0xff]  ;;  %v324_v5 = vunpack.c.l.bf16 %v258_v2  ;;  %v326_v6 = vunpack.c.h.bf16 %v258_v2  ;;  %v328_v7 = vunpack.c.l.bf16 %v265_v3  ;;  %v330_v8 = vunpack.c.h.bf16 %v265_v3  ;;  %v254_v14 = vld [vmem:[%s399_s3] sm:$0xff] }
   0x3   :  { %v76_v58 = vld [vmem:[%s401_s1] sm:$0x1] }
   0x4   :  { %v33_v9 = vsel %vm32_vm0, %v324_v5, 0.0  ;;  %v34_v10 = vsel %vm32_vm0, %v326_v6, 0.0  ;;  %v36_v11 = vsel %vm32_vm0, %v328_v7, 0.0  ;;  %v38_v15 = vsel %vm32_vm0, %v330_v8, 0.0  ;;  %v96_v62 = vld [vmem:[%s402_s2] sm:$0x1] }
   0x5   :  { %v35_v12 = vadd.f32 %v34_v10, %v33_v9 }
   0x6   :  { %148 = vmatpush.bf16.msra.mxu0 %v255_v4  ;;  %267 = vmatpush.bf16.msra.mxu1 %v255_v4 }
   0x7   :  { %v271_v13 = vpop.eup %270  ;;  %v37_v16 = vadd.f32 %v36_v11, %v35_v12 }
   0x8   :  { %v47_v17 = vmul.f32 32.0, %v271_v13  ;;  %vm51_vm1 = vweird.f32 %v271_v13 }
   0x9   :  { %v39_v18 = vadd.f32 %v38_v15, %v37_v16 }
   0xa   :  { %v48_v19 = vsub.f32 1.0, %v47_v17  ;;  %149 = vmatpush.bf16.msra.mxu0 %v254_v14  ;;  %268 = vmatpush.bf16.msra.mxu1 %v254_v14 }
   0xb   :  { %v40_v20 = vrot.slane %v39_v18, 4 }
   0xc   :  { %v49_v21 = vmul.f32 %v271_v13, %v48_v19 }
   0xd   :  { %v41_v22 = vadd.f32 %v40_v20, %v39_v18 }
   0xe   :  { %v50_v24 = vadd.f32 %v271_v13, %v49_v21 }
   0xf   :  { %v42_v23 = vrot.slane %v41_v22, 2 }
  0x10   :  { %v343_v27 = vsel %vm51_vm1, %v271_v13, %v50_v24 }
  0x11   :  { %v43_v25 = vadd.f32 %v42_v23, %v41_v22 }
  0x13   :  { %v44_v26 = vrot.slane %v43_v25, 1 }
  0x15   :  { %v45_v28 = vadd.f32 %v44_v26, %v43_v25 }
  0x17   :  { %v53_v29 = vmul.f32 %v343_v27, %v45_v28 }
  0x19   :  { %v54_v30 = vsub.f32 %v324_v5, %v53_v29  ;;  %v55_v31 = vsub.f32 %v326_v6, %v53_v29  ;;  %v56_v32 = vsub.f32 %v328_v7, %v53_v29  ;;  %v57_v33 = vsub.f32 %v330_v8, %v53_v29 }
  0x1b   :  { %v58_v34 = vmul.f32 %v54_v30, %v54_v30  ;;  %v59_v35 = vmul.f32 %v55_v31, %v55_v31  ;;  %v60_v36 = vmul.f32 %v56_v32, %v56_v32  ;;  %v61_v37 = vmul.f32 %v57_v33, %v57_v33 }
  0x1d   :  { %v62_v38 = vsel %vm32_vm0, %v58_v34, 0.0  ;;  %v63_v39 = vsel %vm32_vm0, %v59_v35, 0.0  ;;  %v65_v40 = vsel %vm32_vm0, %v60_v36, 0.0  ;;  %v67_v42 = vsel %vm32_vm0, %v61_v37, 0.0 }
  0x1e   :  { %v64_v41 = vadd.f32 %v63_v39, %v62_v38 }
  0x20   :  { %v66_v43 = vadd.f32 %v65_v40, %v64_v41 }
  0x22   :  { %v68_v44 = vadd.f32 %v67_v42, %v66_v43 }
  0x24   :  { %v69_v45 = vrot.slane %v68_v44, 4 }
  0x26   :  { %v70_v46 = vadd.f32 %v69_v45, %v68_v44 }
  0x28   :  { %v71_v47 = vrot.slane %v70_v46, 2 }
  0x2a   :  { %v72_v48 = vadd.f32 %v71_v47, %v70_v46 }
  0x2c   :  { %v73_v49 = vrot.slane %v72_v48, 1 }
  0x2e   :  { %v74_v50 = vadd.f32 %v73_v49, %v72_v48 }
  0x30   :  { %v75_v51 = vmul.f32 %v74_v50, %v343_v27 }
  0x32   :  { %v77_v52 = vadd.f32 1e-05, %v75_v51 }
  0x34   :  { %272 = vrsqrt.f32 %v77_v52  ;;  %vm84_vm2 = vweird.f32 %v77_v52 }
  0x3a   :  { %v273_v53 = vpop.eup %272 }
  0x3b   :  { %v79_v54 = vmul.f32 %v273_v53, %v77_v52  ;;  %vm85_vm3 = vweird.f32 %v273_v53 }
  0x3c   :  { %vm86_vm4 = vmor %vm84_vm2, %vm85_vm3 }
  0x3d   :  { %v80_v55 = vmul.f32 %v273_v53, %v79_v54 }
  0x3f   :  { %v81_v56 = vmul.f32 0.5, %v80_v55 }
  0x41   :  { %v82_v57 = vsub.f32 1.5, %v81_v56 }
  0x43   :  { %v83_v59 = vmul.f32 %v273_v53, %v82_v57 }
  0x45   :  { %v87_v60 = vsel %vm86_vm4, %v273_v53, %v83_v59 }
  0x46   :  { %v88_v61 = vmul.f32 %v87_v60, %v76_v58 }
  0x48   :  { %v90_v63 = vperm.slane %v88_v61, 0  ;;  %v97_v0 = vmul.f32 %v88_v61, %v53_v29 }
  0x4a   :  { %v92_v1 = vmul.f32 %v324_v5, %v90_v63  ;;  %v93_v2 = vmul.f32 %v326_v6, %v90_v63  ;;  %v98_v3 = vsub.f32 %v96_v62, %v97_v0  ;;  %v94_v4 = vmul.f32 %v328_v7, %v90_v63  ;;  %v198_v0 = vld [vmem:[%s403_s4] sm:$0x1] }
  0x4b   :  { %v95_v9 = vmul.f32 %v330_v8, %v90_v63 }
  0x4c   :  { %v100_v10 = vperm.slane %v98_v3, 0 }
  0x4e   :  { %v102_v11 = vadd.f32 %v100_v10, %v92_v1  ;;  %v103_v12 = vadd.f32 %v100_v10, %v93_v2  ;;  %v104_v13 = vadd.f32 %v100_v10, %v94_v4  ;;  %v105_v14 = vadd.f32 %v100_v10, %v95_v9 }
  0x50   :  { %v106_v15 = vmax.f32 %v102_v11, 0.0  ;;  %v107_v16 = vmax.f32 %v103_v12, 0.0  ;;  %v108_v17 = vmax.f32 %v104_v13, 0.0  ;;  %v109_v18 = vmax.f32 %v105_v14, 0.0 }
  0x52   :  { %v110_v19 = vpack.c.bf16 %v107_v16, %v106_v15  ;;  %v111_v20 = vpack.c.bf16 %v109_v18, %v108_v17 }
  0x54   :  { %252 = vmatmul.msk.bf16.vlgmr.msra.gmra.mxu0 %vm32_vm0, %v110_v19  ;;  %253 = vmatmul.msk.bf16.vlgmr.msra.gmra.mxu1 %vm32_vm0, %v111_v20 }
  0xd1   :  { %v151_v5 = vpop.f32.mrf.mxu0  ;;  %v156_v6 = vpop.f32.mrf.mxu1 }
  0xd2   :  { %v162_v8 = vsel %vm161_vm5, %v151_v5, 0.0  ;;  %v165_v24 = vsel %vm161_vm5, %v156_v6, 0.0 }
  0xd9   :  { %v153_v7 = vpop.f32.mrf.mxu0  ;;  %v158_v23 = vpop.f32.mrf.mxu1 }
  0xda   :  { %v163_v21 = vsel %vm161_vm5, %v153_v7, 0.0  ;;  %v167_v26 = vsel %vm161_vm5, %v158_v23, 0.0 }
  0xdb   :  { %v164_v22 = vadd.f32 %v163_v21, %v162_v8 }
  0xdd   :  { %v166_v25 = vadd.f32 %v165_v24, %v164_v22 }
  0xdf   :  { %v168_v28 = vadd.f32 %v167_v26, %v166_v25 }
  0xe1   :  { %v169_v29 = vrot.slane %v168_v28, 4 }
  0xe3   :  { %v170_v30 = vadd.f32 %v169_v29, %v168_v28 }
  0xe5   :  { %v171_v31 = vrot.slane %v170_v30, 2 }
  0xe7   :  { %v172_v32 = vadd.f32 %v171_v31, %v170_v30 }
  0xe9   :  { %v173_v33 = vrot.slane %v172_v32, 1 }
  0xeb   :  { %v174_v34 = vadd.f32 %v173_v33, %v172_v32 }
  0xed   :  { %v175_v35 = vmul.f32 %v174_v34, %v343_v27 }
  0xef   :  { %v176_v36 = vsub.f32 %v151_v5, %v175_v35  ;;  %v177_v37 = vsub.f32 %v153_v7, %v175_v35  ;;  %v178_v38 = vsub.f32 %v156_v6, %v175_v35  ;;  %v179_v39 = vsub.f32 %v158_v23, %v175_v35 }
  0xf1   :  { %v180_v40 = vmul.f32 %v176_v36, %v176_v36  ;;  %v181_v41 = vmul.f32 %v177_v37, %v177_v37  ;;  %v182_v42 = vmul.f32 %v178_v38, %v178_v38  ;;  %v183_v43 = vmul.f32 %v179_v39, %v179_v39 }
  0xf3   :  { %v184_v44 = vsel %vm161_vm5, %v180_v40, 0.0  ;;  %v185_v45 = vsel %vm161_vm5, %v181_v41, 0.0  ;;  %v187_v47 = vsel %vm161_vm5, %v182_v42, 0.0  ;;  %v189_v49 = vsel %vm161_vm5, %v183_v43, 0.0 }
  0xf4   :  { %v186_v46 = vadd.f32 %v185_v45, %v184_v44 }
  0xf6   :  { %v188_v48 = vadd.f32 %v187_v47, %v186_v46 }
  0xf8   :  { %v190_v50 = vadd.f32 %v189_v49, %v188_v48 }
  0xfa   :  { %v191_v51 = vrot.slane %v190_v50, 4 }
  0xfc   :  { %v192_v52 = vadd.f32 %v191_v51, %v190_v50 }
  0xfe   :  { %v193_v53 = vrot.slane %v192_v52, 2 }
 0x100   :  { %v194_v54 = vadd.f32 %v193_v53, %v192_v52 }
 0x102   :  { %v195_v55 = vrot.slane %v194_v54, 1 }
 0x104   :  { %v196_v56 = vadd.f32 %v195_v55, %v194_v54 }
 0x106   :  { %v197_v57 = vmul.f32 %v196_v56, %v343_v27  ;;  %v218_v27 = vld [vmem:[%s404_s5] sm:$0x1] }
 0x108   :  { %v199_v58 = vadd.f32 1e-05, %v197_v57 }
 0x10a   :  { %274 = vrsqrt.f32 %v199_v58  ;;  %vm206_vm7 = vweird.f32 %v199_v58 }
 0x110   :  { %v275_v59 = vpop.eup %274 }
 0x111   :  { %v201_v60 = vmul.f32 %v275_v59, %v199_v58  ;;  %vm207_vm6 = vweird.f32 %v275_v59 }
 0x112   :  { %vm208_vm8 = vmor %vm206_vm7, %vm207_vm6 }
 0x113   :  { %v202_v61 = vmul.f32 %v275_v59, %v201_v60 }
 0x115   :  { %v203_v62 = vmul.f32 0.5, %v202_v61 }
 0x117   :  { %v204_v63 = vsub.f32 1.5, %v203_v62 }
 0x119   :  { %v205_v1 = vmul.f32 %v275_v59, %v204_v63 }
 0x11b   :  { %v209_v2 = vsel %vm208_vm8, %v275_v59, %v205_v1 }
 0x11c   :  { %v210_v3 = vmul.f32 %v209_v2, %v198_v0 }
 0x11e   :  { %v212_v4 = vperm.slane %v210_v3, 0  ;;  %v219_v9 = vmul.f32 %v210_v3, %v175_v35 }
 0x120   :  { %v220_v10 = vsub.f32 %v218_v27, %v219_v9  ;;  %v214_v11 = vmul.f32 %v212_v4, %v151_v5  ;;  %v215_v12 = vmul.f32 %v212_v4, %v153_v7  ;;  %v216_v13 = vmul.f32 %v212_v4, %v156_v6 }
 0x121   :  { %v217_v14 = vmul.f32 %v212_v4, %v158_v23 }
 0x122   :  { %v222_v15 = vperm.slane %v220_v10, 0 }
 0x124   :  { %v224_v16 = vadd.f32 %v222_v15, %v214_v11  ;;  %v225_v17 = vadd.f32 %v222_v15, %v215_v12  ;;  %v226_v18 = vadd.f32 %v222_v15, %v216_v13  ;;  %v227_v19 = vadd.f32 %v222_v15, %v217_v14 }
 0x126   :  { %v228_v20 = vmax.f32 %v224_v16, 0.0  ;;  %v229_v8 = vmax.f32 %v225_v17, 0.0  ;;  %v230_v21 = vmax.f32 %v226_v18, 0.0  ;;  %v231_v22 = vmax.f32 %v227_v19, 0.0 }
 0x128   :  { %232 = vst.msk [vmem:[%s405_s6] sm:$0xff] %vm161_vm5, %v228_v20 }
 0x129   :  { %233 = vst.msk [vmem:[%s405_s6 + $0x8] sm:$0xff] %vm161_vm5, %v229_v8 }
 0x12a   :  { %234 = vst.msk [vmem:[%s405_s6 + $0x10] sm:$0xff] %vm161_vm5, %v230_v21 }
 0x12b   :  { %235 = vst.msk [vmem:[%s405_s6 + $0x18] sm:$0xff] %vm161_vm5, %v231_v22 }

// kernel: densenet_forward.31
= control target key start
LH: loop header
LB: loop body
LE: loop exit
PB: predicated region body
PF: predicated region fallthrough
CT: control target
= control target key end

     0   :  { %v216_v1 = vmov 32.0   ;;  %vm26_vm0 = vcmask 523264   ;;  %vm167_vm5 = vcmask 257024   ;;  %s308_s3 = inlined_call_operand.vmem [shape: bf16[64,32], index: 3, kind: input, shape index: {}]   ;;  %s309_s0 = inlined_call_operand.vmem [shape: bf16[32,64], index: 0, kind: input, shape index: {}]   ;;  %s310_s1 = inlined_call_operand.vmem [shape: f32[1,64], index: 1, kind: input, shape index: {}]   ;;  %s311_s2 = inlined_call_operand.vmem [shape: f32[1,64], index: 2, kind: input, shape index: {}]   ;;  %s312_s4 = inlined_call_operand.vmem [shape: bf16[32,32], index: 4, kind: output, shape index: {}]  }
   0x1   :  { %v197_v0 = vld [vmem:[%s308_s3 + $0x18] sm:$0xff]  ;;  %212 = vrcp.f32 %v216_v1  ;;  %v199_v2 = vld [vmem:[%s309_s0] sm:$0xff]   ;;  %v206_v3 = vld [vmem:[%s309_s0 + $0x8] sm:$0xff]  }
   0x2   :  { %148 = vmatpush.bf16.msra.mxu0 %v197_v0  ;;  %207 = vmatpush.bf16.msra.mxu1 %v197_v0  ;;  %v196_v4 = vld [vmem:[%s308_s3 + $0x10] sm:$0xff]  ;;  %v254_v5 = vunpack.c.l.bf16 %v199_v2  ;;  %v256_v6 = vunpack.c.h.bf16 %v199_v2  ;;  %v258_v7 = vunpack.c.l.bf16 %v206_v3  ;;  %v260_v8 = vunpack.c.h.bf16 %v206_v3  ;;  %v195_v14 = vld [vmem:[%s308_s3 + $0x8] sm:$0xff]  ;;  %v194_v20 = vld [vmem:[%s308_s3] sm:$0xff] }
   0x3   :  { %v70_v59 = vld [vmem:[%s310_s1] sm:$0x1] }
   0x4   :  { %v27_v9 = vsel %vm26_vm0, %v254_v5, 0.0  ;;  %v28_v10 = vsel %vm26_vm0, %v256_v6, 0.0  ;;  %v30_v11 = vsel %vm26_vm0, %v258_v7, 0.0  ;;  %v32_v15 = vsel %vm26_vm0, %v260_v8, 0.0  ;;  %v90_v63 = vld [vmem:[%s311_s2] sm:$0x1] }
   0x5   :  { %v29_v12 = vadd.f32 %v28_v10, %v27_v9 }
   0x6   :  { %149 = vmatpush.bf16.msra.mxu0 %v196_v4  ;;  %208 = vmatpush.bf16.msra.mxu1 %v196_v4 }
   0x7   :  { %v213_v13 = vpop.eup %212  ;;  %v31_v16 = vadd.f32 %v30_v11, %v29_v12 }
   0x8   :  { %v41_v17 = vmul.f32 32.0, %v213_v13  ;;  %vm45_vm1 = vweird.f32 %v213_v13 }
   0x9   :  { %v33_v18 = vadd.f32 %v32_v15, %v31_v16 }
   0xa   :  { %v42_v19 = vsub.f32 1.0, %v41_v17  ;;  %150 = vmatpush.bf16.msra.mxu0 %v195_v14  ;;  %209 = vmatpush.bf16.msra.mxu1 %v195_v14 }
   0xb   :  { %v34_v21 = vrot.slane %v33_v18, 4 }
   0xc   :  { %v43_v22 = vmul.f32 %v213_v13, %v42_v19 }
   0xd   :  { %v35_v23 = vadd.f32 %v34_v21, %v33_v18 }
   0xe   :  { %151 = vmatpush.bf16.msra.mxu0 %v194_v20  ;;  %210 = vmatpush.bf16.msra.mxu1 %v194_v20  ;;  %v44_v25 = vadd.f32 %v213_v13, %v43_v22 }
   0xf   :  { %v36_v24 = vrot.slane %v35_v23, 2 }
  0x10   :  { %v46_v28 = vsel %vm45_vm1, %v213_v13, %v44_v25 }
  0x11   :  { %v37_v26 = vadd.f32 %v36_v24, %v35_v23 }
  0x13   :  { %v38_v27 = vrot.slane %v37_v26, 1 }
  0x15   :  { %v39_v29 = vadd.f32 %v38_v27, %v37_v26 }
  0x17   :  { %v47_v30 = vmul.f32 %v46_v28, %v39_v29 }
  0x19   :  { %v48_v31 = vsub.f32 %v254_v5, %v47_v30  ;;  %v49_v32 = vsub.f32 %v256_v6, %v47_v30  ;;  %v50_v33 = vsub.f32 %v258_v7, %v47_v30  ;;  %v51_v34 = vsub.f32 %v260_v8, %v47_v30 }
  0x1b   :  { %v52_v35 = vmul.f32 %v48_v31, %v48_v31  ;;  %v53_v36 = vmul.f32 %v49_v32, %v49_v32  ;;  %v54_v37 = vmul.f32 %v50_v33, %v50_v33  ;;  %v55_v38 = vmul.f32 %v51_v34, %v51_v34 }
  0x1d   :  { %v56_v39 = vsel %vm26_vm0, %v52_v35, 0.0  ;;  %v57_v40 = vsel %vm26_vm0, %v53_v36, 0.0  ;;  %v59_v41 = vsel %vm26_vm0, %v54_v37, 0.0  ;;  %v61_v43 = vsel %vm26_vm0, %v55_v38, 0.0 }
  0x1e   :  { %v58_v42 = vadd.f32 %v57_v40, %v56_v39 }
  0x20   :  { %v60_v44 = vadd.f32 %v59_v41, %v58_v42 }
  0x22   :  { %v62_v45 = vadd.f32 %v61_v43, %v60_v44 }
  0x24   :  { %v63_v46 = vrot.slane %v62_v45, 4 }
  0x26   :  { %v64_v47 = vadd.f32 %v63_v46, %v62_v45 }
  0x28   :  { %v65_v48 = vrot.slane %v64_v47, 2 }
  0x2a   :  { %v66_v49 = vadd.f32 %v65_v48, %v64_v47 }
  0x2c   :  { %v67_v50 = vrot.slane %v66_v49, 1 }
  0x2e   :  { %v68_v51 = vadd.f32 %v67_v50, %v66_v49 }
  0x30   :  { %v69_v52 = vmul.f32 %v68_v51, %v46_v28 }
  0x32   :  { %v71_v53 = vadd.f32 1e-05, %v69_v52 }
  0x34   :  { %214 = vrsqrt.f32 %v71_v53  ;;  %vm78_vm2 = vweird.f32 %v71_v53 }
  0x3a   :  { %v215_v54 = vpop.eup %214 }
  0x3b   :  { %v73_v55 = vmul.f32 %v215_v54, %v71_v53  ;;  %vm79_vm3 = vweird.f32 %v215_v54 }
  0x3c   :  { %vm80_vm4 = vmor %vm78_vm2, %vm79_vm3 }
  0x3d   :  { %v74_v56 = vmul.f32 %v215_v54, %v73_v55 }
  0x3f   :  { %v75_v57 = vmul.f32 0.5, %v74_v56 }
  0x41   :  { %v76_v58 = vsub.f32 1.5, %v75_v57 }
  0x43   :  { %v77_v60 = vmul.f32 %v215_v54, %v76_v58 }
  0x45   :  { %v81_v61 = vsel %vm80_vm4, %v215_v54, %v77_v60 }
  0x46   :  { %v82_v62 = vmul.f32 %v81_v61, %v70_v59 }
  0x48   :  { %v84_v0 = vperm.slane %v82_v62, 0  ;;  %v91_v1 = vmul.f32 %v82_v62, %v47_v30 }
  0x4a   :  { %v86_v2 = vmul.f32 %v254_v5, %v84_v0  ;;  %v87_v3 = vmul.f32 %v256_v6, %v84_v0  ;;  %v92_v4 = vsub.f32 %v90_v63, %v91_v1  ;;  %v88_v9 = vmul.f32 %v258_v7, %v84_v0 }
  0x4b   :  { %v89_v10 = vmul.f32 %v260_v8, %v84_v0 }
  0x4c   :  { %v94_v11 = vperm.slane %v92_v4, 0 }
  0x4e   :  { %v96_v12 = vadd.f32 %v94_v11, %v86_v2  ;;  %v97_v13 = vadd.f32 %v94_v11, %v87_v3  ;;  %v98_v14 = vadd.f32 %v94_v11, %v88_v9  ;;  %v99_v15 = vadd.f32 %v94_v11, %v89_v10 }
  0x50   :  { %v100_v16 = vmax.f32 %v96_v12, 0.0  ;;  %v101_v17 = vmax.f32 %v97_v13, 0.0  ;;  %v102_v18 = vmax.f32 %v98_v14, 0.0  ;;  %v103_v19 = vmax.f32 %v99_v15, 0.0 }
  0x52   :  { %v104_v20 = vpack.c.bf16 %v101_v17, %v100_v16  ;;  %v105_v21 = vpack.c.bf16 %v103_v19, %v102_v18 }
  0x54   :  { %192 = vmatmul.msk.bf16.vlgmr.msra.gmra.mxu0 %vm26_vm0, %v104_v20  ;;  %193 = vmatmul.msk.bf16.vlgmr.msra.gmra.mxu1 %vm26_vm0, %v105_v21 }
  0xd1   :  { %v153_v5 = vpop.f32.mrf.mxu0  ;;  %v158_v6 = vpop.f32.mrf.mxu1 }
  0xd2   :  { %v163_v7 = vpack.c.bf16 %v153_v5, %v153_v5  ;;  %v165_v8 = vpack.c.bf16 %v158_v6, %v158_v6 }
  0xd4   :  { %168 = vst.msk [vmem:[%s312_s4] sm:$0xf] %vm167_vm5, %v163_v7 }
  0xd5   :  { %170 = vst.msk [vmem:[%s312_s4 + $0x8] sm:$0xf] %vm167_vm5, %v165_v8 }
  0xd9   :  { %v155_v22 = vpop.f32.mrf.mxu0  ;;  %v160_v23 = vpop.f32.mrf.mxu1 }
  0xda   :  { %v164_v24 = vpack.c.bf16 %v155_v22, %v155_v22  ;;  %v166_v25 = vpack.c.bf16 %v160_v23, %v160_v23 }
  0xdc   :  { %169 = vst.msk [vmem:[%s312_s4 + $0x4] sm:$0xf] %vm167_vm5, %v164_v24 }
  0xdd   :  { %171 = vst.msk [vmem:[%s312_s4 + $0xc] sm:$0xf] %vm167_vm5, %v166_v25 }

// kernel: densenet_forward.28
= control target key start
LH: loop header
LB: loop body
LE: loop exit
PB: predicated region body
PF: predicated region fallthrough
CT: control target
= control target key end

     0   :  { %vm81_vm0 = vcmask 523264   ;;  %vm939_vm1 = vcmask 125952   ;;  %s1749_s1 = inlined_call_operand.vmem [shape: bf16[9,64,16], index: 1, kind: input, shape index: {}]   ;;  %s1750_s0 = inlined_call_operand.vmem [shape: f32[86,64], index: 0, kind: input, shape index: {}]   ;;  %s1751_s2 = inlined_call_operand.vmem [shape: bf16[72,16], index: 2, kind: output, shape index: {}]  }
   0x1   :  { %v1213_v0 = vld [vmem:[%s1749_s1 + $0x38] sm:$0xff]  ;;  %v1212_v1 = vld [vmem:[%s1749_s1 + $0x30] sm:$0xff]  ;;  %v1211_v2 = vld [vmem:[%s1749_s1 + $0x28] sm:$0xff] }
   0x2   :  { %1242 = vmatpush.bf16.msra.mxu1 %v1213_v0  ;;  %1243 = vmatpush.bf16.msra.mxu2 %v1213_v0  ;;  %v1210_v3 = vld [vmem:[%s1749_s1 + $0x20] sm:$0xff]  ;;  %v36_v4 = vld [vmem:[%s1750_s0 + $0x11] sm:$0xff]  ;;  %v39_v7 = vld [vmem:[%s1750_s0 + $0x29] sm:$0xff] }
   0x3   :  { %1244 = vmatpush.bf16.msra.mxu3 %v1213_v0  ;;  %101 = vmatpush.bf16.msra.mxu0 %v1213_v0  ;;  %v37_v5 = vld [vmem:[%s1750_s0 + $0x19] sm:$0xff]  ;;  %v38_v6 = vld [vmem:[%s1750_s0 + $0x21] sm:$0xff]  ;;  %v35_v14 = vld [vmem:[%s1750_s0 + $0x9] sm:$0xff] }
   0x4   :  { %v1217_v8 = vld [vmem:[%s1749_s1 + $0x58] sm:$0xff]  ;;  %v44_v10 = vpack.c.bf16 %v37_v5, %v36_v4  ;;  %v45_v11 = vpack.c.bf16 %v39_v7, %v38_v6  ;;  %v42_v12 = vld [vmem:[%s1750_s0 + $0x41] sm:$0xff]  ;;  %v1208_v17 = vld [vmem:[%s1749_s1 + $0x10] sm:$0xff] }
   0x5   :  { %v1209_v9 = vld [vmem:[%s1749_s1 + $0x18] sm:$0xff]  ;;  %v34_v13 = vld [vmem:[%s1750_s0 + $0x1] sm:$0xff]  ;;  %v1216_v18 = vld [vmem:[%s1749_s1 + $0x50] sm:$0xff]  ;;  %v47_v19 = vpack.c.bf16 %v42_v12, %v42_v12 }
   0x6   :  { %1245 = vmatpush.bf16.msra.mxu1 %v1212_v1  ;;  %1246 = vmatpush.bf16.msra.mxu2 %v1212_v1  ;;  %v1221_v15 = vld [vmem:[%s1749_s1 + $0x78] sm:$0xff]  ;;  %v43_v20 = vpack.c.bf16 %v35_v14, %v34_v13  ;;  %v1220_v21 = vld [vmem:[%s1749_s1 + $0x70] sm:$0xff]  ;;  %v1207_v23 = vld [vmem:[%s1749_s1 + $0x8] sm:$0xff] }
   0x7   :  { %1247 = vmatpush.bf16.msra.mxu3 %v1212_v1  ;;  %102 = vmatpush.bf16.msra.mxu0 %v1212_v1  ;;  %v1225_v16 = vld [vmem:[%s1749_s1 + $0x98] sm:$0xff]  ;;  %v1224_v22 = vld [vmem:[%s1749_s1 + $0x90] sm:$0xff]  ;;  %v1215_v24 = vld [vmem:[%s1749_s1 + $0x48] sm:$0xff] }
   0x8   :  { %v1219_v25 = vld [vmem:[%s1749_s1 + $0x68] sm:$0xff]  ;;  %v1206_v27 = vld [vmem:[%s1749_s1] sm:$0xff]  ;;  %v1233_v29 = vld [vmem:[%s1749_s1 + $0xd8] sm:$0xff] }
   0x9   :  { %v1223_v26 = vld [vmem:[%s1749_s1 + $0x88] sm:$0xff]  ;;  %v1214_v28 = vld [vmem:[%s1749_s1 + $0x40] sm:$0xff]  ;;  %v1229_v30 = vld [vmem:[%s1749_s1 + $0xb8] sm:$0xff] }
   0xa   :  { %1248 = vmatpush.bf16.msra.mxu1 %v1211_v2  ;;  %1249 = vmatpush.bf16.msra.mxu2 %v1211_v2  ;;  %v40_v31 = vld [vmem:[%s1750_s0 + $0x31] sm:$0xff]  ;;  %v41_v32 = vld [vmem:[%s1750_s0 + $0x39] sm:$0xff]  ;;  %v1366_v34 = vld [vmem:[%s1750_s0 + $0x8] sm:$0xff] }
   0xb   :  { %1250 = vmatpush.bf16.msra.mxu3 %v1211_v2  ;;  %103 = vmatpush.bf16.msra.mxu0 %v1211_v2  ;;  %v12_v33 = vld [vmem:[%s1750_s0] sm:$0xff]  ;;  %v1237_v37 = vld [vmem:[%s1749_s1 + $0xf8] sm:$0xff]  ;;  %v46_v40 = vpack.c.bf16 %v41_v32, %v40_v31  ;;  %v1387_v42 = vld [vmem:[%s1750_s0 + $0xe] sm:$0xff] }
   0xc   :  { %v1218_v35 = vld [vmem:[%s1749_s1 + $0x60] sm:$0xff]  ;;  %v1241_v38 = vld [vmem:[%s1749_s1 + $0x118] sm:$0xff]  ;;  %v21_v41 = vpack.c.bf16 %v1366_v34, %v12_v33  ;;  %v411_v44 = vld [vmem:[%s1750_s0 + $0xf] sm:$0xff] }
   0xd   :  { %v1222_v36 = vld [vmem:[%s1749_s1 + $0x80] sm:$0xff]  ;;  %v1232_v47 = vld [vmem:[%s1749_s1 + $0xd0] sm:$0xff]  ;;  %v1420_v52 = vld [vmem:[%s1750_s0 + $0x18] sm:$0xff] }
   0xe   :  { %1251 = vmatpush.bf16.msra.mxu1 %v1210_v3  ;;  %1252 = vmatpush.bf16.msra.mxu2 %v1210_v3  ;;  %v306_v39 = vld [vmem:[%s1750_s0 + $0x6] sm:$0xff]  ;;  %v1236_v48 = vld [vmem:[%s1749_s1 + $0xf0] sm:$0xff]  ;;  %v1438_v58 = vld [vmem:[%s1750_s0 + $0x1e] sm:$0xff] }
   0xf   :  { %1253 = vmatpush.bf16.msra.mxu3 %v1210_v3  ;;  %104 = vmatpush.bf16.msra.mxu0 %v1210_v3  ;;  %v410_v43 = vld [vmem:[%s1750_s0 + $0x7] sm:$0xff]  ;;  %v315_v45 = vpack.c.bf16 %v1387_v42, %v306_v39  ;;  %v1228_v49 = vld [vmem:[%s1749_s1 + $0xb0] sm:$0xff]  ;;  %v413_v60 = vld [vmem:[%s1750_s0 + $0x1f] sm:$0xff] }
  0x10   :  { %v419_v46 = vpack.c.bf16 %v411_v44, %v410_v43  ;;  %v1240_v50 = vld [vmem:[%s1749_s1 + $0x110] sm:$0xff]  ;;  %v202_v53 = vld [vmem:[%s1750_s0 + $0x2] sm:$0xff]  ;;  %v205_v6 = vld [vmem:[%s1750_s0 + $0x1a] sm:$0xff] }
  0x11   :  { %978 = vmatmul.msk.bf16.vlgmr.msra.gmra.mxu1 %vm81_vm0, %v44_v10  ;;  %979 = vmatmul.msk.bf16.vlgmr.msra.gmra.mxu2 %vm81_vm0, %v45_v11  ;;  %v1415_v51 = vld [vmem:[%s1750_s0 + $0x10] sm:$0xff]  ;;  %v1231_v63 = vld [vmem:[%s1749_s1 + $0xc8] sm:$0xff]  ;;  %v1467_v3 = vld [vmem:[%s1750_s0 + $0x20] sm:$0xff] }
  0x12   :  { %268 = vmatpush.bf16.msrb.mxu2 %v1217_v8  ;;  %173 = vmatpush.bf16.msrb.mxu1 %v1209_v9  ;;  %v203_v54 = vld [vmem:[%s1750_s0 + $0xa] sm:$0xff]  ;;  %v1431_v55 = vld [vmem:[%s1750_s0 + $0x16] sm:$0xff]  ;;  %v22_v56 = vpack.c.bf16 %v1420_v52, %v1415_v51  ;;  %v1559_v31 = vld [vmem:[%s1750_s0 + $0x40] sm:$0xff]  ;;  %v523_v44 = vpack.c.bf16 %v1415_v51, %v1366_v34 }
  0x13   :  { %372 = vmatpush.bf16.msrb.mxu3 %v1221_v15  ;;  %476 = vmatpush.bf16.msrb.mxu0 %v1225_v16  ;;  %v211_v57 = vpack.c.bf16 %v203_v54, %v202_v53  ;;  %v412_v59 = vld [vmem:[%s1750_s0 + $0x17] sm:$0xff]  ;;  %v316_v61 = vpack.c.bf16 %v1438_v58, %v1431_v55  ;;  %v1235_v0 = vld [vmem:[%s1749_s1 + $0xe8] sm:$0xff]  ;;  %v1230_v15 = vld [vmem:[%s1749_s1 + $0xc0] sm:$0xff] }
  0x14   :  { %981 = vmatmul.msk.bf16.vlgmr.msra.gmra.mxu3 %vm81_vm0, %v47_v19  ;;  %977 = vmatmul.msk.bf16.vlgmr.msra.gmra.mxu0 %vm81_vm0, %v43_v20  ;;  %v420_v62 = vpack.c.bf16 %v413_v60, %v412_v59  ;;  %v1227_v1 = vld [vmem:[%s1749_s1 + $0xa8] sm:$0xff]  ;;  %v204_v5 = vld [vmem:[%s1750_s0 + $0x12] sm:$0xff]  ;;  %v1226_v16 = vld [vmem:[%s1749_s1 + $0xa0] sm:$0xff] }
  0x15   :  { %v1239_v2 = vld [vmem:[%s1749_s1 + $0x108] sm:$0xff]  ;;  %v212_v9 = vpack.c.bf16 %v205_v6, %v204_v5  ;;  %v1521_v19 = vld [vmem:[%s1750_s0 + $0x38] sm:$0xff] }
  0x16   :  { %174 = vmatpush.bf16.msrb.mxu1 %v1208_v17  ;;  %269 = vmatpush.bf16.msrb.mxu2 %v1216_v18  ;;  %v1472_v4 = vld [vmem:[%s1750_s0 + $0x28] sm:$0xff]  ;;  %v1234_v17 = vld [vmem:[%s1749_s1 + $0xe0] sm:$0xff]  ;;  %v1516_v18 = vld [vmem:[%s1750_s0 + $0x30] sm:$0xff] }
  0x17   :  { %373 = vmatpush.bf16.msrb.mxu3 %v1220_v21  ;;  %477 = vmatpush.bf16.msrb.mxu0 %v1224_v22  ;;  %v1483_v7 = vld [vmem:[%s1750_s0 + $0x26] sm:$0xff]  ;;  %v23_v8 = vpack.c.bf16 %v1472_v4, %v1467_v3  ;;  %v1490_v10 = vld [vmem:[%s1750_s0 + $0x2e] sm:$0xff]  ;;  %v1532_v22 = vld [vmem:[%s1750_s0 + $0x36] sm:$0xff] }
  0x18   :  { %v414_v11 = vld [vmem:[%s1750_s0 + $0x27] sm:$0xff]  ;;  %v415_v12 = vld [vmem:[%s1750_s0 + $0x2f] sm:$0xff]  ;;  %v317_v13 = vpack.c.bf16 %v1490_v10, %v1483_v7  ;;  %v209_v33 = vld [vmem:[%s1750_s0 + $0x3a] sm:$0xff] }
  0x19   :  { %v421_v14 = vpack.c.bf16 %v415_v12, %v414_v11  ;;  %v206_v20 = vld [vmem:[%s1750_s0 + $0x22] sm:$0xff]  ;;  %v207_v21 = vld [vmem:[%s1750_s0 + $0x2a] sm:$0xff]  ;;  %v208_v32 = vld [vmem:[%s1750_s0 + $0x32] sm:$0xff] }
  0x1a   :  { %175 = vmatpush.bf16.msrb.mxu1 %v1207_v23  ;;  %270 = vmatpush.bf16.msrb.mxu2 %v1215_v24  ;;  %v24_v23 = vpack.c.bf16 %v1521_v19, %v1516_v18  ;;  %v213_v24 = vpack.c.bf16 %v207_v21, %v206_v20  ;;  %v618_v34 = vld [vmem:[%s1750_s0 + $0xc] sm:$0xff]  ;;  %v724_v51 = vld [vmem:[%s1750_s0 + $0x1d] sm:$0xff]  ;;  %v727_v60 = vld [vmem:[%s1750_s0 + $0x35] sm:$0xff] }
  0x1b   :  { %374 = vmatpush.bf16.msrb.mxu3 %v1219_v25  ;;  %478 = vmatpush.bf16.msrb.mxu0 %v1223_v26  ;;  %v1539_v25 = vld [vmem:[%s1750_s0 + $0x3e] sm:$0xff]  ;;  %v726_v59 = vld [vmem:[%s1750_s0 + $0x2d] sm:$0xff] }
  0x1c   :  { %v416_v26 = vld [vmem:[%s1750_s0 + $0x37] sm:$0xff]  ;;  %v725_v53 = vld [vmem:[%s1750_s0 + $0x25] sm:$0xff] }
  0x1d   :  { %v732_v54 = vpack.c.bf16 %v725_v53, %v724_v51  ;;  %v622_v5 = vld [vmem:[%s1750_s0 + $0x2c] sm:$0xff]  ;;  %v623_v6 = vld [vmem:[%s1750_s0 + $0x34] sm:$0xff] }
  0x1e   :  { %176 = vmatpush.bf16.msrb.mxu1 %v1206_v27  ;;  %271 = vmatpush.bf16.msrb.mxu2 %v1214_v28  ;;  %v417_v27 = vld [vmem:[%s1750_s0 + $0x3f] sm:$0xff]  ;;  %v318_v28 = vpack.c.bf16 %v1539_v25, %v1532_v22 }
  0x1f   :  { %375 = vmatpush.bf16.msrb.mxu3 %v1218_v35  ;;  %479 = vmatpush.bf16.msrb.mxu0 %v1222_v36  ;;  %v25_v35 = vpack.c.bf16 %v1559_v31, %v1559_v31  ;;  %v214_v36 = vpack.c.bf16 %v209_v33, %v208_v32  ;;  %v729_v11 = vld [vmem:[%s1750_s0 + $0x45] sm:$0xff] }
  0x21   :  { %980 = vmatmul.msk.bf16.gmra.mxu2 %vm81_vm0, %v46_v40  ;;  %998 = vmatmul.msk.bf16.vlgmr.msrb.gmra.mxu1 %vm81_vm0, %v21_v41  ;;  %v210_v41 = vld [vmem:[%s1750_s0 + $0x42] sm:$0xff] }
  0x22   :  { %684 = vmatpush.bf16.msra.mxu2 %v1233_v29  ;;  %580 = vmatpush.bf16.msra.mxu1 %v1229_v30  ;;  %v422_v29 = vpack.c.bf16 %v417_v27, %v416_v26  ;;  %v1238_v30 = vld [vmem:[%s1749_s1 + $0x100] sm:$0xff]  ;;  %v215_v43 = vpack.c.bf16 %v210_v41, %v210_v41 }
  0x23   :  { %788 = vmatpush.bf16.msra.mxu3 %v1237_v37  ;;  %892 = vmatpush.bf16.msra.mxu0 %v1241_v38  ;;  %v1572_v37 = vld [vmem:[%s1750_s0 + $0x46] sm:$0xff] }
  0x24   :  { %1056 = vmatmul.msk.bf16.vlgmr.msrb.gmra.mxu3 %vm81_vm0, %v315_v45  ;;  %1085 = vmatmul.msk.bf16.vlgmr.msrb.gmra.mxu0 %vm81_vm0, %v419_v46  ;;  %v418_v38 = vld [vmem:[%s1750_s0 + $0x47] sm:$0xff]  ;;  %v319_v39 = vpack.c.bf16 %v1572_v37, %v1572_v37  ;;  %v723_v46 = vld [vmem:[%s1750_s0 + $0x15] sm:$0xff] }
  0x25   :  { %v423_v40 = vpack.c.bf16 %v418_v38, %v418_v38  ;;  %v722_v45 = vld [vmem:[%s1750_s0 + $0xd] sm:$0xff] }
  0x26   :  { %685 = vmatpush.bf16.msra.mxu2 %v1232_v47  ;;  %581 = vmatpush.bf16.msra.mxu1 %v1228_v49  ;;  %v731_v47 = vpack.c.bf16 %v723_v46, %v722_v45  ;;  %v619_v49 = vld [vmem:[%s1750_s0 + $0x14] sm:$0xff] }
  0x27   :  { %789 = vmatpush.bf16.msra.mxu3 %v1236_v48  ;;  %893 = vmatpush.bf16.msra.mxu0 %v1240_v50  ;;  %v835_v48 = vpack.c.bf16 %v1431_v55, %v1387_v42  ;;  %v524_v50 = vpack.c.bf16 %v1467_v3, %v1420_v52  ;;  %v627_v42 = vpack.c.bf16 %v619_v49, %v618_v34  ;;  %v620_v52 = vld [vmem:[%s1750_s0 + $0x1c] sm:$0xff] }
  0x28   :  { %v836_v55 = vpack.c.bf16 %v1483_v7, %v1438_v58 }
  0x2a   :  { %686 = vmatpush.bf16.msra.mxu2 %v1231_v63  ;;  %582 = vmatpush.bf16.msra.mxu1 %v1227_v1  ;;  %v837_v63 = vpack.c.bf16 %v1532_v22, %v1490_v10  ;;  %v728_v10 = vld [vmem:[%s1750_s0 + $0x3d] sm:$0xff] }
  0x2b   :  { %790 = vmatpush.bf16.msra.mxu3 %v1235_v0  ;;  %894 = vmatpush.bf16.msra.mxu0 %v1239_v2 }
  0x2e   :  { %687 = vmatpush.bf16.msra.mxu2 %v1230_v15  ;;  %583 = vmatpush.bf16.msra.mxu1 %v1226_v16  ;;  %v734_v15 = vpack.c.bf16 %v729_v11, %v728_v10  ;;  %v838_v16 = vpack.c.bf16 %v1572_v37, %v1539_v25  ;;  %v625_v25 = vld [vmem:[%s1750_s0 + $0x44] sm:$0xff] }
  0x2f   :  { %791 = vmatpush.bf16.msra.mxu3 %v1234_v17  ;;  %895 = vmatpush.bf16.msra.mxu0 %v1238_v30  ;;  %v834_v30 = vld [vmem:[%s1750_s0 + $0x4e] sm:$0xff] }
  0x31   :  { %999 = vmatmul.msk.bf16.gmra.mxu1 %vm81_vm0, %v22_v56  ;;  %1027 = vmatmul.msk.bf16.vlgmr.msrb.gmra.mxu2 %vm81_vm0, %v211_v57  ;;  %v621_v56 = vld [vmem:[%s1750_s0 + $0x24] sm:$0xff]  ;;  %v525_v57 = vpack.c.bf16 %v1516_v18, %v1472_v4 }
  0x32   :  { %v628_v58 = vpack.c.bf16 %v621_v56, %v620_v52 }
  0x34   :  { %1057 = vmatmul.msk.bf16.gmra.mxu3 %vm81_vm0, %v316_v61  ;;  %1086 = vmatmul.msk.bf16.gmra.mxu0 %vm81_vm0, %v420_v62  ;;  %v733_v62 = vpack.c.bf16 %v727_v60, %v726_v59 }
  0x41   :  { %1000 = vmatmul.msk.bf16.gmra.mxu1 %vm81_vm0, %v23_v8  ;;  %1028 = vmatmul.msk.bf16.gmra.mxu2 %vm81_vm0, %v212_v9  ;;  %v526_v8 = vpack.c.bf16 %v1559_v31, %v1521_v19  ;;  %v629_v9 = vpack.c.bf16 %v623_v6, %v622_v5 }
  0x44   :  { %1058 = vmatmul.msk.bf16.gmra.mxu3 %vm81_vm0, %v317_v13  ;;  %1087 = vmatmul.msk.bf16.gmra.mxu0 %vm81_vm0, %v421_v14 }
  0x51   :  { %1001 = vmatmul.msk.bf16.gmra.mxu1 %vm81_vm0, %v24_v23  ;;  %1029 = vmatmul.msk.bf16.gmra.mxu2 %vm81_vm0, %v213_v24  ;;  %v522_v23 = vld [vmem:[%s1750_s0 + $0x48] sm:$0xff]  ;;  %v624_v24 = vld [vmem:[%s1750_s0 + $0x3c] sm:$0xff] }
  0x52   :  { %v527_v27 = vpack.c.bf16 %v522_v23, %v522_v23 }
  0x54   :  { %1059 = vmatmul.msk.bf16.gmra.mxu3 %vm81_vm0, %v318_v28  ;;  %1088 = vmatmul.msk.bf16.gmra.mxu0 %vm81_vm0, %v422_v29  ;;  %v630_v28 = vpack.c.bf16 %v625_v25, %v624_v24  ;;  %v730_v29 = vld [vmem:[%s1750_s0 + $0x4d] sm:$0xff] }
  0x61   :  { %1002 = vmatmul.msk.bf16.gmra.mxu1 %vm81_vm0, %v25_v35  ;;  %1030 = vmatmul.msk.bf16.gmra.mxu2 %vm81_vm0, %v214_v36  ;;  %v735_v35 = vpack.c.bf16 %v730_v29, %v730_v29  ;;  %v839_v36 = vpack.c.bf16 %v834_v30, %v834_v30 }
  0x64   :  { %1060 = vmatmul.msk.bf16.gmra.mxu3 %vm81_vm0, %v319_v39  ;;  %1089 = vmatmul.msk.bf16.gmra.mxu0 %vm81_vm0, %v423_v40 }
  0x71   :  { %1031 = vmatmul.msk.bf16.gmra.mxu2 %vm81_vm0, %v215_v43  ;;  %1114 = vmatmul.msk.bf16.vlgmr.msra.gmra.mxu1 %vm81_vm0, %v523_v44 }
  0x74   :  { %1172 = vmatmul.msk.bf16.vlgmr.msra.gmra.mxu3 %vm81_vm0, %v731_v47  ;;  %1201 = vmatmul.msk.bf16.vlgmr.msra.gmra.mxu0 %vm81_vm0, %v835_v48  ;;  %v626_v47 = vld [vmem:[%s1750_s0 + $0x4c] sm:$0xff] }
  0x75   :  { %v631_v49 = vpack.c.bf16 %v626_v47, %v626_v47 }
  0x81   :  { %1115 = vmatmul.msk.bf16.gmra.mxu1 %vm81_vm0, %v524_v50  ;;  %1143 = vmatmul.msk.bf16.vlgmr.msra.gmra.mxu2 %vm81_vm0, %v627_v42 }
  0x84   :  { %1173 = vmatmul.msk.bf16.gmra.mxu3 %vm81_vm0, %v732_v54  ;;  %1202 = vmatmul.msk.bf16.gmra.mxu0 %vm81_vm0, %v836_v55 }
  0x8e   :  { %v111_v61 = vpop.f32.mrf.mxu1 }
  0x91   :  { %1116 = vmatmul.msk.bf16.gmra.mxu1 %vm81_vm0, %v525_v57  ;;  %1144 = vmatmul.msk.bf16.gmra.mxu2 %vm81_vm0, %v628_v58  ;;  %v106_v0 = vpop.f32.mrf.mxu0 }
  0x94   :  { %v116_v1 = vpop.f32.mrf.mxu2  ;;  %1174 = vmatmul.msk.bf16.gmra.mxu3 %vm81_vm0, %v733_v62  ;;  %1203 = vmatmul.msk.bf16.gmra.mxu0 %vm81_vm0, %v837_v63 }
  0x96   :  { %v113_v2 = vpop.f32.mrf.mxu1 }
  0x97   :  { %v1640_v3 = vpop.f32.mrf.mxu3 }
  0x99   :  { %v108_v4 = vpop.f32.mrf.mxu0 }
  0x9c   :  { %v118_v7 = vpop.f32.mrf.mxu2 }
  0x9e   :  { %v178_v12 = vpop.f32.mrf.mxu1 }
  0x9f   :  { %v179_v13 = vadd.f32 %v178_v12, %v106_v0  ;;  %v128_v14 = vpop.f32.mrf.mxu3 }
  0xa1   :  { %1117 = vmatmul.msk.bf16.gmra.mxu1 %vm81_vm0, %v526_v8  ;;  %1145 = vmatmul.msk.bf16.gmra.mxu2 %vm81_vm0, %v629_v9  ;;  %v481_v17 = vpop.f32.mrf.mxu0 }
  0xa4   :  { %v121_v18 = vpop.f32.mrf.mxu2  ;;  %1175 = vmatmul.msk.bf16.gmra.mxu3 %vm81_vm0, %v734_v15  ;;  %1204 = vmatmul.msk.bf16.gmra.mxu0 %vm81_vm0, %v838_v16 }
  0xa6   :  { %v180_v19 = vpop.f32.mrf.mxu1 }
  0xa7   :  { %v181_v20 = vadd.f32 %v180_v19, %v108_v4  ;;  %v377_v21 = vpop.f32.mrf.mxu3 }
  0xa9   :  { %v483_v22 = vpop.f32.mrf.mxu0 }
  0xac   :  { %v123_v26 = vpop.f32.mrf.mxu2 }
  0xae   :  { %v183_v31 = vpop.f32.mrf.mxu1 }
  0xaf   :  { %v184_v32 = vadd.f32 %v183_v31, %v111_v61  ;;  %v379_v33 = vpop.f32.mrf.mxu3 }
  0xb1   :  { %1118 = vmatmul.msk.bf16.gmra.mxu1 %vm81_vm0, %v527_v27  ;;  %1146 = vmatmul.msk.bf16.gmra.mxu2 %vm81_vm0, %v630_v28  ;;  %v486_v37 = vpop.f32.mrf.mxu0 }
  0xb4   :  { %v273_v38 = vpop.f32.mrf.mxu2  ;;  %1176 = vmatmul.msk.bf16.gmra.mxu3 %vm81_vm0, %v735_v35  ;;  %1205 = vmatmul.msk.bf16.gmra.mxu0 %vm81_vm0, %v839_v36 }
  0xb5   :  { %v297_v39 = vadd.f32 %v273_v38, %v179_v13 }
  0xb6   :  { %v185_v40 = vpop.f32.mrf.mxu1 }
  0xb7   :  { %v401_v41 = vadd.f32 %v377_v21, %v297_v39  ;;  %v186_v43 = vadd.f32 %v185_v40, %v113_v2  ;;  %v382_v44 = vpop.f32.mrf.mxu3 }
  0xb9   :  { %v488_v45 = vpop.f32.mrf.mxu0  ;;  %v1681_v46 = vadd.f32 %v481_v17, %v401_v41 }
  0xbc   :  { %v275_v48 = vpop.f32.mrf.mxu2 }
  0xbd   :  { %v298_v34 = vadd.f32 %v275_v48, %v181_v20 }
  0xbe   :  { %v188_v50 = vpop.f32.mrf.mxu1 }
  0xbf   :  { %v402_v42 = vadd.f32 %v379_v33, %v298_v34  ;;  %v189_v51 = vadd.f32 %v188_v50, %v116_v1  ;;  %v384_v53 = vpop.f32.mrf.mxu3 }
  0xc1   :  { %1147 = vmatmul.msk.bf16.gmra.mxu2 %vm81_vm0, %v631_v49  ;;  %v491_v54 = vpop.f32.mrf.mxu0  ;;  %v1687_v55 = vadd.f32 %v483_v22, %v402_v42 }
  0xc4   :  { %v278_v52 = vpop.f32.mrf.mxu2 }
  0xc5   :  { %v299_v56 = vadd.f32 %v278_v52, %v184_v32 }
  0xc6   :  { %v190_v57 = vpop.f32.mrf.mxu1 }
  0xc7   :  { %v403_v58 = vadd.f32 %v382_v44, %v299_v56  ;;  %v191_v59 = vadd.f32 %v190_v57, %v118_v7  ;;  %v387_v60 = vpop.f32.mrf.mxu3 }
  0xc9   :  { %v493_v61 = vpop.f32.mrf.mxu0  ;;  %v1689_v62 = vadd.f32 %v486_v37, %v403_v58 }
  0xcc   :  { %v280_v63 = vpop.f32.mrf.mxu2 }
  0xcd   :  { %v300_v0 = vadd.f32 %v280_v63, %v186_v43 }
  0xce   :  { %v193_v2 = vpop.f32.mrf.mxu1 }
  0xcf   :  { %v404_v4 = vadd.f32 %v384_v53, %v300_v0  ;;  %v194_v1 = vadd.f32 %v193_v2, %v121_v18  ;;  %v389_v5 = vpop.f32.mrf.mxu3 }
  0xd1   :  { %v496_v6 = vpop.f32.mrf.mxu0  ;;  %v1691_v8 = vadd.f32 %v488_v45, %v404_v4 }
  0xd4   :  { %v283_v9 = vpop.f32.mrf.mxu2 }
  0xd5   :  { %v301_v10 = vadd.f32 %v283_v9, %v189_v51 }
  0xd6   :  { %v195_v11 = vpop.f32.mrf.mxu1 }
  0xd7   :  { %v405_v12 = vadd.f32 %v387_v60, %v301_v10  ;;  %v196_v13 = vadd.f32 %v195_v11, %v123_v26  ;;  %v392_v14 = vpop.f32.mrf.mxu3 }
  0xd9   :  { %v498_v7 = vpop.f32.mrf.mxu0  ;;  %v1693_v15 = vadd.f32 %v491_v54, %v405_v12 }
  0xdc   :  { %v285_v16 = vpop.f32.mrf.mxu2 }
  0xdd   :  { %v302_v17 = vadd.f32 %v285_v16, %v191_v59 }
  0xde   :  { %v198_v19 = vpop.f32.mrf.mxu1 }
  0xdf   :  { %v406_v20 = vadd.f32 %v389_v5, %v302_v17  ;;  %v199_v21 = vadd.f32 %v198_v19, %v1640_v3  ;;  %v394_v18 = vpop.f32.mrf.mxu3 }
  0xe1   :  { %v501_v22 = vpop.f32.mrf.mxu0  ;;  %v1696_v23 = vadd.f32 %v493_v61, %v406_v20 }
  0xe4   :  { %v288_v24 = vpop.f32.mrf.mxu2 }
  0xe5   :  { %v303_v25 = vadd.f32 %v288_v24, %v194_v1 }
  0xe6   :  { %v200_v27 = vpop.f32.mrf.mxu1 }
  0xe7   :  { %v407_v28 = vadd.f32 %v392_v14, %v303_v25  ;;  %v397_v29 = vpop.f32.mrf.mxu3 }
  0xe9   :  { %v503_v26 = vpop.f32.mrf.mxu0  ;;  %v1698_v30 = vadd.f32 %v496_v6, %v407_v28 }
  0xec   :  { %v290_v31 = vpop.f32.mrf.mxu2 }
  0xed   :  { %v304_v32 = vadd.f32 %v290_v31, %v196_v13 }
  0xee   :  { %v585_v33 = vpop.f32.mrf.mxu1 }
  0xef   :  { %v408_v35 = vadd.f32 %v394_v18, %v304_v32  ;;  %v399_v36 = vpop.f32.mrf.mxu3  ;;  %v609_v50 = vadd.f32 %v585_v33, %v1681_v46 }
  0xf1   :  { %v897_v37 = vpop.f32.mrf.mxu0  ;;  %v1700_v38 = vadd.f32 %v498_v7, %v408_v35 }
  0xf4   :  { %v293_v3 = vpop.f32.mrf.mxu2 }
  0xf5   :  { %v305_v39 = vadd.f32 %v293_v3, %v199_v21 }
  0xf6   :  { %v587_v40 = vpop.f32.mrf.mxu1 }
  0xf7   :  { %v409_v41 = vadd.f32 %v397_v29, %v305_v39  ;;  %v793_v43 = vpop.f32.mrf.mxu3  ;;  %v610_v58 = vadd.f32 %v587_v40, %v1687_v55 }
  0xf9   :  { %v899_v44 = vpop.f32.mrf.mxu0  ;;  %v1702_v45 = vadd.f32 %v501_v22, %v409_v41 }
  0xfc   :  { %v295_v47 = vpop.f32.mrf.mxu2 }
  0xfe   :  { %v590_v48 = vpop.f32.mrf.mxu1 }
  0xff   :  { %v795_v34 = vpop.f32.mrf.mxu3  ;;  %v611_v1 = vadd.f32 %v590_v48, %v1689_v62 }
 0x101   :  { %v902_v49 = vpop.f32.mrf.mxu0 }
 0x104   :  { %v689_v42 = vpop.f32.mrf.mxu2 }
 0x105   :  { %v713_v51 = vadd.f32 %v689_v42, %v609_v50 }
 0x106   :  { %v592_v53 = vpop.f32.mrf.mxu1 }
 0x107   :  { %v817_v54 = vadd.f32 %v793_v43, %v713_v51  ;;  %v798_v52 = vpop.f32.mrf.mxu3  ;;  %v612_v14 = vadd.f32 %v592_v53, %v1691_v8 }
 0x109   :  { %v921_v56 = vadd.f32 %v897_v37, %v817_v54  ;;  %v904_v57 = vpop.f32.mrf.mxu0 }
 0x10b   :  { %v930_v59 = vpack.c.bf16 %v921_v56, %v921_v56 }
 0x10c   :  { %v691_v60 = vpop.f32.mrf.mxu2 }
 0x10d   :  { %940 = vst.msk [vmem:[%s1751_s2] sm:$0xf] %vm939_vm1, %v930_v59  ;;  %v714_v61 = vadd.f32 %v691_v60, %v610_v58 }
 0x10e   :  { %v595_v63 = vpop.f32.mrf.mxu1 }
 0x10f   :  { %v818_v46 = vadd.f32 %v795_v34, %v714_v61  ;;  %v800_v0 = vpop.f32.mrf.mxu3  ;;  %v613_v22 = vadd.f32 %v595_v63, %v1693_v15 }
 0x111   :  { %v922_v2 = vadd.f32 %v899_v44, %v818_v46  ;;  %v907_v4 = vpop.f32.mrf.mxu0 }
 0x113   :  { %v931_v5 = vpack.c.bf16 %v922_v2, %v922_v2 }
 0x114   :  { %v694_v6 = vpop.f32.mrf.mxu2 }
 0x115   :  { %941 = vst.msk [vmem:[%s1751_s2 + $0x4] sm:$0xf] %vm939_vm1, %v931_v5  ;;  %v715_v55 = vadd.f32 %v694_v6, %v611_v1 }
 0x116   :  { %v597_v9 = vpop.f32.mrf.mxu1 }
 0x117   :  { %v819_v10 = vadd.f32 %v798_v52, %v715_v55  ;;  %v803_v11 = vpop.f32.mrf.mxu3  ;;  %v614_v32 = vadd.f32 %v597_v9, %v1696_v23 }
 0x119   :  { %v923_v12 = vadd.f32 %v902_v49, %v819_v10  ;;  %v909_v13 = vpop.f32.mrf.mxu0 }
 0x11b   :  { %v932_v7 = vpack.c.bf16 %v923_v12, %v923_v12 }
 0x11c   :  { %v696_v16 = vpop.f32.mrf.mxu2 }
 0x11d   :  { %942 = vst.msk [vmem:[%s1751_s2 + $0x8] sm:$0xf] %vm939_vm1, %v932_v7  ;;  %v716_v62 = vadd.f32 %v696_v16, %v612_v14 }
 0x11e   :  { %v600_v17 = vpop.f32.mrf.mxu1 }
 0x11f   :  { %v820_v19 = vadd.f32 %v800_v0, %v716_v62  ;;  %v805_v20 = vpop.f32.mrf.mxu3  ;;  %v615_v41 = vadd.f32 %v600_v17, %v1698_v30 }
 0x121   :  { %v924_v21 = vadd.f32 %v904_v57, %v820_v19  ;;  %v912_v18 = vpop.f32.mrf.mxu0 }
 0x123   :  { %v933_v24 = vpack.c.bf16 %v924_v21, %v924_v21 }
 0x124   :  { %v699_v25 = vpop.f32.mrf.mxu2 }
 0x125   :  { %943 = vst.msk [vmem:[%s1751_s2 + $0xc] sm:$0xf] %vm939_vm1, %v933_v24  ;;  %v717_v8 = vadd.f32 %v699_v25, %v613_v22 }
 0x126   :  { %v602_v27 = vpop.f32.mrf.mxu1 }
 0x127   :  { %v821_v28 = vadd.f32 %v803_v11, %v717_v8  ;;  %v808_v29 = vpop.f32.mrf.mxu3  ;;  %v616_v42 = vadd.f32 %v602_v27, %v1700_v38 }
 0x129   :  { %v925_v26 = vadd.f32 %v907_v4, %v821_v28  ;;  %v914_v31 = vpop.f32.mrf.mxu0 }
 0x12b   :  { %v934_v33 = vpack.c.bf16 %v925_v26, %v925_v26 }
 0x12c   :  { %v701_v35 = vpop.f32.mrf.mxu2 }
 0x12d   :  { %944 = vst.msk [vmem:[%s1751_s2 + $0x10] sm:$0xf] %vm939_vm1, %v934_v33  ;;  %v718_v15 = vadd.f32 %v701_v35, %v614_v32 }
 0x12e   :  { %v605_v36 = vpop.f32.mrf.mxu1 }
 0x12f   :  { %v822_v37 = vadd.f32 %v805_v20, %v718_v15  ;;  %v810_v3 = vpop.f32.mrf.mxu3  ;;  %v617_v57 = vadd.f32 %v605_v36, %v1702_v45 }
 0x131   :  { %v926_v39 = vadd.f32 %v909_v13, %v822_v37  ;;  %v917_v40 = vpop.f32.mrf.mxu0 }
 0x133   :  { %v935_v43 = vpack.c.bf16 %v926_v39, %v926_v39 }
 0x134   :  { %v704_v44 = vpop.f32.mrf.mxu2 }
 0x135   :  { %945 = vst.msk [vmem:[%s1751_s2 + $0x14] sm:$0xf] %vm939_vm1, %v935_v43  ;;  %v719_v23 = vadd.f32 %v704_v44, %v615_v41 }
 0x136   :  { %v607_v47 = vpop.f32.mrf.mxu1 }
 0x137   :  { %v823_v48 = vadd.f32 %v808_v29, %v719_v23  ;;  %v813_v34 = vpop.f32.mrf.mxu3 }
 0x139   :  { %v927_v49 = vadd.f32 %v912_v18, %v823_v48  ;;  %v919_v50 = vpop.f32.mrf.mxu0 }
 0x13b   :  { %v936_v51 = vpack.c.bf16 %v927_v49, %v927_v49 }
 0x13c   :  { %v706_v53 = vpop.f32.mrf.mxu2 }
 0x13d   :  { %946 = vst.msk [vmem:[%s1751_s2 + $0x18] sm:$0xf] %vm939_vm1, %v936_v51  ;;  %v720_v30 = vadd.f32 %v706_v53, %v616_v42 }
 0x13f   :  { %v824_v54 = vadd.f32 %v810_v3, %v720_v30  ;;  %v815_v52 = vpop.f32.mrf.mxu3 }
 0x141   :  { %v928_v56 = vadd.f32 %v914_v31, %v824_v54 }
 0x143   :  { %v937_v58 = vpack.c.bf16 %v928_v56, %v928_v56 }
 0x144   :  { %v709_v59 = vpop.f32.mrf.mxu2 }
 0x145   :  { %947 = vst.msk [vmem:[%s1751_s2 + $0x1c] sm:$0xf] %vm939_vm1, %v937_v58  ;;  %v721_v38 = vadd.f32 %v709_v59, %v617_v57 }
 0x147   :  { %v825_v60 = vadd.f32 %v813_v34, %v721_v38 }
 0x149   :  { %v929_v61 = vadd.f32 %v917_v40, %v825_v60 }
 0x14b   :  { %v938_v63 = vpack.c.bf16 %v929_v61, %v929_v61 }
 0x14c   :  { %v711_v46 = vpop.f32.mrf.mxu2 }
 0x14d   :  { %948 = vst.msk [vmem:[%s1751_s2 + $0x20] sm:$0xf] %vm939_vm1, %v938_v63 }

// kernel: densenet_forward.32
= control target key start
LH: loop header
LB: loop body
LE: loop exit
PB: predicated region body
PF: predicated region fallthrough
CT: control target
= control target key end

     0   :  { %vm26_vm0 = vcmask 261120   ;;  %v177_v2 = vmov 8.0   ;;  %vm110_vm5 = vcmask 523264   ;;  %s243_s3 = inlined_call_operand.vmem [shape: bf16[32,64], index: 3, kind: input, shape index: {}]   ;;  %s244_s0 = inlined_call_operand.vmem [shape: bf16[8,32], index: 0, kind: input, shape index: {}]   ;;  %s245_s1 = inlined_call_operand.vmem [shape: f32[1,32], index: 1, kind: input, shape index: {}]   ;;  %s246_s2 = inlined_call_operand.vmem [shape: f32[1,32], index: 2, kind: input, shape index: {}]   ;;  %s247_s4 = inlined_call_operand.vmem [shape: f32[1,64], index: 4, kind: input, shape index: {}]   ;;  %s248_s5 = inlined_call_operand.vmem [shape: f32[1,64], index: 5, kind: input, shape index: {}]   ;;  %s249_s6 = inlined_call_operand.vmem [shape: f32[8,64], index: 6, kind: output, shape index: {}]  }
   0x1   :  { %v169_v0 = vld [vmem:[%s243_s3 + $0x8] sm:$0xff]  ;;  %v24_v1 = vld [vmem:[%s244_s0] sm:$0xf]  ;;  %171 = vrcp.f32 %v177_v2 }
   0x2   :  { %v25_v3 = vunpack.c.l.bf16 %v24_v1  ;;  %103 = vmatpush.bf16.msra.mxu0 %v169_v0  ;;  %v168_v4 = vld [vmem:[%s243_s3] sm:$0xff] }
   0x3   :  { %v52_v35 = vld [vmem:[%s245_s1] sm:$0x1] }
   0x4   :  { %v27_v5 = vsel %vm26_vm0, %v25_v3, 0.0  ;;  %v69_v39 = vld [vmem:[%s246_s2] sm:$0x1] }
   0x5   :  { %v28_v6 = vrot.slane %v27_v5, 4 }
   0x6   :  { %104 = vmatpush.bf16.msra.mxu0 %v168_v4 }
   0x7   :  { %v172_v7 = vpop.eup %171  ;;  %v29_v8 = vadd.f32 %v28_v6, %v27_v5 }
   0x8   :  { %v35_v9 = vmul.f32 8.0, %v172_v7  ;;  %vm39_vm1 = vweird.f32 %v172_v7 }
   0x9   :  { %v30_v10 = vrot.slane %v29_v8, 2 }
   0xa   :  { %v36_v11 = vsub.f32 1.0, %v35_v9 }
   0xb   :  { %v31_v12 = vadd.f32 %v30_v10, %v29_v8  ;;  %v129_v10 = vld [vmem:[%s247_s4] sm:$0x1] }
   0xc   :  { %v37_v13 = vmul.f32 %v172_v7, %v36_v11 }
   0xd   :  { %v32_v14 = vrot.slane %v31_v12, 1 }
   0xe   :  { %v38_v15 = vadd.f32 %v172_v7, %v37_v13 }
   0xf   :  { %v33_v16 = vadd.f32 %v32_v14, %v31_v12  ;;  %v146_v14 = vld [vmem:[%s248_s5] sm:$0x1] }
  0x10   :  { %v40_v17 = vsel %vm39_vm1, %v172_v7, %v38_v15 }
  0x11   :  { %v41_v18 = vmul.f32 %v40_v17, %v33_v16 }
  0x13   :  { %v42_v19 = vsub.f32 %v25_v3, %v41_v18 }
  0x15   :  { %v43_v20 = vmul.f32 %v42_v19, %v42_v19 }
  0x17   :  { %v44_v21 = vsel %vm26_vm0, %v43_v20, 0.0 }
  0x18   :  { %v45_v22 = vrot.slane %v44_v21, 4 }
  0x1a   :  { %v46_v23 = vadd.f32 %v45_v22, %v44_v21 }
  0x1c   :  { %v47_v24 = vrot.slane %v46_v23, 2 }
  0x1e   :  { %v48_v25 = vadd.f32 %v47_v24, %v46_v23 }
  0x20   :  { %v49_v26 = vrot.slane %v48_v25, 1 }
  0x22   :  { %v50_v27 = vadd.f32 %v49_v26, %v48_v25 }
  0x24   :  { %v51_v28 = vmul.f32 %v50_v27, %v40_v17 }
  0x26   :  { %v53_v29 = vadd.f32 1e-05, %v51_v28 }
  0x28   :  { %173 = vrsqrt.f32 %v53_v29  ;;  %vm60_vm2 = vweird.f32 %v53_v29 }
  0x2e   :  { %v174_v30 = vpop.eup %173 }
  0x2f   :  { %v55_v31 = vmul.f32 %v174_v30, %v53_v29  ;;  %vm61_vm3 = vweird.f32 %v174_v30 }
  0x30   :  { %vm62_vm4 = vmor %vm60_vm2, %vm61_vm3 }
  0x31   :  { %v56_v32 = vmul.f32 %v174_v30, %v55_v31 }
  0x33   :  { %v57_v33 = vmul.f32 0.5, %v56_v32 }
  0x35   :  { %v58_v34 = vsub.f32 1.5, %v57_v33 }
  0x37   :  { %v59_v36 = vmul.f32 %v174_v30, %v58_v34 }
  0x39   :  { %v63_v37 = vsel %vm62_vm4, %v174_v30, %v59_v36 }
  0x3a   :  { %v64_v38 = vmul.f32 %v63_v37, %v52_v35 }
  0x3c   :  { %v66_v40 = vperm.slane %v64_v38, 0  ;;  %v70_v41 = vmul.f32 %v64_v38, %v41_v18 }
  0x3e   :  { %v68_v42 = vmul.f32 %v66_v40, %v25_v3  ;;  %v71_v43 = vsub.f32 %v69_v39, %v70_v41 }
  0x40   :  { %v73_v44 = vperm.slane %v71_v43, 0 }
  0x42   :  { %v75_v45 = vadd.f32 %v73_v44, %v68_v42 }
  0x44   :  { %v76_v46 = vmax.f32 %v75_v45, 0.0 }
  0x46   :  { %v77_v47 = vpack.c.bf16 %v76_v46, %v76_v46 }
  0x48   :  { %167 = vmatmul.msk.bf16.vlgmr.msra.gmra.mxu0 %vm26_vm0, %v77_v47 }
  0xc5   :  { %v106_v48 = vpop.f32.mrf.mxu0 }
  0xc6   :  { %v111_v49 = vsel %vm110_vm5, %v106_v48, 0.0 }
  0xc7   :  { %v112_v50 = vrot.slane %v111_v49, 4 }
  0xc9   :  { %v113_v51 = vadd.f32 %v112_v50, %v111_v49 }
  0xcb   :  { %v114_v52 = vrot.slane %v113_v51, 2 }
  0xcd   :  { %v115_v53 = vadd.f32 %v114_v52, %v113_v51  ;;  %v108_v54 = vpop.f32.mrf.mxu0 }
  0xcf   :  { %v116_v55 = vrot.slane %v115_v53, 1 }
  0xd1   :  { %v117_v56 = vadd.f32 %v116_v55, %v115_v53 }
  0xd3   :  { %v118_v57 = vmul.f32 %v117_v56, %v40_v17 }
  0xd5   :  { %v119_v58 = vsub.f32 %v106_v48, %v118_v57 }
  0xd7   :  { %v120_v59 = vmul.f32 %v119_v58, %v119_v58 }
  0xd9   :  { %v121_v60 = vsel %vm110_vm5, %v120_v59, 0.0 }
  0xda   :  { %v122_v61 = vrot.slane %v121_v60, 4 }
  0xdc   :  { %v123_v62 = vadd.f32 %v122_v61, %v121_v60 }
  0xde   :  { %v124_v63 = vrot.slane %v123_v62, 2 }
  0xe0   :  { %v125_v0 = vadd.f32 %v124_v63, %v123_v62 }
  0xe2   :  { %v126_v1 = vrot.slane %v125_v0, 1 }
  0xe4   :  { %v127_v2 = vadd.f32 %v126_v1, %v125_v0 }
  0xe6   :  { %v128_v3 = vmul.f32 %v127_v2, %v40_v17 }
  0xe8   :  { %v130_v4 = vadd.f32 1e-05, %v128_v3 }
  0xea   :  { %175 = vrsqrt.f32 %v130_v4  ;;  %vm137_vm7 = vweird.f32 %v130_v4 }
  0xf0   :  { %v176_v5 = vpop.eup %175 }
  0xf1   :  { %v132_v6 = vmul.f32 %v176_v5, %v130_v4  ;;  %vm138_vm6 = vweird.f32 %v176_v5 }
  0xf2   :  { %vm139_vm8 = vmor %vm137_vm7, %vm138_vm6 }
  0xf3   :  { %v133_v7 = vmul.f32 %v176_v5, %v132_v6 }
  0xf5   :  { %v134_v8 = vmul.f32 0.5, %v133_v7 }
  0xf7   :  { %v135_v9 = vsub.f32 1.5, %v134_v8 }
  0xf9   :  { %v136_v11 = vmul.f32 %v176_v5, %v135_v9 }
  0xfb   :  { %v140_v12 = vsel %vm139_vm8, %v176_v5, %v136_v11 }
  0xfc   :  { %v141_v13 = vmul.f32 %v140_v12, %v129_v10 }
  0xfe   :  { %v143_v15 = vperm.slane %v141_v13, 0  ;;  %v147_v16 = vmul.f32 %v141_v13, %v118_v57 }
 0x100   :  { %v148_v17 = vsub.f32 %v146_v14, %v147_v16  ;;  %v145_v18 = vmul.f32 %v143_v15, %v106_v48 }
 0x102   :  { %v150_v19 = vperm.slane %v148_v17, 0 }
 0x104   :  { %v152_v20 = vadd.f32 %v150_v19, %v145_v18 }
 0x106   :  { %v153_v21 = vmax.f32 %v152_v20, 0.0 }
 0x108   :  { %154 = vst.msk [vmem:[%s249_s6] sm:$0xff] %vm110_vm5, %v153_v21 }

// kernel: densenet_forward.33
= control target key start
LH: loop header
LB: loop body
LE: loop exit
PB: predicated region body
PF: predicated region fallthrough
CT: control target
= control target key end

     0   :  { %vm65_vm0 = vcmask 523264   ;;  %vm620_vm1 = vcmask 125952   ;;  %s1149_s1 = inlined_call_operand.vmem [shape: bf16[9,64,16], index: 1, kind: input, shape index: {}]   ;;  %s1150_s0 = inlined_call_operand.vmem [shape: f32[42,64], index: 0, kind: input, shape index: {}]   ;;  %s1151_s2 = inlined_call_operand.vmem [shape: bf16[32,16], index: 2, kind: output, shape index: {}]  }
   0x1   :  { %v862_v0 = vld [vmem:[%s1149_s1 + $0x38] sm:$0xff]  ;;  %v861_v3 = vld [vmem:[%s1149_s1 + $0x30] sm:$0xff]  ;;  %v860_v6 = vld [vmem:[%s1149_s1 + $0x28] sm:$0xff] }
   0x2   :  { %v866_v1 = vld [vmem:[%s1149_s1 + $0x58] sm:$0xff]  ;;  %76 = vmatpush.bf16.msra.mxu0 %v862_v0  ;;  %891 = vmatpush.bf16.msra.mxu1 %v862_v0  ;;  %v865_v4 = vld [vmem:[%s1149_s1 + $0x50] sm:$0xff]  ;;  %v864_v7 = vld [vmem:[%s1149_s1 + $0x48] sm:$0xff] }
   0x3   :  { %v870_v2 = vld [vmem:[%s1149_s1 + $0x78] sm:$0xff]  ;;  %189 = vmatpush.bf16.msra.mxu2 %v866_v1  ;;  %v869_v5 = vld [vmem:[%s1149_s1 + $0x70] sm:$0xff]  ;;  %v868_v8 = vld [vmem:[%s1149_s1 + $0x68] sm:$0xff] }
   0x4   :  { %257 = vmatpush.bf16.msra.mxu3 %v870_v2  ;;  %v859_v9 = vld [vmem:[%s1149_s1 + $0x20] sm:$0xff]  ;;  %v946_v11 = vld [vmem:[%s1150_s0 + $0x9] sm:$0xff]  ;;  %v951_v12 = vld [vmem:[%s1150_s0 + $0x11] sm:$0xff] }
   0x5   :  { %v26_v10 = vld [vmem:[%s1150_s0 + $0x1] sm:$0xff]  ;;  %v956_v13 = vld [vmem:[%s1150_s0 + $0x19] sm:$0xff]  ;;  %v973_v18 = vld [vmem:[%s1150_s0 + $0xa] sm:$0xff] }
   0x6   :  { %77 = vmatpush.bf16.msra.mxu0 %v861_v3  ;;  %892 = vmatpush.bf16.msra.mxu1 %v861_v3  ;;  %v858_v14 = vld [vmem:[%s1149_s1 + $0x18] sm:$0xff]  ;;  %v863_v15 = vld [vmem:[%s1149_s1 + $0x40] sm:$0xff]  ;;  %v209_v21 = vld [vmem:[%s1150_s0 + $0xc] sm:$0xff]  ;;  %v30_v22 = vpack.c.bf16 %v946_v11, %v26_v10  ;;  %v31_v23 = vpack.c.bf16 %v956_v13, %v951_v12  ;;  %v484_v3 = vpack.c.bf16 %v951_v12, %v946_v11 }
   0x7   :  { %190 = vmatpush.bf16.msra.mxu2 %v865_v4  ;;  %v874_v16 = vld [vmem:[%s1149_s1 + $0x98] sm:$0xff]  ;;  %v140_v17 = vld [vmem:[%s1150_s0 + $0x2] sm:$0xff]  ;;  %v857_v26 = vld [vmem:[%s1149_s1 + $0x10] sm:$0xff] }
   0x8   :  { %258 = vmatpush.bf16.msra.mxu3 %v869_v5  ;;  %v867_v19 = vld [vmem:[%s1149_s1 + $0x60] sm:$0xff]  ;;  %v144_v24 = vpack.c.bf16 %v973_v18, %v140_v17  ;;  %v886_v25 = vld [vmem:[%s1149_s1 + $0xf8] sm:$0xff]  ;;  %v873_v28 = vld [vmem:[%s1149_s1 + $0x90] sm:$0xff] }
   0x9   :  { %v208_v20 = vld [vmem:[%s1150_s0 + $0x4] sm:$0xff]  ;;  %v882_v29 = vld [vmem:[%s1149_s1 + $0xd8] sm:$0xff]  ;;  %v885_v30 = vld [vmem:[%s1149_s1 + $0xf0] sm:$0xff] }
   0xa   :  { %78 = vmatpush.bf16.msra.mxu0 %v860_v6  ;;  %893 = vmatpush.bf16.msra.mxu1 %v860_v6  ;;  %v212_v27 = vpack.c.bf16 %v209_v21, %v208_v20  ;;  %v856_v31 = vld [vmem:[%s1149_s1 + $0x8] sm:$0xff]  ;;  %v881_v33 = vld [vmem:[%s1149_s1 + $0xd0] sm:$0xff]  ;;  %v855_v35 = vld [vmem:[%s1149_s1] sm:$0xff] }
   0xb   :  { %191 = vmatpush.bf16.msra.mxu2 %v864_v7  ;;  %v872_v32 = vld [vmem:[%s1149_s1 + $0x88] sm:$0xff]  ;;  %v871_v36 = vld [vmem:[%s1149_s1 + $0x80] sm:$0xff]  ;;  %v878_v38 = vld [vmem:[%s1149_s1 + $0xb8] sm:$0xff] }
   0xc   :  { %259 = vmatpush.bf16.msra.mxu3 %v868_v8  ;;  %v884_v34 = vld [vmem:[%s1149_s1 + $0xe8] sm:$0xff]  ;;  %v12_v37 = vld [vmem:[%s1150_s0] sm:$0xff]  ;;  %v890_v40 = vld [vmem:[%s1149_s1 + $0x118] sm:$0xff] }
   0xd   :  { %v13_v39 = vld [vmem:[%s1150_s0 + $0x8] sm:$0xff]  ;;  %v883_v44 = vld [vmem:[%s1149_s1 + $0xe0] sm:$0xff]  ;;  %v142_v45 = vld [vmem:[%s1150_s0 + $0x12] sm:$0xff] }
   0xe   :  { %79 = vmatpush.bf16.msra.mxu0 %v859_v9  ;;  %894 = vmatpush.bf16.msra.mxu1 %v859_v9  ;;  %v880_v41 = vld [vmem:[%s1149_s1 + $0xc8] sm:$0xff]  ;;  %v143_v46 = vld [vmem:[%s1150_s0 + $0x1a] sm:$0xff]  ;;  %v877_v49 = vld [vmem:[%s1149_s1 + $0xb0] sm:$0xff]  ;;  %v16_v50 = vpack.c.bf16 %v13_v39, %v12_v37  ;;  %v552_v9 = vpack.c.bf16 %v142_v45, %v973_v18 }
   0xf   :  { %192 = vmatpush.bf16.msra.mxu2 %v863_v15  ;;  %v276_v42 = vld [vmem:[%s1150_s0 + $0x5] sm:$0xff]  ;;  %v277_v43 = vld [vmem:[%s1150_s0 + $0xd] sm:$0xff]  ;;  %v211_v48 = vld [vmem:[%s1150_s0 + $0x1c] sm:$0xff]  ;;  %v145_v52 = vpack.c.bf16 %v143_v46, %v142_v45 }
  0x10   :  { %260 = vmatpush.bf16.msra.mxu3 %v867_v19  ;;  %v210_v47 = vld [vmem:[%s1150_s0 + $0x14] sm:$0xff]  ;;  %v280_v51 = vpack.c.bf16 %v277_v43, %v276_v42  ;;  %v879_v55 = vld [vmem:[%s1149_s1 + $0xc0] sm:$0xff]  ;;  %v876_v56 = vld [vmem:[%s1149_s1 + $0xa8] sm:$0xff] }
  0x11   :  { %653 = vmatmul.msk.bf16.vlgmr.msra.gmra.mxu0 %vm65_vm0, %v30_v22  ;;  %654 = vmatmul.msk.bf16.vlgmr.msra.gmra.mxu1 %vm65_vm0, %v31_v23  ;;  %v889_v53 = vld [vmem:[%s1149_s1 + $0x110] sm:$0xff]  ;;  %v213_v54 = vpack.c.bf16 %v211_v48, %v210_v47  ;;  %v888_v57 = vld [vmem:[%s1149_s1 + $0x108] sm:$0xff]  ;;  %v875_v58 = vld [vmem:[%s1149_s1 + $0xa0] sm:$0xff] }
  0x12   :  { %125 = vmatpush.bf16.msrb.mxu1 %v858_v14  ;;  %325 = vmatpush.bf16.msrb.mxu0 %v874_v16  ;;  %v887_v59 = vld [vmem:[%s1149_s1 + $0x100] sm:$0xff]  ;;  %v14_v60 = vld [vmem:[%s1150_s0 + $0x10] sm:$0xff]  ;;  %v15_v61 = vld [vmem:[%s1150_s0 + $0x18] sm:$0xff] }
  0x13   :  { %697 = vmatmul.msk.bf16.vlgmr.msra.gmra.mxu2 %vm65_vm0, %v144_v24  ;;  %723 = vmatmul.msk.bf16.vlgmr.msra.gmra.mxu3 %vm65_vm0, %v212_v27  ;;  %v278_v62 = vld [vmem:[%s1150_s0 + $0x15] sm:$0xff]  ;;  %v279_v63 = vld [vmem:[%s1150_s0 + $0x1d] sm:$0xff]  ;;  %v17_v0 = vpack.c.bf16 %v15_v61, %v14_v60  ;;  %v416_v2 = vpack.c.bf16 %v14_v60, %v13_v39  ;;  %v344_v4 = vld [vmem:[%s1150_s0 + $0x6] sm:$0xff] }
  0x14   :  { %529 = vmatpush.bf16.msrb.mxu3 %v886_v25  ;;  %461 = vmatpush.bf16.msrb.mxu2 %v882_v29  ;;  %v281_v1 = vpack.c.bf16 %v279_v63, %v278_v62  ;;  %v345_v5 = vld [vmem:[%s1150_s0 + $0xe] sm:$0xff]  ;;  %v415_v6 = vld [vmem:[%s1150_s0 + $0x20] sm:$0xff]  ;;  %v346_v12 = vld [vmem:[%s1150_s0 + $0x16] sm:$0xff] }
  0x15   :  { %v483_v7 = vld [vmem:[%s1150_s0 + $0x21] sm:$0xff]  ;;  %v348_v8 = vpack.c.bf16 %v345_v5, %v344_v4  ;;  %v417_v10 = vpack.c.bf16 %v415_v6, %v15_v61 }
  0x16   :  { %126 = vmatpush.bf16.msrb.mxu1 %v857_v26  ;;  %326 = vmatpush.bf16.msrb.mxu0 %v873_v28  ;;  %v485_v11 = vpack.c.bf16 %v483_v7, %v956_v13  ;;  %v347_v14 = vld [vmem:[%s1150_s0 + $0x1e] sm:$0xff] }
  0x17   :  { %v551_v13 = vld [vmem:[%s1150_s0 + $0x22] sm:$0xff]  ;;  %v349_v15 = vpack.c.bf16 %v347_v14, %v346_v12 }
  0x18   :  { %530 = vmatpush.bf16.msrb.mxu3 %v885_v30  ;;  %462 = vmatpush.bf16.msrb.mxu2 %v881_v33  ;;  %v553_v16 = vpack.c.bf16 %v551_v13, %v143_v46 }
  0x1a   :  { %127 = vmatpush.bf16.msrb.mxu1 %v856_v31  ;;  %327 = vmatpush.bf16.msrb.mxu0 %v872_v32 }
  0x1c   :  { %531 = vmatpush.bf16.msrb.mxu3 %v884_v34  ;;  %463 = vmatpush.bf16.msrb.mxu2 %v880_v41 }
  0x1e   :  { %128 = vmatpush.bf16.msrb.mxu1 %v855_v35  ;;  %328 = vmatpush.bf16.msrb.mxu0 %v871_v36 }
  0x20   :  { %532 = vmatpush.bf16.msrb.mxu3 %v883_v44  ;;  %464 = vmatpush.bf16.msrb.mxu2 %v879_v55 }
  0x21   :  { %671 = vmatmul.msk.bf16.vlgmr.msrb.gmra.mxu1 %vm65_vm0, %v16_v50  ;;  %749 = vmatmul.msk.bf16.vlgmr.msrb.gmra.mxu0 %vm65_vm0, %v280_v51 }
  0x22   :  { %393 = vmatpush.bf16.msra.mxu1 %v878_v38  ;;  %597 = vmatpush.bf16.msra.mxu0 %v890_v40 }
  0x23   :  { %698 = vmatmul.msk.bf16.gmra.mxu2 %vm65_vm0, %v145_v52  ;;  %724 = vmatmul.msk.bf16.gmra.mxu3 %vm65_vm0, %v213_v54 }
  0x26   :  { %394 = vmatpush.bf16.msra.mxu1 %v877_v49  ;;  %598 = vmatpush.bf16.msra.mxu0 %v889_v53 }
  0x2a   :  { %395 = vmatpush.bf16.msra.mxu1 %v876_v56  ;;  %599 = vmatpush.bf16.msra.mxu0 %v888_v57 }
  0x2e   :  { %396 = vmatpush.bf16.msra.mxu1 %v875_v58  ;;  %600 = vmatpush.bf16.msra.mxu0 %v887_v59 }
  0x31   :  { %672 = vmatmul.msk.bf16.gmra.mxu1 %vm65_vm0, %v17_v0  ;;  %750 = vmatmul.msk.bf16.gmra.mxu0 %vm65_vm0, %v281_v1 }
  0x33   :  { %801 = vmatmul.msk.bf16.vlgmr.msrb.gmra.mxu2 %vm65_vm0, %v416_v2  ;;  %827 = vmatmul.msk.bf16.vlgmr.msrb.gmra.mxu3 %vm65_vm0, %v484_v3 }
  0x41   :  { %775 = vmatmul.msk.bf16.vlgmr.msra.gmra.mxu1 %vm65_vm0, %v348_v8  ;;  %853 = vmatmul.msk.bf16.vlgmr.msra.gmra.mxu0 %vm65_vm0, %v552_v9 }
  0x43   :  { %802 = vmatmul.msk.bf16.gmra.mxu2 %vm65_vm0, %v417_v10  ;;  %828 = vmatmul.msk.bf16.gmra.mxu3 %vm65_vm0, %v485_v11 }
  0x51   :  { %776 = vmatmul.msk.bf16.gmra.mxu1 %vm65_vm0, %v349_v15  ;;  %854 = vmatmul.msk.bf16.gmra.mxu0 %vm65_vm0, %v553_v16 }
  0x8e   :  { %v81_v17 = vpop.f32.mrf.mxu0  ;;  %v86_v18 = vpop.f32.mrf.mxu1 }
  0x96   :  { %v194_v19 = vpop.f32.mrf.mxu2  ;;  %v83_v20 = vpop.f32.mrf.mxu0 }
  0x97   :  { %v88_v21 = vpop.f32.mrf.mxu1  ;;  %v262_v22 = vpop.f32.mrf.mxu3 }
  0x9e   :  { %v196_v23 = vpop.f32.mrf.mxu2  ;;  %v330_v25 = vpop.f32.mrf.mxu0 }
  0x9f   :  { %v130_v24 = vpop.f32.mrf.mxu1  ;;  %v264_v26 = vpop.f32.mrf.mxu3 }
  0xa0   :  { %v131_v34 = vadd.f32 %v130_v24, %v81_v17 }
  0xa2   :  { %v204_v36 = vadd.f32 %v194_v19, %v131_v34 }
  0xa4   :  { %v272_v39 = vadd.f32 %v262_v22, %v204_v36 }
  0xa6   :  { %v199_v27 = vpop.f32.mrf.mxu2  ;;  %v332_v29 = vpop.f32.mrf.mxu0  ;;  %v340_v43 = vadd.f32 %v330_v25, %v272_v39 }
  0xa7   :  { %v132_v28 = vpop.f32.mrf.mxu1  ;;  %v267_v30 = vpop.f32.mrf.mxu3 }
  0xa8   :  { %v133_v40 = vadd.f32 %v132_v28, %v83_v20 }
  0xaa   :  { %v205_v44 = vadd.f32 %v196_v23, %v133_v40 }
  0xac   :  { %v273_v48 = vadd.f32 %v264_v26, %v205_v44 }
  0xae   :  { %v335_v32 = vpop.f32.mrf.mxu0  ;;  %v201_v33 = vpop.f32.mrf.mxu2  ;;  %v341_v53 = vadd.f32 %v332_v29, %v273_v48 }
  0xaf   :  { %v135_v31 = vpop.f32.mrf.mxu1  ;;  %v269_v35 = vpop.f32.mrf.mxu3 }
  0xb0   :  { %v136_v49 = vadd.f32 %v135_v31, %v86_v18 }
  0xb2   :  { %v206_v54 = vadd.f32 %v199_v27, %v136_v49 }
  0xb4   :  { %v274_v61 = vadd.f32 %v267_v30, %v206_v54 }
  0xb6   :  { %v337_v38 = vpop.f32.mrf.mxu0  ;;  %v466_v41 = vpop.f32.mrf.mxu2  ;;  %v342_v1 = vadd.f32 %v335_v32, %v274_v61 }
  0xb7   :  { %v137_v37 = vpop.f32.mrf.mxu1  ;;  %v534_v42 = vpop.f32.mrf.mxu3 }
  0xb8   :  { %v138_v62 = vadd.f32 %v137_v37, %v88_v21 }
  0xba   :  { %v207_v2 = vadd.f32 %v201_v33, %v138_v62 }
  0xbc   :  { %v275_v9 = vadd.f32 %v269_v35, %v207_v2 }
  0xbe   :  { %v602_v46 = vpop.f32.mrf.mxu0  ;;  %v468_v52 = vpop.f32.mrf.mxu2  ;;  %v343_v14 = vadd.f32 %v337_v38, %v275_v9 }
  0xbf   :  { %v398_v45 = vpop.f32.mrf.mxu1  ;;  %v536_v56 = vpop.f32.mrf.mxu3 }
  0xc0   :  { %v408_v47 = vadd.f32 %v398_v45, %v340_v43 }
  0xc2   :  { %v476_v50 = vadd.f32 %v466_v41, %v408_v47 }
  0xc4   :  { %v544_v51 = vadd.f32 %v534_v42, %v476_v50 }
  0xc6   :  { %v612_v55 = vadd.f32 %v602_v46, %v544_v51  ;;  %v604_v60 = vpop.f32.mrf.mxu0  ;;  %v471_v4 = vpop.f32.mrf.mxu2 }
  0xc7   :  { %v400_v57 = vpop.f32.mrf.mxu1  ;;  %v539_v8 = vpop.f32.mrf.mxu3 }
  0xc8   :  { %v616_v58 = vpack.c.bf16 %v612_v55, %v612_v55  ;;  %v409_v59 = vadd.f32 %v400_v57, %v341_v53 }
  0xca   :  { %621 = vst.msk [vmem:[%s1151_s2] sm:$0xf] %vm620_vm1, %v616_v58  ;;  %v477_v63 = vadd.f32 %v468_v52, %v409_v59 }
  0xcc   :  { %v545_v0 = vadd.f32 %v536_v56, %v477_v63 }
  0xce   :  { %v613_v3 = vadd.f32 %v604_v60, %v545_v0  ;;  %v607_v11 = vpop.f32.mrf.mxu0  ;;  %v473_v18 = vpop.f32.mrf.mxu2 }
  0xcf   :  { %v403_v5 = vpop.f32.mrf.mxu1  ;;  %v541_v20 = vpop.f32.mrf.mxu3 }
  0xd0   :  { %v617_v6 = vpack.c.bf16 %v613_v3, %v613_v3  ;;  %v410_v7 = vadd.f32 %v403_v5, %v342_v1 }
  0xd2   :  { %622 = vst.msk [vmem:[%s1151_s2 + $0x4] sm:$0xf] %vm620_vm1, %v617_v6  ;;  %v478_v10 = vadd.f32 %v471_v4, %v410_v7 }
  0xd4   :  { %v546_v12 = vadd.f32 %v539_v8, %v478_v10 }
  0xd6   :  { %v614_v13 = vadd.f32 %v607_v11, %v546_v12  ;;  %v609_v22 = vpop.f32.mrf.mxu0 }
  0xd7   :  { %v405_v15 = vpop.f32.mrf.mxu1 }
  0xd8   :  { %v618_v16 = vpack.c.bf16 %v614_v13, %v614_v13  ;;  %v411_v17 = vadd.f32 %v405_v15, %v343_v14 }
  0xda   :  { %623 = vst.msk [vmem:[%s1151_s2 + $0x8] sm:$0xf] %vm620_vm1, %v618_v16  ;;  %v479_v19 = vadd.f32 %v473_v18, %v411_v17 }
  0xdc   :  { %v547_v21 = vadd.f32 %v541_v20, %v479_v19 }
  0xde   :  { %v615_v23 = vadd.f32 %v609_v22, %v547_v21 }
  0xe0   :  { %v619_v24 = vpack.c.bf16 %v615_v23, %v615_v23 }
  0xe2   :  { %624 = vst.msk [vmem:[%s1151_s2 + $0xc] sm:$0xf] %vm620_vm1, %v619_v24 }

// kernel: densenet_forward.34
= control target key start
LH: loop header
LB: loop body
LE: loop exit
PB: predicated region body
PF: predicated region fallthrough
CT: control target
= control target key end

     0   :  { %v190_v1 = vmov 8.0   ;;  %vm26_vm0 = vcmask 392192   ;;  %vm118_vm5 = vcmask 523264   ;;  %s259_s3 = inlined_call_operand.vmem [shape: bf16[48,64], index: 3, kind: input, shape index: {}]   ;;  %s260_s0 = inlined_call_operand.vmem [shape: bf16[8,48], index: 0, kind: input, shape index: {}]   ;;  %s261_s1 = inlined_call_operand.vmem [shape: f32[1,48], index: 1, kind: input, shape index: {}]   ;;  %s262_s2 = inlined_call_operand.vmem [shape: f32[1,48], index: 2, kind: input, shape index: {}]   ;;  %s263_s4 = inlined_call_operand.vmem [shape: f32[1,64], index: 4, kind: input, shape index: {}]   ;;  %s264_s5 = inlined_call_operand.vmem [shape: f32[1,64], index: 5, kind: input, shape index: {}]   ;;  %s265_s6 = inlined_call_operand.vmem [shape: f32[8,64], index: 6, kind: output, shape index: {}]  }
   0x1   :  { %v182_v0 = vld [vmem:[%s259_s3 + $0x10] sm:$0xff]  ;;  %184 = vrcp.f32 %v190_v1  ;;  %v24_v2 = vld [vmem:[%s260_s0] sm:$0xf]  ;;  %v181_v3 = vld [vmem:[%s259_s3 + $0x8] sm:$0xff] }
   0x2   :  { %110 = vmatpush.bf16.msra.mxu0 %v182_v0  ;;  %v25_v4 = vunpack.c.l.bf16 %v24_v2  ;;  %v180_v8 = vld [vmem:[%s259_s3] sm:$0xff] }
   0x3   :  { %v52_v36 = vld [vmem:[%s261_s1] sm:$0x1] }
   0x4   :  { %v27_v5 = vsel %vm26_vm0, %v25_v4, 0.0  ;;  %v69_v40 = vld [vmem:[%s262_s2] sm:$0x1] }
   0x5   :  { %v28_v6 = vrot.slane %v27_v5, 4 }
   0x6   :  { %111 = vmatpush.bf16.msra.mxu0 %v181_v3 }
   0x7   :  { %v185_v7 = vpop.eup %184  ;;  %v29_v9 = vadd.f32 %v28_v6, %v27_v5 }
   0x8   :  { %v35_v10 = vmul.f32 8.0, %v185_v7  ;;  %vm39_vm1 = vweird.f32 %v185_v7 }
   0x9   :  { %v30_v11 = vrot.slane %v29_v9, 2 }
   0xa   :  { %v36_v12 = vsub.f32 1.0, %v35_v10  ;;  %112 = vmatpush.bf16.msra.mxu0 %v180_v8 }
   0xb   :  { %v31_v13 = vadd.f32 %v30_v11, %v29_v9  ;;  %v137_v11 = vld [vmem:[%s263_s4] sm:$0x1] }
   0xc   :  { %v37_v14 = vmul.f32 %v185_v7, %v36_v12 }
   0xd   :  { %v32_v15 = vrot.slane %v31_v13, 1 }
   0xe   :  { %v38_v16 = vadd.f32 %v185_v7, %v37_v14 }
   0xf   :  { %v33_v17 = vadd.f32 %v32_v15, %v31_v13  ;;  %v154_v15 = vld [vmem:[%s264_s5] sm:$0x1] }
  0x10   :  { %v40_v18 = vsel %vm39_vm1, %v185_v7, %v38_v16 }
  0x11   :  { %v41_v19 = vmul.f32 %v40_v18, %v33_v17 }
  0x13   :  { %v42_v20 = vsub.f32 %v25_v4, %v41_v19 }
  0x15   :  { %v43_v21 = vmul.f32 %v42_v20, %v42_v20 }
  0x17   :  { %v44_v22 = vsel %vm26_vm0, %v43_v21, 0.0 }
  0x18   :  { %v45_v23 = vrot.slane %v44_v22, 4 }
  0x1a   :  { %v46_v24 = vadd.f32 %v45_v23, %v44_v22 }
  0x1c   :  { %v47_v25 = vrot.slane %v46_v24, 2 }
  0x1e   :  { %v48_v26 = vadd.f32 %v47_v25, %v46_v24 }
  0x20   :  { %v49_v27 = vrot.slane %v48_v26, 1 }
  0x22   :  { %v50_v28 = vadd.f32 %v49_v27, %v48_v26 }
  0x24   :  { %v51_v29 = vmul.f32 %v50_v28, %v40_v18 }
  0x26   :  { %v53_v30 = vadd.f32 1e-05, %v51_v29 }
  0x28   :  { %186 = vrsqrt.f32 %v53_v30  ;;  %vm60_vm2 = vweird.f32 %v53_v30 }
  0x2e   :  { %v187_v31 = vpop.eup %186 }
  0x2f   :  { %v55_v32 = vmul.f32 %v187_v31, %v53_v30  ;;  %vm61_vm3 = vweird.f32 %v187_v31 }
  0x30   :  { %vm62_vm4 = vmor %vm60_vm2, %vm61_vm3 }
  0x31   :  { %v56_v33 = vmul.f32 %v187_v31, %v55_v32 }
  0x33   :  { %v57_v34 = vmul.f32 0.5, %v56_v33 }
  0x35   :  { %v58_v35 = vsub.f32 1.5, %v57_v34 }
  0x37   :  { %v59_v37 = vmul.f32 %v187_v31, %v58_v35 }
  0x39   :  { %v63_v38 = vsel %vm62_vm4, %v187_v31, %v59_v37 }
  0x3a   :  { %v64_v39 = vmul.f32 %v63_v38, %v52_v36 }
  0x3c   :  { %v66_v41 = vperm.slane %v64_v39, 0  ;;  %v70_v42 = vmul.f32 %v64_v39, %v41_v19 }
  0x3e   :  { %v68_v43 = vmul.f32 %v66_v41, %v25_v4  ;;  %v71_v44 = vsub.f32 %v69_v40, %v70_v42 }
  0x40   :  { %v73_v45 = vperm.slane %v71_v44, 0 }
  0x42   :  { %v75_v46 = vadd.f32 %v73_v45, %v68_v43 }
  0x44   :  { %v76_v47 = vmax.f32 %v75_v46, 0.0 }
  0x46   :  { %v77_v48 = vpack.c.bf16 %v76_v47, %v76_v47 }
  0x48   :  { %179 = vmatmul.msk.bf16.vlgmr.msra.gmra.mxu0 %vm26_vm0, %v77_v48 }
  0xc5   :  { %v114_v49 = vpop.f32.mrf.mxu0 }
  0xc6   :  { %v119_v50 = vsel %vm118_vm5, %v114_v49, 0.0 }
  0xc7   :  { %v120_v51 = vrot.slane %v119_v50, 4 }
  0xc9   :  { %v121_v52 = vadd.f32 %v120_v51, %v119_v50 }
  0xcb   :  { %v122_v53 = vrot.slane %v121_v52, 2 }
  0xcd   :  { %v123_v54 = vadd.f32 %v122_v53, %v121_v52  ;;  %v116_v55 = vpop.f32.mrf.mxu0 }
  0xcf   :  { %v124_v56 = vrot.slane %v123_v54, 1 }
  0xd1   :  { %v125_v57 = vadd.f32 %v124_v56, %v123_v54 }
  0xd3   :  { %v126_v58 = vmul.f32 %v125_v57, %v40_v18 }
  0xd5   :  { %v127_v59 = vsub.f32 %v114_v49, %v126_v58 }
  0xd7   :  { %v128_v60 = vmul.f32 %v127_v59, %v127_v59 }
  0xd9   :  { %v129_v61 = vsel %vm118_vm5, %v128_v60, 0.0 }
  0xda   :  { %v130_v62 = vrot.slane %v129_v61, 4 }
  0xdc   :  { %v131_v63 = vadd.f32 %v130_v62, %v129_v61 }
  0xde   :  { %v132_v0 = vrot.slane %v131_v63, 2 }
  0xe0   :  { %v133_v1 = vadd.f32 %v132_v0, %v131_v63 }
  0xe2   :  { %v134_v2 = vrot.slane %v133_v1, 1 }
  0xe4   :  { %v135_v3 = vadd.f32 %v134_v2, %v133_v1 }
  0xe6   :  { %v136_v4 = vmul.f32 %v135_v3, %v40_v18 }
  0xe8   :  { %v138_v5 = vadd.f32 1e-05, %v136_v4 }
  0xea   :  { %188 = vrsqrt.f32 %v138_v5  ;;  %vm145_vm7 = vweird.f32 %v138_v5 }
  0xf0   :  { %v189_v6 = vpop.eup %188 }
  0xf1   :  { %v140_v7 = vmul.f32 %v189_v6, %v138_v5  ;;  %vm146_vm6 = vweird.f32 %v189_v6 }
  0xf2   :  { %vm147_vm8 = vmor %vm145_vm7, %vm146_vm6 }
  0xf3   :  { %v141_v8 = vmul.f32 %v189_v6, %v140_v7 }
  0xf5   :  { %v142_v9 = vmul.f32 0.5, %v141_v8 }
  0xf7   :  { %v143_v10 = vsub.f32 1.5, %v142_v9 }
  0xf9   :  { %v144_v12 = vmul.f32 %v189_v6, %v143_v10 }
  0xfb   :  { %v148_v13 = vsel %vm147_vm8, %v189_v6, %v144_v12 }
  0xfc   :  { %v149_v14 = vmul.f32 %v148_v13, %v137_v11 }
  0xfe   :  { %v151_v16 = vperm.slane %v149_v14, 0  ;;  %v155_v17 = vmul.f32 %v149_v14, %v126_v58 }
 0x100   :  { %v156_v18 = vsub.f32 %v154_v15, %v155_v17  ;;  %v153_v19 = vmul.f32 %v151_v16, %v114_v49 }
 0x102   :  { %v158_v20 = vperm.slane %v156_v18, 0 }
 0x104   :  { %v160_v21 = vadd.f32 %v158_v20, %v153_v19 }
 0x106   :  { %v161_v22 = vmax.f32 %v160_v21, 0.0 }
 0x108   :  { %162 = vst.msk [vmem:[%s265_s6] sm:$0xff] %vm118_vm5, %v161_v22 }

// kernel: densenet_forward.36
= control target key start
LH: loop header
LB: loop body
LE: loop exit
PB: predicated region body
PF: predicated region fallthrough
CT: control target
= control target key end

     0   :  { %v153_v1 = vmov 8.0   ;;  %vm20_vm0 = vcmask 523264   ;;  %vm121_vm5 = vcmask 257024   ;;  %s206_s3 = inlined_call_operand.vmem [shape: bf16[64,32], index: 3, kind: input, shape index: {}]   ;;  %s207_s0 = inlined_call_operand.vmem [shape: bf16[8,64], index: 0, kind: input, shape index: {}]   ;;  %s208_s1 = inlined_call_operand.vmem [shape: f32[1,64], index: 1, kind: input, shape index: {}]   ;;  %s209_s2 = inlined_call_operand.vmem [shape: f32[1,64], index: 2, kind: input, shape index: {}]   ;;  %s210_s4 = inlined_call_operand.vmem [shape: bf16[8,32], index: 4, kind: output, shape index: {}]  }
   0x1   :  { %v147_v0 = vld [vmem:[%s206_s3 + $0x18] sm:$0xff]  ;;  %149 = vrcp.f32 %v153_v1  ;;  %v18_v2 = vld [vmem:[%s207_s0] sm:$0xf]  ;;  %v146_v3 = vld [vmem:[%s206_s3 + $0x10] sm:$0xff] }
   0x2   :  { %111 = vmatpush.bf16.msra.mxu0 %v147_v0  ;;  %v19_v4 = vunpack.c.l.bf16 %v18_v2  ;;  %v145_v8 = vld [vmem:[%s206_s3 + $0x8] sm:$0xff]  ;;  %v144_v13 = vld [vmem:[%s206_s3] sm:$0xff] }
   0x3   :  { %v46_v37 = vld [vmem:[%s208_s1] sm:$0x1] }
   0x4   :  { %v21_v5 = vsel %vm20_vm0, %v19_v4, 0.0  ;;  %v63_v41 = vld [vmem:[%s209_s2] sm:$0x1] }
   0x5   :  { %v22_v6 = vrot.slane %v21_v5, 4 }
   0x6   :  { %112 = vmatpush.bf16.msra.mxu0 %v146_v3 }
   0x7   :  { %v150_v7 = vpop.eup %149  ;;  %v23_v9 = vadd.f32 %v22_v6, %v21_v5 }
   0x8   :  { %v29_v10 = vmul.f32 8.0, %v150_v7  ;;  %vm33_vm1 = vweird.f32 %v150_v7 }
   0x9   :  { %v24_v11 = vrot.slane %v23_v9, 2 }
   0xa   :  { %v30_v12 = vsub.f32 1.0, %v29_v10  ;;  %113 = vmatpush.bf16.msra.mxu0 %v145_v8 }
   0xb   :  { %v25_v14 = vadd.f32 %v24_v11, %v23_v9 }
   0xc   :  { %v31_v15 = vmul.f32 %v150_v7, %v30_v12 }
   0xd   :  { %v26_v16 = vrot.slane %v25_v14, 1 }
   0xe   :  { %v32_v17 = vadd.f32 %v150_v7, %v31_v15  ;;  %114 = vmatpush.bf16.msra.mxu0 %v144_v13 }
   0xf   :  { %v27_v18 = vadd.f32 %v26_v16, %v25_v14 }
  0x10   :  { %v34_v19 = vsel %vm33_vm1, %v150_v7, %v32_v17 }
  0x11   :  { %v35_v20 = vmul.f32 %v34_v19, %v27_v18 }
  0x13   :  { %v36_v21 = vsub.f32 %v19_v4, %v35_v20 }
  0x15   :  { %v37_v22 = vmul.f32 %v36_v21, %v36_v21 }
  0x17   :  { %v38_v23 = vsel %vm20_vm0, %v37_v22, 0.0 }
  0x18   :  { %v39_v24 = vrot.slane %v38_v23, 4 }
  0x1a   :  { %v40_v25 = vadd.f32 %v39_v24, %v38_v23 }
  0x1c   :  { %v41_v26 = vrot.slane %v40_v25, 2 }
  0x1e   :  { %v42_v27 = vadd.f32 %v41_v26, %v40_v25 }
  0x20   :  { %v43_v28 = vrot.slane %v42_v27, 1 }
  0x22   :  { %v44_v29 = vadd.f32 %v43_v28, %v42_v27 }
  0x24   :  { %v45_v30 = vmul.f32 %v44_v29, %v34_v19 }
  0x26   :  { %v47_v31 = vadd.f32 1e-05, %v45_v30 }
  0x28   :  { %151 = vrsqrt.f32 %v47_v31  ;;  %vm54_vm2 = vweird.f32 %v47_v31 }
  0x2e   :  { %v152_v32 = vpop.eup %151 }
  0x2f   :  { %v49_v33 = vmul.f32 %v152_v32, %v47_v31  ;;  %vm55_vm3 = vweird.f32 %v152_v32 }
  0x30   :  { %vm56_vm4 = vmor %vm54_vm2, %vm55_vm3 }
  0x31   :  { %v50_v34 = vmul.f32 %v152_v32, %v49_v33 }
  0x33   :  { %v51_v35 = vmul.f32 0.5, %v50_v34 }
  0x35   :  { %v52_v36 = vsub.f32 1.5, %v51_v35 }
  0x37   :  { %v53_v38 = vmul.f32 %v152_v32, %v52_v36 }
  0x39   :  { %v57_v39 = vsel %vm56_vm4, %v152_v32, %v53_v38 }
  0x3a   :  { %v58_v40 = vmul.f32 %v57_v39, %v46_v37 }
  0x3c   :  { %v60_v42 = vperm.slane %v58_v40, 0  ;;  %v64_v43 = vmul.f32 %v58_v40, %v35_v20 }
  0x3e   :  { %v62_v44 = vmul.f32 %v60_v42, %v19_v4  ;;  %v65_v45 = vsub.f32 %v63_v41, %v64_v43 }
  0x40   :  { %v67_v46 = vperm.slane %v65_v45, 0 }
  0x42   :  { %v69_v47 = vadd.f32 %v67_v46, %v62_v44 }
  0x44   :  { %v70_v48 = vmax.f32 %v69_v47, 0.0 }
  0x46   :  { %v71_v49 = vpack.c.bf16 %v70_v48, %v70_v48 }
  0x48   :  { %143 = vmatmul.msk.bf16.vlgmr.msra.gmra.mxu0 %vm20_vm0, %v71_v49 }
  0xc5   :  { %v116_v50 = vpop.f32.mrf.mxu0 }
  0xc6   :  { %v120_v51 = vpack.c.bf16 %v116_v50, %v116_v50 }
  0xc8   :  { %122 = vst.msk [vmem:[%s210_s4] sm:$0xf] %vm121_vm5, %v120_v51 }
  0xcd   :  { %v118_v52 = vpop.f32.mrf.mxu0 }

// kernel: densenet_forward.37
= control target key start
LH: loop header
LB: loop body
LE: loop exit
PB: predicated region body
PF: predicated region fallthrough
CT: control target
= control target key end

     0   :  { %vm26_vm0 = vcmask 254976   ;;  %v178_v2 = vmov 2.0   ;;  %vm94_vm5 = vcmask 261120   ;;  %vm111_vm6 = vcmask 517120   ;;  %s243_s3 = inlined_call_operand.vmem [shape: bf16[32,64], index: 3, kind: input, shape index: {}]   ;;  %s244_s0 = inlined_call_operand.vmem [shape: bf16[2,32], index: 0, kind: input, shape index: {}]   ;;  %s245_s1 = inlined_call_operand.vmem [shape: f32[1,32], index: 1, kind: input, shape index: {}]   ;;  %s246_s2 = inlined_call_operand.vmem [shape: f32[1,32], index: 2, kind: input, shape index: {}]   ;;  %s247_s4 = inlined_call_operand.vmem [shape: f32[1,64], index: 4, kind: input, shape index: {}]   ;;  %s248_s5 = inlined_call_operand.vmem [shape: f32[1,64], index: 5, kind: input, shape index: {}]   ;;  %s249_s6 = inlined_call_operand.vmem [shape: f32[2,64], index: 6, kind: output, shape index: {}]  }
   0x1   :  { %v170_v0 = vld [vmem:[%s243_s3 + $0x8] sm:$0xff]  ;;  %v24_v1 = vld [vmem:[%s244_s0] sm:$0x1]  ;;  %172 = vrcp.f32 %v178_v2 }
   0x2   :  { %v25_v3 = vunpack.c.l.bf16 %v24_v1  ;;  %104 = vmatpush.bf16.msra.mxu0 %v170_v0  ;;  %v169_v4 = vld [vmem:[%s243_s3] sm:$0xff] }
   0x3   :  { %v52_v35 = vld [vmem:[%s245_s1] sm:$0x1] }
   0x4   :  { %v27_v5 = vsel %vm26_vm0, %v25_v3, 0.0  ;;  %v69_v39 = vld [vmem:[%s246_s2] sm:$0x1] }
   0x5   :  { %v28_v6 = vrot.slane %v27_v5, 4 }
   0x6   :  { %105 = vmatpush.bf16.msra.mxu0 %v169_v4 }
   0x7   :  { %v173_v7 = vpop.eup %172  ;;  %v29_v8 = vadd.f32 %v28_v6, %v27_v5 }
   0x8   :  { %v35_v9 = vmul.f32 2.0, %v173_v7  ;;  %vm39_vm1 = vweird.f32 %v173_v7 }
   0x9   :  { %v30_v10 = vrot.slane %v29_v8, 2 }
   0xa   :  { %v36_v11 = vsub.f32 1.0, %v35_v9 }
   0xb   :  { %v31_v12 = vadd.f32 %v30_v10, %v29_v8  ;;  %v130_v10 = vld [vmem:[%s247_s4] sm:$0x1] }
   0xc   :  { %v37_v13 = vmul.f32 %v173_v7, %v36_v11 }
   0xd   :  { %v32_v14 = vrot.slane %v31_v12, 1 }
   0xe   :  { %v38_v15 = vadd.f32 %v173_v7, %v37_v13 }
   0xf   :  { %v33_v16 = vadd.f32 %v32_v14, %v31_v12  ;;  %v147_v14 = vld [vmem:[%s248_s5] sm:$0x1] }
  0x10   :  { %v40_v17 = vsel %vm39_vm1, %v173_v7, %v38_v15 }
  0x11   :  { %v41_v18 = vmul.f32 %v40_v17, %v33_v16 }
  0x13   :  { %v42_v19 = vsub.f32 %v25_v3, %v41_v18 }
  0x15   :  { %v43_v20 = vmul.f32 %v42_v19, %v42_v19 }
  0x17   :  { %v44_v21 = vsel %vm26_vm0, %v43_v20, 0.0 }
  0x18   :  { %v45_v22 = vrot.slane %v44_v21, 4 }
  0x1a   :  { %v46_v23 = vadd.f32 %v45_v22, %v44_v21 }
  0x1c   :  { %v47_v24 = vrot.slane %v46_v23, 2 }
  0x1e   :  { %v48_v25 = vadd.f32 %v47_v24, %v46_v23 }
  0x20   :  { %v49_v26 = vrot.slane %v48_v25, 1 }
  0x22   :  { %v50_v27 = vadd.f32 %v49_v26, %v48_v25 }
  0x24   :  { %v51_v28 = vmul.f32 %v50_v27, %v40_v17 }
  0x26   :  { %v53_v29 = vadd.f32 1e-05, %v51_v28 }
  0x28   :  { %174 = vrsqrt.f32 %v53_v29  ;;  %vm60_vm2 = vweird.f32 %v53_v29 }
  0x2e   :  { %v175_v30 = vpop.eup %174 }
  0x2f   :  { %v55_v31 = vmul.f32 %v175_v30, %v53_v29  ;;  %vm61_vm3 = vweird.f32 %v175_v30 }
  0x30   :  { %vm62_vm4 = vmor %vm60_vm2, %vm61_vm3 }
  0x31   :  { %v56_v32 = vmul.f32 %v175_v30, %v55_v31 }
  0x33   :  { %v57_v33 = vmul.f32 0.5, %v56_v32 }
  0x35   :  { %v58_v34 = vsub.f32 1.5, %v57_v33 }
  0x37   :  { %v59_v36 = vmul.f32 %v175_v30, %v58_v34 }
  0x39   :  { %v63_v37 = vsel %vm62_vm4, %v175_v30, %v59_v36 }
  0x3a   :  { %v64_v38 = vmul.f32 %v63_v37, %v52_v35 }
  0x3c   :  { %v66_v40 = vperm.slane %v64_v38, 0  ;;  %v70_v41 = vmul.f32 %v64_v38, %v41_v18 }
  0x3e   :  { %v68_v42 = vmul.f32 %v66_v40, %v25_v3  ;;  %v71_v43 = vsub.f32 %v69_v39, %v70_v41 }
  0x40   :  { %v73_v44 = vperm.slane %v71_v43, 0 }
  0x42   :  { %v75_v45 = vadd.f32 %v73_v44, %v68_v42 }
  0x44   :  { %v76_v46 = vmax.f32 %v75_v45, 0.0 }
  0x46   :  { %v77_v47 = vpack.c.bf16 %v76_v46, %v76_v46 }
  0x48   :  { %168 = vmatmul.msk.bf16.vlgmr.msra.gmra.mxu0 %vm94_vm5, %v77_v47 }
  0xc5   :  { %v107_v48 = vpop.f32.mrf.mxu0 }
  0xc6   :  { %v112_v49 = vsel %vm111_vm6, %v107_v48, 0.0 }
  0xc7   :  { %v113_v50 = vrot.slane %v112_v49, 4 }
  0xc9   :  { %v114_v51 = vadd.f32 %v113_v50, %v112_v49 }
  0xcb   :  { %v115_v52 = vrot.slane %v114_v51, 2 }
  0xcd   :  { %v116_v53 = vadd.f32 %v115_v52, %v114_v51  ;;  %v109_v54 = vpop.f32.mrf.mxu0 }
  0xcf   :  { %v117_v55 = vrot.slane %v116_v53, 1 }
  0xd1   :  { %v118_v56 = vadd.f32 %v117_v55, %v116_v53 }
  0xd3   :  { %v119_v57 = vmul.f32 %v118_v56, %v40_v17 }
  0xd5   :  { %v120_v58 = vsub.f32 %v107_v48, %v119_v57 }
  0xd7   :  { %v121_v59 = vmul.f32 %v120_v58, %v120_v58 }
  0xd9   :  { %v122_v60 = vsel %vm111_vm6, %v121_v59, 0.0 }
  0xda   :  { %v123_v61 = vrot.slane %v122_v60, 4 }
  0xdc   :  { %v124_v62 = vadd.f32 %v123_v61, %v122_v60 }
  0xde   :  { %v125_v63 = vrot.slane %v124_v62, 2 }
  0xe0   :  { %v126_v0 = vadd.f32 %v125_v63, %v124_v62 }
  0xe2   :  { %v127_v1 = vrot.slane %v126_v0, 1 }
  0xe4   :  { %v128_v2 = vadd.f32 %v127_v1, %v126_v0 }
  0xe6   :  { %v129_v3 = vmul.f32 %v128_v2, %v40_v17 }
  0xe8   :  { %v131_v4 = vadd.f32 1e-05, %v129_v3 }
  0xea   :  { %176 = vrsqrt.f32 %v131_v4  ;;  %vm138_vm8 = vweird.f32 %v131_v4 }
  0xf0   :  { %v177_v5 = vpop.eup %176 }
  0xf1   :  { %v133_v6 = vmul.f32 %v177_v5, %v131_v4  ;;  %vm139_vm7 = vweird.f32 %v177_v5 }
  0xf2   :  { %vm140_vm9 = vmor %vm138_vm8, %vm139_vm7 }
  0xf3   :  { %v134_v7 = vmul.f32 %v177_v5, %v133_v6 }
  0xf5   :  { %v135_v8 = vmul.f32 0.5, %v134_v7 }
  0xf7   :  { %v136_v9 = vsub.f32 1.5, %v135_v8 }
  0xf9   :  { %v137_v11 = vmul.f32 %v177_v5, %v136_v9 }
  0xfb   :  { %v141_v12 = vsel %vm140_vm9, %v177_v5, %v137_v11 }
  0xfc   :  { %v142_v13 = vmul.f32 %v141_v12, %v130_v10 }
  0xfe   :  { %v144_v15 = vperm.slane %v142_v13, 0  ;;  %v148_v16 = vmul.f32 %v142_v13, %v119_v57 }
 0x100   :  { %v149_v17 = vsub.f32 %v147_v14, %v148_v16  ;;  %v146_v18 = vmul.f32 %v144_v15, %v107_v48 }
 0x102   :  { %v151_v19 = vperm.slane %v149_v17, 0 }
 0x104   :  { %v153_v20 = vadd.f32 %v151_v19, %v146_v18 }
 0x106   :  { %v154_v21 = vmax.f32 %v153_v20, 0.0 }
 0x108   :  { %155 = vst.msk [vmem:[%s249_s6] sm:$0x3] %vm111_vm6, %v154_v21 }

// kernel: densenet_forward.39
= control target key start
LH: loop header
LB: loop body
LE: loop exit
PB: predicated region body
PF: predicated region fallthrough
CT: control target
= control target key end

     0   :  { %v191_v1 = vmov 2.0   ;;  %vm26_vm0 = vcmask 386048   ;;  %vm102_vm5 = vcmask 392192   ;;  %vm119_vm6 = vcmask 517120   ;;  %s259_s3 = inlined_call_operand.vmem [shape: bf16[48,64], index: 3, kind: input, shape index: {}]   ;;  %s260_s0 = inlined_call_operand.vmem [shape: bf16[2,48], index: 0, kind: input, shape index: {}]   ;;  %s261_s1 = inlined_call_operand.vmem [shape: f32[1,48], index: 1, kind: input, shape index: {}]   ;;  %s262_s2 = inlined_call_operand.vmem [shape: f32[1,48], index: 2, kind: input, shape index: {}]   ;;  %s263_s4 = inlined_call_operand.vmem [shape: f32[1,64], index: 4, kind: input, shape index: {}]   ;;  %s264_s5 = inlined_call_operand.vmem [shape: f32[1,64], index: 5, kind: input, shape index: {}]   ;;  %s265_s6 = inlined_call_operand.vmem [shape: f32[2,64], index: 6, kind: output, shape index: {}]  }
   0x1   :  { %v183_v0 = vld [vmem:[%s259_s3 + $0x10] sm:$0xff]  ;;  %185 = vrcp.f32 %v191_v1  ;;  %v24_v2 = vld [vmem:[%s260_s0] sm:$0x1]  ;;  %v182_v3 = vld [vmem:[%s259_s3 + $0x8] sm:$0xff] }
   0x2   :  { %111 = vmatpush.bf16.msra.mxu0 %v183_v0  ;;  %v25_v4 = vunpack.c.l.bf16 %v24_v2  ;;  %v181_v8 = vld [vmem:[%s259_s3] sm:$0xff] }
   0x3   :  { %v52_v36 = vld [vmem:[%s261_s1] sm:$0x1] }
   0x4   :  { %v27_v5 = vsel %vm26_vm0, %v25_v4, 0.0  ;;  %v69_v40 = vld [vmem:[%s262_s2] sm:$0x1] }
   0x5   :  { %v28_v6 = vrot.slane %v27_v5, 4 }
   0x6   :  { %112 = vmatpush.bf16.msra.mxu0 %v182_v3 }
   0x7   :  { %v186_v7 = vpop.eup %185  ;;  %v29_v9 = vadd.f32 %v28_v6, %v27_v5 }
   0x8   :  { %v35_v10 = vmul.f32 2.0, %v186_v7  ;;  %vm39_vm1 = vweird.f32 %v186_v7 }
   0x9   :  { %v30_v11 = vrot.slane %v29_v9, 2 }
   0xa   :  { %v36_v12 = vsub.f32 1.0, %v35_v10  ;;  %113 = vmatpush.bf16.msra.mxu0 %v181_v8 }
   0xb   :  { %v31_v13 = vadd.f32 %v30_v11, %v29_v9  ;;  %v138_v11 = vld [vmem:[%s263_s4] sm:$0x1] }
   0xc   :  { %v37_v14 = vmul.f32 %v186_v7, %v36_v12 }
   0xd   :  { %v32_v15 = vrot.slane %v31_v13, 1 }
   0xe   :  { %v38_v16 = vadd.f32 %v186_v7, %v37_v14 }
   0xf   :  { %v33_v17 = vadd.f32 %v32_v15, %v31_v13  ;;  %v155_v15 = vld [vmem:[%s264_s5] sm:$0x1] }
  0x10   :  { %v40_v18 = vsel %vm39_vm1, %v186_v7, %v38_v16 }
  0x11   :  { %v41_v19 = vmul.f32 %v40_v18, %v33_v17 }
  0x13   :  { %v42_v20 = vsub.f32 %v25_v4, %v41_v19 }
  0x15   :  { %v43_v21 = vmul.f32 %v42_v20, %v42_v20 }
  0x17   :  { %v44_v22 = vsel %vm26_vm0, %v43_v21, 0.0 }
  0x18   :  { %v45_v23 = vrot.slane %v44_v22, 4 }
  0x1a   :  { %v46_v24 = vadd.f32 %v45_v23, %v44_v22 }
  0x1c   :  { %v47_v25 = vrot.slane %v46_v24, 2 }
  0x1e   :  { %v48_v26 = vadd.f32 %v47_v25, %v46_v24 }
  0x20   :  { %v49_v27 = vrot.slane %v48_v26, 1 }
  0x22   :  { %v50_v28 = vadd.f32 %v49_v27, %v48_v26 }
  0x24   :  { %v51_v29 = vmul.f32 %v50_v28, %v40_v18 }
  0x26   :  { %v53_v30 = vadd.f32 1e-05, %v51_v29 }
  0x28   :  { %187 = vrsqrt.f32 %v53_v30  ;;  %vm60_vm2 = vweird.f32 %v53_v30 }
  0x2e   :  { %v188_v31 = vpop.eup %187 }
  0x2f   :  { %v55_v32 = vmul.f32 %v188_v31, %v53_v30  ;;  %vm61_vm3 = vweird.f32 %v188_v31 }
  0x30   :  { %vm62_vm4 = vmor %vm60_vm2, %vm61_vm3 }
  0x31   :  { %v56_v33 = vmul.f32 %v188_v31, %v55_v32 }
  0x33   :  { %v57_v34 = vmul.f32 0.5, %v56_v33 }
  0x35   :  { %v58_v35 = vsub.f32 1.5, %v57_v34 }
  0x37   :  { %v59_v37 = vmul.f32 %v188_v31, %v58_v35 }
  0x39   :  { %v63_v38 = vsel %vm62_vm4, %v188_v31, %v59_v37 }
  0x3a   :  { %v64_v39 = vmul.f32 %v63_v38, %v52_v36 }
  0x3c   :  { %v66_v41 = vperm.slane %v64_v39, 0  ;;  %v70_v42 = vmul.f32 %v64_v39, %v41_v19 }
  0x3e   :  { %v68_v43 = vmul.f32 %v66_v41, %v25_v4  ;;  %v71_v44 = vsub.f32 %v69_v40, %v70_v42 }
  0x40   :  { %v73_v45 = vperm.slane %v71_v44, 0 }
  0x42   :  { %v75_v46 = vadd.f32 %v73_v45, %v68_v43 }
  0x44   :  { %v76_v47 = vmax.f32 %v75_v46, 0.0 }
  0x46   :  { %v77_v48 = vpack.c.bf16 %v76_v47, %v76_v47 }
  0x48   :  { %180 = vmatmul.msk.bf16.vlgmr.msra.gmra.mxu0 %vm102_vm5, %v77_v48 }
  0xc5   :  { %v115_v49 = vpop.f32.mrf.mxu0 }
  0xc6   :  { %v120_v50 = vsel %vm119_vm6, %v115_v49, 0.0 }
  0xc7   :  { %v121_v51 = vrot.slane %v120_v50, 4 }
  0xc9   :  { %v122_v52 = vadd.f32 %v121_v51, %v120_v50 }
  0xcb   :  { %v123_v53 = vrot.slane %v122_v52, 2 }
  0xcd   :  { %v124_v54 = vadd.f32 %v123_v53, %v122_v52  ;;  %v117_v55 = vpop.f32.mrf.mxu0 }
  0xcf   :  { %v125_v56 = vrot.slane %v124_v54, 1 }
  0xd1   :  { %v126_v57 = vadd.f32 %v125_v56, %v124_v54 }
  0xd3   :  { %v127_v58 = vmul.f32 %v126_v57, %v40_v18 }
  0xd5   :  { %v128_v59 = vsub.f32 %v115_v49, %v127_v58 }
  0xd7   :  { %v129_v60 = vmul.f32 %v128_v59, %v128_v59 }
  0xd9   :  { %v130_v61 = vsel %vm119_vm6, %v129_v60, 0.0 }
  0xda   :  { %v131_v62 = vrot.slane %v130_v61, 4 }
  0xdc   :  { %v132_v63 = vadd.f32 %v131_v62, %v130_v61 }
  0xde   :  { %v133_v0 = vrot.slane %v132_v63, 2 }
  0xe0   :  { %v134_v1 = vadd.f32 %v133_v0, %v132_v63 }
  0xe2   :  { %v135_v2 = vrot.slane %v134_v1, 1 }
  0xe4   :  { %v136_v3 = vadd.f32 %v135_v2, %v134_v1 }
  0xe6   :  { %v137_v4 = vmul.f32 %v136_v3, %v40_v18 }
  0xe8   :  { %v139_v5 = vadd.f32 1e-05, %v137_v4 }
  0xea   :  { %189 = vrsqrt.f32 %v139_v5  ;;  %vm146_vm8 = vweird.f32 %v139_v5 }
  0xf0   :  { %v190_v6 = vpop.eup %189 }
  0xf1   :  { %v141_v7 = vmul.f32 %v190_v6, %v139_v5  ;;  %vm147_vm7 = vweird.f32 %v190_v6 }
  0xf2   :  { %vm148_vm9 = vmor %vm146_vm8, %vm147_vm7 }
  0xf3   :  { %v142_v8 = vmul.f32 %v190_v6, %v141_v7 }
  0xf5   :  { %v143_v9 = vmul.f32 0.5, %v142_v8 }
  0xf7   :  { %v144_v10 = vsub.f32 1.5, %v143_v9 }
  0xf9   :  { %v145_v12 = vmul.f32 %v190_v6, %v144_v10 }
  0xfb   :  { %v149_v13 = vsel %vm148_vm9, %v190_v6, %v145_v12 }
  0xfc   :  { %v150_v14 = vmul.f32 %v149_v13, %v138_v11 }
  0xfe   :  { %v152_v16 = vperm.slane %v150_v14, 0  ;;  %v156_v17 = vmul.f32 %v150_v14, %v127_v58 }
 0x100   :  { %v157_v18 = vsub.f32 %v155_v15, %v156_v17  ;;  %v154_v19 = vmul.f32 %v152_v16, %v115_v49 }
 0x102   :  { %v159_v20 = vperm.slane %v157_v18, 0 }
 0x104   :  { %v161_v21 = vadd.f32 %v159_v20, %v154_v19 }
 0x106   :  { %v162_v22 = vmax.f32 %v161_v21, 0.0 }
 0x108   :  { %163 = vst.msk [vmem:[%s265_s6] sm:$0x3] %vm119_vm6, %v162_v22 }

// kernel: densenet_forward.38
= control target key start
LH: loop header
LB: loop body
LE: loop exit
PB: predicated region body
PF: predicated region fallthrough
CT: control target
= control target key end

     0   :  { %vm63_vm0 = vcmask 523264   ;;  %vm594_vm1 = vcmask 125952   ;;  %vm597_vm2 = vcmask 122880   ;;  %s1099_s1 = inlined_call_operand.vmem [shape: bf16[9,64,16], index: 1, kind: input, shape index: {}]   ;;  %s1100_s0 = inlined_call_operand.vmem [shape: f32[26,64], index: 0, kind: input, shape index: {}]   ;;  %s1101_s2 = inlined_call_operand.vmem [shape: bf16[18,16], index: 2, kind: output, shape index: {}]  }
   0x1   :  { %v836_v0 = vld [vmem:[%s1099_s1 + $0x38] sm:$0xff]  ;;  %v835_v3 = vld [vmem:[%s1099_s1 + $0x30] sm:$0xff]  ;;  %v834_v6 = vld [vmem:[%s1099_s1 + $0x28] sm:$0xff] }
   0x2   :  { %v840_v1 = vld [vmem:[%s1099_s1 + $0x58] sm:$0xff]  ;;  %74 = vmatpush.bf16.msra.mxu0 %v836_v0  ;;  %865 = vmatpush.bf16.msra.mxu1 %v836_v0  ;;  %v839_v4 = vld [vmem:[%s1099_s1 + $0x50] sm:$0xff]  ;;  %v838_v7 = vld [vmem:[%s1099_s1 + $0x48] sm:$0xff] }
   0x3   :  { %v844_v2 = vld [vmem:[%s1099_s1 + $0x78] sm:$0xff]  ;;  %184 = vmatpush.bf16.msra.mxu2 %v840_v1  ;;  %v843_v5 = vld [vmem:[%s1099_s1 + $0x70] sm:$0xff]  ;;  %v842_v8 = vld [vmem:[%s1099_s1 + $0x68] sm:$0xff] }
   0x4   :  { %249 = vmatpush.bf16.msra.mxu3 %v844_v2  ;;  %v833_v9 = vld [vmem:[%s1099_s1 + $0x20] sm:$0xff]  ;;  %v26_v11 = vld [vmem:[%s1100_s0 + $0x9] sm:$0xff]  ;;  %v27_v12 = vld [vmem:[%s1100_s0 + $0x11] sm:$0x3] }
   0x5   :  { %v25_v10 = vld [vmem:[%s1100_s0 + $0x1] sm:$0xff]  ;;  %v832_v13 = vld [vmem:[%s1099_s1 + $0x18] sm:$0xff]  ;;  %v137_v17 = vld [vmem:[%s1100_s0 + $0xa] sm:$0xff]  ;;  %v29_v22 = vpack.c.bf16 %v27_v12, %v27_v12 }
   0x6   :  { %75 = vmatpush.bf16.msra.mxu0 %v835_v3  ;;  %866 = vmatpush.bf16.msra.mxu1 %v835_v3  ;;  %v837_v14 = vld [vmem:[%s1099_s1 + $0x40] sm:$0xff]  ;;  %v848_v15 = vld [vmem:[%s1099_s1 + $0x98] sm:$0xff]  ;;  %v202_v20 = vld [vmem:[%s1100_s0 + $0xb] sm:$0xff]  ;;  %v28_v21 = vpack.c.bf16 %v26_v11, %v25_v10 }
   0x7   :  { %185 = vmatpush.bf16.msra.mxu2 %v839_v4  ;;  %v136_v16 = vld [vmem:[%s1100_s0 + $0x2] sm:$0xff]  ;;  %v860_v24 = vld [vmem:[%s1099_s1 + $0xf8] sm:$0xff]  ;;  %v831_v25 = vld [vmem:[%s1099_s1 + $0x10] sm:$0xff] }
   0x8   :  { %250 = vmatpush.bf16.msra.mxu3 %v843_v5  ;;  %v841_v18 = vld [vmem:[%s1099_s1 + $0x60] sm:$0xff]  ;;  %v139_v23 = vpack.c.bf16 %v137_v17, %v136_v16  ;;  %v847_v27 = vld [vmem:[%s1099_s1 + $0x90] sm:$0xff]  ;;  %v856_v28 = vld [vmem:[%s1099_s1 + $0xd8] sm:$0xff] }
   0x9   :  { %v201_v19 = vld [vmem:[%s1100_s0 + $0x3] sm:$0xff]  ;;  %v859_v29 = vld [vmem:[%s1099_s1 + $0xf0] sm:$0xff]  ;;  %v852_v37 = vld [vmem:[%s1099_s1 + $0xb8] sm:$0xff] }
   0xa   :  { %76 = vmatpush.bf16.msra.mxu0 %v834_v6  ;;  %867 = vmatpush.bf16.msra.mxu1 %v834_v6  ;;  %v204_v26 = vpack.c.bf16 %v202_v20, %v201_v19  ;;  %v830_v30 = vld [vmem:[%s1099_s1 + $0x8] sm:$0xff]  ;;  %v855_v32 = vld [vmem:[%s1099_s1 + $0xd0] sm:$0xff]  ;;  %v829_v34 = vld [vmem:[%s1099_s1] sm:$0xff] }
   0xb   :  { %186 = vmatpush.bf16.msra.mxu2 %v838_v7  ;;  %v846_v31 = vld [vmem:[%s1099_s1 + $0x88] sm:$0xff]  ;;  %v845_v35 = vld [vmem:[%s1099_s1 + $0x80] sm:$0xff]  ;;  %v864_v39 = vld [vmem:[%s1099_s1 + $0x118] sm:$0xff] }
   0xc   :  { %251 = vmatpush.bf16.msra.mxu3 %v842_v8  ;;  %v858_v33 = vld [vmem:[%s1099_s1 + $0xe8] sm:$0xff]  ;;  %v12_v36 = vld [vmem:[%s1100_s0] sm:$0xff]  ;;  %v138_v44 = vld [vmem:[%s1100_s0 + $0x12] sm:$0x3] }
   0xd   :  { %v13_v38 = vld [vmem:[%s1100_s0 + $0x8] sm:$0xff]  ;;  %v857_v43 = vld [vmem:[%s1099_s1 + $0xe0] sm:$0xff]  ;;  %v203_v45 = vld [vmem:[%s1100_s0 + $0x13] sm:$0x3]  ;;  %v140_v49 = vpack.c.bf16 %v138_v44, %v138_v44 }
   0xe   :  { %77 = vmatpush.bf16.msra.mxu0 %v833_v9  ;;  %868 = vmatpush.bf16.msra.mxu1 %v833_v9  ;;  %v854_v40 = vld [vmem:[%s1099_s1 + $0xc8] sm:$0xff]  ;;  %v851_v46 = vld [vmem:[%s1099_s1 + $0xb0] sm:$0xff]  ;;  %v15_v47 = vpack.c.bf16 %v13_v38, %v12_v36  ;;  %v205_v51 = vpack.c.bf16 %v203_v45, %v203_v45  ;;  %v853_v52 = vld [vmem:[%s1099_s1 + $0xc0] sm:$0xff] }
   0xf   :  { %187 = vmatpush.bf16.msra.mxu2 %v837_v14  ;;  %v266_v41 = vld [vmem:[%s1100_s0 + $0x4] sm:$0xff]  ;;  %v267_v42 = vld [vmem:[%s1100_s0 + $0xc] sm:$0xff]  ;;  %v268_v58 = vld [vmem:[%s1100_s0 + $0x14] sm:$0x3] }
  0x10   :  { %252 = vmatpush.bf16.msra.mxu3 %v841_v18  ;;  %v269_v48 = vpack.c.bf16 %v267_v42, %v266_v41  ;;  %v863_v50 = vld [vmem:[%s1099_s1 + $0x110] sm:$0xff]  ;;  %v850_v53 = vld [vmem:[%s1099_s1 + $0xa8] sm:$0xff]  ;;  %v849_v55 = vld [vmem:[%s1099_s1 + $0xa0] sm:$0xff]  ;;  %v270_v0 = vpack.c.bf16 %v268_v58, %v268_v58 }
  0x11   :  { %627 = vmatmul.msk.bf16.vlgmr.msra.gmra.mxu0 %vm63_vm0, %v28_v21  ;;  %628 = vmatmul.msk.bf16.vlgmr.msra.gmra.mxu1 %vm63_vm0, %v29_v22  ;;  %v862_v54 = vld [vmem:[%s1099_s1 + $0x108] sm:$0xff]  ;;  %v861_v56 = vld [vmem:[%s1099_s1 + $0x100] sm:$0xff]  ;;  %v14_v57 = vld [vmem:[%s1100_s0 + $0x10] sm:$0x3] }
  0x12   :  { %122 = vmatpush.bf16.msrb.mxu1 %v832_v13  ;;  %314 = vmatpush.bf16.msrb.mxu0 %v848_v15  ;;  %v396_v59 = vld [vmem:[%s1100_s0 + $0x6] sm:$0xff]  ;;  %v397_v60 = vld [vmem:[%s1100_s0 + $0xe] sm:$0xff]  ;;  %v16_v63 = vpack.c.bf16 %v14_v57, %v14_v57  ;;  %v398_v6 = vld [vmem:[%s1100_s0 + $0x16] sm:$0x3] }
  0x13   :  { %671 = vmatmul.msk.bf16.vlgmr.msra.gmra.mxu2 %vm63_vm0, %v139_v23  ;;  %697 = vmatmul.msk.bf16.vlgmr.msra.gmra.mxu3 %vm63_vm0, %v204_v26  ;;  %v461_v61 = vld [vmem:[%s1100_s0 + $0x7] sm:$0xff]  ;;  %v462_v62 = vld [vmem:[%s1100_s0 + $0xf] sm:$0xff]  ;;  %v399_v1 = vpack.c.bf16 %v397_v60, %v396_v59  ;;  %v463_v7 = vld [vmem:[%s1100_s0 + $0x17] sm:$0x3]  ;;  %v400_v10 = vpack.c.bf16 %v398_v6, %v398_v6 }
  0x14   :  { %509 = vmatpush.bf16.msrb.mxu3 %v860_v24  ;;  %444 = vmatpush.bf16.msrb.mxu2 %v856_v28  ;;  %v464_v2 = vpack.c.bf16 %v462_v62, %v461_v61  ;;  %v331_v3 = vld [vmem:[%s1100_s0 + $0x5] sm:$0xff]  ;;  %v332_v4 = vld [vmem:[%s1100_s0 + $0xd] sm:$0xff]  ;;  %v465_v11 = vpack.c.bf16 %v463_v7, %v463_v7  ;;  %v333_v12 = vld [vmem:[%s1100_s0 + $0x15] sm:$0x3] }
  0x15   :  { %v527_v5 = vld [vmem:[%s1100_s0 + $0x10] sm:$0xff]  ;;  %v334_v8 = vpack.c.bf16 %v332_v4, %v331_v3  ;;  %v528_v13 = vld [vmem:[%s1100_s0 + $0x18] sm:$0x3]  ;;  %v335_v14 = vpack.c.bf16 %v333_v12, %v333_v12 }
  0x16   :  { %123 = vmatpush.bf16.msrb.mxu1 %v831_v25  ;;  %315 = vmatpush.bf16.msrb.mxu0 %v847_v27  ;;  %v529_v9 = vpack.c.bf16 %v527_v5, %v13_v38  ;;  %v530_v15 = vpack.c.bf16 %v528_v13, %v528_v13 }
  0x18   :  { %510 = vmatpush.bf16.msrb.mxu3 %v859_v29  ;;  %445 = vmatpush.bf16.msrb.mxu2 %v855_v32 }
  0x1a   :  { %124 = vmatpush.bf16.msrb.mxu1 %v830_v30  ;;  %316 = vmatpush.bf16.msrb.mxu0 %v846_v31 }
  0x1c   :  { %511 = vmatpush.bf16.msrb.mxu3 %v858_v33  ;;  %446 = vmatpush.bf16.msrb.mxu2 %v854_v40 }
  0x1e   :  { %125 = vmatpush.bf16.msrb.mxu1 %v829_v34  ;;  %317 = vmatpush.bf16.msrb.mxu0 %v845_v35 }
  0x20   :  { %512 = vmatpush.bf16.msrb.mxu3 %v857_v43  ;;  %447 = vmatpush.bf16.msrb.mxu2 %v853_v52 }
  0x21   :  { %645 = vmatmul.msk.bf16.vlgmr.msrb.gmra.mxu1 %vm63_vm0, %v15_v47  ;;  %723 = vmatmul.msk.bf16.vlgmr.msrb.gmra.mxu0 %vm63_vm0, %v269_v48 }
  0x22   :  { %379 = vmatpush.bf16.msra.mxu1 %v852_v37  ;;  %574 = vmatpush.bf16.msra.mxu0 %v864_v39 }
  0x23   :  { %672 = vmatmul.msk.bf16.gmra.mxu2 %vm63_vm0, %v140_v49  ;;  %698 = vmatmul.msk.bf16.gmra.mxu3 %vm63_vm0, %v205_v51 }
  0x26   :  { %380 = vmatpush.bf16.msra.mxu1 %v851_v46  ;;  %575 = vmatpush.bf16.msra.mxu0 %v863_v50 }
  0x2a   :  { %381 = vmatpush.bf16.msra.mxu1 %v850_v53  ;;  %576 = vmatpush.bf16.msra.mxu0 %v862_v54 }
  0x2e   :  { %382 = vmatpush.bf16.msra.mxu1 %v849_v55  ;;  %577 = vmatpush.bf16.msra.mxu0 %v861_v56 }
  0x31   :  { %646 = vmatmul.msk.bf16.gmra.mxu1 %vm63_vm0, %v16_v63  ;;  %724 = vmatmul.msk.bf16.gmra.mxu0 %vm63_vm0, %v270_v0 }
  0x33   :  { %775 = vmatmul.msk.bf16.vlgmr.msrb.gmra.mxu2 %vm63_vm0, %v399_v1  ;;  %801 = vmatmul.msk.bf16.vlgmr.msrb.gmra.mxu3 %vm63_vm0, %v464_v2 }
  0x41   :  { %749 = vmatmul.msk.bf16.vlgmr.msra.gmra.mxu1 %vm63_vm0, %v334_v8  ;;  %827 = vmatmul.msk.bf16.vlgmr.msra.gmra.mxu0 %vm63_vm0, %v529_v9 }
  0x43   :  { %776 = vmatmul.msk.bf16.gmra.mxu2 %vm63_vm0, %v400_v10  ;;  %802 = vmatmul.msk.bf16.gmra.mxu3 %vm63_vm0, %v465_v11 }
  0x51   :  { %750 = vmatmul.msk.bf16.gmra.mxu1 %vm63_vm0, %v335_v14  ;;  %828 = vmatmul.msk.bf16.gmra.mxu0 %vm63_vm0, %v530_v15 }
  0x8e   :  { %v79_v16 = vpop.f32.mrf.mxu0  ;;  %v84_v17 = vpop.f32.mrf.mxu1 }
  0x96   :  { %v189_v18 = vpop.f32.mrf.mxu2  ;;  %v81_v19 = vpop.f32.mrf.mxu0 }
  0x97   :  { %v86_v20 = vpop.f32.mrf.mxu1  ;;  %v254_v21 = vpop.f32.mrf.mxu3 }
  0x9e   :  { %v191_v22 = vpop.f32.mrf.mxu2  ;;  %v319_v24 = vpop.f32.mrf.mxu0 }
  0x9f   :  { %v127_v23 = vpop.f32.mrf.mxu1  ;;  %v256_v25 = vpop.f32.mrf.mxu3 }
  0xa0   :  { %v128_v34 = vadd.f32 %v127_v23, %v79_v16 }
  0xa2   :  { %v198_v35 = vadd.f32 %v189_v18, %v128_v34 }
  0xa4   :  { %v263_v40 = vadd.f32 %v254_v21, %v198_v35 }
  0xa6   :  { %v194_v26 = vpop.f32.mrf.mxu2  ;;  %v321_v28 = vpop.f32.mrf.mxu0  ;;  %v328_v42 = vadd.f32 %v319_v24, %v263_v40 }
  0xa7   :  { %v129_v27 = vpop.f32.mrf.mxu1  ;;  %v259_v29 = vpop.f32.mrf.mxu3 }
  0xa8   :  { %v130_v41 = vadd.f32 %v129_v27, %v81_v19 }
  0xaa   :  { %v199_v43 = vadd.f32 %v191_v22, %v130_v41 }
  0xac   :  { %v264_v49 = vadd.f32 %v256_v25, %v199_v43 }
  0xae   :  { %v196_v30 = vpop.f32.mrf.mxu2  ;;  %v324_v32 = vpop.f32.mrf.mxu0  ;;  %v329_v53 = vadd.f32 %v321_v28, %v264_v49 }
  0xaf   :  { %v132_v31 = vpop.f32.mrf.mxu1  ;;  %v261_v33 = vpop.f32.mrf.mxu3 }
  0xb0   :  { %v133_v50 = vadd.f32 %v132_v31, %v84_v17 }
  0xb2   :  { %v200_v54 = vadd.f32 %v194_v26, %v133_v50 }
  0xb4   :  { %v265_v62 = vadd.f32 %v259_v29, %v200_v54 }
  0xb6   :  { %v449_v36 = vpop.f32.mrf.mxu2  ;;  %v326_v38 = vpop.f32.mrf.mxu0  ;;  %v330_v1 = vadd.f32 %v324_v32, %v265_v62 }
  0xb7   :  { %v134_v37 = vpop.f32.mrf.mxu1  ;;  %v514_v39 = vpop.f32.mrf.mxu3 }
  0xbe   :  { %v451_v44 = vpop.f32.mrf.mxu2  ;;  %v579_v46 = vpop.f32.mrf.mxu0 }
  0xbf   :  { %v384_v45 = vpop.f32.mrf.mxu1  ;;  %v516_v48 = vpop.f32.mrf.mxu3 }
  0xc0   :  { %v393_v47 = vadd.f32 %v384_v45, %v328_v42 }
  0xc2   :  { %v458_v51 = vadd.f32 %v449_v36, %v393_v47 }
  0xc4   :  { %v523_v52 = vadd.f32 %v514_v39, %v458_v51 }
  0xc6   :  { %v588_v55 = vadd.f32 %v579_v46, %v523_v52  ;;  %v454_v56 = vpop.f32.mrf.mxu2  ;;  %v581_v58 = vpop.f32.mrf.mxu0 }
  0xc7   :  { %v386_v57 = vpop.f32.mrf.mxu1  ;;  %v519_v61 = vpop.f32.mrf.mxu3 }
  0xc8   :  { %v591_v59 = vpack.c.bf16 %v588_v55, %v588_v55  ;;  %v394_v60 = vadd.f32 %v386_v57, %v329_v53 }
  0xca   :  { %595 = vst.msk [vmem:[%s1101_s2] sm:$0xf] %vm594_vm1, %v591_v59  ;;  %v459_v63 = vadd.f32 %v451_v44, %v394_v60 }
  0xcc   :  { %v524_v0 = vadd.f32 %v516_v48, %v459_v63 }
  0xce   :  { %v589_v2 = vadd.f32 %v581_v58, %v524_v0  ;;  %v456_v3 = vpop.f32.mrf.mxu2  ;;  %v584_v5 = vpop.f32.mrf.mxu0 }
  0xcf   :  { %v389_v4 = vpop.f32.mrf.mxu1  ;;  %v521_v8 = vpop.f32.mrf.mxu3 }
  0xd0   :  { %v592_v6 = vpack.c.bf16 %v589_v2, %v589_v2  ;;  %v395_v7 = vadd.f32 %v389_v4, %v330_v1 }
  0xd2   :  { %596 = vst.msk [vmem:[%s1101_s2 + $0x4] sm:$0xf] %vm594_vm1, %v592_v6  ;;  %v460_v9 = vadd.f32 %v454_v56, %v395_v7 }
  0xd4   :  { %v525_v10 = vadd.f32 %v519_v61, %v460_v9 }
  0xd6   :  { %v590_v11 = vadd.f32 %v584_v5, %v525_v10  ;;  %v586_v13 = vpop.f32.mrf.mxu0 }
  0xd7   :  { %v391_v12 = vpop.f32.mrf.mxu1 }
  0xd8   :  { %v593_v14 = vpack.c.bf16 %v590_v11, %v590_v11 }
  0xda   :  { %598 = vst.msk [vmem:[%s1101_s2 + $0x8] sm:$0x1] %vm597_vm2, %v593_v14 }

// kernel: densenet_forward.41
= control target key start
LH: loop header
LB: loop body
LE: loop exit
PB: predicated region body
PF: predicated region fallthrough
CT: control target
= control target key end

     0   :  { %vm26_vm0 = vcmask 517120   ;;  %v196_v2 = vmov 2.0   ;;  %s277_s0 = inlined_call_operand.vmem [shape: bf16[2,64], index: 0, kind: input, shape index: {}]   ;;  %s278_s1 = inlined_call_operand.vmem [shape: f32[1,64], index: 1, kind: input, shape index: {}]   ;;  %s279_s2 = inlined_call_operand.vmem [shape: f32[1,64], index: 2, kind: input, shape index: {}]   ;;  %s280_s3 = inlined_call_operand.vmem [shape: f32[2,2], index: 3, kind: input, shape index: {}]   ;;  %s281_s4 = inlined_call_operand.vmem [shape: f32[64,2], index: 4, kind: input, shape index: {}]   ;;  %s282_s5 = inlined_call_operand.vmem [shape: f32[1,2], index: 5, kind: input, shape index: {}]   ;;  %s283_s6 = inlined_call_operand.hbm [shape: f32[2,2], index: 6, kind: output, shape index: {}]  }
   0x1   :  { %v24_v0 = vld [vmem:[%s277_s0] sm:$0x1]  ;;  %166 = vrcp.f32 %v196_v2 }
   0x2   :  { %v25_v1 = vunpack.c.l.bf16 %v24_v0 }
   0x3   :  { %11 = vsyncpa [#allocation3], 0  ;;  %v113_v28 = vld [vmem:[%s281_s4 + $0x38] sm:$0xff]  ;;  %v112_v29 = vld [vmem:[%s281_s4 + $0x30] sm:$0xff]  ;;  %vm82_vm5 = vcmask 1041408   ;;  %vm78_vm6 = vcmask 15360  }
   0x4   :  { %v27_v3 = vsel %vm26_vm0, %v25_v1, 0.0  ;;  %130 = vmatpush.msra.mxu1 %v113_v28  ;;  %v111_v30 = vld [vmem:[%s281_s4 + $0x28] sm:$0xff]  ;;  %v110_v31 = vld [vmem:[%s281_s4 + $0x20] sm:$0xff]  ;;  %v109_v32 = vld [vmem:[%s281_s4 + $0x18] sm:$0xff]  ;;  %vm118_vm7 = vcmask 523264   ;;  %s197_s20 = smov [#allocation2]  }
   0x5   :  { %v28_v4 = vrot.slane %v27_v3, 4  ;;  %v108_v35 = vld [vmem:[%s281_s4 + $0x10] sm:$0xff]  ;;  %v107_v37 = vld [vmem:[%s281_s4 + $0x8] sm:$0xff]  ;;  %v52_v40 = vld [vmem:[%s278_s1] sm:$0x1]  ;;  %s149_s21 = sshll.u32 %s197_s20, 4  ;;  %s150_s21 = int_to_ptr.vmem [resolvable:$true] %s149_s21 }
   0x6   :  { %131 = vmatpush.msra.mxu1 %v112_v29  ;;  %v69_v44 = vld [vmem:[%s279_s2] sm:$0x1]  ;;  %vm142_vm8 = vcmask 9216  }
   0x7   :  { %v29_v5 = vadd.f32 %v28_v4, %v27_v3  ;;  %v167_v6 = vpop.eup %166  ;;  %v77_v52 = vld [vmem:[%s280_s3] sm:$0x3]  ;;  %s151_s3 = sshll.u32 %s283_s6, 4  ;;  %s152_s3 = int_to_ptr.hbm [resolvable:$true] %s151_s3 }
   0x8   :  { %v35_v8 = vmul.f32 2.0, %v167_v6  ;;  %vm39_vm1 = vweird.f32 %v167_v6  ;;  %132 = vmatpush.msra.mxu1 %v111_v30  ;;  %v106_v53 = vld [vmem:[%s281_s4] sm:$0xff] }
   0x9   :  { %v30_v7 = vrot.slane %v29_v5, 2  ;;  %v165_v55 = vld [vmem:[%s282_s5] ss:$0 sm:$0xff] }
   0xa   :  { %v36_v10 = vsub.f32 1.0, %v35_v8  ;;  %133 = vmatpush.msra.mxu1 %v110_v31 }
   0xb   :  { %v31_v9 = vadd.f32 %v30_v7, %v29_v5 }
   0xc   :  { %v37_v12 = vmul.f32 %v167_v6, %v36_v10  ;;  %134 = vmatpush.msra.mxu1 %v109_v32 }
   0xd   :  { %v32_v11 = vrot.slane %v31_v9, 1 }
   0xe   :  { %v38_v14 = vadd.f32 %v167_v6, %v37_v12  ;;  %135 = vmatpush.msra.mxu1 %v108_v35 }
   0xf   :  { %v33_v13 = vadd.f32 %v32_v11, %v31_v9 }
  0x10   :  { %v40_v15 = vsel %vm39_vm1, %v167_v6, %v38_v14  ;;  %136 = vmatpush.msra.mxu1 %v107_v37 }
  0x11   :  { %v41_v16 = vmul.f32 %v40_v15, %v33_v13 }
  0x12   :  { %137 = vmatpush.msra.mxu1 %v106_v53 }
  0x13   :  { %v42_v17 = vsub.f32 %v25_v1, %v41_v16 }
  0x15   :  { %v43_v18 = vmul.f32 %v42_v17, %v42_v17 }
  0x17   :  { %v44_v19 = vsel %vm26_vm0, %v43_v18, 0.0 }
  0x18   :  { %v45_v20 = vrot.slane %v44_v19, 4 }
  0x1a   :  { %v46_v21 = vadd.f32 %v45_v20, %v44_v19 }
  0x1c   :  { %v47_v22 = vrot.slane %v46_v21, 2 }
  0x1e   :  { %v48_v23 = vadd.f32 %v47_v22, %v46_v21 }
  0x20   :  { %v49_v24 = vrot.slane %v48_v23, 1 }
  0x22   :  { %v50_v25 = vadd.f32 %v49_v24, %v48_v23 }
  0x24   :  { %v51_v26 = vmul.f32 %v50_v25, %v40_v15 }
  0x26   :  { %v53_v27 = vadd.f32 1e-05, %v51_v26 }
  0x28   :  { %168 = vrsqrt.f32 %v53_v27  ;;  %vm60_vm2 = vweird.f32 %v53_v27 }
  0x2e   :  { %v169_v33 = vpop.eup %168 }
  0x2f   :  { %v55_v34 = vmul.f32 %v169_v33, %v53_v27  ;;  %vm61_vm3 = vweird.f32 %v169_v33 }
  0x30   :  { %vm62_vm4 = vmor %vm60_vm2, %vm61_vm3 }
  0x31   :  { %v56_v36 = vmul.f32 %v169_v33, %v55_v34 }
  0x33   :  { %v57_v38 = vmul.f32 0.5, %v56_v36 }
  0x35   :  { %v58_v39 = vsub.f32 1.5, %v57_v38 }
  0x37   :  { %v59_v41 = vmul.f32 %v169_v33, %v58_v39 }
  0x39   :  { %v63_v42 = vsel %vm62_vm4, %v169_v33, %v59_v41 }
  0x3a   :  { %v64_v43 = vmul.f32 %v63_v42, %v52_v40 }
  0x3c   :  { %v66_v45 = vperm.slane %v64_v43, 0  ;;  %v70_v46 = vmul.f32 %v64_v43, %v41_v16 }
  0x3e   :  { %v68_v47 = vmul.f32 %v66_v45, %v25_v1  ;;  %v71_v48 = vsub.f32 %v69_v44, %v70_v46 }
  0x40   :  { %v73_v49 = vperm.slane %v71_v48, 0 }
  0x42   :  { %v75_v50 = vadd.f32 %v73_v49, %v68_v47 }
  0x44   :  { %v76_v51 = vmax.f32 %v75_v50, 0.0 }
  0x46   :  { %160 = vmatpush.msk.msra.mxu0 %vm82_vm5, %v76_v51 }
  0x47   :  { %161 = vmatmul.msk.f32.vlgmr.msra.gmra.mxu0 %vm78_vm6, %v77_v52 }
  0xc4   :  { %v103_v54 = vpop.f32.mrf.mxu0 }
  0xc5   :  { %162 = vmatmul.msk.f32.vlgmr.msra.gmra.mxu1 %vm118_vm7, %v103_v54 }
 0x142   :  { %v139_v56 = vpop.f32.mrf.mxu1 }
 0x143   :  { %v140_v57 = vadd.f32 %v165_v55, %v139_v56 }
 0x145   :  { %143 = vst.msk [vmem:[#allocation2] sm:$0x3] %vm142_vm8, %v140_v57 }
 0x146   :  { %154 = dma.vmem_to_hbm [thread:$0]  %s150_s21, 32, %s152_s3, [#allocation3]  }
 0x147   :  { %194 = dma.done.wait [#allocation3], 32  }
 0x148   :  { %195 = vsyncadd [#allocation3], 4294967264 }
 0x149   :  { %159 = vsyncpa [#allocation3], 1 }

</bundles_post_ra>
